<compile_context>
chip_gen: v7x
topology: tpu7x:2x2x1
jax: 0.10.0
libtpu: 0.0.40
codegen_flags: <defaults>
</compile_context>

<pallas_src>
import functools

import jax
import jax.numpy as jnp
from jax import lax
from jax.experimental import pallas as pl
from jax.experimental.pallas import tpu as pltpu


def _attention_kernel(x_ref, wq_ref, wk_ref, wv_ref, wp_ref, bp_ref, o_ref,
                      q_s, k_s, v_s, o_s, *, num_heads, head_dim):
    """Fused QKV-projection + MHA + output-projection for one batch element.

    x_ref  : [1, N, C] f32   (streamed per grid step)
    wq/wk/wv_ref : [C, C] bf16  (lane-dense, VMEM-resident; scale folded in wq)
    wp_ref : [C, C] bf16        (VMEM-resident)
    bp_ref : [1, C] f32         (proj bias, VMEM-resident)
    o_ref  : [1, N, C] f32      (written exactly once)
    q_s/k_s/v_s/o_s : [N, C] bf16 VMEM scratch
    """
    del num_heads  # implied by C // head_dim below
    _, n, c = o_ref.shape
    heads = c // head_dim

    # Cast activations to bf16 once, in VMEM (MXU input dtype).
    x = x_ref[0].astype(jnp.bfloat16)                                   # [N, C]

    # Lane-dense projections: [N, C] @ [C, C], bf16 MXU, f32 accumulate.
    q_s[...] = jnp.dot(x, wq_ref[...],
                       preferred_element_type=jnp.float32).astype(jnp.bfloat16)
    k_s[...] = jnp.dot(x, wk_ref[...],
                       preferred_element_type=jnp.float32).astype(jnp.bfloat16)
    v_s[...] = jnp.dot(x, wv_ref[...],
                       preferred_element_type=jnp.float32).astype(jnp.bfloat16)

    # Per-head attention; intermediates are flushed to o_s each iteration.
    for h in range(heads):
        lo = h * head_dim
        q_h = q_s[:, lo:lo + head_dim]                                  # [N, Dh]
        k_h = k_s[:, lo:lo + head_dim]
        v_h = v_s[:, lo:lo + head_dim]

        # Scores: q_h @ k_h^T  (scale already folded into the Q weights).
        s = lax.dot_general(q_h, k_h, (((1,), (1,)), ((), ())),
                            preferred_element_type=jnp.float32)          # [N, N]

        # Numerically-stable softmax with DEFERRED normalization.
        m = jnp.max(s, axis=-1, keepdims=True)
        e = jnp.exp(s - m)                                               # EUP
        l = jnp.sum(e, axis=-1, keepdims=True)                           # XLU

        o_h = jnp.dot(e.astype(jnp.bfloat16), v_h,
                      preferred_element_type=jnp.float32)                # [N, Dh]
        o_h = o_h * pl.reciprocal(l, approx=True)                        # EUP
        o_s[:, lo:lo + head_dim] = o_h.astype(jnp.bfloat16)

    # Single deep-K output projection + bias; one lane-dense store to HBM.
    o_ref[0] = (jnp.dot(o_s[...], wp_ref[...],
                        preferred_element_type=jnp.float32)
                + bp_ref[...])


def prepare_attention_params(w_qkv, w_proj, b_proj, *, num_heads):
    """One-time weight prep (call at parameter-load time, not per forward).

    Torch layouts: w_qkv [3C, C] (rows ordered [3, H, Dh]), w_proj [C, C],
    b_proj [C]. Returns lane-dense bf16 slabs with the attention scale folded
    into the Q weights.
    """
    three_c, c = w_qkv.shape
    assert three_c == 3 * c and c % num_heads == 0
    head_dim = c // num_heads
    scale = float(head_dim) ** -0.5

    wq = (jnp.transpose(w_qkv[0 * c:1 * c, :]) * scale).astype(jnp.bfloat16)  # [C, C]
    wk = jnp.transpose(w_qkv[1 * c:2 * c, :]).astype(jnp.bfloat16)            # [C, C]
    wv = jnp.transpose(w_qkv[2 * c:3 * c, :]).astype(jnp.bfloat16)            # [C, C]
    wp = jnp.transpose(w_proj).astype(jnp.bfloat16)                           # [C, C]
    bp = b_proj.reshape(1, c).astype(jnp.float32)
    return wq, wk, wv, wp, bp


def attention_pallas(x, wq, wk, wv, wp, bp, *, num_heads):
    """x: [B, N, C] f32; weights pre-packed by `prepare_attention_params`."""
    B, N, C = x.shape
    Dh = C // num_heads

    kernel = functools.partial(_attention_kernel,
                               num_heads=num_heads, head_dim=Dh)

    resident2d = lambda b: (0, 0)   # same block every step -> DMA'd once

    return pl.pallas_call(
        kernel,
        out_shape=jax.ShapeDtypeStruct((B, N, C), jnp.float32),
        grid_spec=pltpu.PrefetchScalarGridSpec(
            num_scalar_prefetch=0,
            grid=(B,),
            in_specs=[
                pl.BlockSpec((1, N, C), lambda b: (b, 0, 0)),   # x: streamed per batch
                pl.BlockSpec((C, C), resident2d),               # wq (scale folded)
                pl.BlockSpec((C, C), resident2d),               # wk
                pl.BlockSpec((C, C), resident2d),               # wv
                pl.BlockSpec((C, C), resident2d),               # wproj
                pl.BlockSpec((1, C), resident2d),               # proj bias
            ],
            out_specs=pl.BlockSpec((1, N, C), lambda b: (b, 0, 0)),
            scratch_shapes=[
                pltpu.VMEM((N, C), jnp.bfloat16),   # q
                pltpu.VMEM((N, C), jnp.bfloat16),   # k
                pltpu.VMEM((N, C), jnp.bfloat16),   # v
                pltpu.VMEM((N, C), jnp.bfloat16),   # concatenated head outputs
            ],
        ),
        compiler_params=pltpu.CompilerParams(
            # Batch axis is embarrassingly parallel -> megacore sharding on v7x.
            dimension_semantics=("parallel",),
        ),
    )(x, wq, wk, wv, wp, bp)


def attention_ref(x, w_qkv, w_proj, b_proj, num_heads):
    """Pure-JAX reference matching the PyTorch forward."""
    B, N, C = x.shape
    H = num_heads
    Dh = C // H
    qkv = jnp.einsum('bnc,oc->bno', x, w_qkv)                      # [B, N, 3C]
    qkv = qkv.reshape(B, N, 3, H, Dh).transpose(2, 0, 3, 1, 4)     # [3, B, H, N, Dh]
    q, k, v = qkv[0], qkv[1], qkv[2]
    s = jnp.einsum('bhnd,bhmd->bhnm', q, k) * (Dh ** -0.5)
    p = jax.nn.softmax(s, axis=-1)
    o = jnp.einsum('bhnm,bhmd->bhnd', p, v)
    o = jnp.transpose(o, (0, 2, 1, 3)).reshape(B, N, C)
    return jnp.einsum('bnc,oc->bno', o, w_proj) + b_proj


if __name__ == "__main__":
    key = jax.random.PRNGKey(0)
    k1, k2, k3, k4 = jax.random.split(key, 4)

    B, N, C = 2, 128, 256     # small, TPU-friendly (N, C multiples of 128)
    num_heads = 8             # head_dim = 32

    x = jax.random.normal(k1, (B, N, C), jnp.float32)
    w_qkv = jax.random.normal(k2, (3 * C, C), jnp.float32) * (C ** -0.5)
    w_proj = jax.random.normal(k3, (C, C), jnp.float32) * (C ** -0.5)
    b_proj = jax.random.normal(k4, (C,), jnp.float32) * 0.02

    # Weight packing happens once, outside the per-call jitted path.
    params = prepare_attention_params(w_qkv, w_proj, b_proj, num_heads=num_heads)

    fn = jax.jit(functools.partial(attention_pallas, num_heads=num_heads))
    out = jax.block_until_ready(fn(x, *params))

    ref = attention_ref(x, w_qkv, w_proj, b_proj, num_heads)
    max_err = float(jnp.max(jnp.abs(out - ref)))
    ref_scale = float(jnp.max(jnp.abs(ref)))
    tol = 2e-2 * ref_scale + 2e-2   # bf16 matmuls + approx reciprocal
    if not max_err <= tol:
        raise AssertionError(
            f"kernel mismatch: max_err={max_err:.4e}, tol={tol:.4e}, "
            f"ref_scale={ref_scale:.4e}")
    print("KERNEL_OK")
</pallas_src>

<mosaic_0001>
module attributes {stable_mosaic.version = 11 : i64} {
  func.func @_attention_kernel(%arg0: i32, %arg1: memref<1x128x256xf32, #tpu.memory_space<vmem>>, %arg2: memref<256x256xbf16, #tpu.memory_space<vmem>>, %arg3: memref<256x256xbf16, #tpu.memory_space<vmem>>, %arg4: memref<256x256xbf16, #tpu.memory_space<vmem>>, %arg5: memref<256x256xbf16, #tpu.memory_space<vmem>>, %arg6: memref<1x256xf32, #tpu.memory_space<vmem>>, %arg7: memref<1x128x256xf32, #tpu.memory_space<vmem>>, %arg8: memref<128x256xbf16, #tpu.memory_space<vmem>>, %arg9: memref<128x256xbf16, #tpu.memory_space<vmem>>, %arg10: memref<128x256xbf16, #tpu.memory_space<vmem>>, %arg11: memref<128x256xbf16, #tpu.memory_space<vmem>>) attributes {dimension_semantics = [#tpu.dimension_semantics<parallel>], iteration_bounds = array<i64: 2>, scalar_prefetch = 0 : i64, scratch_operands = 4 : i64, tpu.core_type = #tpu.core_type<tc>, window_params = [{transform_indices = @transform_0, window_bounds = array<i64: 1, 128, 256>}, {pipeline_mode = #tpu.pipeline_mode<synchronous>, transform_indices = @transform_1, window_bounds = array<i64: 256, 256>}, {pipeline_mode = #tpu.pipeline_mode<synchronous>, transform_indices = @transform_2, window_bounds = array<i64: 256, 256>}, {pipeline_mode = #tpu.pipeline_mode<synchronous>, transform_indices = @transform_3, window_bounds = array<i64: 256, 256>}, {pipeline_mode = #tpu.pipeline_mode<synchronous>, transform_indices = @transform_4, window_bounds = array<i64: 256, 256>}, {pipeline_mode = #tpu.pipeline_mode<synchronous>, transform_indices = @transform_5, window_bounds = array<i64: 1, 256>}, {transform_indices = @transform_6, window_bounds = array<i64: 1, 128, 256>}]} {
    %c0 = arith.constant 0 : index
    %c0_0 = arith.constant 0 : index
    %c0_1 = arith.constant 0 : index
    %0 = vector.load %arg1[%c0, %c0_0, %c0_1] : memref<1x128x256xf32, #tpu.memory_space<vmem>>, vector<1x128x256xf32>
    %1 = vector.shape_cast %0 : vector<1x128x256xf32> to vector<128x256xf32>
    %2 = arith.truncf %1 : vector<128x256xf32> to vector<128x256xbf16>
    %c0_2 = arith.constant 0 : index
    %c0_3 = arith.constant 0 : index
    %3 = vector.load %arg2[%c0_2, %c0_3] : memref<256x256xbf16, #tpu.memory_space<vmem>>, vector<256x256xbf16>
    %cst = arith.constant dense<0.000000e+00> : vector<128x256xf32>
    %4 = tpu.matmul %2, %3, %cst {dimension_numbers = #tpu.dot_dimension_numbers<[1], [0], [0], [1], [0, 0, 1, 1], [], []>} : vector<128x256xbf16>, vector<256x256xbf16>, vector<128x256xf32> -> vector<128x256xf32>
    %5 = arith.truncf %4 : vector<128x256xf32> to vector<128x256xbf16>
    %c0_4 = arith.constant 0 : index
    %c0_5 = arith.constant 0 : index
    %6 = vector.load %arg8[%c0_4, %c0_5] : memref<128x256xbf16, #tpu.memory_space<vmem>>, vector<128x256xbf16>
    tpu.vector_store %arg8[%c0_4, %c0_5], %5 {strides = array<i32>} : memref<128x256xbf16, #tpu.memory_space<vmem>>, vector<128x256xbf16>,
    %c0_6 = arith.constant 0 : index
    %c0_7 = arith.constant 0 : index
    %7 = vector.load %arg3[%c0_6, %c0_7] : memref<256x256xbf16, #tpu.memory_space<vmem>>, vector<256x256xbf16>
    %cst_8 = arith.constant dense<0.000000e+00> : vector<128x256xf32>
    %8 = tpu.matmul %2, %7, %cst_8 {dimension_numbers = #tpu.dot_dimension_numbers<[1], [0], [0], [1], [0, 0, 1, 1], [], []>} : vector<128x256xbf16>, vector<256x256xbf16>, vector<128x256xf32> -> vector<128x256xf32>
    %9 = arith.truncf %8 : vector<128x256xf32> to vector<128x256xbf16>
    %c0_9 = arith.constant 0 : index
    %c0_10 = arith.constant 0 : index
    %10 = vector.load %arg9[%c0_9, %c0_10] : memref<128x256xbf16, #tpu.memory_space<vmem>>, vector<128x256xbf16>
    tpu.vector_store %arg9[%c0_9, %c0_10], %9 {strides = array<i32>} : memref<128x256xbf16, #tpu.memory_space<vmem>>, vector<128x256xbf16>,
    %c0_11 = arith.constant 0 : index
    %c0_12 = arith.constant 0 : index
    %11 = vector.load %arg4[%c0_11, %c0_12] : memref<256x256xbf16, #tpu.memory_space<vmem>>, vector<256x256xbf16>
    %cst_13 = arith.constant dense<0.000000e+00> : vector<128x256xf32>
    %12 = tpu.matmul %2, %11, %cst_13 {dimension_numbers = #tpu.dot_dimension_numbers<[1], [0], [0], [1], [0, 0, 1, 1], [], []>} : vector<128x256xbf16>, vector<256x256xbf16>, vector<128x256xf32> -> vector<128x256xf32>
    %13 = arith.truncf %12 : vector<128x256xf32> to vector<128x256xbf16>
    %c0_14 = arith.constant 0 : index
    %c0_15 = arith.constant 0 : index
    %14 = vector.load %arg10[%c0_14, %c0_15] : memref<128x256xbf16, #tpu.memory_space<vmem>>, vector<128x256xbf16>
    tpu.vector_store %arg10[%c0_14, %c0_15], %13 {strides = array<i32>} : memref<128x256xbf16, #tpu.memory_space<vmem>>, vector<128x256xbf16>,
    %c0_16 = arith.constant 0 : index
    %c0_17 = arith.constant 0 : index
    %15 = vector.load %arg8[%c0_16, %c0_17] : memref<128x256xbf16, #tpu.memory_space<vmem>>, vector<128x32xbf16>
    %c0_18 = arith.constant 0 : index
    %c0_19 = arith.constant 0 : index
    %16 = vector.load %arg9[%c0_18, %c0_19] : memref<128x256xbf16, #tpu.memory_space<vmem>>, vector<128x32xbf16>
    %c0_20 = arith.constant 0 : index
    %c0_21 = arith.constant 0 : index
    %17 = vector.load %arg10[%c0_20, %c0_21] : memref<128x256xbf16, #tpu.memory_space<vmem>>, vector<128x32xbf16>
    %cst_22 = arith.constant dense<0.000000e+00> : vector<128x128xf32>
    %18 = tpu.matmul %15, %16, %cst_22 {dimension_numbers = #tpu.dot_dimension_numbers<[1], [1], [0], [0], [0, 0, 1, 0], [], []>} : vector<128x32xbf16>, vector<128x32xbf16>, vector<128x128xf32> -> vector<128x128xf32>
    %cst_23 = arith.constant dense<0xFF800000> : vector<128xf32>
    %19 = vector.multi_reduction <maximumf>, %18, %cst_23 [1] : vector<128x128xf32> to vector<128xf32>
    %20 = vector.shape_cast %19 : vector<128xf32> to vector<128x1xf32>
    %21 = vector.broadcast %20 : vector<128x1xf32> to vector<128x128xf32>
    %22 = arith.subf %18, %21 : vector<128x128xf32>
    %23 = math.exp %22 : vector<128x128xf32>
    %cst_24 = arith.constant dense<0.000000e+00> : vector<128xf32>
    %24 = vector.multi_reduction <add>, %23, %cst_24 [1] : vector<128x128xf32> to vector<128xf32>
    %25 = vector.shape_cast %24 : vector<128xf32> to vector<128x1xf32>
    %26 = arith.truncf %23 : vector<128x128xf32> to vector<128x128xbf16>
    %cst_25 = arith.constant dense<0.000000e+00> : vector<128x32xf32>
    %27 = tpu.matmul %26, %17, %cst_25 {dimension_numbers = #tpu.dot_dimension_numbers<[1], [0], [0], [1], [0, 0, 1, 1], [], []>} : vector<128x128xbf16>, vector<128x32xbf16>, vector<128x32xf32> -> vector<128x32xf32>
    %28 = tpu.reciprocal %25 {approx = true} : vector<128x1xf32> -> vector<128x1xf32>
    %29 = vector.broadcast %28 : vector<128x1xf32> to vector<128x32xf32>
    %30 = arith.mulf %27, %29 : vector<128x32xf32>
    %31 = arith.truncf %30 : vector<128x32xf32> to vector<128x32xbf16>
    %c0_26 = arith.constant 0 : index
    %c0_27 = arith.constant 0 : index
    %32 = vector.load %arg11[%c0_26, %c0_27] : memref<128x256xbf16, #tpu.memory_space<vmem>>, vector<128x32xbf16>
    tpu.vector_store %arg11[%c0_26, %c0_27], %31 {strides = array<i32>} : memref<128x256xbf16, #tpu.memory_space<vmem>>, vector<128x32xbf16>,
    %c0_28 = arith.constant 0 : index
    %c32 = arith.constant 32 : index
    %33 = vector.load %arg8[%c0_28, %c32] : memref<128x256xbf16, #tpu.memory_space<vmem>>, vector<128x32xbf16>
    %c0_29 = arith.constant 0 : index
    %c32_30 = arith.constant 32 : index
    %34 = vector.load %arg9[%c0_29, %c32_30] : memref<128x256xbf16, #tpu.memory_space<vmem>>, vector<128x32xbf16>
    %c0_31 = arith.constant 0 : index
    %c32_32 = arith.constant 32 : index
    %35 = vector.load %arg10[%c0_31, %c32_32] : memref<128x256xbf16, #tpu.memory_space<vmem>>, vector<128x32xbf16>
    %cst_33 = arith.constant dense<0.000000e+00> : vector<128x128xf32>
    %36 = tpu.matmul %33, %34, %cst_33 {dimension_numbers = #tpu.dot_dimension_numbers<[1], [1], [0], [0], [0, 0, 1, 0], [], []>} : vector<128x32xbf16>, vector<128x32xbf16>, vector<128x128xf32> -> vector<128x128xf32>
    %cst_34 = arith.constant dense<0xFF800000> : vector<128xf32>
    %37 = vector.multi_reduction <maximumf>, %36, %cst_34 [1] : vector<128x128xf32> to vector<128xf32>
    %38 = vector.shape_cast %37 : vector<128xf32> to vector<128x1xf32>
    %39 = vector.broadcast %38 : vector<128x1xf32> to vector<128x128xf32>
    %40 = arith.subf %36, %39 : vector<128x128xf32>
    %41 = math.exp %40 : vector<128x128xf32>
    %cst_35 = arith.constant dense<0.000000e+00> : vector<128xf32>
    %42 = vector.multi_reduction <add>, %41, %cst_35 [1] : vector<128x128xf32> to vector<128xf32>
    %43 = vector.shape_cast %42 : vector<128xf32> to vector<128x1xf32>
    %44 = arith.truncf %41 : vector<128x128xf32> to vector<128x128xbf16>
    %cst_36 = arith.constant dense<0.000000e+00> : vector<128x32xf32>
    %45 = tpu.matmul %44, %35, %cst_36 {dimension_numbers = #tpu.dot_dimension_numbers<[1], [0], [0], [1], [0, 0, 1, 1], [], []>} : vector<128x128xbf16>, vector<128x32xbf16>, vector<128x32xf32> -> vector<128x32xf32>
    %46 = tpu.reciprocal %43 {approx = true} : vector<128x1xf32> -> vector<128x1xf32>
    %47 = vector.broadcast %46 : vector<128x1xf32> to vector<128x32xf32>
    %48 = arith.mulf %45, %47 : vector<128x32xf32>
    %49 = arith.truncf %48 : vector<128x32xf32> to vector<128x32xbf16>
    %c0_37 = arith.constant 0 : index
    %c32_38 = arith.constant 32 : index
    %50 = vector.load %arg11[%c0_37, %c32_38] : memref<128x256xbf16, #tpu.memory_space<vmem>>, vector<128x32xbf16>
    tpu.vector_store %arg11[%c0_37, %c32_38], %49 {strides = array<i32>} : memref<128x256xbf16, #tpu.memory_space<vmem>>, vector<128x32xbf16>,
    %c0_39 = arith.constant 0 : index
    %c64 = arith.constant 64 : index
    %51 = vector.load %arg8[%c0_39, %c64] : memref<128x256xbf16, #tpu.memory_space<vmem>>, vector<128x32xbf16>
    %c0_40 = arith.constant 0 : index
    %c64_41 = arith.constant 64 : index
    %52 = vector.load %arg9[%c0_40, %c64_41] : memref<128x256xbf16, #tpu.memory_space<vmem>>, vector<128x32xbf16>
    %c0_42 = arith.constant 0 : index
    %c64_43 = arith.constant 64 : index
    %53 = vector.load %arg10[%c0_42, %c64_43] : memref<128x256xbf16, #tpu.memory_space<vmem>>, vector<128x32xbf16>
    %cst_44 = arith.constant dense<0.000000e+00> : vector<128x128xf32>
    %54 = tpu.matmul %51, %52, %cst_44 {dimension_numbers = #tpu.dot_dimension_numbers<[1], [1], [0], [0], [0, 0, 1, 0], [], []>} : vector<128x32xbf16>, vector<128x32xbf16>, vector<128x128xf32> -> vector<128x128xf32>
    %cst_45 = arith.constant dense<0xFF800000> : vector<128xf32>
    %55 = vector.multi_reduction <maximumf>, %54, %cst_45 [1] : vector<128x128xf32> to vector<128xf32>
    %56 = vector.shape_cast %55 : vector<128xf32> to vector<128x1xf32>
    %57 = vector.broadcast %56 : vector<128x1xf32> to vector<128x128xf32>
    %58 = arith.subf %54, %57 : vector<128x128xf32>
    %59 = math.exp %58 : vector<128x128xf32>
    %cst_46 = arith.constant dense<0.000000e+00> : vector<128xf32>
    %60 = vector.multi_reduction <add>, %59, %cst_46 [1] : vector<128x128xf32> to vector<128xf32>
    %61 = vector.shape_cast %60 : vector<128xf32> to vector<128x1xf32>
    %62 = arith.truncf %59 : vector<128x128xf32> to vector<128x128xbf16>
    %cst_47 = arith.constant dense<0.000000e+00> : vector<128x32xf32>
    %63 = tpu.matmul %62, %53, %cst_47 {dimension_numbers = #tpu.dot_dimension_numbers<[1], [0], [0], [1], [0, 0, 1, 1], [], []>} : vector<128x128xbf16>, vector<128x32xbf16>, vector<128x32xf32> -> vector<128x32xf32>
    %64 = tpu.reciprocal %61 {approx = true} : vector<128x1xf32> -> vector<128x1xf32>
    %65 = vector.broadcast %64 : vector<128x1xf32> to vector<128x32xf32>
    %66 = arith.mulf %63, %65 : vector<128x32xf32>
    %67 = arith.truncf %66 : vector<128x32xf32> to vector<128x32xbf16>
    %c0_48 = arith.constant 0 : index
    %c64_49 = arith.constant 64 : index
    %68 = vector.load %arg11[%c0_48, %c64_49] : memref<128x256xbf16, #tpu.memory_space<vmem>>, vector<128x32xbf16>
    tpu.vector_store %arg11[%c0_48, %c64_49], %67 {strides = array<i32>} : memref<128x256xbf16, #tpu.memory_space<vmem>>, vector<128x32xbf16>,
    %c0_50 = arith.constant 0 : index
    %c96 = arith.constant 96 : index
    %69 = vector.load %arg8[%c0_50, %c96] : memref<128x256xbf16, #tpu.memory_space<vmem>>, vector<128x32xbf16>
    %c0_51 = arith.constant 0 : index
    %c96_52 = arith.constant 96 : index
    %70 = vector.load %arg9[%c0_51, %c96_52] : memref<128x256xbf16, #tpu.memory_space<vmem>>, vector<128x32xbf16>
    %c0_53 = arith.constant 0 : index
    %c96_54 = arith.constant 96 : index
    %71 = vector.load %arg10[%c0_53, %c96_54] : memref<128x256xbf16, #tpu.memory_space<vmem>>, vector<128x32xbf16>
    %cst_55 = arith.constant dense<0.000000e+00> : vector<128x128xf32>
    %72 = tpu.matmul %69, %70, %cst_55 {dimension_numbers = #tpu.dot_dimension_numbers<[1], [1], [0], [0], [0, 0, 1, 0], [], []>} : vector<128x32xbf16>, vector<128x32xbf16>, vector<128x128xf32> -> vector<128x128xf32>
    %cst_56 = arith.constant dense<0xFF800000> : vector<128xf32>
    %73 = vector.multi_reduction <maximumf>, %72, %cst_56 [1] : vector<128x128xf32> to vector<128xf32>
    %74 = vector.shape_cast %73 : vector<128xf32> to vector<128x1xf32>
    %75 = vector.broadcast %74 : vector<128x1xf32> to vector<128x128xf32>
    %76 = arith.subf %72, %75 : vector<128x128xf32>
    %77 = math.exp %76 : vector<128x128xf32>
    %cst_57 = arith.constant dense<0.000000e+00> : vector<128xf32>
    %78 = vector.multi_reduction <add>, %77, %cst_57 [1] : vector<128x128xf32> to vector<128xf32>
    %79 = vector.shape_cast %78 : vector<128xf32> to vector<128x1xf32>
    %80 = arith.truncf %77 : vector<128x128xf32> to vector<128x128xbf16>
    %cst_58 = arith.constant dense<0.000000e+00> : vector<128x32xf32>
    %81 = tpu.matmul %80, %71, %cst_58 {dimension_numbers = #tpu.dot_dimension_numbers<[1], [0], [0], [1], [0, 0, 1, 1], [], []>} : vector<128x128xbf16>, vector<128x32xbf16>, vector<128x32xf32> -> vector<128x32xf32>
    %82 = tpu.reciprocal %79 {approx = true} : vector<128x1xf32> -> vector<128x1xf32>
    %83 = vector.broadcast %82 : vector<128x1xf32> to vector<128x32xf32>
    %84 = arith.mulf %81, %83 : vector<128x32xf32>
    %85 = arith.truncf %84 : vector<128x32xf32> to vector<128x32xbf16>
    %c0_59 = arith.constant 0 : index
    %c96_60 = arith.constant 96 : index
    %86 = vector.load %arg11[%c0_59, %c96_60] : memref<128x256xbf16, #tpu.memory_space<vmem>>, vector<128x32xbf16>
    tpu.vector_store %arg11[%c0_59, %c96_60], %85 {strides = array<i32>} : memref<128x256xbf16, #tpu.memory_space<vmem>>, vector<128x32xbf16>,
    %c0_61 = arith.constant 0 : index
    %c128 = arith.constant 128 : index
    %87 = vector.load %arg8[%c0_61, %c128] : memref<128x256xbf16, #tpu.memory_space<vmem>>, vector<128x32xbf16>
    %c0_62 = arith.constant 0 : index
    %c128_63 = arith.constant 128 : index
    %88 = vector.load %arg9[%c0_62, %c128_63] : memref<128x256xbf16, #tpu.memory_space<vmem>>, vector<128x32xbf16>
    %c0_64 = arith.constant 0 : index
    %c128_65 = arith.constant 128 : index
    %89 = vector.load %arg10[%c0_64, %c128_65] : memref<128x256xbf16, #tpu.memory_space<vmem>>, vector<128x32xbf16>
    %cst_66 = arith.constant dense<0.000000e+00> : vector<128x128xf32>
    %90 = tpu.matmul %87, %88, %cst_66 {dimension_numbers = #tpu.dot_dimension_numbers<[1], [1], [0], [0], [0, 0, 1, 0], [], []>} : vector<128x32xbf16>, vector<128x32xbf16>, vector<128x128xf32> -> vector<128x128xf32>
    %cst_67 = arith.constant dense<0xFF800000> : vector<128xf32>
    %91 = vector.multi_reduction <maximumf>, %90, %cst_67 [1] : vector<128x128xf32> to vector<128xf32>
    %92 = vector.shape_cast %91 : vector<128xf32> to vector<128x1xf32>
    %93 = vector.broadcast %92 : vector<128x1xf32> to vector<128x128xf32>
    %94 = arith.subf %90, %93 : vector<128x128xf32>
    %95 = math.exp %94 : vector<128x128xf32>
    %cst_68 = arith.constant dense<0.000000e+00> : vector<128xf32>
    %96 = vector.multi_reduction <add>, %95, %cst_68 [1] : vector<128x128xf32> to vector<128xf32>
    %97 = vector.shape_cast %96 : vector<128xf32> to vector<128x1xf32>
    %98 = arith.truncf %95 : vector<128x128xf32> to vector<128x128xbf16>
    %cst_69 = arith.constant dense<0.000000e+00> : vector<128x32xf32>
    %99 = tpu.matmul %98, %89, %cst_69 {dimension_numbers = #tpu.dot_dimension_numbers<[1], [0], [0], [1], [0, 0, 1, 1], [], []>} : vector<128x128xbf16>, vector<128x32xbf16>, vector<128x32xf32> -> vector<128x32xf32>
    %100 = tpu.reciprocal %97 {approx = true} : vector<128x1xf32> -> vector<128x1xf32>
    %101 = vector.broadcast %100 : vector<128x1xf32> to vector<128x32xf32>
    %102 = arith.mulf %99, %101 : vector<128x32xf32>
    %103 = arith.truncf %102 : vector<128x32xf32> to vector<128x32xbf16>
    %c0_70 = arith.constant 0 : index
    %c128_71 = arith.constant 128 : index
    %104 = vector.load %arg11[%c0_70, %c128_71] : memref<128x256xbf16, #tpu.memory_space<vmem>>, vector<128x32xbf16>
    tpu.vector_store %arg11[%c0_70, %c128_71], %103 {strides = array<i32>} : memref<128x256xbf16, #tpu.memory_space<vmem>>, vector<128x32xbf16>,
    %c0_72 = arith.constant 0 : index
    %c160 = arith.constant 160 : index
    %105 = vector.load %arg8[%c0_72, %c160] : memref<128x256xbf16, #tpu.memory_space<vmem>>, vector<128x32xbf16>
    %c0_73 = arith.constant 0 : index
    %c160_74 = arith.constant 160 : index
    %106 = vector.load %arg9[%c0_73, %c160_74] : memref<128x256xbf16, #tpu.memory_space<vmem>>, vector<128x32xbf16>
    %c0_75 = arith.constant 0 : index
    %c160_76 = arith.constant 160 : index
    %107 = vector.load %arg10[%c0_75, %c160_76] : memref<128x256xbf16, #tpu.memory_space<vmem>>, vector<128x32xbf16>
    %cst_77 = arith.constant dense<0.000000e+00> : vector<128x128xf32>
    %108 = tpu.matmul %105, %106, %cst_77 {dimension_numbers = #tpu.dot_dimension_numbers<[1], [1], [0], [0], [0, 0, 1, 0], [], []>} : vector<128x32xbf16>, vector<128x32xbf16>, vector<128x128xf32> -> vector<128x128xf32>
    %cst_78 = arith.constant dense<0xFF800000> : vector<128xf32>
    %109 = vector.multi_reduction <maximumf>, %108, %cst_78 [1] : vector<128x128xf32> to vector<128xf32>
    %110 = vector.shape_cast %109 : vector<128xf32> to vector<128x1xf32>
    %111 = vector.broadcast %110 : vector<128x1xf32> to vector<128x128xf32>
    %112 = arith.subf %108, %111 : vector<128x128xf32>
    %113 = math.exp %112 : vector<128x128xf32>
    %cst_79 = arith.constant dense<0.000000e+00> : vector<128xf32>
    %114 = vector.multi_reduction <add>, %113, %cst_79 [1] : vector<128x128xf32> to vector<128xf32>
    %115 = vector.shape_cast %114 : vector<128xf32> to vector<128x1xf32>
    %116 = arith.truncf %113 : vector<128x128xf32> to vector<128x128xbf16>
    %cst_80 = arith.constant dense<0.000000e+00> : vector<128x32xf32>
    %117 = tpu.matmul %116, %107, %cst_80 {dimension_numbers = #tpu.dot_dimension_numbers<[1], [0], [0], [1], [0, 0, 1, 1], [], []>} : vector<128x128xbf16>, vector<128x32xbf16>, vector<128x32xf32> -> vector<128x32xf32>
    %118 = tpu.reciprocal %115 {approx = true} : vector<128x1xf32> -> vector<128x1xf32>
    %119 = vector.broadcast %118 : vector<128x1xf32> to vector<128x32xf32>
    %120 = arith.mulf %117, %119 : vector<128x32xf32>
    %121 = arith.truncf %120 : vector<128x32xf32> to vector<128x32xbf16>
    %c0_81 = arith.constant 0 : index
    %c160_82 = arith.constant 160 : index
    %122 = vector.load %arg11[%c0_81, %c160_82] : memref<128x256xbf16, #tpu.memory_space<vmem>>, vector<128x32xbf16>
    tpu.vector_store %arg11[%c0_81, %c160_82], %121 {strides = array<i32>} : memref<128x256xbf16, #tpu.memory_space<vmem>>, vector<128x32xbf16>,
    %c0_83 = arith.constant 0 : index
    %c192 = arith.constant 192 : index
    %123 = vector.load %arg8[%c0_83, %c192] : memref<128x256xbf16, #tpu.memory_space<vmem>>, vector<128x32xbf16>
    %c0_84 = arith.constant 0 : index
    %c192_85 = arith.constant 192 : index
    %124 = vector.load %arg9[%c0_84, %c192_85] : memref<128x256xbf16, #tpu.memory_space<vmem>>, vector<128x32xbf16>
    %c0_86 = arith.constant 0 : index
    %c192_87 = arith.constant 192 : index
    %125 = vector.load %arg10[%c0_86, %c192_87] : memref<128x256xbf16, #tpu.memory_space<vmem>>, vector<128x32xbf16>
    %cst_88 = arith.constant dense<0.000000e+00> : vector<128x128xf32>
    %126 = tpu.matmul %123, %124, %cst_88 {dimension_numbers = #tpu.dot_dimension_numbers<[1], [1], [0], [0], [0, 0, 1, 0], [], []>} : vector<128x32xbf16>, vector<128x32xbf16>, vector<128x128xf32> -> vector<128x128xf32>
    %cst_89 = arith.constant dense<0xFF800000> : vector<128xf32>
    %127 = vector.multi_reduction <maximumf>, %126, %cst_89 [1] : vector<128x128xf32> to vector<128xf32>
    %128 = vector.shape_cast %127 : vector<128xf32> to vector<128x1xf32>
    %129 = vector.broadcast %128 : vector<128x1xf32> to vector<128x128xf32>
    %130 = arith.subf %126, %129 : vector<128x128xf32>
    %131 = math.exp %130 : vector<128x128xf32>
    %cst_90 = arith.constant dense<0.000000e+00> : vector<128xf32>
    %132 = vector.multi_reduction <add>, %131, %cst_90 [1] : vector<128x128xf32> to vector<128xf32>
    %133 = vector.shape_cast %132 : vector<128xf32> to vector<128x1xf32>
    %134 = arith.truncf %131 : vector<128x128xf32> to vector<128x128xbf16>
    %cst_91 = arith.constant dense<0.000000e+00> : vector<128x32xf32>
    %135 = tpu.matmul %134, %125, %cst_91 {dimension_numbers = #tpu.dot_dimension_numbers<[1], [0], [0], [1], [0, 0, 1, 1], [], []>} : vector<128x128xbf16>, vector<128x32xbf16>, vector<128x32xf32> -> vector<128x32xf32>
    %136 = tpu.reciprocal %133 {approx = true} : vector<128x1xf32> -> vector<128x1xf32>
    %137 = vector.broadcast %136 : vector<128x1xf32> to vector<128x32xf32>
    %138 = arith.mulf %135, %137 : vector<128x32xf32>
    %139 = arith.truncf %138 : vector<128x32xf32> to vector<128x32xbf16>
    %c0_92 = arith.constant 0 : index
    %c192_93 = arith.constant 192 : index
    %140 = vector.load %arg11[%c0_92, %c192_93] : memref<128x256xbf16, #tpu.memory_space<vmem>>, vector<128x32xbf16>
    tpu.vector_store %arg11[%c0_92, %c192_93], %139 {strides = array<i32>} : memref<128x256xbf16, #tpu.memory_space<vmem>>, vector<128x32xbf16>,
    %c0_94 = arith.constant 0 : index
    %c224 = arith.constant 224 : index
    %141 = vector.load %arg8[%c0_94, %c224] : memref<128x256xbf16, #tpu.memory_space<vmem>>, vector<128x32xbf16>
    %c0_95 = arith.constant 0 : index
    %c224_96 = arith.constant 224 : index
    %142 = vector.load %arg9[%c0_95, %c224_96] : memref<128x256xbf16, #tpu.memory_space<vmem>>, vector<128x32xbf16>
    %c0_97 = arith.constant 0 : index
    %c224_98 = arith.constant 224 : index
    %143 = vector.load %arg10[%c0_97, %c224_98] : memref<128x256xbf16, #tpu.memory_space<vmem>>, vector<128x32xbf16>
    %cst_99 = arith.constant dense<0.000000e+00> : vector<128x128xf32>
    %144 = tpu.matmul %141, %142, %cst_99 {dimension_numbers = #tpu.dot_dimension_numbers<[1], [1], [0], [0], [0, 0, 1, 0], [], []>} : vector<128x32xbf16>, vector<128x32xbf16>, vector<128x128xf32> -> vector<128x128xf32>
    %cst_100 = arith.constant dense<0xFF800000> : vector<128xf32>
    %145 = vector.multi_reduction <maximumf>, %144, %cst_100 [1] : vector<128x128xf32> to vector<128xf32>
    %146 = vector.shape_cast %145 : vector<128xf32> to vector<128x1xf32>
    %147 = vector.broadcast %146 : vector<128x1xf32> to vector<128x128xf32>
    %148 = arith.subf %144, %147 : vector<128x128xf32>
    %149 = math.exp %148 : vector<128x128xf32>
    %cst_101 = arith.constant dense<0.000000e+00> : vector<128xf32>
    %150 = vector.multi_reduction <add>, %149, %cst_101 [1] : vector<128x128xf32> to vector<128xf32>
    %151 = vector.shape_cast %150 : vector<128xf32> to vector<128x1xf32>
    %152 = arith.truncf %149 : vector<128x128xf32> to vector<128x128xbf16>
    %cst_102 = arith.constant dense<0.000000e+00> : vector<128x32xf32>
    %153 = tpu.matmul %152, %143, %cst_102 {dimension_numbers = #tpu.dot_dimension_numbers<[1], [0], [0], [1], [0, 0, 1, 1], [], []>} : vector<128x128xbf16>, vector<128x32xbf16>, vector<128x32xf32> -> vector<128x32xf32>
    %154 = tpu.reciprocal %151 {approx = true} : vector<128x1xf32> -> vector<128x1xf32>
    %155 = vector.broadcast %154 : vector<128x1xf32> to vector<128x32xf32>
    %156 = arith.mulf %153, %155 : vector<128x32xf32>
    %157 = arith.truncf %156 : vector<128x32xf32> to vector<128x32xbf16>
    %c0_103 = arith.constant 0 : index
    %c224_104 = arith.constant 224 : index
    %158 = vector.load %arg11[%c0_103, %c224_104] : memref<128x256xbf16, #tpu.memory_space<vmem>>, vector<128x32xbf16>
    tpu.vector_store %arg11[%c0_103, %c224_104], %157 {strides = array<i32>} : memref<128x256xbf16, #tpu.memory_space<vmem>>, vector<128x32xbf16>,
    %c0_105 = arith.constant 0 : index
    %c0_106 = arith.constant 0 : index
    %159 = vector.load %arg11[%c0_105, %c0_106] : memref<128x256xbf16, #tpu.memory_space<vmem>>, vector<128x256xbf16>
    %c0_107 = arith.constant 0 : index
    %c0_108 = arith.constant 0 : index
    %160 = vector.load %arg5[%c0_107, %c0_108] : memref<256x256xbf16, #tpu.memory_space<vmem>>, vector<256x256xbf16>
    %cst_109 = arith.constant dense<0.000000e+00> : vector<128x256xf32>
    %161 = tpu.matmul %159, %160, %cst_109 {dimension_numbers = #tpu.dot_dimension_numbers<[1], [0], [0], [1], [0, 0, 1, 1], [], []>} : vector<128x256xbf16>, vector<256x256xbf16>, vector<128x256xf32> -> vector<128x256xf32>
    %c0_110 = arith.constant 0 : index
    %c0_111 = arith.constant 0 : index
    %162 = vector.load %arg6[%c0_110, %c0_111] : memref<1x256xf32, #tpu.memory_space<vmem>>, vector<1x256xf32>
    %163 = vector.broadcast %162 : vector<1x256xf32> to vector<128x256xf32>
    %164 = arith.addf %161, %163 : vector<128x256xf32>
    %c0_112 = arith.constant 0 : index
    %c0_113 = arith.constant 0 : index
    %c0_114 = arith.constant 0 : index
    %165 = vector.load %arg7[%c0_112, %c0_113, %c0_114] : memref<1x128x256xf32, #tpu.memory_space<vmem>>, vector<1x128x256xf32>
    %166 = vector.shape_cast %165 : vector<1x128x256xf32> to vector<128x256xf32>
    %167 = vector.shape_cast %164 : vector<128x256xf32> to vector<1x128x256xf32>
    tpu.vector_store %arg7[%c0_112, %c0_113, %c0_114], %167 {strides = array<i32>} : memref<1x128x256xf32, #tpu.memory_space<vmem>>, vector<1x128x256xf32>,
    return
  }
  func.func @transform_0(%arg0: i32) -> (i32, i32, i32) {
    %c0_i32 = arith.constant 0 : i32
    %c0_i32_0 = arith.constant 0 : i32
    %c0_i32_1 = arith.constant 0 : i32
    return %arg0, %c0_i32, %c0_i32_0 : i32, i32, i32
  }
  func.func @transform_1(%arg0: i32) -> (i32, i32) {
    %c0_i32 = arith.constant 0 : i32
    %c0_i32_0 = arith.constant 0 : i32
    %c0_i32_1 = arith.constant 0 : i32
    return %c0_i32, %c0_i32_0 : i32, i32
  }
  func.func @transform_2(%arg0: i32) -> (i32, i32) {
    %c0_i32 = arith.constant 0 : i32
    %c0_i32_0 = arith.constant 0 : i32
    %c0_i32_1 = arith.constant 0 : i32
    return %c0_i32, %c0_i32_0 : i32, i32
  }
  func.func @transform_3(%arg0: i32) -> (i32, i32) {
    %c0_i32 = arith.constant 0 : i32
    %c0_i32_0 = arith.constant 0 : i32
    %c0_i32_1 = arith.constant 0 : i32
    return %c0_i32, %c0_i32_0 : i32, i32
  }
  func.func @transform_4(%arg0: i32) -> (i32, i32) {
    %c0_i32 = arith.constant 0 : i32
    %c0_i32_0 = arith.constant 0 : i32
    %c0_i32_1 = arith.constant 0 : i32
    return %c0_i32, %c0_i32_0 : i32, i32
  }
  func.func @transform_5(%arg0: i32) -> (i32, i32) {
    %c0_i32 = arith.constant 0 : i32
    %c0_i32_0 = arith.constant 0 : i32
    %c0_i32_1 = arith.constant 0 : i32
    return %c0_i32, %c0_i32_0 : i32, i32
  }
  func.func @transform_6(%arg0: i32) -> (i32, i32, i32) {
    %c0_i32 = arith.constant 0 : i32
    %c0_i32_0 = arith.constant 0 : i32
    %c0_i32_1 = arith.constant 0 : i32
    return %arg0, %c0_i32, %c0_i32_0 : i32, i32, i32
  }
}

</mosaic_0001>

<bundles_post_ra>
// kernel: attention_pallas.1
= control target key start
LH: loop header
LB: loop body
LE: loop exit
PB: predicated region body
PF: predicated region fallthrough
CT: control target
= control target key end

     0   :  { %11 = vsyncpa [#allocation7], 0  ;;  %s11300_s0 = inlined_call_operand.hbm [shape: f32[2,128,256], index: 0, kind: input, shape index: {}]   ;;  %s11301_s1 = inlined_call_operand.hbm [shape: bf16[256,256], index: 1, kind: input, shape index: {}]   ;;  %s11302_s2 = inlined_call_operand.hbm [shape: bf16[256,256], index: 2, kind: input, shape index: {}]   ;;  %s11303_s3 = inlined_call_operand.hbm [shape: bf16[256,256], index: 3, kind: input, shape index: {}]   ;;  %s11304_s4 = inlined_call_operand.hbm [shape: bf16[256,256], index: 4, kind: input, shape index: {}]   ;;  %s11305_s5 = inlined_call_operand.vmem [shape: f32[1,256], index: 5, kind: input, shape index: {}]   ;;  %s11306_s6 = inlined_call_operand.hbm [shape: f32[2,128,256], index: 6, kind: output, shape index: {}]  }
   0x1   :  { %13 = vsyncpa [#allocation7 + $0x1], 0 }
   0x2   :  { %14 = vsyncpa [#allocation10], 0 }
   0x3   :  { %15 = vsyncpa [#allocation13], 0 }
   0x4   :  { %16 = vsyncpa [#allocation8], 0 }
   0x5   :  { %18 = vsyncpa [#allocation8 + $0x1], 0  ;;  %s8142_s21 = smov 0   ;;  %s8144_s22 = smov 0  }
   0x6   :  { %s8146_s23 = smov 0   ;;  %s8148_s24 = smov 0  }
   0x7 LB: > { %s8163_s25 = sadd.s32 4294967295, %s8090_s24   ;;  %s6026_s26 = sadd.s32 4294967294, %s8090_s24   ;;  %s8090_s24 = sphi %s8148_s24, %s11966_s24   ;;  %s8086_s23 = sphi %s8146_s23, %s11965_s23   ;;  %s8082_s22 = sphi %s8144_s22, %s11964_s22   ;;  %s8078_s21 = sphi %s8142_s21, %s11963_s21  }
   0x8   : > { %p44_p0 = scmp.ne.s32.totalorder %s8082_s22, %s8078_s21  ;;  %p11307_p1 = scmp.eq.s32.totalorder %s8163_s25, 0 }
   0x9   : > { %p179_p3 = scmp.eq.s32.totalorder %s6026_s26, 1  ;;  %p6027_p5 = scmp.ge.s32.totalorder %s8090_s24, 1 }
   0xa   : > { %p8172_p4 = por %p11307_p1, %p44_p0  ;;  %p186_p7 = scmp.lt.s32.totalorder %s8090_s24, 3 }
   0xb   : > { %p8177_p6 = por %p179_p3, %p44_p0  ;;  %s8092_s30 = smov [#allocation9]  }
   0xc   : > { %s11448_s27 = scalar_select %p8172_p4, 1, 0 }
   0xd   : > { %s11449_s28 = scalar_select %p8177_p6, 1, 0 }
   0xe   : > { %p8182_p8 = pnand %p6027_p5, %p186_p7  ;;  %s198_s7 = sshll.u32 %s8092_s30, 4  ;;  %s8186_s7 = int_to_ptr.vmem [resolvable:$true] %s198_s7 }
   0xf   : > { %s8093_s9 = smov [#allocation12]   ;;  %s8094_s11 = smov [#allocation11]  }
  0x10   : > { %s11450_s29 = scalar_select %p8182_p8, 1, 0 }
  0x11   : > { %p7094_p9 = pneg %p8182_p8  ;;  %s224_s10 = sshll.u32 %s8093_s9, 4  ;;  %s8197_s10 = int_to_ptr.vmem [resolvable:$true] %s224_s10 }
  0x12   : > { %s8199_s12 = sshll.u32 %s8094_s11, 4  ;;  %s7874_s15 = scalar_lea.hbm %s11301_s1, 4096  ;;  %s212_s12 = int_to_ptr.vmem [resolvable:$true] %s8199_s12 }
  0x13   : > { %p8193_p11 = pnand %p7094_p9, %p11307_p1  ;;  %p7875_p12 = scmp.ne.s32.totalorder %s11301_s1, %s7874_s15 }
  0x14   : > { %p7881_p5 = scmp.lt.u32.totalorder %s7874_s15, %s11301_s1 }
  0x15   : > { %p8209_p13 = pneg %p8193_p11 }
  0x17   : > { %p7877_p0 = pnand %p8209_p13, %p7875_p12 }
  0x19   : > { %p7878_p3 = pneg %p7877_p0 }
  0x1b   : > { %p7883_p7 = pnand %p7881_p5, %p7878_p3 }
  0x1d   : > { %7886 = shalt.err (!%p7883_p7)
}
  0x1e   : > { %s7887_s26 = scalar_lea.vmem %s8186_s7, 4096  ;;  %p7895_p2 = scmp.lt.s32.totalorder %s8186_s7, %s8186_s7 }
  0x1f   : > { %p7888_p9 = scmp.ne.s32.totalorder %s8186_s7, %s7887_s26  ;;  %p7896_p6 = scmp.lt.s32.totalorder %s7887_s26, %s7887_s26 }
  0x21   : > { %p7890_p10 = pnand %p7888_p9, %p8209_p13  ;;  %p7897_p12 = por %p7896_p6, %p7895_p2 }
  0x23   : > { %p7891_p1 = pneg %p7890_p10 }
  0x25   : > { %p7898_p0 = pnand %p7897_p12, %p7891_p1 }
  0x27   : > { %7901 = shalt.err (!%p7898_p0)
}
  0x28   : > { %s8095_s30 = smov 128   ;;  %s8096_s9 = smov 8  }
  0x29   : > { %7097 = dma.hbm_to_vmem [thread:$0]  (!%p8193_p11), %s11301_s1, 4096, %s8186_s7, [#allocation10], %s8095_s30, %s8095_s30, %s8096_s9  }
  0x2a   : > { %s7902_s16 = scalar_lea.hbm %s11303_s3, 4096 }
  0x2b   : > { %p7903_p1 = scmp.ne.s32.totalorder %s11303_s3, %s7902_s16  ;;  %p7909_p10 = scmp.lt.u32.totalorder %s7902_s16, %s11303_s3 }
  0x2d   : > { %p7905_p2 = pnand %p7903_p1, %p8209_p13 }
  0x2f   : > { %p7906_p6 = pneg %p7905_p2 }
  0x31   : > { %p7911_p3 = pnand %p7909_p10, %p7906_p6 }
  0x33   : > { %7914 = shalt.err (!%p7911_p3)
}
  0x34   : > { %s7915_s7 = scalar_lea.vmem %s8197_s10, 4096  ;;  %p7923_p12 = scmp.lt.s32.totalorder %s8197_s10, %s8197_s10 }
  0x35   : > { %p7916_p5 = scmp.ne.s32.totalorder %s8197_s10, %s7915_s7  ;;  %p7924_p0 = scmp.lt.s32.totalorder %s7915_s7, %s7915_s7 }
  0x37   : > { %p7918_p7 = pnand %p7916_p5, %p8209_p13  ;;  %p7925_p1 = por %p7924_p0, %p7923_p12 }
  0x39   : > { %p7919_p9 = pneg %p7918_p7 }
  0x3b   : > { %p7926_p2 = pnand %p7925_p1, %p7919_p9 }
  0x3d   : > { %7929 = shalt.err (!%p7926_p2)
}
  0x3e   : > { %7103 = dma.hbm_to_vmem [thread:$0]  (!%p8193_p11), %s11303_s3, 4096, %s8197_s10, [#allocation13], %s8095_s30, %s8095_s30, %s8096_s9  }
  0x3f   : > { %s7930_s16 = scalar_lea.hbm %s11302_s2, 4096 }
  0x40   : > { %p7931_p6 = scmp.ne.s32.totalorder %s11302_s2, %s7930_s16  ;;  %p7937_p5 = scmp.lt.u32.totalorder %s7930_s16, %s11302_s2 }
  0x42   : > { %p7933_p10 = pnand %p7931_p6, %p8209_p13 }
  0x44   : > { %p7934_p3 = pneg %p7933_p10 }
  0x46   : > { %p7939_p7 = pnand %p7937_p5, %p7934_p3 }
  0x48   : > { %7942 = shalt.err (!%p7939_p7)
}
  0x49   : > { %s7943_s7 = scalar_lea.vmem %s212_s12, 4096  ;;  %p7951_p1 = scmp.lt.s32.totalorder %s212_s12, %s212_s12 }
  0x4a   : > { %p7944_p9 = scmp.ne.s32.totalorder %s212_s12, %s7943_s7  ;;  %p7952_p2 = scmp.lt.s32.totalorder %s7943_s7, %s7943_s7 }
  0x4c   : > { %p7946_p12 = pnand %p7944_p9, %p8209_p13  ;;  %p7953_p4 = por %p7952_p2, %p7951_p1 }
  0x4e   : > { %p7947_p0 = pneg %p7946_p12 }
  0x50   : > { %p7954_p8 = pnand %p7953_p4, %p7947_p0 }
  0x52   : > { %7957 = shalt.err (!%p7954_p8)
}
  0x53   : > { %7100 = dma.hbm_to_vmem [thread:$0]  (!%p8193_p11), %s11302_s2, 4096, %s212_s12, [#allocation10], %s8095_s30, %s8095_s30, %s8096_s9  }
  0x54   : > { %s8097_s13 = smov [#allocation14]   ;;  %s7958_s17 = scalar_lea.hbm %s11304_s4, 4096 }
  0x55   : > { %s237_s14 = sshll.u32 %s8097_s13, 4  ;;  %p7959_p4 = scmp.ne.s32.totalorder %s11304_s4, %s7958_s17  ;;  %s238_s14 = int_to_ptr.vmem [resolvable:$true] %s237_s14 }
  0x56   : > { %p7965_p10 = scmp.lt.u32.totalorder %s7958_s17, %s11304_s4 }
  0x57   : > { %p7961_p8 = pnand %p7959_p4, %p8209_p13 }
  0x59   : > { %p7962_p6 = pneg %p7961_p8 }
  0x5b   : > { %p7967_p3 = pnand %p7965_p10, %p7962_p6 }
  0x5d   : > { %7970 = shalt.err (!%p7967_p3)
}
  0x5e   : > { %s7971_s12 = scalar_lea.vmem %s238_s14, 4096  ;;  %p7979_p12 = scmp.lt.s32.totalorder %s238_s14, %s238_s14 }
  0x5f   : > { %p7972_p5 = scmp.ne.s32.totalorder %s238_s14, %s7971_s12  ;;  %p7980_p0 = scmp.lt.s32.totalorder %s7971_s12, %s7971_s12 }
  0x61   : > { %p7974_p7 = pnand %p7972_p5, %p8209_p13  ;;  %p7981_p1 = por %p7980_p0, %p7979_p12 }
  0x63   : > { %p7975_p9 = pneg %p7974_p7 }
  0x65   : > { %p7982_p2 = pnand %p7981_p1, %p7975_p9 }
  0x67   : > { %7985 = shalt.err (!%p7982_p2)
}
  0x68   : > { %7106 = dma.hbm_to_vmem [thread:$0]  (!%p8193_p11), %s11304_s4, 4096, %s238_s14, [#allocation13], %s8095_s30, %s8095_s30, %s8096_s9  }
  0x69   : > { %s8303_s18 = sadd.s32 1, %s8090_s24   ;;  %s31_s8 = sadd.s32 1, %s8086_s23 }
  0x6a   : > { %s28_s13 = ssub.s32 %s8090_s24, %s8303_s18  ;;  %p38_p13 = scmp.ne.s32.totalorder %s8086_s23, %s8082_s22 }
  0x6b   : > { %p29_p4 = scmp.eq.s32.totalorder %s28_s13, 0  ;;  %p39_p8 = scmp.eq.s32.totalorder %s8090_s24, 0 }
  0x6c   : > { %p11453_p6 = scmp.eq.s32.totalorder %s8163_s25, 1  ;;  %p7119_p3 = scmp.lt.s32.totalorder %s8090_s24, 2 }
  0x6d   : > { %s8319_s16 = scalar_select %p29_p4, %s8086_s23, %s31_s8  }
  0x6e   : > { %p8313_p10 = por %p11453_p6, %p38_p13  ;;  %p40_p5 = por %p39_p8, %p38_p13 }
  0x6f   : > { %s254_s17 = sand.u32 1, %s8086_s23   ;;  %s6240_s30 = sshll.u32 %s8090_s24, 12 }
  0x70   : > { %s6033_s19 = sshll.u32 %s254_s17, 8  ;;  %s8326_s20 = scalar_lea.hbm %s11300_s0, %s6240_s30 }
  0x71   : > { %s258_s26 = scalar_lea.vmem [#allocation6], %s6033_s19  ;;  %p8330_p11 = pnand %p7119_p3, %p40_p5 }
  0x72   : > { %s265_s7 = sshll.u32 %s258_s26, 4  ;;  %s8334_s10 = scalar_lea.sflag [#allocation7], %s254_s17  ;;  %s8328_s7 = int_to_ptr.vmem [resolvable:$true] %s265_s7 }
  0x73   : > { %s7986_s11 = scalar_lea.hbm %s8326_s20, 4096  ;;  %p7988_p9 = pneg %p8330_p11 }
  0x74   : > { %p7987_p7 = scmp.ne.s32.totalorder %s8326_s20, %s7986_s11  ;;  %s7991_s19 = scalar_lea.hbm %s11300_s0, 8192 }
  0x75   : > { %p7992_p1 = scmp.lt.u32.totalorder %s8326_s20, %s11300_s0  ;;  %p7993_p2 = scmp.lt.u32.totalorder %s7991_s19, %s7986_s11 }
  0x76   : > { %p7989_p12 = pnand %p7988_p9, %p7987_p7  ;;  %p7995_p4 = scmp.lt.u32.totalorder %s7986_s11, %s8326_s20 }
  0x77   : > { %p7994_p13 = por %p7993_p2, %p7992_p1 }
  0x78   : > { %p7990_p0 = pneg %p7989_p12 }
  0x79   : > { %p7996_p8 = por %p7995_p4, %p7994_p13 }
  0x7b   : > { %p7997_p6 = pnand %p7996_p8, %p7990_p0 }
  0x7d   : > { %8000 = shalt.err (!%p7997_p6)
}
  0x7e   : > { %s8001_s17 = scalar_lea.vmem %s8328_s7, 4096  ;;  %s8098_s14 = smov [#allocation6]  }
  0x7f   : > { %p8002_p3 = scmp.ne.s32.totalorder %s8328_s7, %s8001_s17  ;;  %s8006_s26 = sshll.u32 %s8098_s14, 4  ;;  %s8007_s26 = int_to_ptr.vmem [resolvable:$false] %s8006_s26 }
  0x80   : > { %s8008_s8 = scalar_lea.vmem %s8007_s26, 8192  ;;  %p8009_p12 = scmp.lt.s32.totalorder %s8328_s7, %s8007_s26 }
  0x81   : > { %p8004_p5 = pnand %p8002_p3, %p7988_p9  ;;  %p8010_p1 = scmp.lt.s32.totalorder %s8008_s8, %s8001_s17 }
  0x83   : > { %p8005_p7 = pneg %p8004_p5  ;;  %p8011_p2 = por %p8010_p1, %p8009_p12 }
  0x85   : > { %p8012_p13 = pnand %p8011_p2, %p8005_p7 }
  0x87   : > { %8015 = shalt.err (!%p8012_p13)
}
  0x88   : > { %s8099_s11 = smov 256   ;;  %s8100_s13 = smov 16  }
  0x89   : > { %7110 = dma.hbm_to_vmem [thread:$0]  (!%p8330_p11), %s8326_s20, 4096, %s8328_s7, %s8334_s10, %s8099_s11, %s8099_s11, %s8100_s13  }
  0x8a   : > { %p11456_p9 = scmp.ne.s32.totalorder %s11450_s29, 0 }
  0x8c   : > { %277 = sbr.rel (%p11456_p9) target bundleno = 4200 (0x1068), region = 44 }
  0x93   : > { %s8365_s19 = sand.u32 1, %s8082_s22   ;;  %p11457_p0 = scmp.ne.s32.totalorder %s11448_s27, 0 }
  0x94   : > { %s6037_s30 = sshll.u32 %s8365_s19, 8  ;;  %s280_s9 = scalar_lea.sflag [#allocation7], %s8365_s19 }
  0x95   : > { %s8371_s17 = scalar_lea.vmem [#allocation6], %s6037_s30 }
  0x96   : > { %8061 = dma.done.wait (%p11457_p0), %s280_s9, 4096  }
  0x97   : > { %8063 = vsyncadd (%p11457_p0), %s280_s9, 4294963200  ;;  %p11458_p11 = scmp.eq.s32.totalorder %s8163_s25, 0 }
  0x99   : > { %8065 = dma.done.wait (%p11458_p11), [#allocation10], 8192   ;;  %p11459_p4 = pmov %p11458_p11 }
  0x9b   : > { %8067 = vsyncadd (%p11459_p4), [#allocation10], 4294959104  ;;  %p11460_p8 = pmov %p11459_p4 }
  0x9c   : > { %p11461_p6 = pmov %p11459_p4 }
  0x9d   : > { %8069 = dma.done.wait (%p11460_p8), [#allocation13], 8192  }
  0x9e   : > { %8071 = vsyncadd (%p11461_p6), [#allocation13], 4294959104  ;;  %v7170_v0 = vld [vmem:[#allocation9 + $0x4] ss:$8 sps:$4 sm:$0xff]   ;;  %v7172_v1 = vld [vmem:[#allocation9] ss:$8 sps:$4 sm:$0xff]  }
  0x9f   : > { %569 = vmatprep.subr.bf16.mxu1 %v7170_v0  ;;  %v7173_v2 = vld [vmem:[#allocation9 + $0x14] ss:$8 sps:$4 sm:$0xff]   ;;  %v7175_v3 = vld [vmem:[#allocation9 + $0x10] ss:$8 sps:$4 sm:$0xff]   ;;  %v7176_v4 = vld [vmem:[#allocation9 + $0x24] ss:$8 sps:$4 sm:$0xff]  }
  0xa0   : > { %570 = vmatpush1.bf16.msra.mxu1 %v7172_v1  ;;  %v7178_v5 = vld [vmem:[#allocation9 + $0x20] ss:$8 sps:$4 sm:$0xff]   ;;  %v7179_v6 = vld [vmem:[#allocation9 + $0x34] ss:$8 sps:$4 sm:$0xff]   ;;  %v7181_v7 = vld [vmem:[#allocation9 + $0x30] ss:$8 sps:$4 sm:$0xff]  }
  0xa1   : > { %571 = vmatprep.subr.bf16.mxu1 %v7173_v2  ;;  %v7182_v8 = vld [vmem:[#allocation9 + $0x44] ss:$8 sps:$4 sm:$0xff]   ;;  %v7184_v9 = vld [vmem:[#allocation9 + $0x40] ss:$8 sps:$4 sm:$0xff]   ;;  %v7185_v10 = vld [vmem:[#allocation9 + $0x54] ss:$8 sps:$4 sm:$0xff]  }
  0xa2   : > { %v7187_v11 = vld [vmem:[#allocation9 + $0x50] ss:$8 sps:$4 sm:$0xff]   ;;  %v7188_v12 = vld [vmem:[#allocation9 + $0x64] ss:$8 sps:$4 sm:$0xff]   ;;  %v7190_v16 = vld [vmem:[#allocation9 + $0x60] ss:$8 sps:$4 sm:$0xff]  }
  0xa3   : > { %v330_v13 = vld [vmem:[%s8371_s17 + $0x8] sm:$0xff]  ;;  %v332_v14 = vld [vmem:[%s8371_s17 + $0x18] sm:$0xff]  ;;  %v329_v40 = vld [vmem:[%s8371_s17] sm:$0xff]  ;;  %vm1412_vm0 = vcmask 261120   ;;  %s8101_s27 = smov 96   ;;  %s8102_s29 = smov 64  }
  0xa4   : > { %572 = vmatpush1.bf16.msra.mxu1 %v7175_v3  ;;  %v8387_v15 = vpack.c.bf16 %v332_v14, %v330_v13  ;;  %v7191_v17 = vld [vmem:[#allocation9 + $0x74] ss:$8 sps:$4 sm:$0xff]   ;;  %v7193_v18 = vld [vmem:[#allocation9 + $0x70] ss:$8 sps:$4 sm:$0xff]   ;;  %v7194_v19 = vld [vmem:[#allocation9 + $0x84] ss:$8 sps:$4 sm:$0xff]  }
  0xa5   : > { %573 = vmatprep.subr.bf16.mxu1 %v7176_v4  ;;  %v7196_v20 = vld [vmem:[#allocation9 + $0x80] ss:$8 sps:$4 sm:$0xff]   ;;  %v7197_v21 = vld [vmem:[#allocation9 + $0x94] ss:$8 sps:$4 sm:$0xff]   ;;  %v7199_v22 = vld [vmem:[#allocation9 + $0x90] ss:$8 sps:$4 sm:$0xff]  }
  0xa6   : > { %601 = vmatprep.mubr.bf16.mxu1 %v8387_v15  ;;  %1275 = vmatprep.mubr.bf16.mxu0 %v8387_v15  ;;  %v7200_v23 = vld [vmem:[#allocation9 + $0xa4] ss:$8 sps:$4 sm:$0xff]   ;;  %v7202_v24 = vld [vmem:[#allocation9 + $0xa0] ss:$8 sps:$4 sm:$0xff]   ;;  %v7203_v25 = vld [vmem:[#allocation9 + $0xb4] ss:$8 sps:$4 sm:$0xff]  }
  0xa7   : > { %v7205_v26 = vld [vmem:[#allocation9 + $0xb0] ss:$8 sps:$4 sm:$0xff]   ;;  %v7206_v27 = vld [vmem:[#allocation9 + $0xc4] ss:$8 sps:$4 sm:$0xff]   ;;  %v7208_v28 = vld [vmem:[#allocation9 + $0xc0] ss:$8 sps:$4 sm:$0xff]  }
  0xa8   : > { %574 = vmatpush1.bf16.msra.mxu1 %v7178_v5  ;;  %v7209_v29 = vld [vmem:[#allocation9 + $0xd4] ss:$8 sps:$4 sm:$0xff]   ;;  %v7260_v30 = vld [vmem:[#allocation12 + $0x4] ss:$8 sps:$4 sm:$0xff]   ;;  %v7262_v31 = vld [vmem:[#allocation12] ss:$8 sps:$4 sm:$0xff]  }
  0xa9   : > { %575 = vmatprep.subr.bf16.mxu1 %v7179_v6  ;;  %v7211_v32 = vld [vmem:[#allocation9 + $0xd0] ss:$8 sps:$4 sm:$0xff]   ;;  %v7212_v33 = vld [vmem:[#allocation9 + $0xe4] ss:$8 sps:$4 sm:$0xff]   ;;  %1243 = vmatprep.subr.bf16.mxu0 %v7260_v30  ;;  %v7266_v34 = vld [vmem:[#allocation12 + $0x14] ss:$8 sps:$4 sm:$0xff]  }
  0xaa   : > { %1244 = vmatpush1.bf16.msra.mxu0 %v7262_v31  ;;  %v7268_v35 = vld [vmem:[#allocation12 + $0x10] ss:$8 sps:$4 sm:$0xff]   ;;  %v7214_v36 = vld [vmem:[#allocation9 + $0xe0] ss:$8 sps:$4 sm:$0xff]   ;;  %v7215_v37 = vld [vmem:[#allocation9 + $0xf4] ss:$8 sps:$4 sm:$0xff]  }
  0xab   : > { %1245 = vmatprep.subr.bf16.mxu0 %v7266_v34  ;;  %v7272_v38 = vld [vmem:[#allocation12 + $0x24] ss:$8 sps:$4 sm:$0xff]   ;;  %v7217_v39 = vld [vmem:[#allocation9 + $0xf0] ss:$8 sps:$4 sm:$0xff]   ;;  %v7274_v41 = vld [vmem:[#allocation12 + $0x20] ss:$8 sps:$4 sm:$0xff]  }
  0xac   : > { %576 = vmatpush1.bf16.msra.mxu1 %v7181_v7  ;;  %v331_v42 = vld [vmem:[%s8371_s17 + $0x10] sm:$0xff]  ;;  %v7220_v44 = vld [vmem:[#allocation11 + $0x4] ss:$8 sps:$4 sm:$0xff]   ;;  %v336_v46 = vld [vmem:[%s8371_s17 + $0x38] sm:$0xff]  ;;  %s8103_s20 = smov 32   ;;  %vm2361_vm1 = vcmask 523520  }
  0xad   : > { %577 = vmatprep.subr.bf16.mxu1 %v7182_v8  ;;  %v7275_v43 = vld [vmem:[#allocation12 + $0x34] ss:$8 sps:$4 sm:$0xff]   ;;  %v334_v45 = vld [vmem:[%s8371_s17 + $0x28] sm:$0xff]  ;;  %v7277_v47 = vld [vmem:[#allocation12 + $0x30] ss:$8 sps:$4 sm:$0xff]   ;;  %v8395_v48 = vpack.c.bf16 %v331_v42, %v329_v40  ;;  %vm2908_vm2 = vcmask 785920  }
  0xae   : > { %1246 = vmatpush1.bf16.msra.mxu0 %v7268_v35  ;;  %v7278_v49 = vld [vmem:[#allocation12 + $0x44] ss:$8 sps:$4 sm:$0xff]   ;;  %v7218_v50 = vld [vmem:[#allocation11] ss:$8 sps:$4 sm:$0xff]   ;;  %v8397_v51 = vpack.c.bf16 %v336_v46, %v334_v45  ;;  %v7223_v52 = vld [vmem:[#allocation11 + $0x14] ss:$8 sps:$4 sm:$0xff]  }
  0xaf   : > { %1247 = vmatprep.subr.bf16.mxu0 %v7272_v38  ;;  %v7221_v53 = vld [vmem:[#allocation11 + $0x10] ss:$8 sps:$4 sm:$0xff]   ;;  %v333_v54 = vld [vmem:[%s8371_s17 + $0x20] sm:$0xff]  ;;  %v7281_v57 = vld [vmem:[#allocation12 + $0x54] ss:$8 sps:$4 sm:$0xff]   ;;  %vm3455_vm3 = vcmask 1048320  }
  0xb0   : > { %578 = vmatpush1.bf16.msra.mxu1 %v7184_v9  ;;  %v7280_v55 = vld [vmem:[#allocation12 + $0x40] ss:$8 sps:$4 sm:$0xff]   ;;  %v335_v56 = vld [vmem:[%s8371_s17 + $0x30] sm:$0xff]  ;;  %v7226_v58 = vld [vmem:[#allocation11 + $0x24] ss:$8 sps:$4 sm:$0xff]   ;;  %s11185_s10 = scalar_lea.vmem [#allocation15], %s6037_s30 }
  0xb1   : > { %579 = vmatprep.subr.bf16.mxu1 %v7185_v10  ;;  %v338_v59 = vld [vmem:[%s8371_s17 + $0x48] sm:$0xff]  ;;  %v340_v60 = vld [vmem:[%s8371_s17 + $0x58] sm:$0xff]  ;;  %v8405_v62 = vpack.c.bf16 %v335_v56, %v333_v54  ;;  %v337_v4 = vld [vmem:[%s8371_s17 + $0x40] sm:$0xff]  ;;  %s6241_s14 = sshll.u32 %s8163_s25, 12  ;;  %s5915_s26 = sshll.u32 %s11185_s10, 4  ;;  %s11252_s26 = int_to_ptr.vmem [resolvable:$true] %s5915_s26 }
  0xb2   : > { %1248 = vmatpush1.bf16.msra.mxu0 %v7274_v41  ;;  %v7283_v61 = vld [vmem:[#allocation12 + $0x50] ss:$8 sps:$4 sm:$0xff]   ;;  %v7284_v63 = vld [vmem:[#allocation12 + $0x64] ss:$8 sps:$4 sm:$0xff]   ;;  %v7224_v0 = vld [vmem:[#allocation11 + $0x20] ss:$8 sps:$4 sm:$0xff]   ;;  %v8407_v1 = vpack.c.bf16 %v340_v60, %v338_v59  ;;  %s11250_s13 = scalar_lea.hbm %s11306_s6, %s6241_s14 }
  0xb3   : > { %1249 = vmatprep.subr.bf16.mxu0 %v7275_v43  ;;  %v7229_v2 = vld [vmem:[#allocation11 + $0x34] ss:$8 sps:$4 sm:$0xff]   ;;  %v7227_v3 = vld [vmem:[#allocation11 + $0x30] ss:$8 sps:$4 sm:$0xff]   ;;  %v7286_v6 = vld [vmem:[#allocation12 + $0x60] ss:$8 sps:$4 sm:$0xff]  }
  0xb4   : > { %580 = vmatpush1.bf16.msra.mxu1 %v7187_v11  ;;  %v339_v5 = vld [vmem:[%s8371_s17 + $0x50] sm:$0xff]  ;;  %v7232_v7 = vld [vmem:[#allocation11 + $0x44] ss:$8 sps:$4 sm:$0xff]   ;;  %v344_v9 = vld [vmem:[%s8371_s17 + $0x78] sm:$0xff]  ;;  %s5902_s25 = scalar_lea.sflag [#allocation8], %s8365_s19  ;;  %s8016_s30 = scalar_lea.vmem %s11252_s26, 4096 }
  0xb5   : > { %581 = vmatprep.subr.bf16.mxu1 %v7188_v12  ;;  %v342_v8 = vld [vmem:[%s8371_s17 + $0x68] sm:$0xff]  ;;  %v7287_v10 = vld [vmem:[#allocation12 + $0x74] ss:$8 sps:$4 sm:$0xff]   ;;  %v7289_v11 = vld [vmem:[#allocation12 + $0x70] ss:$8 sps:$4 sm:$0xff]   ;;  %v8415_v14 = vpack.c.bf16 %v339_v5, %v337_v4  ;;  %p8017_p3 = scmp.ne.s32.totalorder %s11252_s26, %s8016_s30  ;;  %s8104_s9 = smov [#allocation15]  }
  0xb6   : > { %1250 = vmatpush1.bf16.msra.mxu0 %v7277_v47  ;;  %v7290_v12 = vld [vmem:[#allocation12 + $0x84] ss:$8 sps:$4 sm:$0xff]   ;;  %v7230_v13 = vld [vmem:[#allocation11 + $0x40] ss:$8 sps:$4 sm:$0xff]   ;;  %v7241_v31 = vld [vmem:[#allocation11 + $0x74] ss:$8 sps:$4 sm:$0xff]  }
  0xb7   : > { %1251 = vmatprep.subr.bf16.mxu0 %v7278_v49  ;;  %v7239_v34 = vld [vmem:[#allocation11 + $0x70] ss:$8 sps:$4 sm:$0xff]   ;;  %v345_v35 = vld [vmem:[%s8371_s17 + $0x80] sm:$0xff]  ;;  %v350_v38 = vld [vmem:[%s8371_s17 + $0xa8] sm:$0xff]  ;;  %p8018_p5 = pnand %p8017_p3, %p8313_p10 }
  0xb8   : > { %582 = vmatpush1.bf16.msra.mxu1 %v7190_v16  ;;  %v7235_v16 = vld [vmem:[#allocation11 + $0x54] ss:$8 sps:$4 sm:$0xff]   ;;  %v7301_v40 = vld [vmem:[#allocation12 + $0xb0] ss:$8 sps:$4 sm:$0xff]   ;;  %v7302_v42 = vld [vmem:[#allocation12 + $0xc4] ss:$8 sps:$4 sm:$0xff]  }
  0xb9   : > { %583 = vmatprep.subr.bf16.mxu1 %v7191_v17  ;;  %v8417_v17 = vpack.c.bf16 %v344_v9, %v342_v8  ;;  %v7242_v43 = vld [vmem:[#allocation11 + $0x80] ss:$8 sps:$4 sm:$0xff]   ;;  %v7247_v45 = vld [vmem:[#allocation11 + $0x94] ss:$8 sps:$4 sm:$0xff]   ;;  %v7245_v49 = vld [vmem:[#allocation11 + $0x90] ss:$8 sps:$4 sm:$0xff]   ;;  %p8019_p7 = pneg %p8018_p5 }
  0xba   : > { %1252 = vmatpush1.bf16.msra.mxu0 %v7280_v55  ;;  %v7304_v46 = vld [vmem:[#allocation12 + $0xc0] ss:$8 sps:$4 sm:$0xff]   ;;  %v7305_v47 = vld [vmem:[#allocation12 + $0xd4] ss:$8 sps:$4 sm:$0xff]   ;;  %v7307_v56 = vld [vmem:[#allocation12 + $0xd0] ss:$8 sps:$4 sm:$0xff]  }
  0xbb   : > { %1253 = vmatprep.subr.bf16.mxu0 %v7281_v57  ;;  %v354_v54 = vld [vmem:[%s8371_s17 + $0xc8] sm:$0xff]  ;;  %v356_v55 = vld [vmem:[%s8371_s17 + $0xd8] sm:$0xff]  ;;  %v355_v4 = vld [vmem:[%s8371_s17 + $0xd0] sm:$0xff] }
  0xbc   : > { %584 = vmatpush1.bf16.msra.mxu1 %v7193_v18  ;;  %v7292_v18 = vld [vmem:[#allocation12 + $0x80] ss:$8 sps:$4 sm:$0xff]   ;;  %v8447_v60 = vpack.c.bf16 %v356_v55, %v354_v54  ;;  %v7256_v5 = vld [vmem:[#allocation11 + $0xc4] ss:$8 sps:$4 sm:$0xff]   ;;  %v7313_v8 = vld [vmem:[#allocation12 + $0xf0] ss:$8 sps:$4 sm:$0xff]  }
  0xbd   : > { %585 = vmatprep.subr.bf16.mxu1 %v7194_v19  ;;  %v7293_v19 = vld [vmem:[#allocation12 + $0x94] ss:$8 sps:$4 sm:$0xff]   ;;  %v7248_v59 = vld [vmem:[#allocation11 + $0xa0] ss:$8 sps:$4 sm:$0xff]  }
  0xbe   : > { %1254 = vmatpush1.bf16.msra.mxu0 %v7283_v61  ;;  %v7253_v61 = vld [vmem:[#allocation11 + $0xb4] ss:$8 sps:$4 sm:$0xff]  }
  0xbf   : > { %1255 = vmatprep.subr.bf16.mxu0 %v7284_v63  ;;  %v7310_v63 = vld [vmem:[#allocation12 + $0xe0] ss:$8 sps:$4 sm:$0xff]  }
  0xc0   : > { %586 = vmatpush1.bf16.msra.mxu1 %v7196_v20  ;;  %v7233_v20 = vld [vmem:[#allocation11 + $0x50] ss:$8 sps:$4 sm:$0xff]  }
  0xc1   : > { %587 = vmatprep.subr.bf16.mxu1 %v7197_v21  ;;  %v341_v21 = vld [vmem:[%s8371_s17 + $0x60] sm:$0xff] }
  0xc2   : > { %1256 = vmatpush1.bf16.msra.mxu0 %v7286_v6  ;;  %v358_v6 = vld [vmem:[%s8371_s17 + $0xe8] sm:$0xff] }
  0xc3   : > { %1257 = vmatprep.subr.bf16.mxu0 %v7287_v10  ;;  %v7254_v10 = vld [vmem:[#allocation11 + $0xc0] ss:$8 sps:$4 sm:$0xff]  }
  0xc4   : > { %588 = vmatpush1.bf16.msra.mxu1 %v7199_v22  ;;  %v343_v22 = vld [vmem:[%s8371_s17 + $0x70] sm:$0xff] }
  0xc5   : > { %589 = vmatprep.subr.bf16.mxu1 %v7200_v23  ;;  %v7238_v23 = vld [vmem:[#allocation11 + $0x64] ss:$8 sps:$4 sm:$0xff]  }
  0xc6   : > { %1258 = vmatpush1.bf16.msra.mxu0 %v7289_v11 }
  0xc7   : > { %1259 = vmatprep.subr.bf16.mxu0 %v7290_v12  ;;  %v7259_v12 = vld [vmem:[#allocation11 + $0xd4] ss:$8 sps:$4 sm:$0xff]  }
  0xc8   : > { %590 = vmatpush1.bf16.msra.mxu1 %v7202_v24  ;;  %v346_v24 = vld [vmem:[%s8371_s17 + $0x88] sm:$0xff] }
  0xc9   : > { %591 = vmatprep.subr.bf16.mxu1 %v7203_v25  ;;  %v348_v25 = vld [vmem:[%s8371_s17 + $0x98] sm:$0xff] }
  0xca   : > { %1260 = vmatpush1.bf16.msra.mxu0 %v7292_v18  ;;  %v8427_v30 = vpack.c.bf16 %v348_v25, %v346_v24  ;;  %v359_v18 = vld [vmem:[%s8371_s17 + $0xf0] sm:$0xff] }
  0xcb   : > { %1261 = vmatprep.subr.bf16.mxu0 %v7293_v19  ;;  %v7265_v19 = vld [vmem:[#allocation11 + $0xe4] ss:$8 sps:$4 sm:$0xff]  }
  0xcc   : > { %592 = vmatpush1.bf16.msra.mxu1 %v7205_v26  ;;  %v7295_v26 = vld [vmem:[#allocation12 + $0x90] ss:$8 sps:$4 sm:$0xff]  }
  0xcd   : > { %593 = vmatprep.subr.bf16.mxu1 %v7206_v27  ;;  %v8425_v27 = vpack.c.bf16 %v343_v22, %v341_v21  ;;  %v7263_v21 = vld [vmem:[#allocation11 + $0xe0] ss:$8 sps:$4 sm:$0xff]   ;;  %v7271_v22 = vld [vmem:[#allocation11 + $0xf4] ss:$8 sps:$4 sm:$0xff]  }
  0xce   : > { %1262 = vmatpush1.bf16.msra.mxu0 %v7295_v26 }
  0xd0   : > { %594 = vmatpush1.bf16.msra.mxu1 %v7208_v28  ;;  %v7296_v28 = vld [vmem:[#allocation12 + $0xa4] ss:$8 sps:$4 sm:$0xff]  }
  0xd1   : > { %595 = vmatprep.subr.bf16.mxu1 %v7209_v29  ;;  %v7236_v29 = vld [vmem:[#allocation11 + $0x60] ss:$8 sps:$4 sm:$0xff]   ;;  %1263 = vmatprep.subr.bf16.mxu0 %v7296_v28 }
  0xd4   : > { %596 = vmatpush1.bf16.msra.mxu1 %v7211_v32  ;;  %v7298_v32 = vld [vmem:[#allocation12 + $0xa0] ss:$8 sps:$4 sm:$0xff]  }
  0xd5   : > { %597 = vmatprep.subr.bf16.mxu1 %v7212_v33  ;;  %v7299_v33 = vld [vmem:[#allocation12 + $0xb4] ss:$8 sps:$4 sm:$0xff]   ;;  %1264 = vmatpush1.bf16.msra.mxu0 %v7298_v32 }
  0xd6   : > { %1265 = vmatprep.subr.bf16.mxu0 %v7299_v33 }
  0xd8   : > { %598 = vmatpush1.bf16.msra.mxu1 %v7214_v36  ;;  %v347_v36 = vld [vmem:[%s8371_s17 + $0x90] sm:$0xff] }
  0xd9   : > { %599 = vmatprep.subr.bf16.mxu1 %v7215_v37  ;;  %v7244_v37 = vld [vmem:[#allocation11 + $0x84] ss:$8 sps:$4 sm:$0xff]   ;;  %v8435_v41 = vpack.c.bf16 %v347_v36, %v345_v35  ;;  %1266 = vmatpush1.bf16.msra.mxu0 %v7301_v40 }
  0xda   : > { %1267 = vmatprep.subr.bf16.mxu0 %v7302_v42 }
  0xdc   : > { %600 = vmatpush1.bf16.msra.mxu1 %v7217_v39  ;;  %v352_v39 = vld [vmem:[%s8371_s17 + $0xb8] sm:$0xff] }
  0xdd   : > { %906 = vmatprep.subr.bf16.mxu1 %v7220_v44  ;;  %v8437_v44 = vpack.c.bf16 %v352_v39, %v350_v38  ;;  %1268 = vmatpush1.bf16.msra.mxu0 %v7304_v46 }
  0xde   : > { %1269 = vmatprep.subr.bf16.mxu0 %v7305_v47 }
  0xdf   : > { %602 = vmatmul.mubr.bf16.vlgmr.msra.gmra.mrb[0].mxu1 %v8395_v48 }
  0xe0   : > { %907 = vmatpush1.bf16.msra.mxu1 %v7218_v50  ;;  %611 = vmatprep.mubr.bf16.mxu1 %v8397_v51  ;;  %v349_v50 = vld [vmem:[%s8371_s17 + $0xa0] sm:$0xff] }
  0xe1   : > { %908 = vmatprep.subr.bf16.mxu1 %v7223_v52  ;;  %v351_v52 = vld [vmem:[%s8371_s17 + $0xb0] sm:$0xff]  ;;  %1270 = vmatpush1.bf16.msra.mxu0 %v7307_v56 }
  0xe2   : > { %v8445_v57 = vpack.c.bf16 %v351_v52, %v349_v50 }
  0xe4   : > { %909 = vmatpush1.bf16.msra.mxu1 %v7221_v53  ;;  %v7250_v53 = vld [vmem:[#allocation11 + $0xa4] ss:$8 sps:$4 sm:$0xff]  }
  0xe5   : > { %910 = vmatprep.subr.bf16.mxu1 %v7226_v58  ;;  %v7308_v58 = vld [vmem:[#allocation12 + $0xe4] ss:$8 sps:$4 sm:$0xff]  }
  0xe6   : > { %1271 = vmatprep.subr.bf16.mxu0 %v7308_v58 }
  0xe7   : > { %612 = vmatmul.mubr.bf16.gmra.mrb[4].mxu1 %v8405_v62  ;;  %1272 = vmatpush1.bf16.msra.mxu0 %v7310_v63 }
  0xe8   : > { %911 = vmatpush1.bf16.msra.mxu1 %v7224_v0  ;;  %621 = vmatprep.mubr.bf16.mxu1 %v8407_v1  ;;  %v7311_v0 = vld [vmem:[#allocation12 + $0xf4] ss:$8 sps:$4 sm:$0xff]  }
  0xe9   : > { %912 = vmatprep.subr.bf16.mxu1 %v7229_v2  ;;  %v7251_v2 = vld [vmem:[#allocation11 + $0xb0] ss:$8 sps:$4 sm:$0xff]   ;;  %1273 = vmatprep.subr.bf16.mxu0 %v7311_v0 }
  0xeb   : > { %1274 = vmatpush1.bf16.msra.mxu0 %v7313_v8 }
  0xec   : > { %913 = vmatpush1.bf16.msra.mxu1 %v7227_v3  ;;  %v353_v3 = vld [vmem:[%s8371_s17 + $0xc0] sm:$0xff] }
  0xed   : > { %914 = vmatprep.subr.bf16.mxu1 %v7232_v7  ;;  %v360_v7 = vld [vmem:[%s8371_s17 + $0xf8] sm:$0xff]  ;;  %v373_v9 = vpack.c.bf16 %v355_v4, %v353_v3 }
  0xee   : > { %v376_v11 = vpack.c.bf16 %v360_v7, %v358_v6  ;;  %1276 = vmatmul.mubr.bf16.vlgmr.msra.gmra.mrb[0].mxu0 %v8395_v48 }
  0xef   : > { %622 = vmatmul.mubr.bf16.gmra.mrb[8].mxu1 %v8415_v14  ;;  %1285 = vmatprep.mubr.bf16.mxu0 %v8397_v51 }
  0xf0   : > { %915 = vmatpush1.bf16.msra.mxu1 %v7230_v13  ;;  %631 = vmatprep.mubr.bf16.mxu1 %v8417_v17  ;;  %v7257_v13 = vld [vmem:[#allocation11 + $0xd0] ss:$8 sps:$4 sm:$0xff]  }
  0xf1   : > { %916 = vmatprep.subr.bf16.mxu1 %v7235_v16  ;;  %v357_v16 = vld [vmem:[%s8371_s17 + $0xe0] sm:$0xff]  ;;  %s8020_s17 = sshll.u32 %s8104_s9, 4  ;;  %s8021_s17 = int_to_ptr.vmem [resolvable:$false] %s8020_s17 }
  0xf2   : > { %p8023_p12 = scmp.lt.s32.totalorder %s11252_s26, %s8021_s17 }
  0xf4   : > { %917 = vmatpush1.bf16.msra.mxu1 %v7233_v20  ;;  %v375_v20 = vpack.c.bf16 %v359_v18, %v357_v16 }
  0xf5   : > { %918 = vmatprep.subr.bf16.mxu1 %v7238_v23  ;;  %v7269_v23 = vld [vmem:[#allocation11 + $0xf0] ss:$8 sps:$4 sm:$0xff]  }
  0xf6   : > { %1286 = vmatmul.mubr.bf16.gmra.mrb[4].mxu0 %v8405_v62 }
  0xf7   : > { %632 = vmatmul.mubr.bf16.gmra.mrb[12].mxu1 %v8425_v27  ;;  %1295 = vmatprep.mubr.bf16.mxu0 %v8407_v1 }
  0xf8   : > { %919 = vmatpush1.bf16.msra.mxu1 %v7236_v29  ;;  %641 = vmatprep.mubr.bf16.mxu1 %v8427_v30 }
  0xf9   : > { %920 = vmatprep.subr.bf16.mxu1 %v7241_v31 }
  0xfc   : > { %921 = vmatpush1.bf16.msra.mxu1 %v7239_v34 }
  0xfd   : > { %922 = vmatprep.subr.bf16.mxu1 %v7244_v37 }
  0xfe   : > { %1296 = vmatmul.mubr.bf16.gmra.mrb[8].mxu0 %v8415_v14 }
  0xff   : > { %642 = vmatmul.mubr.bf16.gmra.mrb[16].mxu1 %v8435_v41  ;;  %1305 = vmatprep.mubr.bf16.mxu0 %v8417_v17 }
 0x100   : > { %923 = vmatpush1.bf16.msra.mxu1 %v7242_v43  ;;  %651 = vmatprep.mubr.bf16.mxu1 %v8437_v44 }
 0x101   : > { %924 = vmatprep.subr.bf16.mxu1 %v7247_v45 }
 0x104   : > { %925 = vmatpush1.bf16.msra.mxu1 %v7245_v49 }
 0x105   : > { %926 = vmatprep.subr.bf16.mxu1 %v7250_v53 }
 0x106   : > { %1306 = vmatmul.mubr.bf16.gmra.mrb[12].mxu0 %v8425_v27 }
 0x107   : > { %652 = vmatmul.mubr.bf16.gmra.mrb[20].mxu1 %v8445_v57  ;;  %1315 = vmatprep.mubr.bf16.mxu0 %v8427_v30 }
 0x108   : > { %927 = vmatpush1.bf16.msra.mxu1 %v7248_v59  ;;  %661 = vmatprep.mubr.bf16.mxu1 %v8447_v60 }
 0x109   : > { %928 = vmatprep.subr.bf16.mxu1 %v7253_v61 }
 0x10c   : > { %929 = vmatpush1.bf16.msra.mxu1 %v7251_v2 }
 0x10d   : > { %930 = vmatprep.subr.bf16.mxu1 %v7256_v5 }
 0x10e   : > { %1316 = vmatmul.mubr.bf16.gmra.mrb[16].mxu0 %v8435_v41 }
 0x10f   : > { %662 = vmatmul.mubr.bf16.gmra.mrb[24].mxu1 %v373_v9  ;;  %1325 = vmatprep.mubr.bf16.mxu0 %v8437_v44 }
 0x110   : > { %931 = vmatpush1.bf16.msra.mxu1 %v7254_v10  ;;  %671 = vmatprep.mubr.bf16.mxu1 %v376_v11 }
 0x111   : > { %932 = vmatprep.subr.bf16.mxu1 %v7259_v12 }
 0x114   : > { %933 = vmatpush1.bf16.msra.mxu1 %v7257_v13 }
 0x115   : > { %934 = vmatprep.subr.bf16.mxu1 %v7265_v19 }
 0x116   : > { %1326 = vmatmul.mubr.bf16.gmra.mrb[20].mxu0 %v8445_v57 }
 0x117   : > { %672 = vmatmul.mubr.bf16.gmra.mrb[28].mxu1 %v375_v20  ;;  %1335 = vmatprep.mubr.bf16.mxu0 %v8447_v60 }
 0x118   : > { %935 = vmatpush1.bf16.msra.mxu1 %v7263_v21  ;;  %938 = vmatprep.mubr.bf16.mxu1 %v8387_v15 }
 0x119   : > { %936 = vmatprep.subr.bf16.mxu1 %v7271_v22 }
 0x11c   : > { %937 = vmatpush1.bf16.msra.mxu1 %v7269_v23 }
 0x11e   : > { %1336 = vmatmul.mubr.bf16.gmra.mrb[24].mxu0 %v373_v9 }
 0x11f   : > { %939 = vmatmul.mubr.bf16.vlgmr.msra.gmra.mrb[32].mxu1 %v8395_v48  ;;  %1345 = vmatprep.mubr.bf16.mxu0 %v376_v11 }
 0x120   : > { %948 = vmatprep.mubr.bf16.mxu1 %v8397_v51 }
 0x126   : > { %1346 = vmatmul.mubr.bf16.gmra.mrb[28].mxu0 %v375_v20 }
 0x127   : > { %949 = vmatmul.mubr.bf16.gmra.mrb[36].mxu1 %v8405_v62 }
 0x128   : > { %958 = vmatprep.mubr.bf16.mxu1 %v8407_v1 }
 0x12f   : > { %959 = vmatmul.mubr.bf16.gmra.mrb[40].mxu1 %v8415_v14 }
 0x130   : > { %968 = vmatprep.mubr.bf16.mxu1 %v8417_v17 }
 0x137   : > { %969 = vmatmul.mubr.bf16.gmra.mrb[44].mxu1 %v8425_v27 }
 0x138   : > { %978 = vmatprep.mubr.bf16.mxu1 %v8427_v30 }
 0x13f   : > { %979 = vmatmul.mubr.bf16.gmra.mrb[48].mxu1 %v8435_v41 }
 0x140   : > { %988 = vmatprep.mubr.bf16.mxu1 %v8437_v44 }
 0x147   : > { %989 = vmatmul.mubr.bf16.gmra.mrb[52].mxu1 %v8445_v57 }
 0x148   : > { %998 = vmatprep.mubr.bf16.mxu1 %v8447_v60 }
 0x14f   : > { %999 = vmatmul.mubr.bf16.gmra.mrb[56].mxu1 %v373_v9 }
 0x150   : > { %1008 = vmatprep.mubr.bf16.mxu1 %v376_v11 }
 0x157   : > { %1009 = vmatmul.mubr.bf16.gmra.mrb[60].mxu1 %v375_v20 }
 0x1b2   : > { %v603_v15 = vpop.f32.mrb[0].mxu1 }
 0x1b3   : > { %v605_v48 = vpop.f32.mrb[1].mxu1 }
 0x1b4   : > { %v607_v51 = vpop.f32.mrb[2].mxu1 }
 0x1b5   : > { %v8482_v62 = vpack.c.bf16 %v607_v51, %v603_v15  ;;  %v609_v1 = vpop.f32.mrb[3].mxu1 }
 0x1b6   : > { %v8484_v14 = vpack.c.bf16 %v609_v1, %v605_v48 }
 0x1b7   : > { %11462 = vst [vmem:[#allocation20_spill] sm:$0xff] %v8482_v62  ;;  %6514 = vmatprep.mubr.msk.bf16.mxu1 %vm1412_vm0, %v8482_v62 }
 0x1b8   : > { %11463 = vst [vmem:[#allocation21_spill] sm:$0xff] %v8484_v14 }
 0x1ba   : > { %v613_v17 = vpop.f32.mrb[4].mxu1 }
 0x1bb   : > { %v615_v24 = vpop.f32.mrb[5].mxu1 }
 0x1bc   : > { %v617_v25 = vpop.f32.mrb[6].mxu1 }
 0x1bd   : > { %v8488_v26 = vpack.c.bf16 %v617_v25, %v613_v17  ;;  %v619_v27 = vpop.f32.mrb[7].mxu1 }
 0x1be   : > { %v8490_v28 = vpack.c.bf16 %v619_v27, %v615_v24 }
 0x1c0   : > { %11464 = vst [vmem:[#allocation22_spill] sm:$0xff] %v8490_v28 }
 0x1c1   : > { %v1277_v58 = vpop.f32.mrb[0].mxu0 }
 0x1c2   : > { %v623_v29 = vpop.f32.mrb[8].mxu1  ;;  %v1279_v61 = vpop.f32.mrb[1].mxu0 }
 0x1c3   : > { %v625_v30 = vpop.f32.mrb[9].mxu1  ;;  %v1281_v0 = vpop.f32.mrb[2].mxu0 }
 0x1c4   : > { %v627_v31 = vpop.f32.mrb[10].mxu1  ;;  %v8512_v2 = vpack.c.bf16 %v1281_v0, %v1277_v58  ;;  %v1283_v3 = vpop.f32.mrb[3].mxu0 }
 0x1c5   : > { %v8492_v32 = vpack.c.bf16 %v627_v31, %v623_v29  ;;  %v629_v33 = vpop.f32.mrb[11].mxu1  ;;  %v8514_v4 = vpack.c.bf16 %v1283_v3, %v1279_v61 }
 0x1c6   : > { %v8494_v34 = vpack.c.bf16 %v629_v33, %v625_v30  ;;  %11473 = vst [vmem:[#allocation31_spill] sm:$0xff] %v8512_v2 }
 0x1c7   : > { %11465 = vst [vmem:[#allocation23_spill] sm:$0xff] %v8492_v32  ;;  %11474 = vst [vmem:[#allocation32_spill] sm:$0xff] %v8514_v4 }
 0x1c8   : > { %11466 = vst [vmem:[#allocation24_spill] sm:$0xff] %v8494_v34 }
 0x1c9   : > { %v1287_v8 = vpop.f32.mrb[4].mxu0 }
 0x1ca   : > { %v633_v35 = vpop.f32.mrb[12].mxu1  ;;  %v1289_v11 = vpop.f32.mrb[5].mxu0 }
 0x1cb   : > { %v635_v36 = vpop.f32.mrb[13].mxu1  ;;  %v1291_v13 = vpop.f32.mrb[6].mxu0 }
 0x1cc   : > { %v637_v37 = vpop.f32.mrb[14].mxu1  ;;  %v8520_v16 = vpack.c.bf16 %v1291_v13, %v1287_v8  ;;  %v1293_v18 = vpop.f32.mrb[7].mxu0 }
 0x1cd   : > { %v8496_v38 = vpack.c.bf16 %v637_v37, %v633_v35  ;;  %v639_v39 = vpop.f32.mrb[15].mxu1  ;;  %v8522_v19 = vpack.c.bf16 %v1293_v18, %v1289_v11 }
 0x1ce   : > { %v8498_v40 = vpack.c.bf16 %v639_v39, %v635_v36 }
 0x1cf   : > { %11476 = vst [vmem:[#allocation34_spill] sm:$0xff] %v8522_v19 }
 0x1d0   : > { %11467 = vst [vmem:[#allocation25_spill] sm:$0xff] %v8498_v40 }
 0x1d1   : > { %v1297_v23 = vpop.f32.mrb[8].mxu0 }
 0x1d2   : > { %v643_v41 = vpop.f32.mrb[16].mxu1  ;;  %v1299_v51 = vpop.f32.mrb[9].mxu0 }
 0x1d3   : > { %v645_v42 = vpop.f32.mrb[17].mxu1  ;;  %v1301_v17 = vpop.f32.mrb[10].mxu0 }
 0x1d4   : > { %v647_v43 = vpop.f32.mrb[18].mxu1  ;;  %v8534_v25 = vpack.c.bf16 %v1301_v17, %v1297_v23  ;;  %v1303_v27 = vpop.f32.mrb[11].mxu0 }
 0x1d5   : > { %v8500_v44 = vpack.c.bf16 %v647_v43, %v643_v41  ;;  %v649_v45 = vpop.f32.mrb[19].mxu1  ;;  %v8536_v29 = vpack.c.bf16 %v1303_v27, %v1299_v51 }
 0x1d6   : > { %v8502_v46 = vpack.c.bf16 %v649_v45, %v645_v42 }
 0x1d7   : > { %11468 = vst [vmem:[#allocation26_spill] sm:$0xff] %v8500_v44  ;;  %11478 = vst [vmem:[#allocation36_spill] sm:$0xff] %v8536_v29 }
 0x1d8   : > { %11469 = vst [vmem:[#allocation27_spill] sm:$0xff] %v8502_v46 }
 0x1d9   : > { %v1307_v35 = vpop.f32.mrb[12].mxu0 }
 0x1da   : > { %v653_v47 = vpop.f32.mrb[20].mxu1  ;;  %v1309_v39 = vpop.f32.mrb[13].mxu0 }
 0x1db   : > { %v655_v49 = vpop.f32.mrb[21].mxu1  ;;  %v1311_v42 = vpop.f32.mrb[14].mxu0 }
 0x1dc   : > { %v657_v50 = vpop.f32.mrb[22].mxu1  ;;  %v8548_v45 = vpack.c.bf16 %v1311_v42, %v1307_v35 }
 0x1dd   : > { %v8504_v52 = vpack.c.bf16 %v657_v50, %v653_v47  ;;  %v659_v53 = vpop.f32.mrb[23].mxu1  ;;  %v1313_v47 = vpop.f32.mrb[15].mxu0 }
 0x1de   : > { %v8506_v54 = vpack.c.bf16 %v659_v53, %v655_v49  ;;  %11480 = vst [vmem:[#allocation38_spill] sm:$0xff] %v8548_v45  ;;  %v8550_v49 = vpack.c.bf16 %v1313_v47, %v1309_v39 }
 0x1e0   : > { %11470 = vst [vmem:[#allocation28_spill] sm:$0xff] %v8506_v54  ;;  %11481 = vst [vmem:[#allocation39_spill] sm:$0xff] %v8550_v49 }
 0x1e2   : > { %v663_v55 = vpop.f32.mrb[24].mxu1 }
 0x1e3   : > { %v665_v56 = vpop.f32.mrb[25].mxu1 }
 0x1e4   : > { %v667_v57 = vpop.f32.mrb[26].mxu1 }
 0x1e5   : > { %v8508_v59 = vpack.c.bf16 %v667_v57, %v663_v55  ;;  %v669_v60 = vpop.f32.mrb[27].mxu1 }
 0x1e6   : > { %v8510_v63 = vpack.c.bf16 %v669_v60, %v665_v56  ;;  %v1317_v56 = vpop.f32.mrb[16].mxu0 }
 0x1e7   : > { %11471 = vst [vmem:[#allocation29_spill] sm:$0xff] %v8508_v59  ;;  %v1319_v60 = vpop.f32.mrb[17].mxu0 }
 0x1e8   : > { %11472 = vst [vmem:[#allocation30_spill] sm:$0xff] %v8510_v63  ;;  %v1321_v0 = vpop.f32.mrb[18].mxu0 }
 0x1ea   : > { %v673_v5 = vpop.f32.mrb[28].mxu1 }
 0x1eb   : > { %v675_v6 = vpop.f32.mrb[29].mxu1 }
 0x1ec   : > { %v677_v7 = vpop.f32.mrb[30].mxu1 }
 0x1ed   : > { %v8516_v9 = vpack.c.bf16 %v677_v7, %v673_v5  ;;  %v679_v10 = vpop.f32.mrb[31].mxu1  ;;  %v8562_v5 = vpack.c.bf16 %v1321_v0, %v1317_v56 }
 0x1ee   : > { %v8518_v12 = vpack.c.bf16 %v679_v10, %v675_v6  ;;  %v1323_v6 = vpop.f32.mrb[19].mxu0 }
 0x1ef   : > { %v8564_v7 = vpack.c.bf16 %v1323_v6, %v1319_v60  ;;  %v1327_v13 = vpop.f32.mrb[20].mxu0 }
 0x1f0   : > { %11475 = vst [vmem:[#allocation33_spill] sm:$0xff] %v8518_v12 }
 0x1f1   : > { %11483 = vst [vmem:[#allocation41_spill] sm:$0xff] %v8564_v7 }
 0x1f2   : > { %v940_v20 = vpop.f32.mrb[32].mxu1 }
 0x1f3   : > { %v942_v21 = vpop.f32.mrb[33].mxu1 }
 0x1f4   : > { %v944_v22 = vpop.f32.mrb[34].mxu1 }
 0x1f5   : > { %v8524_v15 = vpack.c.bf16 %v944_v22, %v940_v20  ;;  %v946_v48 = vpop.f32.mrb[35].mxu1 }
 0x1f6   : > { %v8526_v1 = vpack.c.bf16 %v946_v48, %v942_v21  ;;  %v1329_v21 = vpop.f32.mrb[21].mxu0 }
 0x1f7   : > { %1879 = vrot.lane.b32.xlu0 %v8524_v15, %s8101_s27  ;;  %7010 = vmatprep.subr.msk.bf16.mxu1 %vm1412_vm0, %v8524_v15  ;;  %v1438_v24 = vsel %vm1412_vm0, %v8524_v15, 0  ;;  %v1331_v23 = vpop.f32.mrb[22].mxu0 }
 0x1f8   : > { %11477 = vst [vmem:[#allocation35_spill] sm:$0xff] %v8526_v1  ;;  %6499 = vmatpush3.bf16.xpose.msra.mxu1 %v1438_v24  ;;  %v8576_v51 = vpack.c.bf16 %v1331_v23, %v1327_v13  ;;  %v1333_v17 = vpop.f32.mrb[23].mxu0 }
 0x1f9   : > { %v8578_v24 = vpack.c.bf16 %v1333_v17, %v1329_v21 }
 0x1fa   : > { %v950_v30 = vpop.f32.mrb[36].mxu1 }
 0x1fb   : > { %v952_v31 = vpop.f32.mrb[37].mxu1  ;;  %11485 = vst [vmem:[#allocation43_spill] sm:$0xff] %v8578_v24 }
 0x1fc   : > { %v954_v33 = vpop.f32.mrb[38].mxu1 }
 0x1fd   : > { %v8538_v36 = vpack.c.bf16 %v954_v33, %v950_v30  ;;  %v956_v37 = vpop.f32.mrb[39].mxu1  ;;  %v1337_v33 = vpop.f32.mrb[24].mxu0 }
 0x1fe   : > { %v8540_v41 = vpack.c.bf16 %v956_v37, %v952_v31  ;;  %v1339_v39 = vpop.f32.mrb[25].mxu0 }
 0x1ff   : > { %1881 = vrot.lane.b32.xlu0 %v8538_v36, %s8101_s27  ;;  %7011 = vmatprep.subr.msk.bf16.mxu1 %vm1412_vm0, %v8538_v36  ;;  %v1441_v43 = vsel %vm1412_vm0, %v8538_v36, 0 }
 0x200   : > { %11479 = vst [vmem:[#allocation37_spill] sm:$0xff] %v8540_v41  ;;  %6501 = vmatpush3.bf16.xpose.msra.mxu1 %v1441_v43  ;;  %v1341_v43 = vpop.f32.mrb[26].mxu0 }
 0x202   : > { %v960_v50 = vpop.f32.mrb[40].mxu1 }
 0x203   : > { %v962_v53 = vpop.f32.mrb[41].mxu1 }
 0x204   : > { %v964_v55 = vpop.f32.mrb[42].mxu1 }
 0x205   : > { %v8552_v57 = vpack.c.bf16 %v964_v55, %v960_v50  ;;  %v966_v58 = vpop.f32.mrb[43].mxu1  ;;  %v8590_v50 = vpack.c.bf16 %v1341_v43, %v1337_v33 }
 0x206   : > { %v8554_v61 = vpack.c.bf16 %v966_v58, %v962_v53  ;;  %v1343_v53 = vpop.f32.mrb[27].mxu0 }
 0x207   : > { %1883 = vrot.lane.b32.xlu1 %v8552_v57, %s8101_s27  ;;  %7012 = vmatprep.subr.msk.bf16.mxu1 %vm1412_vm0, %v8552_v57  ;;  %v1444_v3 = vsel %vm1412_vm0, %v8552_v57, 0  ;;  %11487 = vst [vmem:[#allocation45_spill] sm:$0xff] %v8590_v50  ;;  %v8592_v55 = vpack.c.bf16 %v1343_v53, %v1339_v39  ;;  %v1347_v0 = vpop.f32.mrb[28].mxu0 }
 0x208   : > { %11482 = vst [vmem:[#allocation40_spill] sm:$0xff] %v8554_v61  ;;  %6503 = vmatpush3.bf16.xpose.msra.mxu1 %v1444_v3 }
 0x209   : > { %11488 = vst [vmem:[#allocation46_spill] sm:$0xff] %v8592_v55 }
 0x20a   : > { %v970_v8 = vpop.f32.mrb[44].mxu1 }
 0x20b   : > { %v972_v10 = vpop.f32.mrb[45].mxu1 }
 0x20c   : > { %v974_v11 = vpop.f32.mrb[46].mxu1 }
 0x20d   : > { %v8566_v18 = vpack.c.bf16 %v974_v11, %v970_v8  ;;  %v976_v20 = vpop.f32.mrb[47].mxu1  ;;  %v8596_v8 = vpop.f32.mrb[29].mxu0 }
 0x20e   : > { %v8568_v22 = vpack.c.bf16 %v976_v20, %v972_v10  ;;  %v1351_v11 = vpop.f32.mrb[30].mxu0 }
 0x20f   : > { %1885 = vrot.lane.b32.xlu1 %v8566_v18, %s8101_s27  ;;  %7013 = vmatprep.subr.msk.bf16.mxu1 %vm1412_vm0, %v8566_v18  ;;  %v1447_v48 = vsel %vm1412_vm0, %v8566_v18, 0  ;;  %v8606_v20 = vpack.c.bf16 %v1351_v11, %v1347_v0 }
 0x210   : > { %11484 = vst [vmem:[#allocation42_spill] sm:$0xff] %v8568_v22  ;;  %6505 = vmatpush3.bf16.xpose.msra.mxu1 %v1447_v48 }
 0x211   : > { %11490 = vst [vmem:[#allocation48_spill] sm:$0xff] %v8606_v20 }
 0x212   : > { %v980_v27 = vpop.f32.mrb[48].mxu1 }
 0x213   : > { %v982_v30 = vpop.f32.mrb[49].mxu1 }
 0x214   : > { %v984_v31 = vpop.f32.mrb[50].mxu1 }
 0x215   : > { %v8580_v35 = vpack.c.bf16 %v984_v31, %v980_v27  ;;  %v986_v37 = vpop.f32.mrb[51].mxu1 }
 0x216   : > { %v8582_v42 = vpack.c.bf16 %v986_v37, %v982_v30 }
 0x217   : > { %1887 = vrot.lane.b32.xlu0 %v8580_v35, %s8101_s27  ;;  %7014 = vmatprep.subr.msk.bf16.mxu1 %vm1412_vm0, %v8580_v35  ;;  %v1450_v47 = vsel %vm1412_vm0, %v8580_v35, 0 }
 0x218   : > { %11486 = vst [vmem:[#allocation44_spill] sm:$0xff] %v8582_v42  ;;  %6507 = vmatpush3.bf16.xpose.msra.mxu1 %v1450_v47 }
 0x21a   : > { %v990_v56 = vpop.f32.mrb[52].mxu1 }
 0x21b   : > { %v992_v58 = vpop.f32.mrb[53].mxu1 }
 0x21c   : > { %v994_v60 = vpop.f32.mrb[54].mxu1 }
 0x21d   : > { %v8594_v3 = vpack.c.bf16 %v994_v60, %v990_v56  ;;  %v996_v6 = vpop.f32.mrb[55].mxu1 }
 0x21e   : > { %v8598_v10 = vpack.c.bf16 %v996_v6, %v992_v58 }
 0x21f   : > { %1889 = vrot.lane.b32.xlu1 %v8594_v3, %s8101_s27  ;;  %7015 = vmatprep.subr.msk.bf16.mxu1 %vm1412_vm0, %v8594_v3  ;;  %v1453_v13 = vsel %vm1412_vm0, %v8594_v3, 0 }
 0x220   : > { %11489 = vst [vmem:[#allocation47_spill] sm:$0xff] %v8598_v10  ;;  %6509 = vmatpush3.bf16.xpose.msra.mxu1 %v1453_v13 }
 0x222   : > { %v1000_v21 = vpop.f32.mrb[56].mxu1 }
 0x223   : > { %v1002_v23 = vpop.f32.mrb[57].mxu1 }
 0x224   : > { %v1004_v48 = vpop.f32.mrb[58].mxu1 }
 0x225   : > { %v8608_v17 = vpack.c.bf16 %v1004_v48, %v1000_v21  ;;  %v1006_v27 = vpop.f32.mrb[59].mxu1 }
 0x226   : > { %v8610_v30 = vpack.c.bf16 %v1006_v27, %v1002_v23 }
 0x227   : > { %1891 = vrot.lane.b32.xlu0 %v8608_v17, %s8101_s27  ;;  %7016 = vmatprep.subr.msk.bf16.mxu1 %vm1412_vm0, %v8608_v17  ;;  %v1456_v31 = vsel %vm1412_vm0, %v8608_v17, 0 }
 0x228   : > { %11491 = vst [vmem:[#allocation49_spill] sm:$0xff] %v8610_v30  ;;  %6511 = vmatpush3.bf16.xpose.msra.mxu1 %v1456_v31  ;;  %v1353_v31 = vpop.f32.mrb[31].mxu0 }
 0x22a   : > { %v1010_v33 = vpop.f32.mrb[60].mxu1 }
 0x22b   : > { %1855 = vrot.lane.b32.xlu0 %v8482_v62, %s8101_s27  ;;  %v1012_v37 = vpop.f32.mrb[61].mxu1 }
 0x22c   : > { %v1014_v39 = vpop.f32.mrb[62].mxu1 }
 0x22d   : > { %v8620_v43 = vpack.c.bf16 %v1014_v39, %v1010_v33  ;;  %v1016_v47 = vpop.f32.mrb[63].mxu1  ;;  %v8755_v33 = vpack.c.bf16 %v1353_v31, %v8596_v8 }
 0x22e   : > { %v8622_v53 = vpack.c.bf16 %v1016_v47, %v1012_v37 }
 0x22f   : > { %1857 = vrot.lane.b32.xlu0 %v8488_v26, %s8101_s27  ;;  %1893 = vrot.lane.b32.xlu1 %v8620_v43, %s8101_s27  ;;  %v1459_v56 = vsel %vm1412_vm0, %v8620_v43, 0  ;;  %11493 = vst [vmem:[#allocation51_spill] sm:$0xff] %v8755_v33 }
 0x230   : > { %11492 = vst [vmem:[#allocation50_spill] sm:$0xff] %v8622_v53  ;;  %7017 = vmatprep.subr.msk.bf16.mxu1 %vm1412_vm0, %v8620_v43 }
 0x231   : > { %6513 = vmatpush3.bf16.xpose.msra.mxu1 %v1459_v56 }
 0x232   : > { %6530 = vmatprep.subr.bf16.mxu1 %v8512_v2 }
 0x233   : > { %2430 = vrot.lane.b32.xlu0 %v8552_v57, %s8102_s29  ;;  %2426 = vrot.lane.b32.xlu1 %v8524_v15, %s8102_s29 }
 0x237   : > { %2434 = vrot.lane.b32.xlu0 %v8580_v35, %s8102_s29  ;;  %2428 = vrot.lane.b32.xlu1 %v8538_v36, %s8102_s29 }
 0x238   : > { %6515 = vmatmul.mubr.msk.bf16.vlgmr.msra.gmra.mrb[64].mxu1 %vm1412_vm0, %v8488_v26 }
 0x239   : > { %6518 = vmatprep.mubr.msk.bf16.mxu1 %vm1412_vm0, %v8492_v32  ;;  %6531 = vmatpush3.bf16.msra.mxu1 %v8512_v2 }
 0x23a   : > { %6532 = vmatprep.subr.bf16.mxu1 %v8520_v16 }
 0x23b   : > { %1861 = vrot.lane.b32.xlu0 %v8496_v38, %s8101_s27  ;;  %2432 = vrot.lane.b32.xlu1 %v8566_v18, %s8102_s29 }
 0x23d   : > { %6533 = vmatpush3.bf16.msra.mxu1 %v8520_v16 }
 0x23e   : > { %6534 = vmatprep.subr.bf16.mxu1 %v8534_v25 }
 0x23f   : > { %1863 = vrot.lane.b32.xlu0 %v8500_v44, %s8101_s27  ;;  %1859 = vrot.lane.b32.xlu1 %v8492_v32, %s8101_s27 }
 0x240   : > { %6519 = vmatmul.mubr.msk.bf16.gmra.mrb[68].mxu1 %vm1412_vm0, %v8496_v38 }
 0x241   : > { %6522 = vmatprep.mubr.msk.bf16.mxu1 %vm1412_vm0, %v8500_v44  ;;  %6535 = vmatpush3.bf16.msra.mxu1 %v8534_v25 }
 0x242   : > { %6536 = vmatprep.subr.bf16.mxu1 %v8548_v45 }
 0x243   : > { %2438 = vrot.lane.b32.xlu0 %v8608_v17, %s8102_s29  ;;  %2436 = vrot.lane.b32.xlu1 %v8594_v3, %s8102_s29 }
 0x245   : > { %6537 = vmatpush3.bf16.msra.mxu1 %v8548_v45 }
 0x246   : > { %6538 = vmatprep.subr.bf16.mxu1 %v8562_v5 }
 0x247   : > { %1869 = vrot.lane.b32.xlu0 %v8516_v9, %s8101_s27  ;;  %1865 = vrot.lane.b32.xlu1 %v8504_v52, %s8101_s27 }
 0x248   : > { %6523 = vmatmul.mubr.msk.bf16.gmra.mrb[72].mxu1 %vm1412_vm0, %v8504_v52 }
 0x249   : > { %6526 = vmatprep.mubr.msk.bf16.mxu1 %vm1412_vm0, %v8508_v59  ;;  %6539 = vmatpush3.bf16.msra.mxu1 %v8562_v5 }
 0x24a   : > { %6540 = vmatprep.subr.bf16.mxu1 %v8576_v51 }
 0x24b   : > { %2402 = vrot.lane.b32.xlu0 %v8482_v62, %s8102_s29  ;;  %1867 = vrot.lane.b32.xlu1 %v8508_v59, %s8101_s27 }
 0x24d   : > { %6541 = vmatpush3.bf16.msra.mxu1 %v8576_v51 }
 0x24e   : > { %6542 = vmatprep.subr.bf16.mxu1 %v8590_v50 }
 0x24f   : > { %2406 = vrot.lane.b32.xlu0 %v8492_v32, %s8102_s29  ;;  %2440 = vrot.lane.b32.xlu1 %v8620_v43, %s8102_s29 }
 0x250   : > { %6527 = vmatmul.mubr.msk.bf16.gmra.mrb[76].mxu1 %vm1412_vm0, %v8516_v9 }
 0x251   : > { %6543 = vmatpush3.bf16.msra.mxu1 %v8590_v50 }
 0x252   : > { %6544 = vmatprep.subr.bf16.mxu1 %v8606_v20 }
 0x253   : > { %2410 = vrot.lane.b32.xlu0 %v8500_v44, %s8102_s29  ;;  %2404 = vrot.lane.b32.xlu1 %v8488_v26, %s8102_s29 }
 0x255   : > { %6545 = vmatpush3.bf16.msra.mxu1 %v8606_v20 }
 0x257   : > { %2414 = vrot.lane.b32.xlu0 %v8508_v59, %s8102_s29  ;;  %2408 = vrot.lane.b32.xlu1 %v8496_v38, %s8102_s29 }
 0x25b   : > { %2172 = vrot.lane.b32.xlu0 %v8534_v25, %s8101_s27  ;;  %2412 = vrot.lane.b32.xlu1 %v8504_v52, %s8102_s29 }
 0x25f   : > { %2178 = vrot.lane.b32.xlu0 %v8576_v51, %s8101_s27  ;;  %2416 = vrot.lane.b32.xlu1 %v8516_v9, %s8102_s29 }
 0x263   : > { %2182 = vrot.lane.b32.xlu0 %v8606_v20, %s8101_s27  ;;  %2168 = vrot.lane.b32.xlu1 %v8512_v2, %s8101_s27 }
 0x267   : > { %2717 = vrot.lane.b32.xlu0 %v8520_v16, %s8102_s29  ;;  %2170 = vrot.lane.b32.xlu1 %v8520_v16, %s8101_s27 }
 0x269   : > { %v1880_v58 = vpop.permute.xlu0 %1879 }
 0x26a   : > { %7018 = vmatprep.subr.msk.bf16.mxu0 %vm1412_vm0, %v1880_v58  ;;  %v1920_v60 = vsel %vm1412_vm0, %v1880_v58, 0 }
 0x26b   : > { %6563 = vmatpush3.bf16.xpose.msra.mxu0 %v1920_v60  ;;  %2721 = vrot.lane.b32.xlu0 %v8548_v45, %s8102_s29 }
 0x26c   : > { %2174 = vrot.lane.b32.xlu1 %v8548_v45, %s8101_s27 }
 0x26f   : > { %2727 = vrot.lane.b32.xlu0 %v8590_v50, %s8102_s29 }
 0x270   : > { %2176 = vrot.lane.b32.xlu1 %v8562_v5, %s8101_s27 }
 0x271   : > { %v1882_v0 = vpop.permute.xlu0 %1881 }
 0x272   : > { %7019 = vmatprep.subr.msk.bf16.mxu0 %vm1412_vm0, %v1882_v0  ;;  %v1923_v6 = vsel %vm1412_vm0, %v1882_v0, 0 }
 0x273   : > { %6565 = vmatpush3.bf16.xpose.msra.mxu0 %v1923_v6  ;;  %2973 = vrot.lane.b32.xlu0 %v8524_v15, %s8103_s20 }
 0x274   : > { %2180 = vrot.lane.b32.xlu1 %v8590_v50, %s8101_s27 }
 0x277   : > { %2975 = vrot.lane.b32.xlu0 %v8538_v36, %s8103_s20 }
 0x278   : > { %2715 = vrot.lane.b32.xlu1 %v8512_v2, %s8102_s29 }
 0x279   : > { %v1884_v11 = vpop.permute.xlu1 %1883 }
 0x27a   : > { %7020 = vmatprep.subr.msk.bf16.mxu0 %vm1412_vm0, %v1884_v11  ;;  %v1926_v13 = vsel %vm1412_vm0, %v1884_v11, 0 }
 0x27b   : > { %6567 = vmatpush3.bf16.xpose.msra.mxu0 %v1926_v13 }
 0x27c   : > { %2719 = vrot.lane.b32.xlu1 %v8534_v25, %s8102_s29 }
 0x280   : > { %2723 = vrot.lane.b32.xlu1 %v8562_v5, %s8102_s29 }
 0x281   : > { %v1886_v15 = vpop.permute.xlu1 %1885 }
 0x282   : > { %7021 = vmatprep.subr.msk.bf16.mxu0 %vm1412_vm0, %v1886_v15  ;;  %v1929_v36 = vsel %vm1412_vm0, %v1886_v15, 0 }
 0x283   : > { %6569 = vmatpush3.bf16.xpose.msra.mxu0 %v1929_v36 }
 0x284   : > { %2725 = vrot.lane.b32.xlu1 %v8576_v51, %s8102_s29 }
 0x288   : > { %2729 = vrot.lane.b32.xlu1 %v8606_v20, %s8102_s29 }
 0x289   : > { %v1888_v21 = vpop.permute.xlu0 %1887 }
 0x28a   : > { %7022 = vmatprep.subr.msk.bf16.mxu0 %vm1412_vm0, %v1888_v21  ;;  %v1932_v23 = vsel %vm1412_vm0, %v1888_v21, 0 }
 0x28b   : > { %6571 = vmatpush3.bf16.xpose.msra.mxu0 %v1932_v23 }
 0x291   : > { %v1890_v48 = vpop.permute.xlu1 %1889 }
 0x292   : > { %7023 = vmatprep.subr.msk.bf16.mxu0 %vm1412_vm0, %v1890_v48  ;;  %v1935_v27 = vsel %vm1412_vm0, %v1890_v48, 0 }
 0x293   : > { %6573 = vmatpush3.bf16.xpose.msra.mxu0 %v1935_v27 }
 0x299   : > { %v1892_v37 = vpop.permute.xlu0 %1891 }
 0x29a   : > { %7024 = vmatprep.subr.msk.bf16.mxu0 %vm1412_vm0, %v1892_v37  ;;  %v1938_v39 = vsel %vm1412_vm0, %v1892_v37, 0 }
 0x29b   : > { %6575 = vmatpush3.bf16.xpose.msra.mxu0 %v1938_v39 }
 0x29d   : > { %v1856_v47 = vpop.permute.xlu0 %1855 }
 0x29e   : > { %6578 = vmatprep.mubr.msk.bf16.mxu0 %vm1412_vm0, %v1856_v47 }
 0x2a1   : > { %v1858_v56 = vpop.permute.xlu0 %1857  ;;  %v1894_v58 = vpop.permute.xlu1 %1893 }
 0x2a2   : > { %7025 = vmatprep.subr.msk.bf16.mxu0 %vm1412_vm0, %v1894_v58  ;;  %v1941_v60 = vsel %vm1412_vm0, %v1894_v58, 0 }
 0x2a3   : > { %6577 = vmatpush3.bf16.xpose.msra.mxu0 %v1941_v60 }
 0x2a5   : > { %v2431_v0 = vpop.permute.xlu0 %2430  ;;  %v2427_v6 = vpop.permute.xlu1 %2426 }
 0x2a6   : > { %7026 = vmatprep.subr.msk.bf16.mxu0 %vm1412_vm0, %v2427_v6  ;;  %v2467_v13 = vsel %vm1412_vm0, %v2427_v6, 0  ;;  %v2473_v39 = vsel %vm1412_vm0, %v2431_v0, 0 }
 0x2a9   : > { %v2435_v8 = vpop.permute.xlu0 %2434  ;;  %v2429_v11 = vpop.permute.xlu1 %2428 }
 0x2aa   : > { %6579 = vmatmul.mubr.msk.bf16.vlgmr.msra.gmra.mrb[32].mxu0 %vm1412_vm0, %v1858_v56  ;;  %v2470_v48 = vsel %vm1412_vm0, %v2429_v11, 0 }
 0x2ab   : > { %6627 = vmatpush3.bf16.xpose.msra.mxu0 %v2467_v13  ;;  %v2479_v13 = vsel %vm1412_vm0, %v2435_v8, 0 }
 0x2ac   : > { %7027 = vmatprep.subr.msk.bf16.mxu0 %vm1412_vm0, %v2429_v11 }
 0x2ad   : > { %v1862_v15 = vpop.permute.xlu0 %1861  ;;  %v2433_v36 = vpop.permute.xlu1 %2432 }
 0x2ae   : > { %v2476_v6 = vsel %vm1412_vm0, %v2433_v36, 0 }
 0x2b1   : > { %v1864_v21 = vpop.permute.xlu0 %1863  ;;  %v1860_v23 = vpop.permute.xlu1 %1859 }
 0x2b2   : > { %6582 = vmatprep.mubr.msk.bf16.mxu0 %vm1412_vm0, %v1860_v23 }
 0x2b3   : > { %6583 = vmatmul.mubr.msk.bf16.gmra.mrb[36].mxu0 %vm1412_vm0, %v1862_v15 }
 0x2b4   : > { %6629 = vmatpush3.bf16.xpose.msra.mxu0 %v2470_v48  ;;  %6586 = vmatprep.mubr.msk.bf16.mxu0 %vm1412_vm0, %v1864_v21 }
 0x2b5   : > { %7028 = vmatprep.subr.msk.bf16.mxu0 %vm1412_vm0, %v2431_v0  ;;  %v2437_v27 = vpop.permute.xlu1 %2436  ;;  %v2439_v31 = vpop.permute.xlu0 %2438 }
 0x2b6   : > { %v2482_v23 = vsel %vm1412_vm0, %v2437_v27, 0  ;;  %v2485_v48 = vsel %vm1412_vm0, %v2439_v31, 0 }
 0x2b9   : > { %v1866_v37 = vpop.permute.xlu1 %1865  ;;  %v1870_v47 = vpop.permute.xlu0 %1869 }
 0x2bb   : > { %6587 = vmatmul.mubr.msk.bf16.gmra.mrb[40].mxu0 %vm1412_vm0, %v1866_v37 }
 0x2bc   : > { %6631 = vmatpush3.bf16.xpose.msra.mxu0 %v2473_v39 }
 0x2bd   : > { %7029 = vmatprep.subr.msk.bf16.mxu0 %vm1412_vm0, %v2433_v36  ;;  %v1868_v56 = vpop.permute.xlu1 %1867  ;;  %v2403_v60 = vpop.permute.xlu0 %2402 }
 0x2be   : > { %6590 = vmatprep.mubr.msk.bf16.mxu0 %vm1412_vm0, %v1868_v56 }
 0x2c1   : > { %v2441_v58 = vpop.permute.xlu1 %2440  ;;  %v2407_v37 = vpop.permute.xlu0 %2406 }
 0x2c3   : > { %6591 = vmatmul.mubr.msk.bf16.gmra.mrb[44].mxu0 %vm1412_vm0, %v1870_v47 }
 0x2c4   : > { %6633 = vmatpush3.bf16.xpose.msra.mxu0 %v2476_v6  ;;  %6642 = vmatprep.mubr.msk.bf16.mxu0 %vm1412_vm0, %v2403_v60 }
 0x2c5   : > { %7030 = vmatprep.subr.msk.bf16.mxu0 %vm1412_vm0, %v2435_v8  ;;  %v2405_v11 = vpop.permute.xlu1 %2404  ;;  %v2488_v8 = vsel %vm1412_vm0, %v2441_v58, 0 }
 0x2c9   : > { %v2409_v0 = vpop.permute.xlu1 %2408 }
 0x2cc   : > { %6635 = vmatpush3.bf16.xpose.msra.mxu0 %v2479_v13 }
 0x2cd   : > { %7031 = vmatprep.subr.msk.bf16.mxu0 %vm1412_vm0, %v2437_v27  ;;  %v2413_v15 = vpop.permute.xlu1 %2412  ;;  %v2411_v27 = vpop.permute.xlu0 %2410 }
 0x2d1   : > { %v2417_v21 = vpop.permute.xlu1 %2416  ;;  %v2415_v39 = vpop.permute.xlu0 %2414 }
 0x2d4   : > { %6637 = vmatpush3.bf16.xpose.msra.mxu0 %v2482_v23 }
 0x2d5   : > { %7032 = vmatprep.subr.msk.bf16.mxu0 %vm1412_vm0, %v2439_v31  ;;  %v8783_v36 = vpop.permute.xlu1 %2168 }
 0x2d6   : > { %6594 = vmatprep.subr.bf16.mxu1 %v8783_v36 }
 0x2d9   : > { %v8850_v12 = vpop.permute.xlu1 %2170 }
 0x2dc   : > { %6639 = vmatpush3.bf16.xpose.msra.mxu0 %v2485_v48 }
 0x2dd   : > { %7033 = vmatprep.subr.msk.bf16.mxu0 %vm1412_vm0, %v2441_v58 }
 0x2de   : > { %v8854_v54 = vpop.permute.xlu1 %2174 }
 0x2e2   : > { %v8858_v40 = vpop.permute.xlu1 %2176 }
 0x2e4   : > { %6641 = vmatpush3.bf16.xpose.msra.mxu0 %v2488_v8 }
 0x2e6   : > { %v8871_v53 = vpop.permute.xlu1 %2180 }
 0x2ea   : > { %v8882_v22 = vpop.permute.xlu1 %2715 }
 0x2eb   : > { %6643 = vmatmul.mubr.msk.bf16.vlgmr.msra.gmra.mrb[48].mxu0 %vm1412_vm0, %v2405_v11 }
 0x2ec   : > { %6646 = vmatprep.mubr.msk.bf16.mxu0 %vm1412_vm0, %v2407_v37 }
 0x2ee   : > { %v8892_v50 = vpop.permute.xlu1 %2719 }
 0x2ef   : > { %11497 = vst [vmem:[#allocation55_spill] sm:$0xff] %v8892_v50 }
 0x2f2   : > { %v8902_v24 = vpop.permute.xlu1 %2723 }
 0x2f3   : > { %6647 = vmatmul.mubr.msk.bf16.gmra.mrb[52].mxu0 %vm1412_vm0, %v2409_v0  ;;  %11499 = vst [vmem:[#allocation57_spill] sm:$0xff] %v8902_v24 }
 0x2f4   : > { %6650 = vmatprep.mubr.msk.bf16.mxu0 %vm1412_vm0, %v2411_v27 }
 0x2f6   : > { %v8910_v29 = vpop.permute.xlu1 %2725 }
 0x2f7   : > { %11500 = vst [vmem:[#allocation58_spill] sm:$0xff] %v8910_v29 }
 0x2fb   : > { %6651 = vmatmul.mubr.msk.bf16.gmra.mrb[56].mxu0 %vm1412_vm0, %v2413_v15 }
 0x2fc   : > { %6654 = vmatprep.mubr.msk.bf16.mxu0 %vm1412_vm0, %v2415_v39  ;;  %v8848_v39 = vpop.permute.xlu0 %2172 }
 0x300   : > { %v8852_v63 = vpop.permute.xlu0 %2178 }
 0x303   : > { %6655 = vmatmul.mubr.msk.bf16.gmra.mrb[60].mxu0 %vm1412_vm0, %v2417_v21 }
 0x304   : > { %v8856_v46 = vpop.permute.xlu0 %2182 }
 0x30b   : > { %v8796_v31 = vpop.f32.mrb[64].mxu1 }
 0x30c   : > { %1562 = vmax.xlane.f32.xlu0 %v8796_v31  ;;  %v8799_v47 = vpop.f32.mrb[65].mxu1 }
 0x30d   : > { %v8801_v56 = vpop.f32.mrb[66].mxu1 }
 0x30e   : > { %v8803_v58 = vpop.f32.mrb[67].mxu1 }
 0x30f   : > { %1560 = vmax.xlane.f32.xlu1 %v8803_v58 }
 0x310   : > { %1558 = vmax.xlane.f32.xlu0 %v8799_v47 }
 0x313   : > { %v8807_v60 = vpop.f32.mrb[68].mxu1 }
 0x314   : > { %1564 = vmax.xlane.f32.xlu0 %v8801_v56  ;;  %1570 = vmax.xlane.f32.xlu1 %v8807_v60  ;;  %v8811_v6 = vpop.f32.mrb[69].mxu1 }
 0x315   : > { %v8813_v11 = vpop.f32.mrb[70].mxu1 }
 0x316   : > { %v8815_v0 = vpop.f32.mrb[71].mxu1 }
 0x318   : > { %1566 = vmax.xlane.f32.xlu1 %v8811_v6  ;;  %1572 = vmax.xlane.f32.xlu0 %v8813_v11 }
 0x31b   : > { %v8819_v13 = vpop.f32.mrb[72].mxu1 }
 0x31c   : > { %1568 = vmax.xlane.f32.xlu0 %v8815_v0  ;;  %1578 = vmax.xlane.f32.xlu1 %v8819_v13  ;;  %v8823_v15 = vpop.f32.mrb[73].mxu1 }
 0x31d   : > { %v8825_v21 = vpop.f32.mrb[74].mxu1 }
 0x31e   : > { %v8827_v23 = vpop.f32.mrb[75].mxu1 }
 0x320   : > { %1574 = vmax.xlane.f32.xlu1 %v8823_v15  ;;  %1580 = vmax.xlane.f32.xlu0 %v8825_v21 }
 0x323   : > { %v8831_v48 = vpop.f32.mrb[76].mxu1 }
 0x324   : > { %1576 = vmax.xlane.f32.xlu0 %v8827_v23  ;;  %1586 = vmax.xlane.f32.xlu1 %v8831_v48  ;;  %v8835_v8 = vpop.f32.mrb[77].mxu1 }
 0x325   : > { %v8837_v37 = vpop.f32.mrb[78].mxu1 }
 0x326   : > { %v8839_v27 = vpop.f32.mrb[79].mxu1 }
 0x328   : > { %1582 = vmax.xlane.f32.xlu1 %v8835_v8 }
 0x339   : > { %2977 = vrot.lane.b32.xlu1 %v8552_v57, %s8103_s20  ;;  %v8860_v57 = vpop.permute.xlu0 %2717 }
 0x33a   : > { %2979 = vrot.lane.b32.xlu0 %v8566_v18, %s8103_s20  ;;  %11494 = vst [vmem:[#allocation52_spill] sm:$0xff] %v8860_v57 }
 0x33d   : > { %v8874_v30 = vpop.permute.xlu0 %2721 }
 0x33e   : > { %11495 = vst [vmem:[#allocation53_spill] sm:$0xff] %v8874_v30 }
 0x341   : > { %v8886_v61 = vpop.permute.xlu0 %2727 }
 0x342   : > { %11496 = vst [vmem:[#allocation54_spill] sm:$0xff] %v8886_v61  ;;  %v8920_v61 = vpop.permute.xlu1 %2729 }
 0x343   : > { %11503 = vst [vmem:[#allocation61_spill] sm:$0xff] %v8920_v61 }
 0x345   : > { %v8897_v33 = vpop.permute.xlu0 %2973 }
 0x346   : > { %11498 = vst [vmem:[#allocation56_spill] sm:$0xff] %v8897_v33 }
 0x349   : > { %v8912_v19 = vpop.permute.xlu0 %2975 }
 0x34a   : > { %11501 = vst [vmem:[#allocation59_spill] sm:$0xff] %v8912_v19 }
 0x359   : > { %1588 = vmax.xlane.f32.xlu0 %v8837_v37 }
 0x35d   : > { %1584 = vmax.xlane.f32.xlu0 %v8839_v27 }
 0x37d   : > { %v8862_v34 = vpop.f32.mrb[32].mxu0 }
 0x37e   : > { %v8864_v18 = vpop.f32.mrb[33].mxu0  ;;  %2044 = vmax.xlane.f32.xlu0 %v8862_v34 }
 0x37f   : > { %v8867_v28 = vpop.f32.mrb[34].mxu0 }
 0x380   : > { %v8869_v14 = vpop.f32.mrb[35].mxu0 }
 0x382   : > { %2040 = vmax.xlane.f32.xlu0 %v8864_v18 }
 0x386   : > { %v8876_v10 = vpop.f32.mrb[36].mxu0  ;;  %2046 = vmax.xlane.f32.xlu0 %v8867_v28 }
 0x387   : > { %v8879_v42 = vpop.f32.mrb[37].mxu0  ;;  %2052 = vmax.xlane.f32.xlu1 %v8876_v10 }
 0x388   : > { %v8884_v41 = vpop.f32.mrb[38].mxu0 }
 0x389   : > { %v8888_v1 = vpop.f32.mrb[39].mxu0 }
 0x38a   : > { %2042 = vmax.xlane.f32.xlu0 %v8869_v14 }
 0x38b   : > { %2048 = vmax.xlane.f32.xlu1 %v8879_v42 }
 0x38e   : > { %v8894_v20 = vpop.f32.mrb[40].mxu0  ;;  %2050 = vmax.xlane.f32.xlu0 %v8888_v1 }
 0x38f   : > { %v8899_v55 = vpop.f32.mrb[41].mxu0  ;;  %2054 = vmax.xlane.f32.xlu1 %v8884_v41 }
 0x390   : > { %v8904_v7 = vpop.f32.mrb[42].mxu0 }
 0x391   : > { %v8906_v49 = vpop.f32.mrb[43].mxu0 }
 0x392   : > { %2062 = vmax.xlane.f32.xlu0 %v8904_v7 }
 0x393   : > { %2060 = vmax.xlane.f32.xlu1 %v8894_v20 }
 0x396   : > { %v8914_v4 = vpop.f32.mrb[44].mxu0  ;;  %2058 = vmax.xlane.f32.xlu0 %v8906_v49 }
 0x397   : > { %11502 = vst [vmem:[#allocation60_spill] sm:$0xff] %v8914_v4  ;;  %v8917_v33 = vpop.f32.mrb[45].mxu0  ;;  %2056 = vmax.xlane.f32.xlu1 %v8899_v55 }
 0x398   : > { %v8922_v45 = vpop.f32.mrb[46].mxu0 }
 0x399   : > { %11504 = vst [vmem:[#allocation62_spill] sm:$0xff] %v8922_v45  ;;  %v1563_v2 = vpop.xlane.xlu0 %1562  ;;  %v8924_v24 = vpop.f32.mrb[47].mxu0 }
 0x39a   : > { %2070 = vmax.xlane.f32.xlu0 %v8922_v45  ;;  %v1592_v29 = vsub.f32 %v8796_v31, %v1563_v2 }
 0x39b   : > { %2068 = vmax.xlane.f32.xlu1 %v8914_v4 }
 0x39c   : > { %v1561_v19 = vpop.xlane.xlu1 %1560  ;;  %v1610_v32 = vmul.f32 1.442695, %v1592_v29 }
 0x39d   : > { %v1591_v59 = vsub.f32 %v8803_v58, %v1561_v19  ;;  %v1559_v30 = vpop.xlane.xlu0 %1558 }
 0x39e   : > { %v1590_v44 = vsub.f32 %v8799_v47, %v1559_v30  ;;  %2066 = vmax.xlane.f32.xlu0 %v8924_v24 }
 0x39f   : > { %v1608_v61 = vmul.f32 1.442695, %v1591_v59  ;;  %2064 = vmax.xlane.f32.xlu1 %v8917_v33 }
 0x3a0   : > { %v1606_v50 = vmul.f32 1.442695, %v1590_v44 }
 0x3a1   : > { %7362 = vpow2.f32 %v1608_v61  ;;  %v1565_v57 = vpop.xlane.xlu0 %1564  ;;  %v1571_v62 = vpop.xlane.xlu1 %1570 }
 0x3a2   : > { %7364 = vpow2.f32 %v1606_v50  ;;  %v1593_v4 = vsub.f32 %v8801_v56, %v1565_v57  ;;  %v1596_v59 = vsub.f32 %v8807_v60, %v1571_v62 }
 0x3a3   : > { %7366 = vpow2.f32 %v1610_v32 }
 0x3a4   : > { %v1612_v45 = vmul.f32 1.442695, %v1593_v4  ;;  %v1618_v32 = vmul.f32 1.442695, %v1596_v59 }
 0x3a5   : > { %v1567_v2 = vpop.xlane.xlu1 %1566  ;;  %v1573_v19 = vpop.xlane.xlu0 %1572 }
 0x3a6   : > { %7368 = vpow2.f32 %v1612_v45  ;;  %v1594_v30 = vsub.f32 %v8811_v6, %v1567_v2  ;;  %v1597_v31 = vsub.f32 %v8813_v11, %v1573_v19 }
 0x3a8   : > { %v1614_v47 = vmul.f32 1.442695, %v1594_v30  ;;  %v1620_v44 = vmul.f32 1.442695, %v1597_v31 }
 0x3a9   : > { %v1569_v29 = vpop.xlane.xlu0 %1568  ;;  %v1579_v61 = vpop.xlane.xlu1 %1578 }
 0x3aa   : > { %v1595_v58 = vsub.f32 %v8815_v0, %v1569_v29  ;;  %7370 = vpow2.f32 %v1614_v47  ;;  %v1600_v2 = vsub.f32 %v8819_v13, %v1579_v61 }
 0x3ab   : > { %v8938_v50 = vpop.eup %7362  ;;  %7372 = vpow2.f32 %v1620_v44 }
 0x3ac   : > { %11505 = vst [vmem:[#allocation63_spill] sm:$0xff] %v8938_v50  ;;  %v8940_v56 = vpop.eup %7364  ;;  %v1616_v4 = vmul.f32 1.442695, %v1595_v58 }
 0x3ad   : > { %11506 = vst [vmem:[#allocation64_spill] sm:$0xff] %v8940_v56  ;;  %v1575_v45 = vpop.xlane.xlu1 %1574  ;;  %v1581_v6 = vpop.xlane.xlu0 %1580  ;;  %v1670_v11 = vpack.c.bf16 %v8938_v50, %v8940_v56 }
 0x3ae   : > { %7374 = vpow2.f32 %v1616_v4  ;;  %v1598_v62 = vsub.f32 %v8823_v15, %v1575_v45  ;;  %v1601_v60 = vsub.f32 %v8825_v21, %v1581_v6  ;;  %v8946_v57 = vpop.eup %7366  ;;  %v1626_v15 = vmul.f32 1.442695, %v1600_v2 }
 0x3af   : > { %11507 = vst [vmem:[#allocation65_spill] sm:$0xff] %v8946_v57  ;;  %6546 = vmatprep.mubr.bf16.mxu1 %v1670_v11  ;;  %7376 = vpow2.f32 %v1618_v32 }
 0x3b0   : > { %v8948_v0 = vpop.eup %7368  ;;  %v1622_v19 = vmul.f32 1.442695, %v1598_v62  ;;  %v1628_v30 = vmul.f32 1.442695, %v1601_v60 }
 0x3b1   : > { %11508 = vst [vmem:[#allocation66_spill] sm:$0xff] %v8948_v0  ;;  %v1577_v31 = vpop.xlane.xlu0 %1576  ;;  %v1671_v59 = vpack.c.bf16 %v8948_v0, %v8946_v57 }
 0x3b2   : > { %v1599_v47 = vsub.f32 %v8827_v23, %v1577_v31  ;;  %7378 = vpow2.f32 %v1622_v19 }
 0x3b3   : > { %6547 = vmatmul.mubr.bf16.vlgmr.msra.gmra.mrb[80].mxu1 %v1671_v59  ;;  %7380 = vpow2.f32 %v1628_v30 }
 0x3b4   : > { %v1624_v21 = vmul.f32 1.442695, %v1599_v47  ;;  %6595 = vmatpush3.bf16.msra.mxu1 %v8783_v36  ;;  %v8956_v44 = vpop.eup %7370 }
 0x3b5   : > { %6596 = vmatprep.subr.bf16.mxu1 %v8850_v12  ;;  %11509 = vst [vmem:[#allocation67_spill] sm:$0xff] %v8956_v44  ;;  %v8958_v13 = vpop.eup %7372 }
 0x3b6   : > { %7382 = vpow2.f32 %v1624_v21  ;;  %11510 = vst [vmem:[#allocation68_spill] sm:$0xff] %v8958_v13 }
 0x3b7   : > { %7384 = vpow2.f32 %v1626_v15 }
 0x3b8   : > { %v8960_v29 = vpop.eup %7374  ;;  %6597 = vmatpush3.bf16.msra.mxu1 %v8850_v12 }
 0x3b9   : > { %11511 = vst [vmem:[#allocation69_spill] sm:$0xff] %v8960_v29  ;;  %6598 = vmatprep.subr.bf16.mxu1 %v8848_v39  ;;  %v1672_v23 = vpack.c.bf16 %v8960_v29, %v8956_v44  ;;  %v8966_v61 = vpop.eup %7376 }
 0x3ba   : > { %11512 = vst [vmem:[#allocation70_spill] sm:$0xff] %v8966_v61  ;;  %v1673_v36 = vpack.c.bf16 %v8958_v13, %v8966_v61 }
 0x3bb   : > { %6550 = vmatprep.mubr.bf16.mxu1 %v1672_v23  ;;  %v9040_v23 = vpop.permute.xlu0 %2979 }
 0x3bc   : > { %6599 = vmatpush3.bf16.msra.mxu1 %v8848_v39  ;;  %v8972_v58 = vpop.eup %7378 }
 0x3bd   : > { %6551 = vmatmul.mubr.bf16.gmra.mrb[84].mxu1 %v1673_v36  ;;  %6600 = vmatprep.subr.bf16.mxu1 %v8854_v54  ;;  %11513 = vst [vmem:[#allocation71_spill] sm:$0xff] %v8972_v58  ;;  %v8976_v12 = vpop.eup %7380 }
 0x3be   : > { %v8974_v32 = vpop.f32.mrb[48].mxu0  ;;  %11514 = vst [vmem:[#allocation72_spill] sm:$0xff] %v8976_v12 }
 0x3bf   : > { %v8978_v4 = vpop.f32.mrb[49].mxu0  ;;  %2591 = vmax.xlane.f32.xlu1 %v8974_v32 }
 0x3c0   : > { %v8981_v45 = vpop.eup %7382  ;;  %6601 = vmatpush3.bf16.msra.mxu1 %v8854_v54  ;;  %v8984_v6 = vpop.f32.mrb[50].mxu0 }
 0x3c1   : > { %11515 = vst [vmem:[#allocation73_spill] sm:$0xff] %v8981_v45  ;;  %6602 = vmatprep.subr.bf16.mxu1 %v8858_v40  ;;  %v8987_v39 = vpop.f32.mrb[51].mxu0  ;;  %2593 = vmax.xlane.f32.xlu0 %v8984_v6  ;;  %v1674_v11 = vpack.c.bf16 %v8981_v45, %v8972_v58  ;;  %v8992_v62 = vpop.eup %7384 }
 0x3c2   : > { %11516 = vst [vmem:[#allocation74_spill] sm:$0xff] %v8992_v62  ;;  %v1675_v60 = vpack.c.bf16 %v8976_v12, %v8992_v62 }
 0x3c3   : > { %6554 = vmatprep.mubr.bf16.mxu1 %v1674_v11  ;;  %2587 = vmax.xlane.f32.xlu1 %v8978_v4 }
 0x3c4   : > { %6603 = vmatpush3.bf16.msra.mxu1 %v8858_v40 }
 0x3c5   : > { %6555 = vmatmul.mubr.bf16.gmra.mrb[88].mxu1 %v1675_v60  ;;  %6604 = vmatprep.subr.bf16.mxu1 %v8852_v63 }
 0x3c6   : > { %2589 = vmax.xlane.f32.xlu0 %v8987_v39  ;;  %v9000_v54 = vpop.f32.mrb[52].mxu0 }
 0x3c7   : > { %v9002_v2 = vpop.f32.mrb[53].mxu0  ;;  %2599 = vmax.xlane.f32.xlu1 %v9000_v54 }
 0x3c8   : > { %6605 = vmatpush3.bf16.msra.mxu1 %v8852_v63  ;;  %v9006_v19 = vpop.f32.mrb[54].mxu0 }
 0x3c9   : > { %6606 = vmatprep.subr.bf16.mxu1 %v8871_v53  ;;  %v9009_v30 = vpop.f32.mrb[55].mxu0 }
 0x3ca   : > { %2597 = vmax.xlane.f32.xlu0 %v9009_v30 }
 0x3cb   : > { %2595 = vmax.xlane.f32.xlu1 %v9002_v2 }
 0x3cc   : > { %6607 = vmatpush3.bf16.msra.mxu1 %v8871_v53 }
 0x3cd   : > { %6608 = vmatprep.subr.bf16.mxu1 %v8856_v46 }
 0x3ce   : > { %v9015_v40 = vpop.f32.mrb[56].mxu0 }
 0x3cf   : > { %v9017_v31 = vpop.f32.mrb[57].mxu0  ;;  %2601 = vmax.xlane.f32.xlu1 %v9006_v19  ;;  %2607 = vmax.xlane.f32.xlu0 %v9015_v40 }
 0x3d0   : > { %6609 = vmatpush3.bf16.msra.mxu1 %v8856_v46  ;;  %v9022_v63 = vpop.f32.mrb[58].mxu0  ;;  %v1587_v46 = vpop.xlane.xlu1 %1586 }
 0x3d1   : > { %6658 = vmatprep.subr.bf16.mxu1 %v8882_v22  ;;  %v9025_v59 = vpop.f32.mrb[59].mxu0  ;;  %v1604_v62 = vsub.f32 %v8831_v48, %v1587_v46 }
 0x3d3   : > { %2603 = vmax.xlane.f32.xlu1 %v9017_v31  ;;  %v1634_v57 = vmul.f32 1.442695, %v1604_v62 }
 0x3d4   : > { %v1583_v36 = vpop.xlane.xlu1 %1582 }
 0x3d5   : > { %v1602_v11 = vsub.f32 %v8835_v8, %v1583_v36 }
 0x3d6   : > { %v9028_v53 = vpop.f32.mrb[60].mxu0 }
 0x3d7   : > { %v9030_v47 = vpop.f32.mrb[61].mxu0  ;;  %2609 = vmax.xlane.f32.xlu1 %v9022_v63  ;;  %v1630_v45 = vmul.f32 1.442695, %v1602_v11 }
 0x3d8   : > { %v9033_v15 = vpop.f32.mrb[62].mxu0  ;;  %2611 = vmax.xlane.f32.xlu0 %v9030_v47 }
 0x3d9   : > { %v9036_v21 = vpop.f32.mrb[63].mxu0  ;;  %7386 = vpow2.f32 %v1630_v45 }
 0x3db   : > { %2605 = vmax.xlane.f32.xlu1 %v9025_v59 }
 0x3df   : > { %2615 = vmax.xlane.f32.xlu1 %v9028_v53 }
 0x3e3   : > { %2617 = vmax.xlane.f32.xlu1 %v9033_v15  ;;  %v9051_v8 = vpop.eup %7386 }
 0x3e4   : > { %11517 = vst [vmem:[#allocation75_spill] sm:$0xff] %v9051_v8 }
 0x3e6   : > { %v1589_v60 = vpop.xlane.xlu0 %1588 }
 0x3e7   : > { %v1605_v12 = vsub.f32 %v8837_v37, %v1589_v60 }
 0x3e9   : > { %v1636_v58 = vmul.f32 1.442695, %v1605_v12 }
 0x3ea   : > { %v1585_v61 = vpop.xlane.xlu0 %1584 }
 0x3eb   : > { %v1603_v44 = vsub.f32 %v8839_v27, %v1585_v61  ;;  %7388 = vpow2.f32 %v1636_v58 }
 0x3ed   : > { %v1632_v56 = vmul.f32 1.442695, %v1603_v44 }
 0x3ee   : > { %2983 = vrot.lane.b32.xlu0 %v8594_v3, %s8103_s20 }
 0x3ef   : > { %7390 = vpow2.f32 %v1632_v56  ;;  %v9076_v56 = vpop.permute.xlu1 %2977 }
 0x3f0   : > { %7392 = vpow2.f32 %v1634_v57 }
 0x3f4   : > { %2981 = vrot.lane.b32.xlu1 %v8580_v35, %s8103_s20 }
 0x3f5   : > { %v9053_v48 = vpop.eup %7388 }
 0x3f6   : > { %11518 = vst [vmem:[#allocation76_spill] sm:$0xff] %v9053_v48 }
 0x3f8   : > { %2951 = vrot.lane.b32.xlu1 %v8488_v26, %s8103_s20 }
 0x3f9   : > { %v9057_v37 = vpop.eup %7390 }
 0x3fa   : > { %11519 = vst [vmem:[#allocation77_spill] sm:$0xff] %v9057_v37  ;;  %v9059_v27 = vpop.eup %7392  ;;  %v1676_v44 = vpack.c.bf16 %v9057_v37, %v9051_v8 }
 0x3fb   : > { %11520 = vst [vmem:[#allocation78_spill] sm:$0xff] %v9059_v27  ;;  %v1677_v3 = vpack.c.bf16 %v9053_v48, %v9059_v27  ;;  %v11577_v27 = vld [vmem:[#allocation34_spill] sm:$0xff] }
 0x3fc   : > { %2955 = vrot.lane.b32.xlu1 %v8496_v38, %s8103_s20  ;;  %6558 = vmatprep.mubr.bf16.mxu1 %v1676_v44 }
 0x3fd   : > { %6559 = vmatmul.mubr.bf16.gmra.mrb[92].mxu1 %v1677_v3 }
 0x400   : > { %2959 = vrot.lane.b32.xlu1 %v8504_v52, %s8103_s20 }
 0x404   : > { %2963 = vrot.lane.b32.xlu1 %v8516_v9, %s8103_s20 }
 0x408   : > { %3264 = vrot.lane.b32.xlu1 %v8520_v16, %s8103_s20 }
 0x40b   : > { %v2045_v26 = vpop.xlane.xlu0 %2044 }
 0x40c   : > { %3266 = vrot.lane.b32.xlu1 %v8534_v25, %s8103_s20  ;;  %v2074_v57 = vsub.f32 %v8862_v34, %v2045_v26 }
 0x40d   : > { %2613 = vmax.xlane.f32.xlu0 %v9036_v21 }
 0x40e   : > { %v2092_v62 = vmul.f32 1.442695, %v2074_v57 }
 0x40f   : > { %v2041_v35 = vpop.xlane.xlu0 %2040 }
 0x410   : > { %3270 = vrot.lane.b32.xlu1 %v8562_v5, %s8103_s20  ;;  %v2072_v38 = vsub.f32 %v8864_v18, %v2041_v35 }
 0x412   : > { %v2088_v25 = vmul.f32 1.442695, %v2072_v38 }
 0x413   : > { %v2047_v52 = vpop.xlane.xlu0 %2046 }
 0x414   : > { %3272 = vrot.lane.b32.xlu1 %v8576_v51, %s8103_s20  ;;  %v2075_v9 = vsub.f32 %v8867_v28, %v2047_v52  ;;  %v2053_v16 = vpop.xlane.xlu1 %2052  ;;  %7394 = vpow2.f32 %v2088_v25 }
 0x415   : > { %v2078_v34 = vsub.f32 %v8876_v10, %v2053_v16 }
 0x416   : > { %v2094_v61 = vmul.f32 1.442695, %v2075_v9 }
 0x417   : > { %v2043_v58 = vpop.xlane.xlu0 %2042  ;;  %v2100_v3 = vmul.f32 1.442695, %v2078_v34 }
 0x418   : > { %v2073_v12 = vsub.f32 %v8869_v14, %v2043_v58  ;;  %v2049_v45 = vpop.xlane.xlu1 %2048  ;;  %7396 = vpow2.f32 %v2094_v61 }
 0x419   : > { %v2076_v5 = vsub.f32 %v8879_v42, %v2049_v45 }
 0x41a   : > { %v2090_v18 = vmul.f32 1.442695, %v2073_v12 }
 0x41b   : > { %v2096_v46 = vmul.f32 1.442695, %v2076_v5  ;;  %v2051_v36 = vpop.xlane.xlu0 %2050 }
 0x41c   : > { %7398 = vpow2.f32 %v2090_v18  ;;  %v2077_v28 = vsub.f32 %v8888_v1, %v2051_v36  ;;  %v2055_v51 = vpop.xlane.xlu1 %2054 }
 0x41d   : > { %7400 = vpow2.f32 %v2092_v62  ;;  %v2079_v11 = vsub.f32 %v8884_v41, %v2055_v51  ;;  %v11524_v62 = vld [vmem:[#allocation62_spill] sm:$0xff]  ;;  %v11527_v51 = vld [vmem:[#allocation52_spill] sm:$0xff] }
 0x41e   : > { %v2098_v60 = vmul.f32 1.442695, %v2077_v28  ;;  %7402 = vpow2.f32 %v2096_v46  ;;  %v9094_v38 = vpop.eup %7394  ;;  %v11526_v46 = vld [vmem:[#allocation20_spill] sm:$0xff] }
 0x41f   : > { %v2102_v14 = vmul.f32 1.442695, %v2079_v11  ;;  %v2063_v44 = vpop.xlane.xlu0 %2062  ;;  %11521 = vst [vmem:[#allocation79_spill] sm:$0xff] %v9094_v38 }
 0x420   : > { %7404 = vpow2.f32 %v2098_v60  ;;  %v2061_v42 = vpop.xlane.xlu1 %2060  ;;  %v2083_v26 = vsub.f32 %v8904_v7, %v2063_v44 }
 0x421   : > { %7406 = vpow2.f32 %v2102_v14  ;;  %v2082_v35 = vsub.f32 %v8894_v20, %v2061_v42 }
 0x422   : > { %v9097_v52 = vpop.eup %7396  ;;  %7408 = vpow2.f32 %v2100_v3  ;;  %v2110_v7 = vmul.f32 1.442695, %v2083_v26 }
 0x423   : > { %2985 = vrot.lane.b32.xlu0 %v8608_v17, %s8103_s20  ;;  %v2059_v1 = vpop.xlane.xlu0 %2058  ;;  %v2108_v20 = vmul.f32 1.442695, %v2082_v35  ;;  %v11530_v35 = vld [vmem:[#allocation23_spill] sm:$0xff] }
 0x424   : > { %v2081_v41 = vsub.f32 %v8906_v49, %v2059_v1  ;;  %v2057_v10 = vpop.xlane.xlu1 %2056  ;;  %v11531_v1 = vld [vmem:[#allocation55_spill] sm:$0xff] }
 0x425   : > { %v2080_v9 = vsub.f32 %v8899_v55, %v2057_v10  ;;  %v11534_v10 = vld [vmem:[#allocation26_spill] sm:$0xff] }
 0x426   : > { %v9100_v16 = vpop.eup %7398  ;;  %v2106_v57 = vmul.f32 1.442695, %v2081_v41 }
 0x427   : > { %v9102_v25 = vpop.eup %7400  ;;  %v2104_v61 = vmul.f32 1.442695, %v2080_v9  ;;  %2987 = vrot.lane.b32.xlu0 %v8620_v43, %s8103_s20  ;;  %v2071_v17 = vpop.xlane.xlu0 %2070  ;;  %v2152_v49 = vpack.c.bf16 %v9100_v16, %v9094_v38  ;;  %v11525_v43 = vld [vmem:[#allocation60_spill] sm:$0xff] }
 0x428   : > { %11522 = vst [vmem:[#allocation80_spill] sm:$0xff] %v9102_v25  ;;  %7410 = vpow2.f32 %v2106_v57  ;;  %v2069_v58 = vpop.xlane.xlu1 %2068  ;;  %v2153_v55 = vpack.c.bf16 %v9097_v52, %v9102_v25  ;;  %v9110_v12 = vpop.eup %7402  ;;  %v2087_v5 = vsub.f32 %v11524_v62, %v2071_v17  ;;  %v11539_v17 = vld [vmem:[#allocation57_spill] sm:$0xff]  ;;  %v11542_v62 = vld [vmem:[#allocation31_spill] sm:$0xff] }
 0x429   : > { %11523 = vst [vmem:[#allocation81_spill] sm:$0xff] %v9110_v12  ;;  %7412 = vpow2.f32 %v2104_v61  ;;  %6610 = vmatprep.mubr.bf16.mxu1 %v2152_v49  ;;  %v2086_v18 = vsub.f32 %v11525_v43, %v2069_v58  ;;  %v11538_v61 = vld [vmem:[#allocation29_spill] sm:$0xff]  ;;  %v11544_v43 = vld [vmem:[#allocation58_spill] sm:$0xff] }
 0x42a   : > { %v9112_v45 = vpop.eup %7404  ;;  %7414 = vpow2.f32 %v2110_v7  ;;  %6611 = vmatmul.mubr.bf16.vlgmr.msra.gmra.mrb[96].mxu1 %v2153_v55  ;;  %v2118_v44 = vmul.f32 1.442695, %v2087_v5  ;;  %v11536_v7 = vld [vmem:[#allocation53_spill] sm:$0xff] }
 0x42b   : > { %7416 = vpow2.f32 %v2108_v20  ;;  %2949 = vrot.lane.b32.xlu0 %v11526_v46, %s8103_s20  ;;  %6659 = vmatpush3.bf16.msra.mxu1 %v8882_v22  ;;  %v2067_v36 = vpop.xlane.xlu0 %2066  ;;  %v2154_v28 = vpack.c.bf16 %v9112_v45, %v9110_v12  ;;  %v9123_v60 = vpop.eup %7406  ;;  %v2116_v26 = vmul.f32 1.442695, %v2086_v18 }
 0x42c   : > { %6660 = vmatprep.subr.bf16.mxu1 %v11527_v51  ;;  %v2085_v34 = vsub.f32 %v8924_v24, %v2067_v36  ;;  %v2065_v11 = vpop.xlane.xlu1 %2064  ;;  %11528 = vst [vmem:[#allocation62_spill] sm:$0xff] %v9123_v60  ;;  %v9126_v3 = vpop.eup %7408  ;;  %v11546_v36 = vld [vmem:[#allocation38_spill] sm:$0xff] }
 0x42d   : > { %v2084_v14 = vsub.f32 %v8917_v33, %v2065_v11  ;;  %6614 = vmatprep.mubr.bf16.mxu1 %v2154_v28  ;;  %11529 = vst [vmem:[#allocation60_spill] sm:$0xff] %v9126_v3  ;;  %v2155_v24 = vpack.c.bf16 %v9123_v60, %v9126_v3  ;;  %v11547_v28 = vld [vmem:[#allocation54_spill] sm:$0xff]  ;;  %v11549_v11 = vld [vmem:[#allocation56_spill] sm:$0xff] }
 0x42e   : > { %v2114_v42 = vmul.f32 1.442695, %v2085_v34  ;;  %v11548_v34 = vld [vmem:[#allocation61_spill] sm:$0xff] }
 0x42f   : > { %v2112_v22 = vmul.f32 1.442695, %v2084_v14  ;;  %2953 = vrot.lane.b32.xlu0 %v11530_v35, %s8103_s20  ;;  %6661 = vmatpush3.bf16.msra.mxu1 %v11527_v51 }
 0x430   : > { %7418 = vpow2.f32 %v2114_v42  ;;  %6662 = vmatprep.subr.bf16.mxu1 %v11531_v1 }
 0x431   : > { %7420 = vpow2.f32 %v2112_v22 }
 0x432   : > { %v9134_v33 = vpop.eup %7410  ;;  %7422 = vpow2.f32 %v2118_v44  ;;  %6615 = vmatmul.mubr.bf16.gmra.mrb[100].mxu1 %v2155_v24 }
 0x433   : > { %11532 = vst [vmem:[#allocation20_spill] sm:$0xff] %v9134_v33  ;;  %v9136_v41 = vpop.eup %7412  ;;  %7424 = vpow2.f32 %v2116_v26  ;;  %2957 = vrot.lane.b32.xlu0 %v11534_v10, %s8103_s20  ;;  %6663 = vmatpush3.bf16.msra.mxu1 %v11531_v1 }
 0x434   : > { %11533 = vst [vmem:[#allocation52_spill] sm:$0xff] %v9136_v41  ;;  %v9141_v9 = vpop.eup %7414  ;;  %6664 = vmatprep.subr.bf16.mxu1 %v11536_v7  ;;  %v2156_v57 = vpack.c.bf16 %v9134_v33, %v9136_v41 }
 0x435   : > { %11535 = vst [vmem:[#allocation23_spill] sm:$0xff] %v9141_v9  ;;  %v9146_v20 = vpop.eup %7416 }
 0x436   : > { %11537 = vst [vmem:[#allocation55_spill] sm:$0xff] %v9146_v20  ;;  %6618 = vmatprep.mubr.bf16.mxu1 %v2156_v57  ;;  %v2157_v49 = vpack.c.bf16 %v9141_v9, %v9146_v20 }
 0x437   : > { %2961 = vrot.lane.b32.xlu0 %v11538_v61, %s8103_s20  ;;  %6665 = vmatpush3.bf16.msra.mxu1 %v11536_v7 }
 0x438   : > { %6666 = vmatprep.subr.bf16.mxu1 %v11539_v17 }
 0x43a   : > { %v9154_v58 = vpop.eup %7418  ;;  %6619 = vmatmul.mubr.bf16.gmra.mrb[104].mxu1 %v2157_v49 }
 0x43b   : > { %11540 = vst [vmem:[#allocation26_spill] sm:$0xff] %v9154_v58  ;;  %v9156_v55 = vpop.eup %7420  ;;  %3262 = vrot.lane.b32.xlu0 %v11542_v62, %s8103_s20  ;;  %6667 = vmatpush3.bf16.msra.mxu1 %v11539_v17 }
 0x43c   : > { %11541 = vst [vmem:[#allocation53_spill] sm:$0xff] %v9156_v55  ;;  %v9161_v5 = vpop.eup %7422  ;;  %6668 = vmatprep.subr.bf16.mxu1 %v11544_v43  ;;  %v2158_v18 = vpack.c.bf16 %v9154_v58, %v9156_v55 }
 0x43d   : > { %11543 = vst [vmem:[#allocation29_spill] sm:$0xff] %v9161_v5  ;;  %v9166_v46 = vpop.eup %7424 }
 0x43e   : > { %11545 = vst [vmem:[#allocation57_spill] sm:$0xff] %v9166_v46  ;;  %6622 = vmatprep.mubr.bf16.mxu1 %v2158_v18  ;;  %v2159_v51 = vpack.c.bf16 %v9161_v5, %v9166_v46 }
 0x43f   : > { %3268 = vrot.lane.b32.xlu0 %v11546_v36, %s8103_s20  ;;  %6669 = vmatpush3.bf16.msra.mxu1 %v11544_v43 }
 0x440   : > { %6670 = vmatprep.subr.bf16.mxu1 %v11547_v28 }
 0x442   : > { %6623 = vmatmul.mubr.bf16.gmra.mrb[108].mxu1 %v2159_v51 }
 0x443   : > { %6671 = vmatpush3.bf16.msra.mxu1 %v11547_v28 }
 0x444   : > { %6672 = vmatprep.subr.bf16.mxu1 %v11548_v34 }
 0x447   : > { %6673 = vmatpush3.bf16.msra.mxu1 %v11548_v34 }
 0x448   : > { %7034 = vmatprep.subr.msk.bf16.mxu1 %vm1412_vm0, %v11549_v11 }
 0x44c   : > { %v2592_v14 = vpop.xlane.xlu1 %2591 }
 0x44d   : > { %v2621_v22 = vsub.f32 %v8974_v32, %v2592_v14 }
 0x44e   : > { %v2594_v44 = vpop.xlane.xlu0 %2593 }
 0x44f   : > { %v2622_v42 = vsub.f32 %v8984_v6, %v2594_v44  ;;  %v2639_v61 = vmul.f32 1.442695, %v2621_v22 }
 0x450   : > { %v2588_v26 = vpop.xlane.xlu1 %2587 }
 0x451   : > { %v2619_v35 = vsub.f32 %v8978_v4, %v2588_v26  ;;  %v2641_v1 = vmul.f32 1.442695, %v2622_v42 }
 0x453   : > { %v2635_v24 = vmul.f32 1.442695, %v2619_v35  ;;  %v2590_v10 = vpop.xlane.xlu0 %2589  ;;  %7426 = vpow2.f32 %v2641_v1 }
 0x454   : > { %v2620_v7 = vsub.f32 %v8987_v39, %v2590_v10  ;;  %v2600_v57 = vpop.xlane.xlu1 %2599  ;;  %v3014_v10 = vsel %vm1412_vm0, %v11549_v11, 0 }
 0x455   : > { %7428 = vpow2.f32 %v2635_v24  ;;  %v2625_v62 = vsub.f32 %v9000_v54, %v2600_v57 }
 0x456   : > { %v2637_v17 = vmul.f32 1.442695, %v2620_v7 }
 0x457   : > { %v2598_v49 = vpop.xlane.xlu0 %2597  ;;  %v2647_v36 = vmul.f32 1.442695, %v2625_v62 }
 0x458   : > { %7430 = vpow2.f32 %v2637_v17  ;;  %v2624_v6 = vsub.f32 %v9009_v30, %v2598_v49  ;;  %v2596_v43 = vpop.xlane.xlu1 %2595 }
 0x459   : > { %7432 = vpow2.f32 %v2639_v61  ;;  %v2623_v32 = vsub.f32 %v9002_v2, %v2596_v43  ;;  %v11553_v61 = vld [vmem:[#allocation59_spill] sm:$0xff] }
 0x45a   : > { %v2645_v4 = vmul.f32 1.442695, %v2624_v6 }
 0x45b   : > { %v2643_v18 = vmul.f32 1.442695, %v2623_v32  ;;  %v3017_v32 = vsel %vm1412_vm0, %v11553_v61, 0 }
 0x45c   : > { %7434 = vpow2.f32 %v2645_v4  ;;  %v2602_v39 = vpop.xlane.xlu1 %2601  ;;  %v2608_v2 = vpop.xlane.xlu0 %2607 }
 0x45d   : > { %7436 = vpow2.f32 %v2643_v18  ;;  %v2626_v28 = vsub.f32 %v9006_v19, %v2602_v39  ;;  %v9187_v34 = vpop.eup %7426  ;;  %v2629_v24 = vsub.f32 %v9015_v40, %v2608_v2 }
 0x45e   : > { %7438 = vpow2.f32 %v2647_v36  ;;  %v3020_v36 = vsel %vm1412_vm0, %v9076_v56, 0 }
 0x45f   : > { %v2649_v51 = vmul.f32 1.442695, %v2626_v28  ;;  %v9189_v54 = vpop.eup %7428  ;;  %v2655_v40 = vmul.f32 1.442695, %v2629_v24 }
 0x460   : > { %v2604_v14 = vpop.xlane.xlu1 %2603  ;;  %11550 = vst [vmem:[#allocation31_spill] sm:$0xff] %v9189_v54 }
 0x461   : > { %7440 = vpow2.f32 %v2649_v51  ;;  %v2627_v42 = vsub.f32 %v9017_v31, %v2604_v14 }
 0x462   : > { %v9191_v30 = vpop.eup %7430 }
 0x463   : > { %v9193_v44 = vpop.eup %7432  ;;  %v2699_v26 = vpack.c.bf16 %v9191_v30, %v9189_v54  ;;  %v2651_v31 = vmul.f32 1.442695, %v2627_v42 }
 0x464   : > { %11551 = vst [vmem:[#allocation58_spill] sm:$0xff] %v9193_v44  ;;  %v2610_v22 = vpop.xlane.xlu1 %2609  ;;  %v2700_v19 = vpack.c.bf16 %v9187_v34, %v9193_v44 }
 0x465   : > { %v2630_v35 = vsub.f32 %v9022_v63, %v2610_v22  ;;  %6674 = vmatprep.mubr.bf16.mxu1 %v2699_v26  ;;  %7442 = vpow2.f32 %v2651_v31  ;;  %v2612_v26 = vpop.xlane.xlu0 %2611 }
 0x466   : > { %v9201_v1 = vpop.eup %7434  ;;  %6675 = vmatmul.mubr.bf16.vlgmr.msra.gmra.mrb[112].mxu1 %v2700_v19 }
 0x467   : > { %v9206_v7 = vpop.eup %7436  ;;  %6691 = vmatpush3.bf16.xpose.msra.mxu1 %v3014_v10  ;;  %v2657_v57 = vmul.f32 1.442695, %v2630_v35 }
 0x468   : > { %11552 = vst [vmem:[#allocation38_spill] sm:$0xff] %v9206_v7  ;;  %7035 = vmatprep.subr.msk.bf16.mxu1 %vm1412_vm0, %v11553_v61  ;;  %v2606_v17 = vpop.xlane.xlu1 %2605  ;;  %v2701_v63 = vpack.c.bf16 %v9201_v1, %v9206_v7  ;;  %v9213_v62 = vpop.eup %7438 }
 0x469   : > { %v2628_v49 = vsub.f32 %v9025_v59, %v2606_v17  ;;  %11554 = vst [vmem:[#allocation54_spill] sm:$0xff] %v9213_v62  ;;  %7444 = vpow2.f32 %v2657_v57  ;;  %v2984_v35 = vpop.permute.xlu0 %2983 }
 0x46a   : > { %6678 = vmatprep.mubr.bf16.mxu1 %v2701_v63 }
 0x46b   : > { %v9215_v6 = vpop.eup %7440  ;;  %v2653_v11 = vmul.f32 1.442695, %v2628_v49  ;;  %v2631_v49 = vsub.f32 %v9030_v47, %v2612_v26 }
 0x46c   : > { %11555 = vst [vmem:[#allocation61_spill] sm:$0xff] %v9215_v6  ;;  %v2702_v43 = vpack.c.bf16 %v9215_v6, %v9213_v62  ;;  %v2616_v59 = vpop.xlane.xlu1 %2615 }
 0x46d   : > { %7446 = vpow2.f32 %v2653_v11  ;;  %v2633_v11 = vsub.f32 %v9028_v53, %v2616_v59 }
 0x46e   : > { %7448 = vpow2.f32 %v2655_v40  ;;  %6679 = vmatmul.mubr.bf16.gmra.mrb[116].mxu1 %v2702_v43 }
 0x46f   : > { %6693 = vmatpush3.bf16.xpose.msra.mxu1 %v3017_v32  ;;  %v9223_v4 = vpop.eup %7442  ;;  %v2659_v32 = vmul.f32 1.442695, %v2631_v49 }
 0x470   : > { %7036 = vmatprep.subr.msk.bf16.mxu1 %vm1412_vm0, %v9076_v56  ;;  %11556 = vst [vmem:[#allocation56_spill] sm:$0xff] %v9223_v4  ;;  %v2618_v14 = vpop.xlane.xlu1 %2617  ;;  %v3023_v56 = vsel %vm1412_vm0, %v9040_v23, 0 }
 0x471   : > { %v2634_v40 = vsub.f32 %v9033_v15, %v2618_v14  ;;  %7450 = vpow2.f32 %v2659_v32  ;;  %v11575_v32 = vld [vmem:[#allocation32_spill] sm:$0xff] }
 0x473   : > { %v9225_v18 = vpop.eup %7444 }
 0x474   : > { %11557 = vst [vmem:[#allocation59_spill] sm:$0xff] %v9225_v18  ;;  %v2982_v42 = vpop.permute.xlu1 %2981 }
 0x475   : > { %v3026_v22 = vsel %vm1412_vm0, %v2982_v42, 0 }
 0x477   : > { %v9229_v39 = vpop.eup %7446  ;;  %6695 = vmatpush3.bf16.xpose.msra.mxu1 %v3020_v36 }
 0x478   : > { %11558 = vst [vmem:[#allocation82_spill] sm:$0xff] %v9229_v39  ;;  %v9231_v28 = vpop.eup %7448  ;;  %7037 = vmatprep.subr.msk.bf16.mxu1 %vm1412_vm0, %v9040_v23  ;;  %v2703_v51 = vpack.c.bf16 %v9229_v39, %v9223_v4  ;;  %v3029_v23 = vsel %vm1412_vm0, %v2984_v35, 0  ;;  %v2952_v15 = vpop.permute.xlu1 %2951 }
 0x479   : > { %11559 = vst [vmem:[#allocation83_spill] sm:$0xff] %v9231_v28  ;;  %v2704_v2 = vpack.c.bf16 %v9225_v18, %v9231_v28 }
 0x47a   : > { %6682 = vmatprep.mubr.bf16.mxu1 %v2703_v51  ;;  %v2665_v51 = vmul.f32 1.442695, %v2634_v40 }
 0x47b   : > { %6683 = vmatmul.mubr.bf16.gmra.mrb[120].mxu1 %v2704_v2 }
 0x47c   : > { %7452 = vpow2.f32 %v2665_v51  ;;  %v2956_v26 = vpop.permute.xlu1 %2955 }
 0x47f   : > { %6697 = vmatpush3.bf16.xpose.msra.mxu1 %v3023_v56 }
 0x480   : > { %7038 = vmatprep.subr.msk.bf16.mxu1 %vm1412_vm0, %v2982_v42 }
 0x486   : > { %v9243_v19 = vpop.f32.mrb[80].mxu1 }
 0x487   : > { %11560 = vst [vmem:[#allocation84_spill] sm:$0xff] %v9243_v19  ;;  %6699 = vmatpush3.bf16.xpose.msra.mxu1 %v3026_v22  ;;  %v9245_v24 = vpop.f32.mrb[81].mxu1 }
 0x488   : > { %11561 = vst [vmem:[#allocation85_spill] sm:$0xff] %v9245_v24  ;;  %7039 = vmatprep.subr.msk.bf16.mxu1 %vm1412_vm0, %v2984_v35  ;;  %v9248_v10 = vpop.f32.mrb[82].mxu1  ;;  %v2663_v35 = vmul.f32 1.442695, %v2633_v11 }
 0x489   : > { %11562 = vst [vmem:[#allocation86_spill] sm:$0xff] %v9248_v10  ;;  %v9250_v31 = vpop.f32.mrb[83].mxu1 }
 0x48a   : > { %11563 = vst [vmem:[#allocation87_spill] sm:$0xff] %v9250_v31 }
 0x48f   : > { %6701 = vmatpush3.bf16.xpose.msra.mxu1 %v3029_v23  ;;  %v9276_v23 = vpop.eup %7450 }
 0x490   : > { %v9253_v57 = vpop.f32.mrb[84].mxu1  ;;  %11572 = vst [vmem:[#allocation96_spill] sm:$0xff] %v9276_v23  ;;  %v9279_v40 = vpop.eup %7452 }
 0x491   : > { %11564 = vst [vmem:[#allocation88_spill] sm:$0xff] %v9253_v57  ;;  %v9255_v61 = vpop.f32.mrb[85].mxu1  ;;  %11573 = vst [vmem:[#allocation97_spill] sm:$0xff] %v9279_v40 }
 0x492   : > { %11565 = vst [vmem:[#allocation89_spill] sm:$0xff] %v9255_v61  ;;  %v9257_v17 = vpop.f32.mrb[86].mxu1 }
 0x493   : > { %11566 = vst [vmem:[#allocation90_spill] sm:$0xff] %v9257_v17  ;;  %v9259_v63 = vpop.f32.mrb[87].mxu1 }
 0x494   : > { %11567 = vst [vmem:[#allocation91_spill] sm:$0xff] %v9259_v63 }
 0x498   : > { %v9264_v43 = vpop.f32.mrb[88].mxu1 }
 0x499   : > { %11568 = vst [vmem:[#allocation92_spill] sm:$0xff] %v9264_v43  ;;  %v9266_v36 = vpop.f32.mrb[89].mxu1 }
 0x49a   : > { %11569 = vst [vmem:[#allocation93_spill] sm:$0xff] %v9266_v36  ;;  %v9268_v2 = vpop.f32.mrb[90].mxu1  ;;  %v2614_v56 = vpop.xlane.xlu0 %2613 }
 0x49b   : > { %11570 = vst [vmem:[#allocation94_spill] sm:$0xff] %v9268_v2  ;;  %v2632_v42 = vsub.f32 %v9036_v21, %v2614_v56  ;;  %v9271_v22 = vpop.f32.mrb[91].mxu1  ;;  %v2960_v56 = vpop.permute.xlu1 %2959 }
 0x49c   : > { %11571 = vst [vmem:[#allocation95_spill] sm:$0xff] %v9271_v22 }
 0x49d   : > { %v2661_v47 = vmul.f32 1.442695, %v2632_v42 }
 0x49e   : > { %v2986_v14 = vpop.permute.xlu0 %2985 }
 0x49f   : > { %7454 = vpow2.f32 %v2661_v47  ;;  %7040 = vmatprep.subr.msk.bf16.mxu1 %vm1412_vm0, %v2986_v14  ;;  %v3032_v53 = vsel %vm1412_vm0, %v2986_v14, 0 }
 0x4a0   : > { %7456 = vpow2.f32 %v2663_v35  ;;  %6703 = vmatpush3.bf16.xpose.msra.mxu1 %v3032_v53  ;;  %v2964_v53 = vpop.permute.xlu1 %2963 }
 0x4a2   : > { %v2988_v59 = vpop.permute.xlu0 %2987 }
 0x4a3   : > { %7041 = vmatprep.subr.msk.bf16.mxu1 %vm1412_vm0, %v2988_v59  ;;  %v3035_v49 = vsel %vm1412_vm0, %v2988_v59, 0 }
 0x4a6   : > { %v2950_v21 = vpop.permute.xlu0 %2949 }
 0x4a8   : > { %6705 = vmatpush3.bf16.xpose.msra.mxu1 %v3035_v49  ;;  %v3265_v49 = vpop.permute.xlu1 %3264 }
 0x4a9   : > { %v9281_v11 = vpop.eup %7454  ;;  %6786 = vmatprep.subr.bf16.mxu1 %v11575_v32 }
 0x4aa   : > { %11574 = vst [vmem:[#allocation98_spill] sm:$0xff] %v9281_v11  ;;  %v9284_v51 = vpop.eup %7456  ;;  %v2954_v42 = vpop.permute.xlu0 %2953  ;;  %v2705_v35 = vpack.c.bf16 %v9281_v11, %v9276_v23 }
 0x4ab   : > { %11576 = vst [vmem:[#allocation32_spill] sm:$0xff] %v9284_v51  ;;  %v2706_v47 = vpack.c.bf16 %v9279_v40, %v9284_v51 }
 0x4ac   : > { %6686 = vmatprep.mubr.bf16.mxu1 %v2705_v35  ;;  %v11578_v35 = vld [vmem:[#allocation36_spill] sm:$0xff] }
 0x4ad   : > { %6687 = vmatmul.mubr.bf16.gmra.mrb[124].mxu1 %v2706_v47  ;;  %v11580_v47 = vld [vmem:[#allocation41_spill] sm:$0xff] }
 0x4ae   : > { %6706 = vmatprep.mubr.msk.bf16.mxu1 %vm1412_vm0, %v2950_v21  ;;  %v2958_v14 = vpop.permute.xlu0 %2957  ;;  %v3267_v21 = vpop.permute.xlu1 %3266 }
 0x4b2   : > { %v2962_v59 = vpop.permute.xlu0 %2961 }
 0x4b5   : > { %6707 = vmatmul.mubr.msk.bf16.vlgmr.msra.gmra.mrb[128].mxu1 %vm1412_vm0, %v2952_v15  ;;  %v11579_v15 = vld [vmem:[#allocation39_spill] sm:$0xff] }
 0x4b6   : > { %6787 = vmatpush3.bf16.msra.mxu1 %v11575_v32  ;;  %6710 = vmatprep.mubr.msk.bf16.mxu1 %vm1412_vm0, %v2954_v42  ;;  %v3263_v48 = vpop.permute.xlu0 %3262 }
 0x4b7   : > { %6788 = vmatprep.subr.bf16.mxu1 %v11577_v27  ;;  %6722 = vmatprep.subr.bf16.mxu0 %v3263_v48 }
 0x4b8   : > { %6723 = vmatpush3.bf16.msra.mxu0 %v3263_v48  ;;  %v3271_v48 = vpop.permute.xlu1 %3270 }
 0x4b9   : > { %6724 = vmatprep.subr.bf16.mxu0 %v3265_v49 }
 0x4ba   : > { %6789 = vmatpush3.bf16.msra.mxu1 %v11577_v27  ;;  %v3269_v42 = vpop.permute.xlu0 %3268 }
 0x4bb   : > { %6790 = vmatprep.subr.bf16.mxu1 %v11578_v35 }
 0x4bc   : > { %6725 = vmatpush3.bf16.msra.mxu0 %v3265_v49  ;;  %v11582_v49 = vld [vmem:[#allocation46_spill] sm:$0xff] }
 0x4bd   : > { %6711 = vmatmul.mubr.msk.bf16.gmra.mrb[132].mxu1 %vm1412_vm0, %v2956_v26  ;;  %6726 = vmatprep.subr.bf16.mxu0 %v3267_v21  ;;  %v11581_v26 = vld [vmem:[#allocation43_spill] sm:$0xff] }
 0x4be   : > { %6791 = vmatpush3.bf16.msra.mxu1 %v11578_v35  ;;  %6714 = vmatprep.mubr.msk.bf16.mxu1 %vm1412_vm0, %v2958_v14  ;;  %v3273_v14 = vpop.permute.xlu1 %3272 }
 0x4bf   : > { %6792 = vmatprep.subr.bf16.mxu1 %v11579_v15 }
 0x4c0   : > { %6727 = vmatpush3.bf16.msra.mxu0 %v3267_v21 }
 0x4c1   : > { %6728 = vmatprep.subr.bf16.mxu0 %v3269_v42 }
 0x4c2   : > { %6793 = vmatpush3.bf16.msra.mxu1 %v11579_v15 }
 0x4c3   : > { %6794 = vmatprep.subr.bf16.mxu1 %v11580_v47 }
 0x4c4   : > { %6729 = vmatpush3.bf16.msra.mxu0 %v3269_v42 }
 0x4c5   : > { %6715 = vmatmul.mubr.msk.bf16.gmra.mrb[136].mxu1 %vm1412_vm0, %v2960_v56  ;;  %6730 = vmatprep.subr.bf16.mxu0 %v3271_v48  ;;  %v11583_v56 = vld [vmem:[#allocation51_spill] sm:$0xff] }
 0x4c6   : > { %6795 = vmatpush3.bf16.msra.mxu1 %v11580_v47  ;;  %6718 = vmatprep.mubr.msk.bf16.mxu1 %vm1412_vm0, %v2962_v59 }
 0x4c7   : > { %6796 = vmatprep.subr.bf16.mxu1 %v11581_v26 }
 0x4c8   : > { %6731 = vmatpush3.bf16.msra.mxu0 %v3271_v48 }
 0x4c9   : > { %6732 = vmatprep.subr.bf16.mxu0 %v3273_v14 }
 0x4ca   : > { %6797 = vmatpush3.bf16.msra.mxu1 %v11581_v26 }
 0x4cb   : > { %6798 = vmatprep.subr.bf16.mxu1 %v11582_v49 }
 0x4cc   : > { %6733 = vmatpush3.bf16.msra.mxu0 %v3273_v14 }
 0x4cd   : > { %6719 = vmatmul.mubr.msk.bf16.gmra.mrb[140].mxu1 %vm1412_vm0, %v2964_v53 }
 0x4ce   : > { %6799 = vmatpush3.bf16.msra.mxu1 %v11582_v49 }
 0x4cf   : > { %6800 = vmatprep.subr.bf16.mxu1 %v11583_v56 }
 0x4d0   : > { %v9312_v21 = vpop.f32.mrb[92].mxu1 }
 0x4d1   : > { %11584 = vst [vmem:[#allocation34_spill] sm:$0xff] %v9312_v21  ;;  %v9314_v42 = vpop.f32.mrb[93].mxu1 }
 0x4d2   : > { %11585 = vst [vmem:[#allocation36_spill] sm:$0xff] %v9314_v42  ;;  %6801 = vmatpush3.bf16.msra.mxu1 %v11583_v56  ;;  %v9317_v59 = vpop.f32.mrb[94].mxu1 }
 0x4d3   : > { %11586 = vst [vmem:[#allocation39_spill] sm:$0xff] %v9317_v59  ;;  %v9319_v48 = vpop.f32.mrb[95].mxu1 }
 0x4d4   : > { %11587 = vst [vmem:[#allocation41_spill] sm:$0xff] %v9319_v48 }
 0x4fd   : > { %v9321_v2 = vpop.f32.mrb[96].mxu1 }
 0x4fe   : > { %11588 = vst [vmem:[#allocation43_spill] sm:$0xff] %v9321_v2  ;;  %v9323_v43 = vpop.f32.mrb[97].mxu1 }
 0x4ff   : > { %11589 = vst [vmem:[#allocation46_spill] sm:$0xff] %v9323_v43  ;;  %v9325_v14 = vpop.f32.mrb[98].mxu1 }
 0x500   : > { %11590 = vst [vmem:[#allocation51_spill] sm:$0xff] %v9325_v14  ;;  %v9327_v53 = vpop.f32.mrb[99].mxu1 }
 0x501   : > { %11591 = vst [vmem:[#allocation99_spill] sm:$0xff] %v9327_v53  ;;  %v11624_v53 = vld [vmem:[#allocation37_spill] sm:$0xff] }
 0x505   : > { %v9329_v37 = vpop.f32.mrb[100].mxu1 }
 0x506   : > { %11592 = vst [vmem:[#allocation100_spill] sm:$0xff] %v9329_v37  ;;  %v9331_v8 = vpop.f32.mrb[101].mxu1 }
 0x507   : > { %11593 = vst [vmem:[#allocation101_spill] sm:$0xff] %v9331_v8  ;;  %v9333_v21 = vpop.f32.mrb[102].mxu1 }
 0x508   : > { %11594 = vst [vmem:[#allocation102_spill] sm:$0xff] %v9333_v21  ;;  %v9335_v42 = vpop.f32.mrb[103].mxu1 }
 0x509   : > { %11595 = vst [vmem:[#allocation103_spill] sm:$0xff] %v9335_v42 }
 0x50d   : > { %v9337_v22 = vpop.f32.mrb[104].mxu1 }
 0x50e   : > { %11596 = vst [vmem:[#allocation104_spill] sm:$0xff] %v9337_v22  ;;  %v9339_v59 = vpop.f32.mrb[105].mxu1 }
 0x50f   : > { %11597 = vst [vmem:[#allocation105_spill] sm:$0xff] %v9339_v59  ;;  %v9341_v48 = vpop.f32.mrb[106].mxu1 }
 0x510   : > { %11598 = vst [vmem:[#allocation106_spill] sm:$0xff] %v9341_v48  ;;  %v9343_v36 = vpop.f32.mrb[107].mxu1 }
 0x511   : > { %11599 = vst [vmem:[#allocation107_spill] sm:$0xff] %v9343_v36 }
 0x515   : > { %v9345_v57 = vpop.f32.mrb[108].mxu1 }
 0x516   : > { %11600 = vst [vmem:[#allocation108_spill] sm:$0xff] %v9345_v57  ;;  %v9347_v17 = vpop.f32.mrb[109].mxu1 }
 0x517   : > { %11601 = vst [vmem:[#allocation109_spill] sm:$0xff] %v9347_v17  ;;  %v9349_v61 = vpop.f32.mrb[110].mxu1 }
 0x518   : > { %11602 = vst [vmem:[#allocation110_spill] sm:$0xff] %v9349_v61  ;;  %v9351_v63 = vpop.f32.mrb[111].mxu1 }
 0x519   : > { %11603 = vst [vmem:[#allocation111_spill] sm:$0xff] %v9351_v63 }
 0x539   : > { %v9353_v19 = vpop.f32.mrb[112].mxu1 }
 0x53a   : > { %11604 = vst [vmem:[#allocation112_spill] sm:$0xff] %v9353_v19  ;;  %v9355_v10 = vpop.f32.mrb[113].mxu1 }
 0x53b   : > { %11605 = vst [vmem:[#allocation113_spill] sm:$0xff] %v9355_v10  ;;  %v9357_v24 = vpop.f32.mrb[114].mxu1  ;;  %v11621_v10 = vld [vmem:[#allocation45_spill] sm:$0xff] }
 0x53c   : > { %11606 = vst [vmem:[#allocation114_spill] sm:$0xff] %v9357_v24  ;;  %v9359_v31 = vpop.f32.mrb[115].mxu1  ;;  %v11620_v24 = vld [vmem:[#allocation48_spill] sm:$0xff] }
 0x53d   : > { %11607 = vst [vmem:[#allocation115_spill] sm:$0xff] %v9359_v31 }
 0x541   : > { %v9361_v22 = vpop.f32.mrb[116].mxu1 }
 0x542   : > { %11608 = vst [vmem:[#allocation116_spill] sm:$0xff] %v9361_v22  ;;  %v9363_v48 = vpop.f32.mrb[117].mxu1 }
 0x543   : > { %11609 = vst [vmem:[#allocation117_spill] sm:$0xff] %v9363_v48  ;;  %v9365_v36 = vpop.f32.mrb[118].mxu1 }
 0x544   : > { %11610 = vst [vmem:[#allocation118_spill] sm:$0xff] %v9365_v36  ;;  %v9367_v57 = vpop.f32.mrb[119].mxu1 }
 0x545   : > { %11611 = vst [vmem:[#allocation119_spill] sm:$0xff] %v9367_v57 }
 0x54e   : > { %v9369_v17 = vpop.f32.mrb[120].mxu1 }
 0x54f   : > { %11612 = vst [vmem:[#allocation120_spill] sm:$0xff] %v9369_v17  ;;  %v9371_v61 = vpop.f32.mrb[121].mxu1 }
 0x550   : > { %11613 = vst [vmem:[#allocation121_spill] sm:$0xff] %v9371_v61  ;;  %v9373_v63 = vpop.f32.mrb[122].mxu1 }
 0x551   : > { %11614 = vst [vmem:[#allocation122_spill] sm:$0xff] %v9373_v63  ;;  %v9375_v59 = vpop.f32.mrb[123].mxu1 }
 0x552   : > { %11615 = vst [vmem:[#allocation123_spill] sm:$0xff] %v9375_v59 }
 0x580   : > { %v9377_v21 = vpop.f32.mrb[124].mxu1 }
 0x581   : > { %11616 = vst [vmem:[#allocation124_spill] sm:$0xff] %v9377_v21  ;;  %v9379_v37 = vpop.f32.mrb[125].mxu1 }
 0x582   : > { %11617 = vst [vmem:[#allocation125_spill] sm:$0xff] %v9379_v37  ;;  %v9381_v42 = vpop.f32.mrb[126].mxu1 }
 0x583   : > { %11618 = vst [vmem:[#allocation126_spill] sm:$0xff] %v9381_v42  ;;  %v9383_v22 = vpop.f32.mrb[127].mxu1 }
 0x584   : > { %11619 = vst [vmem:[#allocation127_spill] sm:$0xff] %v9383_v22 }
 0x588   : > { %v6708_v48 = vpop.f32.mrb[128].mxu1 }
 0x589   : > { %3138 = vmax.xlane.f32.xlu0 %v6708_v48  ;;  %v3071_v36 = vpop.f32.mrb[129].mxu1 }
 0x58a   : > { %v6709_v57 = vpop.f32.mrb[130].mxu1 }
 0x58b   : > { %v3074_v8 = vpop.f32.mrb[131].mxu1 }
 0x58c   : > { %3136 = vmax.xlane.f32.xlu1 %v3074_v8 }
 0x58d   : > { %3134 = vmax.xlane.f32.xlu0 %v3071_v36 }
 0x590   : > { %v9385_v17 = vpop.f32.mrb[132].mxu1 }
 0x591   : > { %3140 = vmax.xlane.f32.xlu0 %v6709_v57  ;;  %v9387_v63 = vpop.f32.mrb[133].mxu1 }
 0x592   : > { %v9389_v59 = vpop.f32.mrb[134].mxu1 }
 0x593   : > { %v9391_v21 = vpop.f32.mrb[135].mxu1 }
 0x598   : > { %v9393_v37 = vpop.f32.mrb[136].mxu1 }
 0x599   : > { %v9395_v42 = vpop.f32.mrb[137].mxu1 }
 0x59a   : > { %v9397_v22 = vpop.f32.mrb[138].mxu1 }
 0x59b   : > { %v9399_v61 = vpop.f32.mrb[139].mxu1 }
 0x59d   : > { %3276 = vrot.lane.b32.xlu1 %v11620_v24, %s8103_s20  ;;  %v11622_v24 = vld [vmem:[#allocation35_spill] sm:$0xff] }
 0x5a0   : > { %v9403_v19 = vpop.f32.mrb[140].mxu1 }
 0x5a1   : > { %v9405_v14 = vpop.f32.mrb[141].mxu1 }
 0x5a2   : > { %v9407_v2 = vpop.f32.mrb[142].mxu1 }
 0x5a3   : > { %v9409_v31 = vpop.f32.mrb[143].mxu1 }
 0x5a7   : > { %3274 = vrot.lane.b32.xlu0 %v11621_v10, %s8103_s20  ;;  %v11623_v10 = vld [vmem:[#allocation40_spill] sm:$0xff] }
 0x5c1   : > { %3144 = vmax.xlane.f32.xlu1 %v9391_v21 }
 0x5c5   : > { %3150 = vmax.xlane.f32.xlu1 %v9395_v42 }
 0x5c6   : > { %3142 = vmax.xlane.f32.xlu0 %v9387_v63 }
 0x5c9   : > { %3154 = vmax.xlane.f32.xlu1 %v9393_v37 }
 0x5ca   : > { %3146 = vmax.xlane.f32.xlu0 %v9385_v17 }
 0x5cd   : > { %3158 = vmax.xlane.f32.xlu1 %v9405_v14 }
 0x5ce   : > { %3148 = vmax.xlane.f32.xlu0 %v9389_v59 }
 0x5d1   : > { %3162 = vmax.xlane.f32.xlu1 %v9403_v19 }
 0x5d2   : > { %3152 = vmax.xlane.f32.xlu0 %v9399_v61 }
 0x5d6   : > { %3156 = vmax.xlane.f32.xlu0 %v9397_v22 }
 0x5da   : > { %3160 = vmax.xlane.f32.xlu0 %v9409_v31 }
 0x5de   : > { %3164 = vmax.xlane.f32.xlu0 %v9407_v2 }
 0x5e2   : > { %3954 = vrot.lane.b32.xlu1 %v11622_v24, %s8101_s27 }
 0x5e6   : > { %3958 = vrot.lane.b32.xlu1 %v11623_v10, %s8101_s27 }
 0x5f4   : > { %3956 = vrot.lane.b32.xlu0 %v11624_v53, %s8101_s27 }
 0x616   : > { %v3139_v43 = vpop.xlane.xlu0 %3138 }
 0x617   : > { %v3168_v13 = vsub.f32 %v6708_v48, %v3139_v43 }
 0x619   : > { %v3137_v51 = vpop.xlane.xlu1 %3136  ;;  %v3186_v40 = vmul.f32 1.442695, %v3168_v13 }
 0x61a   : > { %v3167_v46 = vsub.f32 %v3074_v8, %v3137_v51  ;;  %v3135_v29 = vpop.xlane.xlu0 %3134 }
 0x61b   : > { %v3166_v0 = vsub.f32 %v3071_v36, %v3135_v29 }
 0x61c   : > { %v3184_v23 = vmul.f32 1.442695, %v3167_v46  ;;  %v11627_v46 = vld [vmem:[#allocation42_spill] sm:$0xff] }
 0x61d   : > { %v3182_v55 = vmul.f32 1.442695, %v3166_v0  ;;  %v3277_v4 = vpop.permute.xlu1 %3276 }
 0x61e   : > { %7458 = vpow2.f32 %v3184_v23  ;;  %v3141_v50 = vpop.xlane.xlu0 %3140  ;;  %v11629_v23 = vld [vmem:[#allocation47_spill] sm:$0xff] }
 0x61f   : > { %7460 = vpow2.f32 %v3182_v55  ;;  %v3169_v28 = vsub.f32 %v6709_v57, %v3141_v50  ;;  %v3516_v55 = vsel %vm1412_vm0, %v11624_v53, 0 }
 0x620   : > { %7462 = vpow2.f32 %v3186_v40 }
 0x621   : > { %v3188_v20 = vmul.f32 1.442695, %v3169_v28  ;;  %v11628_v28 = vld [vmem:[#allocation44_spill] sm:$0xff] }
 0x622   : > { %v3275_v5 = vpop.permute.xlu0 %3274  ;;  %v3525_v36 = vsel %vm1412_vm0, %v11628_v28, 0 }
 0x623   : > { %7464 = vpow2.f32 %v3188_v20  ;;  %6734 = vmatprep.subr.bf16.mxu0 %v3275_v5  ;;  %v3513_v20 = vsel %vm1412_vm0, %v11622_v24, 0 }
 0x624   : > { %6735 = vmatpush3.bf16.msra.mxu0 %v3275_v5  ;;  %v3519_v5 = vsel %vm1412_vm0, %v11623_v10, 0 }
 0x625   : > { %6736 = vmatprep.subr.bf16.mxu0 %v3277_v4 }
 0x628   : > { %v9431_v11 = vpop.eup %7458  ;;  %6737 = vmatpush3.bf16.msra.mxu0 %v3277_v4  ;;  %v3522_v4 = vsel %vm1412_vm0, %v11627_v46, 0 }
 0x629   : > { %v9433_v8 = vpop.eup %7460  ;;  %7042 = vmatprep.subr.msk.bf16.mxu0 %vm1412_vm0, %v11622_v24 }
 0x62a   : > { %11625 = vst [vmem:[#allocation48_spill] sm:$0xff] %v9433_v8  ;;  %v3246_v0 = vpack.c.bf16 %v9431_v11, %v9433_v8  ;;  %v9439_v50 = vpop.eup %7462 }
 0x62b   : > { %11626 = vst [vmem:[#allocation45_spill] sm:$0xff] %v9439_v50 }
 0x62c   : > { %6738 = vmatprep.mubr.bf16.mxu0 %v3246_v0 }
 0x62d   : > { %v9441_v13 = vpop.eup %7464 }
 0x62e   : > { %v3247_v29 = vpack.c.bf16 %v9441_v13, %v9439_v50 }
 0x630   : > { %6739 = vmatmul.mubr.bf16.vlgmr.msra.gmra.mrb[64].mxu0 %v3247_v29 }
 0x631   : > { %6755 = vmatpush3.bf16.xpose.msra.mxu0 %v3513_v20 }
 0x632   : > { %7043 = vmatprep.subr.msk.bf16.mxu0 %vm1412_vm0, %v11624_v53 }
 0x639   : > { %6757 = vmatpush3.bf16.xpose.msra.mxu0 %v3516_v55 }
 0x63a   : > { %7044 = vmatprep.subr.msk.bf16.mxu0 %vm1412_vm0, %v11623_v10 }
 0x641   : > { %6759 = vmatpush3.bf16.xpose.msra.mxu0 %v3519_v5 }
 0x642   : > { %7045 = vmatprep.subr.msk.bf16.mxu0 %vm1412_vm0, %v11627_v46 }
 0x649   : > { %6761 = vmatpush3.bf16.xpose.msra.mxu0 %v3522_v4  ;;  %v11630_v4 = vld [vmem:[#allocation49_spill] sm:$0xff] }
 0x64a   : > { %7046 = vmatprep.subr.msk.bf16.mxu0 %vm1412_vm0, %v11628_v28 }
 0x64e   : > { %v3145_v57 = vpop.xlane.xlu1 %3144 }
 0x64f   : > { %v3171_v43 = vsub.f32 %v9391_v21, %v3145_v57  ;;  %v3528_v21 = vsel %vm1412_vm0, %v11629_v23, 0 }
 0x651   : > { %6763 = vmatpush3.bf16.xpose.msra.mxu0 %v3525_v36  ;;  %v3192_v51 = vmul.f32 1.442695, %v3171_v43 }
 0x652   : > { %7047 = vmatprep.subr.msk.bf16.mxu0 %vm1412_vm0, %v11629_v23  ;;  %v3151_v40 = vpop.xlane.xlu1 %3150 }
 0x653   : > { %v3143_v48 = vpop.xlane.xlu0 %3142  ;;  %7466 = vpow2.f32 %v3192_v51  ;;  %v3174_v43 = vsub.f32 %v9395_v42, %v3151_v40 }
 0x654   : > { %v3170_v0 = vsub.f32 %v9387_v63, %v3143_v48 }
 0x656   : > { %v3190_v29 = vmul.f32 1.442695, %v3170_v0  ;;  %v3155_v20 = vpop.xlane.xlu1 %3154  ;;  %v3198_v0 = vmul.f32 1.442695, %v3174_v43 }
 0x657   : > { %v3147_v55 = vpop.xlane.xlu0 %3146 }
 0x658   : > { %7468 = vpow2.f32 %v3190_v29  ;;  %v3172_v5 = vsub.f32 %v9385_v17, %v3147_v55  ;;  %v3176_v29 = vsub.f32 %v9393_v37, %v3155_v20 }
 0x659   : > { %6765 = vmatpush3.bf16.xpose.msra.mxu0 %v3528_v21  ;;  %v3531_v21 = vsel %vm1412_vm0, %v11630_v4, 0 }
 0x65a   : > { %7048 = vmatprep.subr.msk.bf16.mxu0 %vm1412_vm0, %v11630_v4  ;;  %v3159_v57 = vpop.xlane.xlu1 %3158  ;;  %v3194_v36 = vmul.f32 1.442695, %v3172_v5  ;;  %v3202_v37 = vmul.f32 1.442695, %v3176_v29 }
 0x65b   : > { %v3149_v41 = vpop.xlane.xlu0 %3148  ;;  %v3178_v20 = vsub.f32 %v9405_v14, %v3159_v57 }
 0x65c   : > { %v3173_v63 = vsub.f32 %v9389_v59, %v3149_v41  ;;  %7470 = vpow2.f32 %v3194_v36  ;;  %v11633_v59 = vld [vmem:[#allocation50_spill] sm:$0xff] }
 0x65d   : > { %v9478_v58 = vpop.eup %7466  ;;  %v3534_v57 = vsel %vm1412_vm0, %v11633_v59, 0 }
 0x65e   : > { %v3196_v48 = vmul.f32 1.442695, %v3173_v63  ;;  %v3163_v51 = vpop.xlane.xlu1 %3162  ;;  %11631 = vst [vmem:[#allocation35_spill] sm:$0xff] %v9478_v58  ;;  %v3206_v63 = vmul.f32 1.442695, %v3178_v20 }
 0x65f   : > { %v3153_v17 = vpop.xlane.xlu0 %3152 }
 0x660   : > { %7472 = vpow2.f32 %v3196_v48  ;;  %v3175_v55 = vsub.f32 %v9399_v61, %v3153_v17  ;;  %v3180_v48 = vsub.f32 %v9403_v19, %v3163_v51 }
 0x661   : > { %6767 = vmatpush3.bf16.xpose.msra.mxu0 %v3531_v21  ;;  %7474 = vpow2.f32 %v3198_v0 }
 0x662   : > { %v9480_v42 = vpop.eup %7468  ;;  %v3200_v40 = vmul.f32 1.442695, %v3175_v55  ;;  %v9482_v41 = vpop.permute.xlu1 %3954  ;;  %7049 = vmatprep.subr.msk.bf16.mxu0 %vm1412_vm0, %v11633_v59 }
 0x663   : > { %11632 = vst [vmem:[#allocation40_spill] sm:$0xff] %v9480_v42  ;;  %v3157_v5 = vpop.xlane.xlu0 %3156  ;;  %7050 = vmatprep.subr.msk.bf16.mxu1 %vm1412_vm0, %v9482_v41  ;;  %v3248_v61 = vpack.c.bf16 %v9478_v58, %v9480_v42 }
 0x664   : > { %7476 = vpow2.f32 %v3200_v40  ;;  %v3177_v43 = vsub.f32 %v9397_v22, %v3157_v5  ;;  %v3210_v22 = vmul.f32 1.442695, %v3180_v48 }
 0x665   : > { %6742 = vmatprep.mubr.bf16.mxu0 %v3248_v61  ;;  %7478 = vpow2.f32 %v3202_v37 }
 0x666   : > { %v3204_v36 = vmul.f32 1.442695, %v3177_v43  ;;  %v9496_v29 = vpop.eup %7470 }
 0x667   : > { %v3161_v0 = vpop.xlane.xlu0 %3160  ;;  %11634 = vst [vmem:[#allocation37_spill] sm:$0xff] %v9496_v29 }
 0x668   : > { %7480 = vpow2.f32 %v3204_v36  ;;  %v3179_v14 = vsub.f32 %v9409_v31, %v3161_v0 }
 0x669   : > { %6769 = vmatpush3.bf16.xpose.msra.mxu0 %v3534_v57  ;;  %7482 = vpow2.f32 %v3206_v63  ;;  %v11644_v57 = vld [vmem:[#allocation21_spill] sm:$0xff] }
 0x66a   : > { %v9498_v17 = vpop.eup %7472  ;;  %v3208_v55 = vmul.f32 1.442695, %v3179_v14 }
 0x66b   : > { %11635 = vst [vmem:[#allocation42_spill] sm:$0xff] %v9498_v17  ;;  %v3165_v21 = vpop.xlane.xlu0 %3164  ;;  %v3249_v40 = vpack.c.bf16 %v9498_v17, %v9496_v29  ;;  %v9503_v51 = vpop.eup %7474 }
 0x66c   : > { %7484 = vpow2.f32 %v3208_v55  ;;  %v3181_v19 = vsub.f32 %v9407_v2, %v3165_v21  ;;  %11636 = vst [vmem:[#allocation44_spill] sm:$0xff] %v9503_v51  ;;  %v11645_v55 = vld [vmem:[#allocation22_spill] sm:$0xff]  ;;  %v11647_v21 = vld [vmem:[#allocation25_spill] sm:$0xff] }
 0x66d   : > { %6743 = vmatmul.mubr.bf16.gmra.mrb[68].mxu0 %v3249_v40  ;;  %7486 = vpow2.f32 %v3210_v22  ;;  %v11646_v22 = vld [vmem:[#allocation24_spill] sm:$0xff]  ;;  %v11648_v40 = vld [vmem:[#allocation27_spill] sm:$0xff] }
 0x66e   : > { %v9505_v31 = vpop.eup %7476  ;;  %v3212_v37 = vmul.f32 1.442695, %v3181_v19  ;;  %v11649_v19 = vld [vmem:[#allocation28_spill] sm:$0xff] }
 0x66f   : > { %11637 = vst [vmem:[#allocation47_spill] sm:$0xff] %v9505_v31  ;;  %v3250_v20 = vpack.c.bf16 %v9505_v31, %v9503_v51  ;;  %v9509_v5 = vpop.eup %7478  ;;  %v9646_v31 = vpop.permute.xlu1 %3958 }
 0x670   : > { %7488 = vpow2.f32 %v3212_v37  ;;  %11638 = vst [vmem:[#allocation49_spill] sm:$0xff] %v9509_v5  ;;  %v11650_v37 = vld [vmem:[#allocation30_spill] sm:$0xff]  ;;  %v9650_v7 = vpop.permute.xlu0 %3956 }
 0x671   : > { %6746 = vmatprep.mubr.bf16.mxu0 %v3250_v20  ;;  %v11651_v20 = vld [vmem:[#allocation33_spill] sm:$0xff] }
 0x672   : > { %v9511_v61 = vpop.eup %7480 }
 0x673   : > { %11639 = vst [vmem:[#allocation50_spill] sm:$0xff] %v9511_v61  ;;  %v3251_v43 = vpack.c.bf16 %v9511_v61, %v9509_v5  ;;  %v9515_v2 = vpop.eup %7482 }
 0x674   : > { %11640 = vst [vmem:[#allocation128_spill] sm:$0xff] %v9515_v2 }
 0x675   : > { %6747 = vmatmul.mubr.bf16.gmra.mrb[72].mxu0 %v3251_v43 }
 0x676   : > { %v9517_v36 = vpop.eup %7484 }
 0x677   : > { %11641 = vst [vmem:[#allocation129_spill] sm:$0xff] %v9517_v36  ;;  %v3252_v63 = vpack.c.bf16 %v9517_v36, %v9515_v2  ;;  %v9521_v48 = vpop.eup %7486 }
 0x678   : > { %11642 = vst [vmem:[#allocation130_spill] sm:$0xff] %v9521_v48 }
 0x679   : > { %6750 = vmatprep.mubr.bf16.mxu0 %v3252_v63 }
 0x67a   : > { %v9523_v0 = vpop.eup %7488 }
 0x67b   : > { %11643 = vst [vmem:[#allocation131_spill] sm:$0xff] %v9523_v0  ;;  %v3253_v14 = vpack.c.bf16 %v9523_v0, %v9521_v48 }
 0x67d   : > { %6751 = vmatmul.mubr.bf16.gmra.mrb[76].mxu0 %v3253_v14 }
 0x67e   : > { %6770 = vmatprep.mubr.msk.bf16.mxu0 %vm1412_vm0, %v11644_v57 }
 0x685   : > { %6771 = vmatmul.mubr.msk.bf16.vlgmr.msra.gmra.mrb[80].mxu0 %vm1412_vm0, %v11645_v55 }
 0x686   : > { %6774 = vmatprep.mubr.msk.bf16.mxu0 %vm1412_vm0, %v11646_v22 }
 0x68d   : > { %6775 = vmatmul.mubr.msk.bf16.gmra.mrb[84].mxu0 %vm1412_vm0, %v11647_v21 }
 0x68e   : > { %6778 = vmatprep.mubr.msk.bf16.mxu0 %vm1412_vm0, %v11648_v40 }
 0x695   : > { %6779 = vmatmul.mubr.msk.bf16.gmra.mrb[88].mxu0 %vm1412_vm0, %v11649_v19 }
 0x696   : > { %6782 = vmatprep.mubr.msk.bf16.mxu0 %vm1412_vm0, %v11650_v37 }
 0x69d   : > { %6783 = vmatmul.mubr.msk.bf16.gmra.mrb[92].mxu0 %vm1412_vm0, %v11651_v20 }
 0x703   : > { %v9543_v43 = vpop.f32.mrb[64].mxu0 }
 0x704   : > { %11652 = vst [vmem:[#allocation21_spill] sm:$0xff] %v9543_v43  ;;  %v9545_v63 = vpop.f32.mrb[65].mxu0 }
 0x705   : > { %11653 = vst [vmem:[#allocation22_spill] sm:$0xff] %v9545_v63  ;;  %v9547_v14 = vpop.f32.mrb[66].mxu0 }
 0x706   : > { %11654 = vst [vmem:[#allocation24_spill] sm:$0xff] %v9547_v14  ;;  %v9549_v48 = vpop.f32.mrb[67].mxu0 }
 0x707   : > { %11655 = vst [vmem:[#allocation25_spill] sm:$0xff] %v9549_v48 }
 0x740   : > { %v9551_v2 = vpop.f32.mrb[68].mxu0 }
 0x741   : > { %11656 = vst [vmem:[#allocation27_spill] sm:$0xff] %v9551_v2  ;;  %v9553_v0 = vpop.f32.mrb[69].mxu0 }
 0x742   : > { %11657 = vst [vmem:[#allocation28_spill] sm:$0xff] %v9553_v0  ;;  %v9555_v5 = vpop.f32.mrb[70].mxu0 }
 0x743   : > { %11658 = vst [vmem:[#allocation30_spill] sm:$0xff] %v9555_v5  ;;  %v9557_v51 = vpop.f32.mrb[71].mxu0 }
 0x744   : > { %11659 = vst [vmem:[#allocation33_spill] sm:$0xff] %v9557_v51 }
 0x748   : > { %v9559_v36 = vpop.f32.mrb[72].mxu0 }
 0x749   : > { %11660 = vst [vmem:[#allocation132_spill] sm:$0xff] %v9559_v36  ;;  %v9561_v29 = vpop.f32.mrb[73].mxu0 }
 0x74a   : > { %11661 = vst [vmem:[#allocation133_spill] sm:$0xff] %v9561_v29  ;;  %v9563_v61 = vpop.f32.mrb[74].mxu0 }
 0x74b   : > { %11662 = vst [vmem:[#allocation134_spill] sm:$0xff] %v9563_v61  ;;  %v9565_v43 = vpop.f32.mrb[75].mxu0 }
 0x74c   : > { %11663 = vst [vmem:[#allocation135_spill] sm:$0xff] %v9565_v43 }
 0x750   : > { %v9567_v63 = vpop.f32.mrb[76].mxu0 }
 0x751   : > { %11664 = vst [vmem:[#allocation136_spill] sm:$0xff] %v9567_v63  ;;  %v9569_v14 = vpop.f32.mrb[77].mxu0 }
 0x752   : > { %11665 = vst [vmem:[#allocation137_spill] sm:$0xff] %v9569_v14  ;;  %v9571_v48 = vpop.f32.mrb[78].mxu0 }
 0x753   : > { %11666 = vst [vmem:[#allocation138_spill] sm:$0xff] %v9571_v48  ;;  %v9573_v2 = vpop.f32.mrb[79].mxu0 }
 0x754   : > { %11667 = vst [vmem:[#allocation139_spill] sm:$0xff] %v9573_v2 }
 0x758   : > { %v9575_v0 = vpop.f32.mrb[80].mxu0 }
 0x759   : > { %3637 = vmax.xlane.f32.xlu1 %v9575_v0  ;;  %v3570_v5 = vpop.f32.mrb[81].mxu0 }
 0x75a   : > { %v6773_v36 = vpop.f32.mrb[82].mxu0 }
 0x75b   : > { %3639 = vmax.xlane.f32.xlu0 %v6773_v36  ;;  %v3573_v29 = vpop.f32.mrb[83].mxu0 }
 0x75d   : > { %3633 = vmax.xlane.f32.xlu1 %v3570_v5 }
 0x75f   : > { %3635 = vmax.xlane.f32.xlu0 %v3573_v29 }
 0x760   : > { %v9578_v61 = vpop.f32.mrb[84].mxu0 }
 0x761   : > { %3645 = vmax.xlane.f32.xlu1 %v9578_v61  ;;  %v9581_v63 = vpop.f32.mrb[85].mxu0 }
 0x762   : > { %v9583_v14 = vpop.f32.mrb[86].mxu0 }
 0x763   : > { %3641 = vmax.xlane.f32.xlu0 %v9581_v63  ;;  %v9586_v48 = vpop.f32.mrb[87].mxu0 }
 0x767   : > { %3647 = vmax.xlane.f32.xlu0 %v9583_v14 }
 0x768   : > { %v9589_v2 = vpop.f32.mrb[88].mxu0 }
 0x769   : > { %v9591_v43 = vpop.f32.mrb[89].mxu0 }
 0x76a   : > { %3649 = vmax.xlane.f32.xlu1 %v9591_v43  ;;  %v9594_v51 = vpop.f32.mrb[90].mxu0 }
 0x76b   : > { %3643 = vmax.xlane.f32.xlu0 %v9586_v48  ;;  %v9597_v62 = vpop.f32.mrb[91].mxu0 }
 0x76e   : > { %3651 = vmax.xlane.f32.xlu1 %v9597_v62 }
 0x76f   : > { %3653 = vmax.xlane.f32.xlu0 %v9589_v2 }
 0x770   : > { %v9601_v18 = vpop.f32.mrb[92].mxu0 }
 0x771   : > { %v9603_v3 = vpop.f32.mrb[93].mxu0 }
 0x772   : > { %v9605_v9 = vpop.f32.mrb[94].mxu0 }
 0x773   : > { %3655 = vmax.xlane.f32.xlu0 %v9594_v51  ;;  %v9608_v42 = vpop.f32.mrb[95].mxu0 }
 0x777   : > { %3661 = vmax.xlane.f32.xlu0 %v9601_v18 }
 0x77b   : > { %3657 = vmax.xlane.f32.xlu0 %v9603_v3 }
 0x77f   : > { %3960 = vrot.lane.b32.xlu1 %v11627_v46, %s8101_s27 }
 0x791   : > { %3962 = vrot.lane.b32.xlu0 %v11628_v28, %s8101_s27 }
 0x795   : > { %3964 = vrot.lane.b32.xlu0 %v11629_v23, %s8101_s27 }
 0x7a3   : > { %3663 = vmax.xlane.f32.xlu1 %v9605_v9 }
 0x7b4   : > { %3932 = vrot.lane.b32.xlu1 %v11645_v55, %s8101_s27  ;;  %3659 = vmax.xlane.f32.xlu0 %v9608_v42 }
 0x7b8   : > { %3942 = vrot.lane.b32.xlu1 %v11650_v37, %s8101_s27 }
 0x7bc   : > { %4243 = vrot.lane.b32.xlu1 %v11575_v32, %s8101_s27 }
 0x7c0   : > { %4249 = vrot.lane.b32.xlu1 %v11579_v15, %s8101_s27 }
 0x7c4   : > { %4251 = vrot.lane.b32.xlu1 %v11580_v47, %s8101_s27 }
 0x7c8   : > { %4255 = vrot.lane.b32.xlu1 %v11582_v49, %s8101_s27 }
 0x7ca   : > { %3966 = vrot.lane.b32.xlu0 %v11630_v4, %s8101_s27 }
 0x7cc   : > { %4500 = vrot.lane.b32.xlu1 %v11622_v24, %s8102_s29 }
 0x7ce   : > { %3968 = vrot.lane.b32.xlu0 %v11633_v59, %s8101_s27 }
 0x7d2   : > { %3930 = vrot.lane.b32.xlu0 %v11644_v57, %s8101_s27 }
 0x7d6   : > { %3934 = vrot.lane.b32.xlu0 %v11646_v22, %s8101_s27 }
 0x7da   : > { %3936 = vrot.lane.b32.xlu0 %v11647_v21, %s8101_s27 }
 0x7de   : > { %3938 = vrot.lane.b32.xlu0 %v11648_v40, %s8101_s27 }
 0x7e2   : > { %3940 = vrot.lane.b32.xlu0 %v11649_v19, %s8101_s27 }
 0x7e6   : > { %v3638_v39 = vpop.xlane.xlu1 %3637  ;;  %3944 = vrot.lane.b32.xlu0 %v11651_v20, %s8101_s27 }
 0x7e7   : > { %v3667_v50 = vsub.f32 %v9575_v0, %v3638_v39 }
 0x7e8   : > { %v3640_v12 = vpop.xlane.xlu0 %3639 }
 0x7e9   : > { %v3668_v33 = vsub.f32 %v6773_v36, %v3640_v12  ;;  %v3685_v54 = vmul.f32 1.442695, %v3667_v50 }
 0x7ea   : > { %v3634_v17 = vpop.xlane.xlu1 %3633  ;;  %4245 = vrot.lane.b32.xlu0 %v11577_v27, %s8101_s27 }
 0x7eb   : > { %v3687_v44 = vmul.f32 1.442695, %v3668_v33  ;;  %v3665_v25 = vsub.f32 %v3570_v5, %v3634_v17 }
 0x7ec   : > { %v3636_v6 = vpop.xlane.xlu0 %3635 }
 0x7ed   : > { %v3681_v60 = vmul.f32 1.442695, %v3665_v25  ;;  %v3666_v8 = vsub.f32 %v3573_v29, %v3636_v6  ;;  %7490 = vpow2.f32 %v3687_v44 }
 0x7ee   : > { %4247 = vrot.lane.b32.xlu0 %v11578_v35, %s8101_s27  ;;  %v3646_v12 = vpop.xlane.xlu1 %3645 }
 0x7ef   : > { %v3683_v58 = vmul.f32 1.442695, %v3666_v8  ;;  %7492 = vpow2.f32 %v3681_v60  ;;  %v3671_v6 = vsub.f32 %v9578_v61, %v3646_v12 }
 0x7f0   : > { %v3642_v38 = vpop.xlane.xlu0 %3641 }
 0x7f1   : > { %7494 = vpow2.f32 %v3683_v58  ;;  %v3669_v33 = vsub.f32 %v9581_v63, %v3642_v38  ;;  %v3693_v38 = vmul.f32 1.442695, %v3671_v6 }
 0x7f2   : > { %7496 = vpow2.f32 %v3685_v54  ;;  %4253 = vrot.lane.b32.xlu0 %v11581_v26, %s8101_s27 }
 0x7f3   : > { %v3689_v44 = vmul.f32 1.442695, %v3669_v33 }
 0x7f4   : > { %v3648_v39 = vpop.xlane.xlu0 %3647 }
 0x7f5   : > { %v3672_v25 = vsub.f32 %v9583_v14, %v3648_v39  ;;  %7498 = vpow2.f32 %v3689_v44 }
 0x7f6   : > { %4257 = vrot.lane.b32.xlu0 %v11583_v56, %s8101_s27 }
 0x7f7   : > { %v3650_v8 = vpop.xlane.xlu1 %3649  ;;  %v3695_v60 = vmul.f32 1.442695, %v3672_v25  ;;  %v9667_v50 = vpop.eup %7490 }
 0x7f8   : > { %v3673_v58 = vsub.f32 %v9591_v43, %v3650_v8  ;;  %v3644_v54 = vpop.xlane.xlu0 %3643 }
 0x7f9   : > { %v3670_v29 = vsub.f32 %v9586_v48, %v3644_v54  ;;  %v9670_v17 = vpop.eup %7492  ;;  %7500 = vpow2.f32 %v3695_v60 }
 0x7fa   : > { %4502 = vrot.lane.b32.xlu0 %v11624_v53, %s8102_s29  ;;  %v3697_v61 = vmul.f32 1.442695, %v3673_v58 }
 0x7fb   : > { %v9674_v5 = vpop.eup %7494  ;;  %v3691_v36 = vmul.f32 1.442695, %v3670_v29  ;;  %v3652_v0 = vpop.xlane.xlu1 %3651 }
 0x7fc   : > { %v9676_v63 = vpop.eup %7496  ;;  %v3674_v43 = vsub.f32 %v9597_v62, %v3652_v0  ;;  %v3654_v14 = vpop.xlane.xlu0 %3653  ;;  %v3745_v48 = vpack.c.bf16 %v9674_v5, %v9670_v17  ;;  %v3995_v62 = vsel %vm1412_vm0, %v9482_v41, 0  ;;  %v3998_v41 = vsel %vm1412_vm0, %v9650_v7, 0 }
 0x7fd   : > { %7502 = vpow2.f32 %v3691_v36  ;;  %v3675_v12 = vsub.f32 %v9589_v2, %v3654_v14  ;;  %v3746_v33 = vpack.c.bf16 %v9667_v50, %v9676_v63  ;;  %v4001_v14 = vsel %vm1412_vm0, %v9646_v31, 0 }
 0x7fe   : > { %7504 = vpow2.f32 %v3693_v38  ;;  %v3699_v39 = vmul.f32 1.442695, %v3674_v43  ;;  %6802 = vmatprep.mubr.bf16.mxu1 %v3745_v48  ;;  %4504 = vrot.lane.b32.xlu0 %v11623_v10, %s8102_s29 }
 0x7ff   : > { %7506 = vpow2.f32 %v3697_v61  ;;  %6803 = vmatmul.mubr.bf16.vlgmr.msra.gmra.mrb[144].mxu1 %v3746_v33  ;;  %v3701_v25 = vmul.f32 1.442695, %v3675_v12  ;;  %v9691_v8 = vpop.eup %7498  ;;  %v3961_v48 = vpop.permute.xlu1 %3960 }
 0x800   : > { %7508 = vpow2.f32 %v3699_v39  ;;  %6819 = vmatpush3.bf16.xpose.msra.mxu1 %v3995_v62  ;;  %v3656_v6 = vpop.xlane.xlu0 %3655  ;;  %v4004_v39 = vsel %vm1412_vm0, %v3961_v48, 0 }
 0x801   : > { %7051 = vmatprep.subr.msk.bf16.mxu1 %vm1412_vm0, %v9650_v7  ;;  %v3676_v2 = vsub.f32 %v9594_v51, %v3656_v6  ;;  %7510 = vpow2.f32 %v3701_v25 }
 0x803   : > { %v3703_v44 = vmul.f32 1.442695, %v3676_v2  ;;  %v9693_v60 = vpop.eup %7500 }
 0x804   : > { %v3662_v36 = vpop.xlane.xlu0 %3661 }
 0x805   : > { %7512 = vpow2.f32 %v3703_v44 }
 0x807   : > { %v9695_v58 = vpop.eup %7502 }
 0x808   : > { %v9699_v54 = vpop.eup %7504  ;;  %6821 = vmatpush3.bf16.xpose.msra.mxu1 %v3998_v41  ;;  %v3747_v29 = vpack.c.bf16 %v9695_v58, %v9691_v8  ;;  %v3658_v33 = vpop.xlane.xlu0 %3657 }
 0x809   : > { %v9703_v38 = vpop.eup %7506  ;;  %7052 = vmatprep.subr.msk.bf16.mxu1 %vm1412_vm0, %v9646_v31  ;;  %v3748_v51 = vpack.c.bf16 %v9693_v60, %v9699_v54 }
 0x80a   : > { %11668 = vst [vmem:[#allocation140_spill] sm:$0xff] %v9703_v38  ;;  %v9709_v61 = vpop.eup %7508  ;;  %6806 = vmatprep.mubr.bf16.mxu1 %v3747_v29  ;;  %v3677_v29 = vsub.f32 %v9603_v3, %v3658_v33 }
 0x80b   : > { %11669 = vst [vmem:[#allocation141_spill] sm:$0xff] %v9709_v61  ;;  %6807 = vmatmul.mubr.bf16.gmra.mrb[148].mxu1 %v3748_v51  ;;  %v3749_v7 = vpack.c.bf16 %v9709_v61, %v9703_v38  ;;  %v9713_v0 = vpop.eup %7510 }
 0x80c   : > { %11670 = vst [vmem:[#allocation142_spill] sm:$0xff] %v9713_v0  ;;  %v3963_v62 = vpop.permute.xlu0 %3962 }
 0x80d   : > { %6810 = vmatprep.mubr.bf16.mxu1 %v3749_v7  ;;  %v4007_v25 = vsel %vm1412_vm0, %v3963_v62, 0 }
 0x80f   : > { %v9715_v43 = vpop.eup %7512 }
 0x810   : > { %11671 = vst [vmem:[#allocation143_spill] sm:$0xff] %v9715_v43  ;;  %6823 = vmatpush3.bf16.xpose.msra.mxu1 %v4001_v14  ;;  %v3750_v12 = vpack.c.bf16 %v9715_v43, %v9713_v0  ;;  %v3965_v6 = vpop.permute.xlu0 %3964  ;;  %v3679_v14 = vsub.f32 %v9601_v18, %v3662_v36 }
 0x811   : > { %7053 = vmatprep.subr.msk.bf16.mxu1 %vm1412_vm0, %v3961_v48  ;;  %v4010_v31 = vsel %vm1412_vm0, %v3965_v6, 0  ;;  %v3705_v48 = vmul.f32 1.442695, %v3677_v29 }
 0x813   : > { %6811 = vmatmul.mubr.bf16.gmra.mrb[152].mxu1 %v3750_v12  ;;  %7514 = vpow2.f32 %v3705_v48 }
 0x818   : > { %6825 = vmatpush3.bf16.xpose.msra.mxu1 %v4004_v39 }
 0x819   : > { %7054 = vmatprep.subr.msk.bf16.mxu1 %vm1412_vm0, %v3963_v62 }
 0x81d   : > { %v9734_v36 = vpop.eup %7514 }
 0x81e   : > { %11672 = vst [vmem:[#allocation144_spill] sm:$0xff] %v9734_v36 }
 0x820   : > { %6827 = vmatpush3.bf16.xpose.msra.mxu1 %v4007_v25  ;;  %v3709_v25 = vmul.f32 1.442695, %v3679_v14 }
 0x821   : > { %7055 = vmatprep.subr.msk.bf16.mxu1 %vm1412_vm0, %v3965_v6 }
 0x828   : > { %6829 = vmatpush3.bf16.xpose.msra.mxu1 %v4010_v31 }
 0x830   : > { %v3664_v2 = vpop.xlane.xlu1 %3663 }
 0x831   : > { %v3680_v7 = vsub.f32 %v9605_v9, %v3664_v2 }
 0x833   : > { %v3711_v12 = vmul.f32 1.442695, %v3680_v7 }
 0x834   : > { %v3933_v44 = vpop.permute.xlu1 %3932 }
 0x835   : > { %7516 = vpow2.f32 %v3711_v12 }
 0x838   : > { %v3943_v41 = vpop.permute.xlu1 %3942 }
 0x83c   : > { %v4244_v51 = vpop.permute.xlu1 %4243 }
 0x83d   : > { %6850 = vmatprep.subr.bf16.mxu0 %v4244_v51 }
 0x83e   : > { %6851 = vmatpush3.bf16.msra.mxu0 %v4244_v51 }
 0x83f   : > { %v9737_v33 = vpop.eup %7516 }
 0x840   : > { %11673 = vst [vmem:[#allocation145_spill] sm:$0xff] %v9737_v33 }
 0x841   : > { %v3660_v39 = vpop.xlane.xlu0 %3659 }
 0x842   : > { %v3678_v62 = vsub.f32 %v9608_v42, %v3660_v39 }
 0x844   : > { %v3707_v6 = vmul.f32 1.442695, %v3678_v62 }
 0x845   : > { %v3967_v31 = vpop.permute.xlu0 %3966 }
 0x846   : > { %7518 = vpow2.f32 %v3707_v6  ;;  %7056 = vmatprep.subr.msk.bf16.mxu1 %vm1412_vm0, %v3967_v31  ;;  %v4013_v3 = vsel %vm1412_vm0, %v3967_v31, 0  ;;  %v4250_v6 = vpop.permute.xlu1 %4249 }
 0x847   : > { %7520 = vpow2.f32 %v3709_v25  ;;  %6831 = vmatpush3.bf16.xpose.msra.mxu1 %v4013_v3 }
 0x849   : > { %v3969_v9 = vpop.permute.xlu0 %3968 }
 0x84a   : > { %7057 = vmatprep.subr.msk.bf16.mxu1 %vm1412_vm0, %v3969_v9  ;;  %v4016_v42 = vsel %vm1412_vm0, %v3969_v9, 0 }
 0x84d   : > { %v3931_v18 = vpop.permute.xlu0 %3930 }
 0x84f   : > { %6833 = vmatpush3.bf16.xpose.msra.mxu1 %v4016_v42 }
 0x850   : > { %v9739_v2 = vpop.eup %7518 }
 0x851   : > { %11674 = vst [vmem:[#allocation146_spill] sm:$0xff] %v9739_v2  ;;  %v9741_v29 = vpop.eup %7520  ;;  %v3935_v51 = vpop.permute.xlu0 %3934  ;;  %v3751_v7 = vpack.c.bf16 %v9739_v2, %v9734_v36 }
 0x852   : > { %11675 = vst [vmem:[#allocation147_spill] sm:$0xff] %v9741_v29  ;;  %v3752_v14 = vpack.c.bf16 %v9737_v33, %v9741_v29 }
 0x853   : > { %6814 = vmatprep.mubr.bf16.mxu1 %v3751_v7 }
 0x854   : > { %6815 = vmatmul.mubr.bf16.gmra.mrb[156].mxu1 %v3752_v14 }
 0x855   : > { %6834 = vmatprep.mubr.msk.bf16.mxu1 %vm1412_vm0, %v3931_v18  ;;  %v3937_v48 = vpop.permute.xlu0 %3936 }
 0x859   : > { %v3939_v12 = vpop.permute.xlu0 %3938 }
 0x85c   : > { %6835 = vmatmul.mubr.msk.bf16.vlgmr.msra.gmra.mrb[160].mxu1 %vm1412_vm0, %v3933_v44  ;;  %v4252_v44 = vpop.permute.xlu1 %4251 }
 0x85d   : > { %6838 = vmatprep.mubr.msk.bf16.mxu1 %vm1412_vm0, %v3935_v51  ;;  %v3941_v39 = vpop.permute.xlu0 %3940 }
 0x860   : > { %v4256_v9 = vpop.permute.xlu1 %4255 }
 0x861   : > { %v3945_v62 = vpop.permute.xlu0 %3944 }
 0x864   : > { %6839 = vmatmul.mubr.msk.bf16.gmra.mrb[164].mxu1 %vm1412_vm0, %v3937_v48  ;;  %v9755_v42 = vpop.permute.xlu1 %4500 }
 0x865   : > { %6842 = vmatprep.mubr.msk.bf16.mxu1 %vm1412_vm0, %v3939_v12  ;;  %v4246_v25 = vpop.permute.xlu0 %4245 }
 0x866   : > { %6852 = vmatprep.subr.bf16.mxu0 %v4246_v25 }
 0x867   : > { %6853 = vmatpush3.bf16.msra.mxu0 %v4246_v25 }
 0x869   : > { %v4248_v31 = vpop.permute.xlu0 %4247 }
 0x86a   : > { %6854 = vmatprep.subr.bf16.mxu0 %v4248_v31 }
 0x86b   : > { %6855 = vmatpush3.bf16.msra.mxu0 %v4248_v31 }
 0x86c   : > { %6843 = vmatmul.mubr.msk.bf16.gmra.mrb[168].mxu1 %vm1412_vm0, %v3941_v39  ;;  %6856 = vmatprep.subr.bf16.mxu0 %v4250_v6 }
 0x86d   : > { %6846 = vmatprep.mubr.msk.bf16.mxu1 %vm1412_vm0, %v3943_v41  ;;  %v4254_v3 = vpop.permute.xlu0 %4253 }
 0x86f   : > { %6857 = vmatpush3.bf16.msra.mxu0 %v4250_v6 }
 0x870   : > { %6858 = vmatprep.subr.bf16.mxu0 %v4252_v44 }
 0x871   : > { %v4258_v18 = vpop.permute.xlu0 %4257 }
 0x873   : > { %6859 = vmatpush3.bf16.msra.mxu0 %v4252_v44 }
 0x874   : > { %6847 = vmatmul.mubr.msk.bf16.gmra.mrb[172].mxu1 %vm1412_vm0, %v3945_v62  ;;  %6860 = vmatprep.subr.bf16.mxu0 %v4254_v3 }
 0x877   : > { %6861 = vmatpush3.bf16.msra.mxu0 %v4254_v3 }
 0x878   : > { %6862 = vmatprep.subr.bf16.mxu0 %v4256_v9 }
 0x87b   : > { %6863 = vmatpush3.bf16.msra.mxu0 %v4256_v9 }
 0x87c   : > { %6864 = vmatprep.subr.bf16.mxu0 %v4258_v18 }
 0x87f   : > { %6865 = vmatpush3.bf16.msra.mxu0 %v4258_v18 }
 0x880   : > { %7058 = vmatprep.subr.msk.bf16.mxu0 %vm1412_vm0, %v9755_v42 }
 0x8d2   : > { %v9759_v41 = vpop.f32.mrb[144].mxu1 }
 0x8d3   : > { %11676 = vst [vmem:[#allocation148_spill] sm:$0xff] %v9759_v41  ;;  %v9761_v51 = vpop.f32.mrb[145].mxu1 }
 0x8d4   : > { %11677 = vst [vmem:[#allocation149_spill] sm:$0xff] %v9761_v51  ;;  %v9763_v7 = vpop.f32.mrb[146].mxu1 }
 0x8d5   : > { %11678 = vst [vmem:[#allocation150_spill] sm:$0xff] %v9763_v7  ;;  %v9765_v14 = vpop.f32.mrb[147].mxu1 }
 0x8d6   : > { %11679 = vst [vmem:[#allocation151_spill] sm:$0xff] %v9765_v14 }
 0x8de   : > { %v9767_v48 = vpop.f32.mrb[148].mxu1 }
 0x8df   : > { %11680 = vst [vmem:[#allocation152_spill] sm:$0xff] %v9767_v48  ;;  %v9769_v12 = vpop.f32.mrb[149].mxu1 }
 0x8e0   : > { %11681 = vst [vmem:[#allocation153_spill] sm:$0xff] %v9769_v12  ;;  %v9771_v39 = vpop.f32.mrb[150].mxu1 }
 0x8e1   : > { %11682 = vst [vmem:[#allocation154_spill] sm:$0xff] %v9771_v39  ;;  %v9773_v62 = vpop.f32.mrb[151].mxu1 }
 0x8e2   : > { %11683 = vst [vmem:[#allocation155_spill] sm:$0xff] %v9773_v62 }
 0x8e6   : > { %v9775_v25 = vpop.f32.mrb[152].mxu1 }
 0x8e7   : > { %11684 = vst [vmem:[#allocation156_spill] sm:$0xff] %v9775_v25  ;;  %v9777_v6 = vpop.f32.mrb[153].mxu1 }
 0x8e8   : > { %11685 = vst [vmem:[#allocation157_spill] sm:$0xff] %v9777_v6  ;;  %v9779_v31 = vpop.f32.mrb[154].mxu1 }
 0x8e9   : > { %11686 = vst [vmem:[#allocation158_spill] sm:$0xff] %v9779_v31  ;;  %v9781_v44 = vpop.f32.mrb[155].mxu1 }
 0x8ea   : > { %11687 = vst [vmem:[#allocation159_spill] sm:$0xff] %v9781_v44 }
 0x927   : > { %v9783_v3 = vpop.f32.mrb[156].mxu1 }
 0x928   : > { %11688 = vst [vmem:[#allocation160_spill] sm:$0xff] %v9783_v3  ;;  %v9785_v9 = vpop.f32.mrb[157].mxu1 }
 0x929   : > { %11689 = vst [vmem:[#allocation161_spill] sm:$0xff] %v9785_v9  ;;  %v9787_v18 = vpop.f32.mrb[158].mxu1 }
 0x92a   : > { %11690 = vst [vmem:[#allocation162_spill] sm:$0xff] %v9787_v18  ;;  %v9789_v29 = vpop.f32.mrb[159].mxu1 }
 0x92b   : > { %11691 = vst [vmem:[#allocation163_spill] sm:$0xff] %v9789_v29 }
 0x92f   : > { %v9791_v33 = vpop.f32.mrb[160].mxu1 }
 0x930   : > { %4119 = vmax.xlane.f32.xlu0 %v9791_v33  ;;  %v9794_v36 = vpop.f32.mrb[161].mxu1 }
 0x931   : > { %4115 = vmax.xlane.f32.xlu1 %v9794_v36  ;;  %v9797_v25 = vpop.f32.mrb[162].mxu1 }
 0x932   : > { %v9799_v31 = vpop.f32.mrb[163].mxu1 }
 0x935   : > { %4121 = vmax.xlane.f32.xlu1 %v9797_v25 }
 0x937   : > { %v9802_v3 = vpop.f32.mrb[164].mxu1 }
 0x938   : > { %v9804_v9 = vpop.f32.mrb[165].mxu1 }
 0x939   : > { %v9806_v18 = vpop.f32.mrb[166].mxu1 }
 0x93a   : > { %v9808_v29 = vpop.f32.mrb[167].mxu1 }
 0x93f   : > { %v9810_v0 = vpop.f32.mrb[168].mxu1 }
 0x940   : > { %v9812_v2 = vpop.f32.mrb[169].mxu1 }
 0x941   : > { %v9814_v43 = vpop.f32.mrb[170].mxu1 }
 0x942   : > { %v9816_v44 = vpop.f32.mrb[171].mxu1 }
 0x946   : > { %4508 = vrot.lane.b32.xlu0 %v11628_v28, %s8102_s29  ;;  %4506 = vrot.lane.b32.xlu1 %v11627_v46, %s8102_s29 }
 0x947   : > { %v9822_v6 = vpop.f32.mrb[172].mxu1 }
 0x948   : > { %v9824_v48 = vpop.f32.mrb[173].mxu1 }
 0x949   : > { %v9826_v39 = vpop.f32.mrb[174].mxu1 }
 0x94a   : > { %v9828_v12 = vpop.f32.mrb[175].mxu1 }
 0x965   : > { %4117 = vmax.xlane.f32.xlu0 %v9799_v31 }
 0x969   : > { %4123 = vmax.xlane.f32.xlu0 %v9804_v9 }
 0x96a   : > { %4127 = vmax.xlane.f32.xlu1 %v9802_v3 }
 0x96e   : > { %4129 = vmax.xlane.f32.xlu1 %v9806_v18 }
 0x972   : > { %4125 = vmax.xlane.f32.xlu1 %v9808_v29 }
 0x976   : > { %4135 = vmax.xlane.f32.xlu1 %v9810_v0 }
 0x97a   : > { %4131 = vmax.xlane.f32.xlu1 %v9812_v2 }
 0x97e   : > { %4133 = vmax.xlane.f32.xlu1 %v9816_v44 }
 0x97f   : > { %4510 = vrot.lane.b32.xlu0 %v11629_v23, %s8102_s29 }
 0x982   : > { %4143 = vmax.xlane.f32.xlu1 %v9822_v6 }
 0x986   : > { %4139 = vmax.xlane.f32.xlu1 %v9824_v48 }
 0x98a   : > { %4141 = vmax.xlane.f32.xlu1 %v9828_v12 }
 0x99b   : > { %4514 = vrot.lane.b32.xlu1 %v11633_v59, %s8102_s29 }
 0x99e   : > { %4137 = vmax.xlane.f32.xlu0 %v9814_v43 }
 0x99f   : > { %4484 = vrot.lane.b32.xlu1 %v11648_v40, %s8102_s29 }
 0x9a2   : > { %4145 = vmax.xlane.f32.xlu0 %v9826_v39 }
 0x9a3   : > { %4488 = vrot.lane.b32.xlu1 %v11650_v37, %s8102_s29 }
 0x9a7   : > { %4789 = vrot.lane.b32.xlu1 %v11575_v32, %s8102_s29 }
 0x9ab   : > { %4795 = vrot.lane.b32.xlu1 %v11579_v15, %s8102_s29 }
 0x9af   : > { %4797 = vrot.lane.b32.xlu1 %v11580_v47, %s8102_s29 }
 0x9b3   : > { %4801 = vrot.lane.b32.xlu1 %v11582_v49, %s8102_s29 }
 0x9b7   : > { %5046 = vrot.lane.b32.xlu1 %v11622_v24, %s8103_s20  ;;  %v9893_v24 = vpop.permute.xlu0 %4502 }
 0x9b8   : > { %4512 = vrot.lane.b32.xlu0 %v11630_v4, %s8102_s29 }
 0x9bb   : > { %5052 = vrot.lane.b32.xlu1 %v11627_v46, %s8103_s20  ;;  %v9897_v46 = vpop.permute.xlu0 %4504 }
 0x9bc   : > { %4476 = vrot.lane.b32.xlu0 %v11644_v57, %s8102_s29 }
 0x9bf   : > { %5060 = vrot.lane.b32.xlu1 %v11633_v59, %s8103_s20  ;;  %v4116_v59 = vpop.xlane.xlu1 %4115 }
 0x9c0   : > { %4478 = vrot.lane.b32.xlu0 %v11645_v55, %s8102_s29 }
 0x9c3   : > { %5030 = vrot.lane.b32.xlu1 %v11648_v40, %s8103_s20  ;;  %v4120_v40 = vpop.xlane.xlu0 %4119 }
 0x9c4   : > { %4480 = vrot.lane.b32.xlu0 %v11646_v22, %s8102_s29  ;;  %v4149_v41 = vsub.f32 %v9791_v33, %v4120_v40 }
 0x9c6   : > { %v4167_v61 = vmul.f32 1.442695, %v4149_v41 }
 0x9c7   : > { %5034 = vrot.lane.b32.xlu1 %v11650_v37, %s8103_s20  ;;  %v9906_v37 = vpop.permute.xlu0 %4508 }
 0x9c8   : > { %4482 = vrot.lane.b32.xlu0 %v11647_v21, %s8102_s29 }
 0x9cb   : > { %5337 = vrot.lane.b32.xlu1 %v11577_v27, %s8103_s20 }
 0x9cc   : > { %4486 = vrot.lane.b32.xlu0 %v11649_v19, %s8102_s29 }
 0x9cf   : > { %5345 = vrot.lane.b32.xlu1 %v11581_v26, %s8103_s20 }
 0x9d0   : > { %4490 = vrot.lane.b32.xlu0 %v11651_v20, %s8102_s29 }
 0x9d4   : > { %4791 = vrot.lane.b32.xlu0 %v11577_v27, %s8102_s29  ;;  %v4122_v27 = vpop.xlane.xlu1 %4121 }
 0x9d5   : > { %v4150_v62 = vsub.f32 %v9797_v25, %v4122_v27 }
 0x9d7   : > { %v4169_v7 = vmul.f32 1.442695, %v4150_v62 }
 0x9d8   : > { %4793 = vrot.lane.b32.xlu0 %v11578_v35, %s8102_s29  ;;  %v9912_v14 = vpop.permute.xlu1 %4506 }
 0x9dc   : > { %4799 = vrot.lane.b32.xlu0 %v11581_v26, %s8102_s29  ;;  %v4147_v26 = vsub.f32 %v9794_v36, %v4116_v59 }
 0x9e0   : > { %4803 = vrot.lane.b32.xlu0 %v11583_v56, %s8102_s29 }
 0x9e4   : > { %5048 = vrot.lane.b32.xlu0 %v11624_v53, %s8103_s20  ;;  %v4163_v53 = vmul.f32 1.442695, %v4147_v26 }
 0x9e6   : > { %7522 = vpow2.f32 %v4163_v53 }
 0x9e7   : > { %7524 = vpow2.f32 %v4169_v7 }
 0x9e8   : > { %5050 = vrot.lane.b32.xlu0 %v11623_v10, %s8103_s20 }
 0x9ec   : > { %5054 = vrot.lane.b32.xlu0 %v11628_v28, %s8103_s20 }
 0x9f0   : > { %5056 = vrot.lane.b32.xlu0 %v11629_v23, %s8103_s20 }
 0x9f2   : > { %v4118_v51 = vpop.xlane.xlu0 %4117 }
 0x9f3   : > { %v4148_v10 = vsub.f32 %v9799_v31, %v4118_v51  ;;  %v9924_v51 = vpop.eup %7522 }
 0x9f4   : > { %5058 = vrot.lane.b32.xlu0 %v11630_v4, %s8103_s20  ;;  %v9926_v59 = vpop.eup %7524 }
 0x9f5   : > { %v4165_v28 = vmul.f32 1.442695, %v4148_v10 }
 0x9f6   : > { %v4124_v36 = vpop.xlane.xlu0 %4123 }
 0x9f7   : > { %7526 = vpow2.f32 %v4165_v28  ;;  %v4128_v33 = vpop.xlane.xlu1 %4127  ;;  %v4151_v23 = vsub.f32 %v9804_v9, %v4124_v36  ;;  %v4544_v36 = vsel %vm1412_vm0, %v9893_v24, 0 }
 0x9f8   : > { %7528 = vpow2.f32 %v4167_v61  ;;  %5022 = vrot.lane.b32.xlu0 %v11644_v57, %s8103_s20  ;;  %v4153_v4 = vsub.f32 %v9802_v3, %v4128_v33 }
 0x9f9   : > { %v4171_v41 = vmul.f32 1.442695, %v4151_v23 }
 0x9fa   : > { %v4175_v9 = vmul.f32 1.442695, %v4153_v4 }
 0x9fb   : > { %v4130_v62 = vpop.xlane.xlu1 %4129  ;;  %7530 = vpow2.f32 %v4171_v41 }
 0x9fc   : > { %v4154_v25 = vsub.f32 %v9806_v18, %v4130_v62  ;;  %5024 = vrot.lane.b32.xlu0 %v11645_v55, %s8103_s20  ;;  %v4547_v62 = vsel %vm1412_vm0, %v9897_v46, 0 }
 0x9fe   : > { %v4177_v7 = vmul.f32 1.442695, %v4154_v25 }
 0x9ff   : > { %v4126_v31 = vpop.xlane.xlu1 %4125 }
 0xa00   : > { %v4152_v61 = vsub.f32 %v9808_v29, %v4126_v31  ;;  %5026 = vrot.lane.b32.xlu0 %v11646_v22, %s8103_s20  ;;  %7532 = vpow2.f32 %v4177_v7  ;;  %v4541_v22 = vsel %vm1412_vm0, %v9755_v42, 0  ;;  %v4553_v31 = vsel %vm1412_vm0, %v9906_v37, 0 }
 0xa01   : > { %v9931_v57 = vpop.eup %7526 }
 0xa02   : > { %v9933_v18 = vpop.eup %7528  ;;  %v4173_v55 = vmul.f32 1.442695, %v4152_v61  ;;  %v4227_v3 = vpack.c.bf16 %v9931_v57, %v9924_v51  ;;  %v4511_v61 = vpop.permute.xlu0 %4510 }
 0xa03   : > { %v4136_v40 = vpop.xlane.xlu1 %4135  ;;  %v4228_v27 = vpack.c.bf16 %v9926_v59, %v9933_v18 }
 0xa04   : > { %7534 = vpow2.f32 %v4173_v55  ;;  %5028 = vrot.lane.b32.xlu0 %v11647_v21, %s8103_s20  ;;  %6866 = vmatprep.mubr.bf16.mxu0 %v4227_v3 }
 0xa05   : > { %7536 = vpow2.f32 %v4175_v9  ;;  %6867 = vmatmul.mubr.bf16.vlgmr.msra.gmra.mrb[96].mxu0 %v4228_v27  ;;  %v9948_v28 = vpop.eup %7530 }
 0xa06   : > { %6883 = vmatpush3.bf16.xpose.msra.mxu0 %v4541_v22 }
 0xa07   : > { %7059 = vmatprep.subr.msk.bf16.mxu0 %vm1412_vm0, %v9893_v24  ;;  %v4132_v29 = vpop.xlane.xlu1 %4131 }
 0xa08   : > { %v4155_v26 = vsub.f32 %v9812_v2, %v4132_v29  ;;  %5032 = vrot.lane.b32.xlu0 %v11649_v19, %s8103_s20 }
 0xa0a   : > { %v4179_v53 = vmul.f32 1.442695, %v4155_v26  ;;  %v9953_v42 = vpop.eup %7532 }
 0xa0b   : > { %v4134_v10 = vpop.xlane.xlu1 %4133 }
 0xa0c   : > { %v4156_v21 = vsub.f32 %v9816_v44, %v4134_v10  ;;  %5036 = vrot.lane.b32.xlu0 %v11651_v20, %s8103_s20  ;;  %7538 = vpow2.f32 %v4179_v53 }
 0xa0e   : > { %v9957_v33 = vpop.eup %7534  ;;  %v4181_v2 = vmul.f32 1.442695, %v4156_v21  ;;  %6885 = vmatpush3.bf16.xpose.msra.mxu0 %v4544_v36 }
 0xa0f   : > { %v9959_v23 = vpop.eup %7536  ;;  %7060 = vmatprep.subr.msk.bf16.mxu0 %vm1412_vm0, %v9897_v46  ;;  %v4144_v19 = vpop.xlane.xlu1 %4143  ;;  %v4229_v44 = vpack.c.bf16 %v9957_v33, %v9948_v28 }
 0xa10   : > { %7540 = vpow2.f32 %v4181_v2  ;;  %5335 = vrot.lane.b32.xlu0 %v11575_v32, %s8103_s20  ;;  %v4230_v20 = vpack.c.bf16 %v9953_v42, %v9959_v23 }
 0xa11   : > { %6870 = vmatprep.mubr.bf16.mxu0 %v4229_v44 }
 0xa12   : > { %6871 = vmatmul.mubr.bf16.gmra.mrb[100].mxu0 %v4230_v20 }
 0xa13   : > { %v4140_v24 = vpop.xlane.xlu1 %4139 }
 0xa14   : > { %5339 = vrot.lane.b32.xlu0 %v11578_v35, %s8103_s20  ;;  %v4550_v35 = vsel %vm1412_vm0, %v9912_v14, 0  ;;  %v4159_v55 = vsub.f32 %v9824_v48, %v4140_v24 }
 0xa16   : > { %6887 = vmatpush3.bf16.xpose.msra.mxu0 %v4547_v62  ;;  %v9977_v32 = vpop.eup %7538  ;;  %v4187_v29 = vmul.f32 1.442695, %v4159_v55 }
 0xa17   : > { %7061 = vmatprep.subr.msk.bf16.mxu0 %vm1412_vm0, %v9912_v14  ;;  %v4142_v25 = vpop.xlane.xlu1 %4141 }
 0xa18   : > { %5341 = vrot.lane.b32.xlu0 %v11579_v15, %s8103_s20  ;;  %v4160_v14 = vsub.f32 %v9828_v12, %v4142_v25 }
 0xa1a   : > { %v9979_v4 = vpop.eup %7540 }
 0xa1b   : > { %v4515_v41 = vpop.permute.xlu1 %4514  ;;  %v4231_v7 = vpack.c.bf16 %v9979_v4, %v9977_v32 }
 0xa1c   : > { %5343 = vrot.lane.b32.xlu0 %v11580_v47, %s8103_s20  ;;  %v4157_v47 = vsub.f32 %v9810_v0, %v4136_v40  ;;  %v4161_v40 = vsub.f32 %v9822_v6, %v4144_v19  ;;  %v4562_v24 = vsel %vm1412_vm0, %v4515_v41, 0 }
 0xa1d   : > { %6874 = vmatprep.mubr.bf16.mxu0 %v4231_v7 }
 0xa1e   : > { %6889 = vmatpush3.bf16.xpose.msra.mxu0 %v4550_v35  ;;  %v4183_v3 = vmul.f32 1.442695, %v4157_v47  ;;  %v4191_v10 = vmul.f32 1.442695, %v4161_v40 }
 0xa1f   : > { %7062 = vmatprep.subr.msk.bf16.mxu0 %vm1412_vm0, %v9906_v37  ;;  %v9989_v15 = vpop.permute.xlu1 %4484  ;;  %v4556_v37 = vsel %vm1412_vm0, %v4511_v61, 0 }
 0xa20   : > { %5347 = vrot.lane.b32.xlu0 %v11582_v49, %s8103_s20  ;;  %v4189_v49 = vmul.f32 1.442695, %v4160_v14  ;;  %7542 = vpow2.f32 %v4183_v3 }
 0xa22   : > { %7544 = vpow2.f32 %v4189_v49 }
 0xa23   : > { %v9993_v46 = vpop.permute.xlu1 %4488 }
 0xa26   : > { %6891 = vmatpush3.bf16.xpose.msra.mxu0 %v4553_v31 }
 0xa27   : > { %7063 = vmatprep.subr.msk.bf16.mxu0 %vm1412_vm0, %v4511_v61  ;;  %v4790_v9 = vpop.permute.xlu1 %4789 }
 0xa28   : > { %6914 = vmatprep.subr.bf16.mxu1 %v4790_v9 }
 0xa29   : > { %6915 = vmatpush3.bf16.msra.mxu1 %v4790_v9 }
 0xa2a   : > { %v10008_v36 = vpop.eup %7542 }
 0xa2b   : > { %v4138_v27 = vpop.xlane.xlu0 %4137  ;;  %v4796_v14 = vpop.permute.xlu1 %4795 }
 0xa2c   : > { %v4158_v22 = vsub.f32 %v9814_v43, %v4138_v27  ;;  %v10010_v6 = vpop.eup %7544 }
 0xa2e   : > { %v4185_v0 = vmul.f32 1.442695, %v4158_v22  ;;  %6893 = vmatpush3.bf16.xpose.msra.mxu0 %v4556_v37 }
 0xa2f   : > { %v4146_v12 = vpop.xlane.xlu0 %4145  ;;  %v4798_v3 = vpop.permute.xlu1 %4797 }
 0xa30   : > { %7546 = vpow2.f32 %v4185_v0  ;;  %v4162_v26 = vsub.f32 %v9826_v39, %v4146_v12 }
 0xa31   : > { %7548 = vpow2.f32 %v4187_v29 }
 0xa32   : > { %v4193_v48 = vmul.f32 1.442695, %v4162_v26 }
 0xa33   : > { %v4513_v53 = vpop.permute.xlu0 %4512  ;;  %v4802_v22 = vpop.permute.xlu1 %4801 }
 0xa34   : > { %7064 = vmatprep.subr.msk.bf16.mxu0 %vm1412_vm0, %v4513_v53  ;;  %v4559_v43 = vsel %vm1412_vm0, %v4513_v53, 0  ;;  %7550 = vpow2.f32 %v4193_v48 }
 0xa35   : > { %7552 = vpow2.f32 %v4191_v10 }
 0xa36   : > { %6895 = vmatpush3.bf16.xpose.msra.mxu0 %v4559_v43 }
 0xa37   : > { %7065 = vmatprep.subr.msk.bf16.mxu0 %vm1412_vm0, %v4515_v41  ;;  %v4477_v21 = vpop.permute.xlu0 %4476  ;;  %v10043_v37 = vpop.permute.xlu1 %5046 }
 0xa3a   : > { %v10012_v2 = vpop.eup %7546 }
 0xa3b   : > { %v10014_v39 = vpop.eup %7548  ;;  %v4479_v19 = vpop.permute.xlu0 %4478  ;;  %v4232_v44 = vpack.c.bf16 %v10012_v2, %v10008_v36 }
 0xa3c   : > { %v4233_v20 = vpack.c.bf16 %v10010_v6, %v10014_v39  ;;  %v10053_v40 = vpop.permute.xlu1 %5052 }
 0xa3d   : > { %6875 = vmatmul.mubr.bf16.gmra.mrb[104].mxu0 %v4232_v44 }
 0xa3e   : > { %6897 = vmatpush3.bf16.xpose.msra.mxu0 %v4562_v24  ;;  %6878 = vmatprep.mubr.bf16.mxu0 %v4233_v20  ;;  %v10021_v25 = vpop.eup %7550 }
 0xa3f   : > { %v4481_v62 = vpop.permute.xlu0 %4480  ;;  %v10023_v7 = vpop.eup %7552 }
 0xa40   : > { %v4234_v31 = vpack.c.bf16 %v10021_v25, %v10023_v7  ;;  %v10057_v48 = vpop.permute.xlu1 %5060 }
 0xa43   : > { %v4483_v35 = vpop.permute.xlu0 %4482 }
 0xa44   : > { %v10063_v43 = vpop.permute.xlu1 %5030 }
 0xa45   : > { %6879 = vmatmul.mubr.bf16.gmra.mrb[108].mxu0 %v4234_v31  ;;  %11695 = vst [vmem:[#allocation167_spill] sm:$0xff] %v10063_v43 }
 0xa46   : > { %6898 = vmatprep.mubr.msk.bf16.mxu0 %vm1412_vm0, %v4477_v21 }
 0xa47   : > { %v4487_v61 = vpop.permute.xlu0 %4486 }
 0xa4b   : > { %v4491_v47 = vpop.permute.xlu0 %4490 }
 0xa4d   : > { %6899 = vmatmul.mubr.msk.bf16.vlgmr.msra.gmra.mrb[112].mxu0 %vm1412_vm0, %v4479_v19  ;;  %v10067_v19 = vpop.permute.xlu1 %5034 }
 0xa4e   : > { %6902 = vmatprep.mubr.msk.bf16.mxu0 %vm1412_vm0, %v4481_v62  ;;  %11697 = vst [vmem:[#allocation169_spill] sm:$0xff] %v10067_v19 }
 0xa4f   : > { %v4792_v41 = vpop.permute.xlu0 %4791 }
 0xa50   : > { %6916 = vmatprep.subr.bf16.mxu1 %v4792_v41 }
 0xa51   : > { %6917 = vmatpush3.bf16.msra.mxu1 %v4792_v41  ;;  %v5338_v24 = vpop.permute.xlu1 %5337 }
 0xa53   : > { %v4794_v9 = vpop.permute.xlu0 %4793 }
 0xa54   : > { %6918 = vmatprep.subr.bf16.mxu1 %v4794_v9 }
 0xa55   : > { %6903 = vmatmul.mubr.msk.bf16.gmra.mrb[116].mxu0 %vm1412_vm0, %v4483_v35  ;;  %6919 = vmatpush3.bf16.msra.mxu1 %v4794_v9 }
 0xa56   : > { %6906 = vmatprep.mubr.msk.bf16.mxu0 %vm1412_vm0, %v9989_v15  ;;  %6920 = vmatprep.subr.bf16.mxu1 %v4796_v14 }
 0xa57   : > { %v4800_v55 = vpop.permute.xlu0 %4799 }
 0xa59   : > { %6921 = vmatpush3.bf16.msra.mxu1 %v4796_v14 }
 0xa5a   : > { %6922 = vmatprep.subr.bf16.mxu1 %v4798_v3 }
 0xa5b   : > { %v4804_v49 = vpop.permute.xlu0 %4803 }
 0xa5d   : > { %6907 = vmatmul.mubr.msk.bf16.gmra.mrb[120].mxu0 %vm1412_vm0, %v4487_v61  ;;  %6923 = vmatpush3.bf16.msra.mxu1 %v4798_v3  ;;  %v5346_v61 = vpop.permute.xlu1 %5345 }
 0xa5e   : > { %6910 = vmatprep.mubr.msk.bf16.mxu0 %vm1412_vm0, %v9993_v46  ;;  %6924 = vmatprep.subr.bf16.mxu1 %v4800_v55 }
 0xa5f   : > { %v10036_v27 = vpop.permute.xlu0 %5048 }
 0xa61   : > { %6925 = vmatpush3.bf16.msra.mxu1 %v4800_v55 }
 0xa62   : > { %6926 = vmatprep.subr.bf16.mxu1 %v4802_v22 }
 0xa63   : > { %v10038_v29 = vpop.permute.xlu0 %5050 }
 0xa65   : > { %6911 = vmatmul.mubr.msk.bf16.gmra.mrb[124].mxu0 %vm1412_vm0, %v4491_v47  ;;  %6927 = vmatpush3.bf16.msra.mxu1 %v4802_v22 }
 0xa66   : > { %6928 = vmatprep.subr.bf16.mxu1 %v4804_v49 }
 0xa67   : > { %v10041_v15 = vpop.permute.xlu0 %5054 }
 0xa69   : > { %6929 = vmatpush3.bf16.msra.mxu1 %v4804_v49 }
 0xa6a   : > { %7066 = vmatprep.subr.msk.bf16.mxu1 %vm1412_vm0, %v10043_v37 }
 0xa6b   : > { %v10047_v46 = vpop.permute.xlu0 %5056 }
 0xa6f   : > { %v10049_v0 = vpop.permute.xlu0 %5058 }
 0xa73   : > { %v10051_v12 = vpop.permute.xlu0 %5022 }
 0xa77   : > { %v10055_v26 = vpop.permute.xlu0 %5024 }
 0xa78   : > { %11692 = vst [vmem:[#allocation164_spill] sm:$0xff] %v10055_v26 }
 0xa7b   : > { %v10059_v53 = vpop.permute.xlu0 %5026 }
 0xa7c   : > { %11693 = vst [vmem:[#allocation165_spill] sm:$0xff] %v10059_v53 }
 0xa7f   : > { %v10061_v10 = vpop.permute.xlu0 %5028 }
 0xa80   : > { %11694 = vst [vmem:[#allocation166_spill] sm:$0xff] %v10061_v10 }
 0xa83   : > { %v10065_v21 = vpop.permute.xlu0 %5032 }
 0xa84   : > { %11696 = vst [vmem:[#allocation168_spill] sm:$0xff] %v10065_v21 }
 0xa87   : > { %v10069_v44 = vpop.permute.xlu0 %5036 }
 0xa88   : > { %11698 = vst [vmem:[#allocation170_spill] sm:$0xff] %v10069_v44 }
 0xa8b   : > { %v5336_v20 = vpop.permute.xlu0 %5335 }
 0xa8c   : > { %6978 = vmatprep.subr.bf16.mxu0 %v5336_v20 }
 0xa8d   : > { %6979 = vmatpush3.bf16.msra.mxu0 %v5336_v20 }
 0xa8e   : > { %6980 = vmatprep.subr.bf16.mxu0 %v5338_v24 }
 0xa8f   : > { %v5340_v62 = vpop.permute.xlu0 %5339 }
 0xa91   : > { %6981 = vmatpush3.bf16.msra.mxu0 %v5338_v24 }
 0xa92   : > { %6982 = vmatprep.subr.bf16.mxu0 %v5340_v62 }
 0xa93   : > { %v5342_v35 = vpop.permute.xlu0 %5341 }
 0xa95   : > { %6983 = vmatpush3.bf16.msra.mxu0 %v5340_v62 }
 0xa96   : > { %6984 = vmatprep.subr.bf16.mxu0 %v5342_v35 }
 0xa97   : > { %v5344_v31 = vpop.permute.xlu0 %5343 }
 0xa99   : > { %6985 = vmatpush3.bf16.msra.mxu0 %v5342_v35 }
 0xa9a   : > { %6986 = vmatprep.subr.bf16.mxu0 %v5344_v31 }
 0xa9b   : > { %v5348_v47 = vpop.permute.xlu0 %5347 }
 0xa9d   : > { %6987 = vmatpush3.bf16.msra.mxu0 %v5344_v31 }
 0xa9e   : > { %6988 = vmatprep.subr.bf16.mxu0 %v5346_v61 }
 0xaa1   : > { %6989 = vmatpush3.bf16.msra.mxu0 %v5346_v61 }
 0xaa2   : > { %6990 = vmatprep.subr.bf16.mxu0 %v5348_v47 }
 0xaa5   : > { %6991 = vmatpush3.bf16.msra.mxu0 %v5348_v47 }
 0xad8   : > { %v10071_v41 = vpop.f32.mrb[96].mxu0 }
 0xad9   : > { %v10073_v14 = vpop.f32.mrb[97].mxu0 }
 0xada   : > { %v10075_v9 = vpop.f32.mrb[98].mxu0 }
 0xadb   : > { %v10077_v55 = vpop.f32.mrb[99].mxu0 }
 0xae5   : > { %v10079_v3 = vpop.f32.mrb[100].mxu0 }
 0xae6   : > { %11699 = vst [vmem:[#allocation171_spill] sm:$0xff] %v10079_v3  ;;  %v10081_v49 = vpop.f32.mrb[101].mxu0 }
 0xae7   : > { %v10083_v22 = vpop.f32.mrb[102].mxu0 }
 0xae8   : > { %11700 = vst [vmem:[#allocation172_spill] sm:$0xff] %v10083_v22  ;;  %v10085_v20 = vpop.f32.mrb[103].mxu0 }
 0xb10   : > { %v10087_v24 = vpop.f32.mrb[104].mxu0 }
 0xb11   : > { %11701 = vst [vmem:[#allocation173_spill] sm:$0xff] %v10087_v24  ;;  %v10089_v62 = vpop.f32.mrb[105].mxu0 }
 0xb12   : > { %11702 = vst [vmem:[#allocation174_spill] sm:$0xff] %v10089_v62  ;;  %v10091_v35 = vpop.f32.mrb[106].mxu0 }
 0xb13   : > { %11703 = vst [vmem:[#allocation175_spill] sm:$0xff] %v10091_v35  ;;  %v10093_v31 = vpop.f32.mrb[107].mxu0 }
 0xb14   : > { %11704 = vst [vmem:[#allocation176_spill] sm:$0xff] %v10093_v31 }
 0xb18   : > { %v10095_v61 = vpop.f32.mrb[108].mxu0 }
 0xb19   : > { %11705 = vst [vmem:[#allocation177_spill] sm:$0xff] %v10095_v61  ;;  %v10097_v47 = vpop.f32.mrb[109].mxu0 }
 0xb1a   : > { %11706 = vst [vmem:[#allocation178_spill] sm:$0xff] %v10097_v47  ;;  %v10099_v44 = vpop.f32.mrb[110].mxu0 }
 0xb1b   : > { %11707 = vst [vmem:[#allocation179_spill] sm:$0xff] %v10099_v44  ;;  %v10101_v19 = vpop.f32.mrb[111].mxu0 }
 0xb1c   : > { %11708 = vst [vmem:[#allocation180_spill] sm:$0xff] %v10101_v19 }
 0xb20   : > { %v10103_v21 = vpop.f32.mrb[112].mxu0 }
 0xb21   : > { %4665 = vmax.xlane.f32.xlu0 %v10103_v21  ;;  %v10106_v22 = vpop.f32.mrb[113].mxu0 }
 0xb22   : > { %4661 = vmax.xlane.f32.xlu1 %v10106_v22  ;;  %v10109_v24 = vpop.f32.mrb[114].mxu0 }
 0xb23   : > { %v10111_v35 = vpop.f32.mrb[115].mxu0 }
 0xb25   : > { %4663 = vmax.xlane.f32.xlu0 %v10111_v35 }
 0xb26   : > { %4667 = vmax.xlane.f32.xlu1 %v10109_v24 }
 0xb28   : > { %v10115_v61 = vpop.f32.mrb[116].mxu0 }
 0xb29   : > { %v10117_v44 = vpop.f32.mrb[117].mxu0 }
 0xb2a   : > { %4673 = vmax.xlane.f32.xlu1 %v10115_v61  ;;  %4669 = vmax.xlane.f32.xlu0 %v10117_v44  ;;  %v10121_v19 = vpop.f32.mrb[118].mxu0 }
 0xb2b   : > { %v10123_v47 = vpop.f32.mrb[119].mxu0 }
 0xb2e   : > { %4675 = vmax.xlane.f32.xlu1 %v10121_v19 }
 0xb30   : > { %v10126_v31 = vpop.f32.mrb[120].mxu0 }
 0xb31   : > { %v10128_v62 = vpop.f32.mrb[121].mxu0 }
 0xb32   : > { %4671 = vmax.xlane.f32.xlu1 %v10123_v47  ;;  %v10131_v3 = vpop.f32.mrb[122].mxu0 }
 0xb33   : > { %4683 = vmax.xlane.f32.xlu0 %v10131_v3  ;;  %v10134_v43 = vpop.f32.mrb[123].mxu0 }
 0xb36   : > { %4681 = vmax.xlane.f32.xlu1 %v10126_v31 }
 0xb38   : > { %v10137_v10 = vpop.f32.mrb[124].mxu0 }
 0xb39   : > { %v10139_v38 = vpop.f32.mrb[125].mxu0 }
 0xb3a   : > { %4677 = vmax.xlane.f32.xlu1 %v10128_v62  ;;  %v10142_v53 = vpop.f32.mrb[126].mxu0 }
 0xb3b   : > { %4691 = vmax.xlane.f32.xlu0 %v10142_v53  ;;  %v10145_v26 = vpop.f32.mrb[127].mxu0 }
 0xb3e   : > { %4679 = vmax.xlane.f32.xlu1 %v10134_v43 }
 0xb42   : > { %4689 = vmax.xlane.f32.xlu1 %v10137_v10 }
 0xb46   : > { %4685 = vmax.xlane.f32.xlu1 %v10139_v38 }
 0xb4a   : > { %4197 = vadd.xlane.f32.xlu1 %v9931_v57  ;;  %v11720_v57 = vld [vmem:[#allocation81_spill] sm:$0xff] }
 0xb4e   : > { %2122 = vadd.xlane.f32.xlu1 %v9100_v16  ;;  %v11709_v16 = vld [vmem:[#allocation79_spill] sm:$0xff] }
 0xb51   : > { %5349 = vrot.lane.b32.xlu0 %v11583_v56, %s8103_s20  ;;  %v11714_v56 = vld [vmem:[#allocation61_spill] sm:$0xff] }
 0xb52   : > { %2669 = vadd.xlane.f32.xlu1 %v9191_v30  ;;  %v11710_v30 = vld [vmem:[#allocation35_spill] sm:$0xff] }
 0xb56   : > { %3216 = vadd.xlane.f32.xlu1 %v9431_v11  ;;  %v11711_v11 = vld [vmem:[#allocation31_spill] sm:$0xff] }
 0xb5a   : > { %4201 = vadd.xlane.f32.xlu1 %v9926_v59  ;;  %v11719_v59 = vld [vmem:[#allocation20_spill] sm:$0xff] }
 0xb5e   : > { %2126 = vadd.xlane.f32.xlu1 %v9097_v52  ;;  %v11712_v52 = vld [vmem:[#allocation48_spill] sm:$0xff] }
 0xb62   : > { %2673 = vadd.xlane.f32.xlu1 %v9187_v34  ;;  %v11713_v34 = vld [vmem:[#allocation62_spill] sm:$0xff] }
 0xb66   : > { %3220 = vadd.xlane.f32.xlu1 %v9441_v13  ;;  %v11717_v13 = vld [vmem:[#allocation42_spill] sm:$0xff] }
 0xb6a   : > { %4205 = vadd.xlane.f32.xlu1 %v9957_v33  ;;  %v11723_v33 = vld [vmem:[#allocation47_spill] sm:$0xff] }
 0xb6e   : > { %2130 = vadd.xlane.f32.xlu1 %v9112_v45  ;;  %v11715_v45 = vld [vmem:[#allocation80_spill] sm:$0xff] }
 0xb70   : > { %4195 = vadd.xlane.f32.xlu0 %v9924_v51  ;;  %v11718_v51 = vld [vmem:[#allocation45_spill] sm:$0xff] }
 0xb72   : > { %2677 = vadd.xlane.f32.xlu1 %v9201_v1  ;;  %v11716_v1 = vld [vmem:[#allocation58_spill] sm:$0xff] }
 0xb74   : > { %2120 = vadd.xlane.f32.xlu0 %v11709_v16  ;;  %v11724_v16 = vld [vmem:[#allocation40_spill] sm:$0xff] }
 0xb76   : > { %3224 = vadd.xlane.f32.xlu1 %v11710_v30  ;;  %v11725_v30 = vld [vmem:[#allocation23_spill] sm:$0xff] }
 0xb78   : > { %2667 = vadd.xlane.f32.xlu0 %v11711_v11  ;;  %v11728_v11 = vld [vmem:[#allocation54_spill] sm:$0xff] }
 0xb7a   : > { %4209 = vadd.xlane.f32.xlu1 %v9953_v42  ;;  %v11722_v42 = vld [vmem:[#allocation38_spill] sm:$0xff] }
 0xb7c   : > { %3214 = vadd.xlane.f32.xlu0 %v11712_v52  ;;  %v11729_v52 = vld [vmem:[#allocation50_spill] sm:$0xff] }
 0xb7e   : > { %2134 = vadd.xlane.f32.xlu1 %v11713_v34  ;;  %v11730_v34 = vld [vmem:[#allocation37_spill] sm:$0xff] }
 0xb80   : > { %4199 = vadd.xlane.f32.xlu0 %v9933_v18  ;;  %v11721_v18 = vld [vmem:[#allocation82_spill] sm:$0xff] }
 0xb82   : > { %2681 = vadd.xlane.f32.xlu1 %v11714_v56 }
 0xb84   : > { %2124 = vadd.xlane.f32.xlu0 %v11715_v45 }
 0xb86   : > { %4687 = vmax.xlane.f32.xlu1 %v10145_v26 }
 0xb88   : > { %2671 = vadd.xlane.f32.xlu0 %v11716_v1 }
 0xb8a   : > { %3228 = vadd.xlane.f32.xlu1 %v11717_v13 }
 0xb8c   : > { %3218 = vadd.xlane.f32.xlu0 %v11718_v51  ;;  %v11731_v51 = vld [vmem:[#allocation26_spill] sm:$0xff] }
 0xb8e   : > { %4213 = vadd.xlane.f32.xlu1 %v9979_v4  ;;  %v11726_v4 = vld [vmem:[#allocation60_spill] sm:$0xff] }
 0xb90   : > { %4203 = vadd.xlane.f32.xlu0 %v9948_v28  ;;  %v11727_v28 = vld [vmem:[#allocation59_spill] sm:$0xff] }
 0xb92   : > { %2138 = vadd.xlane.f32.xlu1 %v11719_v59 }
 0xb94   : > { %2128 = vadd.xlane.f32.xlu0 %v11720_v57 }
 0xb96   : > { %2685 = vadd.xlane.f32.xlu1 %v11721_v18 }
 0xb98   : > { %2675 = vadd.xlane.f32.xlu0 %v11722_v42 }
 0xb9a   : > { %3232 = vadd.xlane.f32.xlu1 %v11723_v33  ;;  %v11732_v33 = vld [vmem:[#allocation52_spill] sm:$0xff] }
 0xb9c   : > { %3222 = vadd.xlane.f32.xlu0 %v11724_v16  ;;  %v11733_v16 = vld [vmem:[#allocation98_spill] sm:$0xff] }
 0xb9e   : > { %4217 = vadd.xlane.f32.xlu1 %v10012_v2 }
 0xba0   : > { %4207 = vadd.xlane.f32.xlu0 %v9959_v23 }
 0xba2   : > { %2142 = vadd.xlane.f32.xlu1 %v11725_v30  ;;  %v11734_v30 = vld [vmem:[#allocation56_spill] sm:$0xff] }
 0xba4   : > { %2132 = vadd.xlane.f32.xlu0 %v11726_v4 }
 0xba6   : > { %2689 = vadd.xlane.f32.xlu1 %v11727_v28 }
 0xba8   : > { %2679 = vadd.xlane.f32.xlu0 %v11728_v11  ;;  %v11736_v11 = vld [vmem:[#allocation44_spill] sm:$0xff] }
 0xbaa   : > { %3236 = vadd.xlane.f32.xlu1 %v11729_v52 }
 0xbac   : > { %3226 = vadd.xlane.f32.xlu0 %v11730_v34 }
 0xbae   : > { %4221 = vadd.xlane.f32.xlu1 %v10010_v6  ;;  %v4666_v56 = vpop.xlane.xlu0 %4665 }
 0xbaf   : > { %v4695_v45 = vsub.f32 %v10103_v21, %v4666_v56  ;;  %v4662_v2 = vpop.xlane.xlu1 %4661 }
 0xbb0   : > { %v4693_v23 = vsub.f32 %v10106_v22, %v4662_v2  ;;  %4211 = vadd.xlane.f32.xlu0 %v9977_v32 }
 0xbb1   : > { %v4713_v1 = vmul.f32 1.442695, %v4695_v45 }
 0xbb2   : > { %v4709_v13 = vmul.f32 1.442695, %v4693_v23  ;;  %2146 = vadd.xlane.f32.xlu1 %v11731_v51  ;;  %v4664_v59 = vpop.xlane.xlu0 %4663  ;;  %v11737_v51 = vld [vmem:[#allocation29_spill] sm:$0xff] }
 0xbb3   : > { %v4694_v57 = vsub.f32 %v10111_v35, %v4664_v59  ;;  %v4668_v18 = vpop.xlane.xlu1 %4667  ;;  %7554 = vpow2.f32 %v4713_v1  ;;  %v11735_v35 = vld [vmem:[#allocation129_spill] sm:$0xff] }
 0xbb4   : > { %v4696_v42 = vsub.f32 %v10109_v24, %v4668_v18  ;;  %2136 = vadd.xlane.f32.xlu0 %v11732_v33  ;;  %7556 = vpow2.f32 %v4709_v13  ;;  %v5087_v18 = vsel %vm1412_vm0, %v10043_v37, 0 }
 0xbb5   : > { %v4711_v6 = vmul.f32 1.442695, %v4694_v57 }
 0xbb6   : > { %v4715_v21 = vmul.f32 1.442695, %v4696_v42  ;;  %2693 = vadd.xlane.f32.xlu1 %v11733_v16 }
 0xbb7   : > { %7558 = vpow2.f32 %v4711_v6  ;;  %v4674_v32 = vpop.xlane.xlu1 %4673  ;;  %v4670_v22 = vpop.xlane.xlu0 %4669 }
 0xbb8   : > { %7560 = vpow2.f32 %v4715_v21  ;;  %2683 = vadd.xlane.f32.xlu0 %v11734_v30  ;;  %v4697_v4 = vsub.f32 %v10117_v44, %v4670_v22  ;;  %v4699_v52 = vsub.f32 %v10115_v61, %v4674_v32  ;;  %v11739_v21 = vld [vmem:[#allocation83_spill] sm:$0xff] }
 0xbb9   : > { %v11740_v30 = vld [vmem:[#allocation63_spill] sm:$0xff] }
 0xbba   : > { %3240 = vadd.xlane.f32.xlu1 %v11735_v35  ;;  %v4717_v34 = vmul.f32 1.442695, %v4697_v4  ;;  %v11741_v35 = vld [vmem:[#allocation49_spill] sm:$0xff] }
 0xbbb   : > { %v4676_v28 = vpop.xlane.xlu1 %4675 }
 0xbbc   : > { %v4700_v24 = vsub.f32 %v10121_v19, %v4676_v28  ;;  %3230 = vadd.xlane.f32.xlu0 %v11736_v11  ;;  %v4721_v19 = vmul.f32 1.442695, %v4699_v52  ;;  %7562 = vpow2.f32 %v4717_v34  ;;  %v11742_v34 = vld [vmem:[#allocation97_spill] sm:$0xff] }
 0xbbd   : > { %v10209_v56 = vpop.eup %7554 }
 0xbbe   : > { %4225 = vadd.xlane.f32.xlu1 %v10021_v25  ;;  %v4723_v45 = vmul.f32 1.442695, %v4700_v24  ;;  %v10211_v23 = vpop.eup %7556 }
 0xbbf   : > { %v4672_v2 = vpop.xlane.xlu1 %4671 }
 0xbc0   : > { %v4698_v44 = vsub.f32 %v10123_v47, %v4672_v2  ;;  %4215 = vadd.xlane.f32.xlu0 %v10008_v36  ;;  %7564 = vpow2.f32 %v4723_v45  ;;  %v4684_v47 = vpop.xlane.xlu0 %4683  ;;  %v11738_v36 = vld [vmem:[#allocation55_spill] sm:$0xff] }
 0xbc1   : > { %v10215_v1 = vpop.eup %7558  ;;  %v4704_v32 = vsub.f32 %v10131_v3, %v4684_v47 }
 0xbc2   : > { %v10217_v13 = vpop.eup %7560  ;;  %v4719_v61 = vmul.f32 1.442695, %v4698_v44  ;;  %2150 = vadd.xlane.f32.xlu1 %v11737_v51  ;;  %v4773_v25 = vpack.c.bf16 %v10215_v1, %v10211_v23  ;;  %v11743_v44 = vld [vmem:[#allocation131_spill] sm:$0xff]  ;;  %v5093_v51 = vsel %vm1412_vm0, %v10038_v29, 0 }
 0xbc3   : > { %v4682_v59 = vpop.xlane.xlu1 %4681  ;;  %v4774_v57 = vpack.c.bf16 %v10217_v13, %v10209_v56  ;;  %v4731_v3 = vmul.f32 1.442695, %v4704_v32  ;;  %v11748_v32 = vld [vmem:[#allocation69_spill] sm:$0xff] }
 0xbc4   : > { %7566 = vpow2.f32 %v4719_v61  ;;  %2140 = vadd.xlane.f32.xlu0 %v11738_v36  ;;  %6930 = vmatprep.mubr.bf16.mxu1 %v4773_v25  ;;  %v4703_v42 = vsub.f32 %v10126_v31, %v4682_v59  ;;  %v11744_v61 = vld [vmem:[#allocation53_spill] sm:$0xff]  ;;  %v11745_v59 = vld [vmem:[#allocation96_spill] sm:$0xff]  ;;  %v11746_v36 = vld [vmem:[#allocation66_spill] sm:$0xff] }
 0xbc5   : > { %7568 = vpow2.f32 %v4721_v19  ;;  %6931 = vmatmul.mubr.bf16.vlgmr.msra.gmra.mrb[176].mxu1 %v4774_v57 }
 0xbc6   : > { %6947 = vmatpush3.bf16.xpose.msra.mxu1 %v5087_v18  ;;  %3715 = vadd.xlane.f32.xlu1 %v9674_v5  ;;  %v4729_v22 = vmul.f32 1.442695, %v4703_v42  ;;  %v10237_v4 = vpop.eup %7562 }
 0xbc7   : > { %7067 = vmatprep.subr.msk.bf16.mxu1 %vm1412_vm0, %v10036_v27  ;;  %v4678_v33 = vpop.xlane.xlu1 %4677 }
 0xbc8   : > { %v4701_v6 = vsub.f32 %v10128_v62, %v4678_v33  ;;  %2687 = vadd.xlane.f32.xlu0 %v11739_v21  ;;  %v10233_v16 = vpop.xlane.xlu0 %4691  ;;  %v5090_v62 = vsel %vm1412_vm0, %v10036_v27, 0  ;;  %7570 = vpow2.f32 %v4729_v22  ;;  %v5096_v33 = vsel %vm1412_vm0, %v10053_v40, 0 }
 0xbca   : > { %1640 = vadd.xlane.f32.xlu1 %v11740_v30  ;;  %v4725_v37 = vmul.f32 1.442695, %v4701_v6  ;;  %v10241_v24 = vpop.eup %7564  ;;  %v11749_v30 = vld [vmem:[#allocation57_spill] sm:$0xff] }
 0xbcb   : > { %v4680_v31 = vpop.xlane.xlu1 %4679 }
 0xbcc   : > { %v4702_v5 = vsub.f32 %v10134_v43, %v4680_v31  ;;  %3234 = vadd.xlane.f32.xlu0 %v11741_v35  ;;  %v5350_v28 = vpop.permute.xlu0 %5349  ;;  %7572 = vpow2.f32 %v4725_v37  ;;  %v11750_v37 = vld [vmem:[#allocation68_spill] sm:$0xff] }
 0xbcd   : > { %6992 = vmatprep.subr.bf16.mxu0 %v5350_v28  ;;  %v11751_v31 = vld [vmem:[#allocation64_spill] sm:$0xff] }
 0xbce   : > { %v10245_v11 = vpop.eup %7566  ;;  %v4727_v52 = vmul.f32 1.442695, %v4702_v5  ;;  %6949 = vmatpush3.bf16.xpose.msra.mxu1 %v5090_v62  ;;  %2697 = vadd.xlane.f32.xlu1 %v11742_v34  ;;  %v5102_v5 = vsel %vm1412_vm0, %v10047_v46, 0 }
 0xbcf   : > { %v10248_v45 = vpop.eup %7568  ;;  %7068 = vmatprep.subr.msk.bf16.mxu1 %vm1412_vm0, %v10038_v29  ;;  %6993 = vmatpush3.bf16.msra.mxu0 %v5350_v28  ;;  %v10252_v43 = vpop.xlane.xlu1 %4689  ;;  %v4775_v27 = vpack.c.bf16 %v10245_v11, %v10237_v4  ;;  %v11753_v28 = vld [vmem:[#allocation130_spill] sm:$0xff] }
 0xbd0   : > { %7574 = vpow2.f32 %v4727_v52  ;;  %4219 = vadd.xlane.f32.xlu0 %v10014_v39  ;;  %v4776_v2 = vpack.c.bf16 %v10241_v24, %v10248_v45  ;;  %v5108_v52 = vsel %vm1412_vm0, %v10057_v48, 0 }
 0xbd1   : > { %6934 = vmatprep.mubr.bf16.mxu1 %v4775_v27  ;;  %7576 = vpow2.f32 %v4731_v3  ;;  %v11754_v3 = vld [vmem:[#allocation65_spill] sm:$0xff] }
 0xbd2   : > { %3244 = vadd.xlane.f32.xlu1 %v11743_v44  ;;  %6935 = vmatmul.mubr.bf16.gmra.mrb[180].mxu1 %v4776_v2  ;;  %v10268_v25 = vpop.eup %7570 }
 0xbd3   : > { %v10260_v19 = vpop.xlane.xlu1 %4685 }
 0xbd4   : > { %2144 = vadd.xlane.f32.xlu0 %v11744_v61 }
 0xbd6   : > { %6951 = vmatpush3.bf16.xpose.msra.mxu1 %v5093_v51  ;;  %3719 = vadd.xlane.f32.xlu1 %v9667_v50  ;;  %v10271_v57 = vpop.eup %7572  ;;  %v11747_v50 = vld [vmem:[#allocation128_spill] sm:$0xff] }
 0xbd7   : > { %7069 = vmatprep.subr.msk.bf16.mxu1 %vm1412_vm0, %v10053_v40  ;;  %v4198_v39 = vpop.xlane.xlu1 %4197  ;;  %v5099_v40 = vsel %vm1412_vm0, %v10041_v15, 0 }
 0xbd8   : > { %2691 = vadd.xlane.f32.xlu0 %v11745_v59  ;;  %7578 = vrcp.f32 %v4198_v39 }
 0xbda   : > { %v10273_v47 = vpop.eup %7574  ;;  %1644 = vadd.xlane.f32.xlu1 %v11746_v36 }
 0xbdb   : > { %v2123_v18 = vpop.xlane.xlu1 %2122  ;;  %v4777_v29 = vpack.c.bf16 %v10273_v47, %v10271_v57  ;;  %v10278_v42 = vpop.eup %7576 }
 0xbdc   : > { %3238 = vadd.xlane.f32.xlu0 %v11747_v50  ;;  %v4778_v6 = vpack.c.bf16 %v10278_v42, %v10268_v25 }
 0xbdd   : > { %6938 = vmatprep.mubr.bf16.mxu1 %v4777_v29 }
 0xbde   : > { %6953 = vmatpush3.bf16.xpose.msra.mxu1 %v5096_v33  ;;  %3723 = vadd.xlane.f32.xlu1 %v9695_v58 }
 0xbdf   : > { %6939 = vmatmul.mubr.bf16.gmra.mrb[184].mxu1 %v4778_v6  ;;  %7070 = vmatprep.subr.msk.bf16.mxu1 %vm1412_vm0, %v10041_v15  ;;  %v2670_v21 = vpop.xlane.xlu1 %2669 }
 0xbe0   : > { %4223 = vadd.xlane.f32.xlu0 %v10023_v7 }
 0xbe2   : > { %1648 = vadd.xlane.f32.xlu1 %v11748_v32  ;;  %v7579_v61 = vpop.eup %7578  ;;  %v11758_v32 = vld [vmem:[#allocation99_spill] sm:$0xff] }
 0xbe3   : > { %v3217_v22 = vpop.xlane.xlu1 %3216 }
 0xbe4   : > { %2148 = vadd.xlane.f32.xlu0 %v11749_v30 }
 0xbe6   : > { %6955 = vmatpush3.bf16.xpose.msra.mxu1 %v5099_v40  ;;  %3727 = vadd.xlane.f32.xlu1 %v9693_v60  ;;  %v11752_v60 = vld [vmem:[#allocation32_spill] sm:$0xff] }
 0xbe7   : > { %7071 = vmatprep.subr.msk.bf16.mxu1 %vm1412_vm0, %v10047_v46  ;;  %v4202_v58 = vpop.xlane.xlu1 %4201 }
 0xbe8   : > { %3713 = vadd.xlane.f32.xlu0 %v9670_v17  ;;  %v5105_v17 = vsel %vm1412_vm0, %v10049_v0, 0 }
 0xbea   : > { %1652 = vadd.xlane.f32.xlu1 %v11750_v37 }
 0xbeb   : > { %v2127_v7 = vpop.xlane.xlu1 %2126 }
 0xbec   : > { %1638 = vadd.xlane.f32.xlu0 %v11751_v31 }
 0xbee   : > { %6957 = vmatpush3.bf16.xpose.msra.mxu1 %v5102_v5 }
 0xbef   : > { %7072 = vmatprep.subr.msk.bf16.mxu1 %vm1412_vm0, %v10049_v0  ;;  %v10303_v15 = vpop.xlane.xlu1 %2673 }
 0xbf0   : > { %2695 = vadd.xlane.f32.xlu0 %v11752_v60  ;;  %v11760_v60 = vld [vmem:[#allocation115_spill] sm:$0xff] }
 0xbf3   : > { %v10306_v35 = vpop.xlane.xlu1 %3220 }
 0xbf4   : > { %3242 = vadd.xlane.f32.xlu0 %v11753_v28 }
 0xbf6   : > { %6959 = vmatpush3.bf16.xpose.msra.mxu1 %v5105_v17 }
 0xbf7   : > { %7073 = vmatprep.subr.msk.bf16.mxu1 %vm1412_vm0, %v10057_v48  ;;  %v10313_v46 = vpop.xlane.xlu1 %4205 }
 0xbf8   : > { %3717 = vadd.xlane.f32.xlu0 %v9676_v63  ;;  %v11755_v63 = vld [vmem:[#allocation67_spill] sm:$0xff] }
 0xbfb   : > { %v10316_v62 = vpop.xlane.xlu1 %2130 }
 0xbfc   : > { %1642 = vadd.xlane.f32.xlu0 %v11754_v3 }
 0xbfd   : > { %v4196_v34 = vpop.xlane.xlu0 %4195 }
 0xbfe   : > { %6961 = vmatpush3.bf16.xpose.msra.mxu1 %v5108_v52  ;;  %7580 = vrcp.f32 %v4196_v34 }
 0xbff   : > { %v10321_v0 = vpop.xlane.xlu1 %2677  ;;  %7582 = vrcp.f32 %v2123_v18  ;;  %v4707_v18 = vsub.f32 %v10137_v10, %v10252_v43 }
 0xc00   : > { %3721 = vadd.xlane.f32.xlu0 %v9691_v8  ;;  %v10334_v8 = vmul.f32 %v7579_v61, %v10077_v55  ;;  %v11757_v55 = vld [vmem:[#allocation46_spill] sm:$0xff] }
 0xc01   : > { %v2121_v27 = vpop.xlane.xlu0 %2120  ;;  %v4737_v10 = vmul.f32 1.442695, %v4707_v18 }
 0xc02   : > { %7584 = vrcp.f32 %v2121_v27  ;;  %v11761_v27 = vld [vmem:[#allocation22_spill] sm:$0xff] }
 0xc03   : > { %v10324_v2 = vpop.xlane.xlu1 %3224  ;;  %7586 = vrcp.f32 %v2670_v21 }
 0xc04   : > { %1646 = vadd.xlane.f32.xlu0 %v11755_v63 }
 0xc05   : > { %v2668_v44 = vpop.xlane.xlu0 %2667 }
 0xc06   : > { %7588 = vrcp.f32 %v2668_v44  ;;  %v11762_v44 = vld [vmem:[#allocation25_spill] sm:$0xff] }
 0xc07   : > { %v10327_v51 = vpop.xlane.xlu1 %4209  ;;  %7590 = vrcp.f32 %v3217_v22 }
 0xc08   : > { %v7581_v48 = vpop.eup %7580  ;;  %3725 = vadd.xlane.f32.xlu0 %v9699_v54  ;;  %v11756_v54 = vld [vmem:[#allocation70_spill] sm:$0xff] }
 0xc09   : > { %v3215_v39 = vpop.xlane.xlu0 %3214  ;;  %v10331_v59 = vmul.f32 %v7581_v48, %v10073_v14  ;;  %v7583_v36 = vpop.eup %7582  ;;  %v4705_v14 = vsub.f32 %v10139_v38, %v10260_v19  ;;  %v11759_v19 = vld [vmem:[#allocation113_spill] sm:$0xff] }
 0xc0a   : > { %7592 = vrcp.f32 %v3215_v39  ;;  %v2306_v22 = vmul.f32 %v7583_v36, %v11758_v32 }
 0xc0b   : > { %v10338_v29 = vpop.xlane.xlu1 %2134  ;;  %v4396_v50 = vpack.c.bf16 %v10334_v8, %v10331_v59  ;;  %7594 = vrcp.f32 %v4202_v58  ;;  %v4708_v58 = vsub.f32 %v10142_v53, %v10233_v16  ;;  %v4733_v31 = vmul.f32 1.442695, %v4705_v14  ;;  %v11767_v59 = vld [vmem:[#allocation21_spill] sm:$0xff] }
 0xc0c   : > { %v7585_v33 = vpop.eup %7584  ;;  %1650 = vadd.xlane.f32.xlu0 %v11756_v54 }
 0xc0d   : > { %v4200_v6 = vpop.xlane.xlu0 %4199  ;;  %v2305_v21 = vmul.f32 %v7585_v33, %v11757_v55  ;;  %v7587_v30 = vpop.eup %7586  ;;  %v4739_v16 = vmul.f32 1.442695, %v4708_v58  ;;  %v11795_v58 = vld [vmem:[#allocation174_spill] sm:$0xff] }
 0xc0e   : > { %7596 = vrcp.f32 %v4200_v6  ;;  %v10356_v28 = vmul.f32 %v7587_v30, %v11760_v60  ;;  %v11766_v60 = vld [vmem:[#allocation114_spill] sm:$0xff] }
 0xc0f   : > { %v10347_v43 = vpop.xlane.xlu1 %2681  ;;  %v2321_v40 = vpack.c.bf16 %v2306_v22, %v2305_v21  ;;  %7598 = vrcp.f32 %v2127_v7  ;;  %v11763_v22 = vld [vmem:[#allocation43_spill] sm:$0xff] }
 0xc10   : > { %v7589_v37 = vpop.eup %7588 }
 0xc11   : > { %2337 = vrot.lane.b32.xlu1 %v2321_v40, %s8103_s20  ;;  %v2125_v38 = vpop.xlane.xlu0 %2124  ;;  %v10353_v5 = vmul.f32 %v7589_v37, %v11759_v19  ;;  %v7591_v17 = vpop.eup %7590  ;;  %v11765_v19 = vld [vmem:[#allocation112_spill] sm:$0xff] }
 0xc12   : > { %7600 = vrcp.f32 %v2125_v38  ;;  %v10366_v61 = vmul.f32 %v7591_v17, %v11762_v44 }
 0xc13   : > { %7602 = vpow2.f32 %v4737_v10  ;;  %v4688_v3 = vpop.xlane.xlu1 %4687  ;;  %v2868_v7 = vpack.c.bf16 %v10356_v28, %v10353_v5 }
 0xc14   : > { %v7593_v52 = vpop.eup %7592  ;;  %7604 = vrcp.f32 %v10303_v15  ;;  %v4706_v53 = vsub.f32 %v10145_v26, %v4688_v3  ;;  %v11799_v15 = vld [vmem:[#allocation105_spill] sm:$0xff] }
 0xc15   : > { %7606 = vpow2.f32 %v4733_v31  ;;  %v2672_v34 = vpop.xlane.xlu0 %2671  ;;  %v10363_v63 = vmul.f32 %v7593_v52, %v11761_v27  ;;  %v7595_v48 = vpop.eup %7594 }
 0xc16   : > { %v4735_v39 = vmul.f32 1.442695, %v4706_v53  ;;  %7608 = vrcp.f32 %v2672_v34  ;;  %v10377_v54 = vmul.f32 %v7595_v48, %v10075_v9 }
 0xc17   : > { %7610 = vrcp.f32 %v10306_v35  ;;  %v10369_v36 = vpop.xlane.xlu1 %3228 }
 0xc18   : > { %v7597_v26 = vpop.eup %7596  ;;  %7612 = vpow2.f32 %v4735_v39 }
 0xc19   : > { %7614 = vpow2.f32 %v4739_v16  ;;  %v3219_v18 = vpop.xlane.xlu0 %3218  ;;  %v10374_v33 = vmul.f32 %v7597_v26, %v10071_v41  ;;  %v7599_v14 = vpop.eup %7598  ;;  %v11764_v41 = vld [vmem:[#allocation51_spill] sm:$0xff] }
 0xc1a   : > { %7616 = vrcp.f32 %v3219_v18  ;;  %v10390_v10 = vmul.f32 %v7599_v14, %v11764_v41 }
 0xc1b   : > { %v10379_v6 = vpop.xlane.xlu1 %4213  ;;  %7618 = vrcp.f32 %v10313_v46 }
 0xc1c   : > { %v7601_v55 = vpop.eup %7600 }
 0xc1d   : > { %v10384_v21 = vpop.eup %7602  ;;  %v4204_v32 = vpop.xlane.xlu0 %4203  ;;  %v10387_v30 = vmul.f32 %v7601_v55, %v11763_v22 }
 0xc1e   : > { %v7605_v9 = vpop.eup %7604  ;;  %7620 = vrcp.f32 %v4204_v32 }
 0xc1f   : > { %v10392_v40 = vpop.eup %7606  ;;  %v10394_v37 = vpop.xlane.xlu1 %2138  ;;  %7622 = vrcp.f32 %v10316_v62  ;;  %v10403_v28 = vmul.f32 %v7605_v9, %v11766_v60  ;;  %v11769_v9 = vld [vmem:[#allocation101_spill] sm:$0xff] }
 0xc20   : > { %v7609_v31 = vpop.eup %7608 }
 0xc21   : > { %v7611_v46 = vpop.eup %7610  ;;  %v2129_v38 = vpop.xlane.xlu0 %2128  ;;  %v10400_v5 = vmul.f32 %v7609_v31, %v11765_v19  ;;  %v11770_v31 = vld [vmem:[#allocation103_spill] sm:$0xff]  ;;  %v11772_v19 = vld [vmem:[#allocation165_spill] sm:$0xff] }
 0xc22   : > { %v10405_v17 = vpop.eup %7612  ;;  %7624 = vrcp.f32 %v2129_v38  ;;  %4412 = vrot.lane.b32.xlu0 %v4396_v50, %s8103_s20  ;;  %v11768_v50 = vld [vmem:[#allocation24_spill] sm:$0xff] }
 0xc23   : > { %v10411_v3 = vpop.eup %7614  ;;  %v10413_v52 = vpop.xlane.xlu1 %2685  ;;  %v4779_v62 = vpack.c.bf16 %v10405_v17, %v10392_v40  ;;  %7626 = vrcp.f32 %v10321_v0  ;;  %v10426_v44 = vmul.f32 %v7611_v46, %v11768_v50 }
 0xc24   : > { %v7617_v16 = vpop.eup %7616  ;;  %v4780_v34 = vpack.c.bf16 %v10411_v3, %v10384_v21 }
 0xc25   : > { %6942 = vmatprep.mubr.bf16.mxu1 %v4779_v62  ;;  %v2676_v27 = vpop.xlane.xlu0 %2675  ;;  %v10423_v8 = vmul.f32 %v7617_v16, %v11767_v59  ;;  %v7619_v48 = vpop.eup %7618  ;;  %v11773_v16 = vld [vmem:[#allocation117_spill] sm:$0xff] }
 0xc26   : > { %7628 = vrcp.f32 %v2676_v27  ;;  %6943 = vmatmul.mubr.bf16.gmra.mrb[188].mxu1 %v4780_v34  ;;  %2884 = vrot.lane.b32.xlu0 %v2868_v7, %s8102_s29  ;;  %v10440_v55 = vmul.f32 %v7619_v48, %v10085_v20  ;;  %v11771_v20 = vld [vmem:[#allocation164_spill] sm:$0xff]  ;;  %v11774_v27 = vld [vmem:[#allocation119_spill] sm:$0xff] }
 0xc27   : > { %v10429_v39 = vpop.xlane.xlu1 %3232  ;;  %6962 = vmatprep.mubr.msk.bf16.mxu1 %vm1412_vm0, %v10051_v12  ;;  %7630 = vrcp.f32 %v10324_v2  ;;  %v11791_v12 = vld [vmem:[#allocation27_spill] sm:$0xff] }
 0xc28   : > { %v7621_v26 = vpop.eup %7620 }
 0xc29   : > { %v3223_v18 = vpop.xlane.xlu0 %3222  ;;  %v10437_v14 = vmul.f32 %v7621_v26, %v10081_v49  ;;  %v7623_v32 = vpop.eup %7622 }
 0xc2a   : > { %7632 = vrcp.f32 %v3223_v18  ;;  %v10451_v49 = vmul.f32 %v7623_v32, %v11770_v31  ;;  %v11775_v32 = vld [vmem:[#allocation140_spill] sm:$0xff] }
 0xc2b   : > { %v10442_v7 = vpop.xlane.xlu1 %4217  ;;  %7634 = vrcp.f32 %v10327_v51 }
 0xc2c   : > { %v7625_v22 = vpop.eup %7624 }
 0xc2d   : > { %v4208_v41 = vpop.xlane.xlu0 %4207  ;;  %v10448_v2 = vmul.f32 %v7625_v22, %v11769_v9  ;;  %v7627_v46 = vpop.eup %7626  ;;  %v11776_v22 = vld [vmem:[#allocation28_spill] sm:$0xff]  ;;  %v11777_v9 = vld [vmem:[#allocation33_spill] sm:$0xff] }
 0xc2e   : > { %7636 = vrcp.f32 %v4208_v41  ;;  %6963 = vmatmul.mubr.msk.bf16.vlgmr.msra.gmra.mrb[192].mxu1 %vm1412_vm0, %v11771_v20  ;;  %v10466_v59 = vmul.f32 %v7627_v46, %v11774_v27  ;;  %v11778_v20 = vld [vmem:[#allocation166_spill] sm:$0xff] }
 0xc2f   : > { %v10455_v38 = vpop.xlane.xlu1 %2142  ;;  %6966 = vmatprep.mubr.msk.bf16.mxu1 %vm1412_vm0, %v11772_v19  ;;  %7638 = vrcp.f32 %v10338_v29 }
 0xc30   : > { %v7629_v60 = vpop.eup %7628 }
 0xc31   : > { %v2133_v62 = vpop.xlane.xlu0 %2132  ;;  %v10463_v34 = vmul.f32 %v7629_v60, %v11773_v16  ;;  %v7631_v50 = vpop.eup %7630  ;;  %v11779_v60 = vld [vmem:[#allocation167_spill] sm:$0xff] }
 0xc32   : > { %7640 = vrcp.f32 %v2133_v62  ;;  %v10478_v31 = vmul.f32 %v7631_v50, %v11777_v9  ;;  %v11780_v16 = vld [vmem:[#allocation71_spill] sm:$0xff] }
 0xc33   : > { %v10468_v48 = vpop.xlane.xlu1 %2689  ;;  %7642 = vrcp.f32 %v10347_v43  ;;  %v11781_v50 = vld [vmem:[#allocation171_spill] sm:$0xff]  ;;  %v11784_v43 = vld [vmem:[#allocation100_spill] sm:$0xff] }
 0xc34   : > { %v7633_v18 = vpop.eup %7632 }
 0xc35   : > { %3729 = vadd.xlane.f32.xlu1 %v11775_v32  ;;  %v2680_v29 = vpop.xlane.xlu0 %2679  ;;  %v10475_v41 = vmul.f32 %v7633_v18, %v11776_v22  ;;  %v7635_v46 = vpop.eup %7634  ;;  %v11782_v32 = vld [vmem:[#allocation172_spill] sm:$0xff] }
 0xc36   : > { %7644 = vrcp.f32 %v2680_v29  ;;  %6967 = vmatmul.mubr.msk.bf16.gmra.mrb[196].mxu1 %vm1412_vm0, %v11778_v20  ;;  %v10494_v29 = vmul.f32 %v7635_v46, %v11782_v32  ;;  %v11787_v20 = vld [vmem:[#allocation169_spill] sm:$0xff] }
 0xc37   : > { %v10482_v19 = vpop.xlane.xlu1 %3236  ;;  %6970 = vmatprep.mubr.msk.bf16.mxu1 %vm1412_vm0, %v11779_v60  ;;  %7646 = vrcp.f32 %v10369_v36  ;;  %v11783_v36 = vld [vmem:[#allocation73_spill] sm:$0xff] }
 0xc38   : > { %v7637_v62 = vpop.eup %7636 }
 0xc39   : > { %1654 = vadd.xlane.f32.xlu1 %v11780_v16  ;;  %v3227_v27 = vpop.xlane.xlu0 %3226  ;;  %v10491_v18 = vmul.f32 %v7637_v62, %v11781_v50  ;;  %v7639_v22 = vpop.eup %7638  ;;  %v11785_v62 = vld [vmem:[#allocation102_spill] sm:$0xff] }
 0xc3a   : > { %7648 = vrcp.f32 %v3227_v27  ;;  %v10506_v50 = vmul.f32 %v7639_v22, %v11785_v62  ;;  %v11786_v27 = vld [vmem:[#allocation168_spill] sm:$0xff]  ;;  %v11789_v62 = vld [vmem:[#allocation118_spill] sm:$0xff] }
 0xc3b   : > { %v10496_v9 = vpop.xlane.xlu1 %4221  ;;  %7650 = vrcp.f32 %v10379_v6  ;;  %v11790_v6 = vld [vmem:[#allocation141_spill] sm:$0xff] }
 0xc3c   : > { %v7641_v60 = vpop.eup %7640 }
 0xc3d   : > { %1656 = vadd.xlane.f32.xlu1 %v11783_v36  ;;  %v4212_v16 = vpop.xlane.xlu0 %4211  ;;  %v10503_v0 = vmul.f32 %v7641_v60, %v11784_v43  ;;  %v7643_v46 = vpop.eup %7642  ;;  %v11788_v60 = vld [vmem:[#allocation116_spill] sm:$0xff] }
 0xc3e   : > { %7652 = vrcp.f32 %v4212_v16  ;;  %6971 = vmatmul.mubr.msk.bf16.gmra.mrb[200].mxu1 %vm1412_vm0, %v11786_v27  ;;  %v10521_v16 = vmul.f32 %v7643_v46, %v11789_v62 }
 0xc3f   : > { %v10510_v32 = vpop.xlane.xlu1 %2146  ;;  %6974 = vmatprep.mubr.msk.bf16.mxu1 %vm1412_vm0, %v11787_v20  ;;  %7654 = vrcp.f32 %v10394_v37 }
 0xc40   : > { %v7645_v36 = vpop.eup %7644 }
 0xc41   : > { %v2137_v43 = vpop.xlane.xlu0 %2136  ;;  %v10518_v22 = vmul.f32 %v7645_v36, %v11788_v60  ;;  %v7647_v26 = vpop.eup %7646  ;;  %v11793_v36 = vld [vmem:[#allocation30_spill] sm:$0xff] }
 0xc42   : > { %7656 = vrcp.f32 %v2137_v43  ;;  %v10533_v60 = vmul.f32 %v7647_v26, %v11793_v36  ;;  %v11794_v43 = vld [vmem:[#allocation170_spill] sm:$0xff] }
 0xc43   : > { %v10523_v27 = vpop.xlane.xlu1 %2693  ;;  %7658 = vrcp.f32 %v10413_v52 }
 0xc44   : > { %v7649_v51 = vpop.eup %7648 }
 0xc45   : > { %3731 = vadd.xlane.f32.xlu0 %v11790_v6  ;;  %v2684_v37 = vpop.xlane.xlu0 %2683  ;;  %v10530_v53 = vmul.f32 %v7649_v51, %v11791_v12  ;;  %v7651_v46 = vpop.eup %7650  ;;  %v11797_v51 = vld [vmem:[#allocation176_spill] sm:$0xff] }
 0xc46   : > { %7660 = vrcp.f32 %v2684_v37  ;;  %6975 = vmatmul.mubr.msk.bf16.gmra.mrb[204].mxu1 %vm1412_vm0, %v11794_v43  ;;  %v10546_v26 = vmul.f32 %v7651_v46, %v11797_v51  ;;  %v11803_v46 = vpack.c.bf16 %v10366_v61, %v10363_v63  ;;  %v11808_v51 = vld [vmem:[#allocation133_spill] sm:$0xff] }
 0xc47   : > { %11792 = vst [vmem:[#allocation79_spill] sm:$0xff] %v10530_v53  ;;  %v10537_v62 = vpop.xlane.xlu1 %3240  ;;  %7662 = vrcp.f32 %v10429_v39  ;;  %v11801_v53 = vld [vmem:[#allocation107_spill] sm:$0xff] }
 0xc48   : > { %v7653_v52 = vpop.eup %7652  ;;  %11798 = vst [vmem:[#allocation31_spill] sm:$0xff] %v10546_v26 }
 0xc49   : > { %v3231_v6 = vpop.xlane.xlu0 %3230  ;;  %v10543_v12 = vmul.f32 %v7653_v52, %v11795_v58  ;;  %v7655_v36 = vpop.eup %7654 }
 0xc4a   : > { %7664 = vrcp.f32 %v3231_v6  ;;  %v10557_v58 = vmul.f32 %v7655_v36, %v11801_v53  ;;  %v11806_v53 = vld [vmem:[#allocation123_spill] sm:$0xff] }
 0xc4b   : > { %11796 = vst [vmem:[#allocation35_spill] sm:$0xff] %v10543_v12  ;;  %v10548_v37 = vpop.xlane.xlu1 %4225  ;;  %7666 = vrcp.f32 %v10442_v7 }
 0xc4c   : > { %v7657_v35 = vpop.eup %7656  ;;  %11802 = vst [vmem:[#allocation62_spill] sm:$0xff] %v10557_v58 }
 0xc4d   : > { %v4216_v20 = vpop.xlane.xlu0 %4215  ;;  %v10554_v39 = vmul.f32 %v7657_v35, %v11799_v15  ;;  %v7659_v52 = vpop.eup %7658  ;;  %v11804_v35 = vld [vmem:[#allocation121_spill] sm:$0xff] }
 0xc4e   : > { %7668 = vrcp.f32 %v4216_v20  ;;  %3431 = vrot.lane.b32.xlu1 %v11803_v46, %s8101_s27  ;;  %v10572_v36 = vmul.f32 %v7659_v52, %v11806_v53 }
 0xc4f   : > { %11800 = vst [vmem:[#allocation48_spill] sm:$0xff] %v10554_v39  ;;  %v10563_v6 = vpop.xlane.xlu1 %2150  ;;  %7670 = vrcp.f32 %v10455_v38  ;;  %v11810_v39 = vld [vmem:[#allocation135_spill] sm:$0xff] }
 0xc50   : > { %v7661_v7 = vpop.eup %7660  ;;  %11807 = vst [vmem:[#allocation80_spill] sm:$0xff] %v10572_v36  ;;  %v11813_v36 = vld [vmem:[#allocation175_spill] sm:$0xff] }
 0xc51   : > { %v2141_v15 = vpop.xlane.xlu0 %2140  ;;  %v10569_v43 = vmul.f32 %v7661_v7, %v11804_v35  ;;  %v7663_v20 = vpop.eup %7662 }
 0xc52   : > { %7672 = vrcp.f32 %v2141_v15  ;;  %v10583_v7 = vmul.f32 %v7663_v20, %v11810_v39  ;;  %v11814_v20 = vpack.c.bf16 %v10377_v54, %v10374_v33  ;;  %v11819_v33 = vpack.c.bf16 %v10390_v10, %v10387_v30  ;;  %v11824_v54 = vld [vmem:[#allocation132_spill] sm:$0xff]  ;;  %v11828_v30 = vld [vmem:[#allocation178_spill] sm:$0xff] }
 0xc53   : > { %11805 = vst [vmem:[#allocation61_spill] sm:$0xff] %v10569_v43  ;;  %v10574_v12 = vpop.xlane.xlu1 %3715  ;;  %7674 = vrcp.f32 %v10468_v48  ;;  %v11812_v43 = vld [vmem:[#allocation173_spill] sm:$0xff] }
 0xc54   : > { %v7665_v61 = vpop.eup %7664  ;;  %11811 = vst [vmem:[#allocation42_spill] sm:$0xff] %v10583_v7 }
 0xc55   : > { %v2688_v46 = vpop.xlane.xlu0 %2687  ;;  %v10580_v38 = vmul.f32 %v7665_v61, %v11808_v51  ;;  %v7667_v35 = vpop.eup %7666 }
 0xc56   : > { %7676 = vrcp.f32 %v2688_v46  ;;  %v10594_v51 = vmul.f32 %v7667_v35, %v11813_v36  ;;  %v11817_v36 = vld [vmem:[#allocation106_spill] sm:$0xff] }
 0xc57   : > { %11809 = vst [vmem:[#allocation58_spill] sm:$0xff] %v10580_v38  ;;  %v10585_v52 = vpop.xlane.xlu1 %1640  ;;  %7678 = vrcp.f32 %v10482_v19 }
 0xc58   : > { %v7669_v53 = vpop.eup %7668 }
 0xc59   : > { %v3235_v63 = vpop.xlane.xlu0 %3234  ;;  %v10591_v48 = vmul.f32 %v7669_v53, %v11812_v43  ;;  %v7671_v61 = vpop.eup %7670  ;;  %v11815_v53 = vld [vmem:[#allocation104_spill] sm:$0xff] }
 0xc5a   : > { %7680 = vrcp.f32 %v3235_v63  ;;  %v10609_v35 = vmul.f32 %v7671_v61, %v11817_v36  ;;  %v11822_v61 = vld [vmem:[#allocation122_spill] sm:$0xff] }
 0xc5b   : > { %v10596_v39 = vpop.xlane.xlu1 %2697  ;;  %4414 = vrot.lane.b32.xlu0 %v11814_v20, %s8103_s20  ;;  %7682 = vrcp.f32 %v10496_v9 }
 0xc5c   : > { %v7673_v19 = vpop.eup %7672  ;;  %11818 = vst [vmem:[#allocation20_spill] sm:$0xff] %v10609_v35 }
 0xc5d   : > { %v4220_v43 = vpop.xlane.xlu0 %4219  ;;  %v10606_v15 = vmul.f32 %v7673_v19, %v11815_v53  ;;  %v7675_v63 = vpop.eup %7674  ;;  %v11820_v53 = vld [vmem:[#allocation120_spill] sm:$0xff] }
 0xc5e   : > { %7684 = vrcp.f32 %v4220_v43  ;;  %v10624_v36 = vmul.f32 %v7675_v63, %v11822_v61 }
 0xc5f   : > { %11816 = vst [vmem:[#allocation45_spill] sm:$0xff] %v10606_v15  ;;  %2339 = vrot.lane.b32.xlu0 %v11819_v33, %s8103_s20  ;;  %7686 = vrcp.f32 %v10510_v32  ;;  %v10618_v9 = vpop.xlane.xlu1 %3244  ;;  %v11826_v15 = vld [vmem:[#allocation134_spill] sm:$0xff] }
 0xc60   : > { %v7677_v20 = vpop.eup %7676  ;;  %11823 = vst [vmem:[#allocation82_spill] sm:$0xff] %v10624_v36  ;;  %v11838_v36 = vld [vmem:[#allocation127_spill] sm:$0xff] }
 0xc61   : > { %v2145_v19 = vpop.xlane.xlu0 %2144  ;;  %v10621_v46 = vmul.f32 %v7677_v20, %v11820_v53  ;;  %v7679_v43 = vpop.eup %7678 }
 0xc62   : > { %7688 = vrcp.f32 %v2145_v19  ;;  %v10633_v35 = vmul.f32 %v7679_v43, %v11826_v15  ;;  %v11836_v15 = vld [vmem:[#allocation125_spill] sm:$0xff] }
 0xc63   : > { %11821 = vst [vmem:[#allocation81_spill] sm:$0xff] %v10621_v46  ;;  %7690 = vrcp.f32 %v10523_v27  ;;  %v10635_v53 = vpop.xlane.xlu1 %3719  ;;  %v11830_v46 = vld [vmem:[#allocation180_spill] sm:$0xff] }
 0xc64   : > { %v7681_v10 = vpop.eup %7680  ;;  %11827 = vst [vmem:[#allocation47_spill] sm:$0xff] %v10633_v35  ;;  %v11834_v35 = vld [vmem:[#allocation111_spill] sm:$0xff] }
 0xc65   : > { %v2692_v33 = vpop.xlane.xlu0 %2691  ;;  %v10630_v32 = vmul.f32 %v7681_v10, %v11824_v54  ;;  %v7683_v20 = vpop.eup %7682 }
 0xc66   : > { %7692 = vrcp.f32 %v2692_v33  ;;  %v10644_v54 = vmul.f32 %v7683_v20, %v11830_v46 }
 0xc67   : > { %11825 = vst [vmem:[#allocation38_spill] sm:$0xff] %v10630_v32  ;;  %7694 = vrcp.f32 %v10537_v62  ;;  %v10649_v33 = vpop.xlane.xlu1 %1644  ;;  %v11832_v32 = vld [vmem:[#allocation109_spill] sm:$0xff] }
 0xc68   : > { %v7685_v19 = vpop.eup %7684  ;;  %11831 = vst [vmem:[#allocation23_spill] sm:$0xff] %v10644_v54 }
 0xc69   : > { %v3239_v61 = vpop.xlane.xlu0 %3238  ;;  %v10641_v27 = vmul.f32 %v7685_v19, %v11828_v30  ;;  %v7687_v10 = vpop.eup %7686 }
 0xc6a   : > { %7696 = vrcp.f32 %v3239_v61  ;;  %v10655_v30 = vmul.f32 %v7687_v10, %v11834_v35 }
 0xc6b   : > { %11829 = vst [vmem:[#allocation40_spill] sm:$0xff] %v10641_v27  ;;  %7698 = vrcp.f32 %v10548_v37  ;;  %v10667_v35 = vpop.xlane.xlu1 %3723 }
 0xc6c   : > { %v7689_v43 = vpop.eup %7688  ;;  %11835 = vst [vmem:[#allocation59_spill] sm:$0xff] %v10655_v30 }
 0xc6d   : > { %v4224_v63 = vpop.xlane.xlu0 %4223  ;;  %v10652_v62 = vmul.f32 %v7689_v43, %v11832_v32  ;;  %v7691_v19 = vpop.eup %7690  ;;  %v11840_v43 = vld [vmem:[#allocation137_spill] sm:$0xff] }
 0xc6e   : > { %7700 = vrcp.f32 %v4224_v63  ;;  %v10664_v27 = vmul.f32 %v7691_v19, %v11838_v36  ;;  %v11844_v63 = vld [vmem:[#allocation177_spill] sm:$0xff] }
 0xc6f   : > { %11833 = vst [vmem:[#allocation60_spill] sm:$0xff] %v10652_v62  ;;  %7702 = vrcp.f32 %v10563_v6 }
 0xc70   : > { %v7693_v20 = vpop.eup %7692  ;;  %11839 = vst [vmem:[#allocation50_spill] sm:$0xff] %v10664_v27 }
 0xc71   : > { %v2149_v61 = vpop.xlane.xlu0 %2148  ;;  %v10661_v37 = vmul.f32 %v7693_v20, %v11836_v15  ;;  %v7695_v32 = vpop.eup %7694  ;;  %v11842_v15 = vld [vmem:[#allocation139_spill] sm:$0xff] }
 0xc72   : > { %7704 = vrcp.f32 %v2149_v61  ;;  %4747 = vadd.xlane.f32.xlu1 %v10217_v13  ;;  %v10676_v20 = vmul.f32 %v7695_v32, %v11842_v15  ;;  %v10682_v61 = vpop.xlane.xlu1 %1648  ;;  %v11848_v15 = vld [vmem:[#allocation108_spill] sm:$0xff] }
 0xc73   : > { %11837 = vst [vmem:[#allocation54_spill] sm:$0xff] %v10661_v37  ;;  %7706 = vrcp.f32 %v10574_v12 }
 0xc74   : > { %v7697_v10 = vpop.eup %7696  ;;  %11843 = vst [vmem:[#allocation26_spill] sm:$0xff] %v10676_v20 }
 0xc75   : > { %v3714_v6 = vpop.xlane.xlu0 %3713  ;;  %v10673_v46 = vmul.f32 %v7697_v10, %v11840_v43  ;;  %v7699_v36 = vpop.eup %7698  ;;  %v11846_v10 = vld [vmem:[#allocation179_spill] sm:$0xff] }
 0xc76   : > { %7708 = vrcp.f32 %v3714_v6  ;;  %4743 = vadd.xlane.f32.xlu1 %v10215_v1  ;;  %v10688_v43 = vmul.f32 %v7699_v36, %v11846_v10 }
 0xc77   : > { %11841 = vst [vmem:[#allocation37_spill] sm:$0xff] %v10673_v46  ;;  %7710 = vrcp.f32 %v10585_v52  ;;  %v11850_v46 = vld [vmem:[#allocation110_spill] sm:$0xff] }
 0xc78   : > { %v7701_v19 = vpop.eup %7700  ;;  %11847 = vst [vmem:[#allocation98_spill] sm:$0xff] %v10688_v43 }
 0xc79   : > { %v1639_v12 = vpop.xlane.xlu0 %1638  ;;  %v10685_v37 = vmul.f32 %v7701_v19, %v11844_v63  ;;  %v7703_v32 = vpop.eup %7702 }
 0xc7a   : > { %7712 = vrcp.f32 %v1639_v12  ;;  %4755 = vadd.xlane.f32.xlu1 %v10241_v24  ;;  %v10698_v63 = vmul.f32 %v7703_v32, %v11850_v46  ;;  %v3728_v24 = vpop.xlane.xlu1 %3727  ;;  %v11854_v32 = vld [vmem:[#allocation87_spill] sm:$0xff] }
 0xc7b   : > { %11845 = vst [vmem:[#allocation52_spill] sm:$0xff] %v10685_v37  ;;  %7714 = vrcp.f32 %v10596_v39  ;;  %v11852_v39 = vld [vmem:[#allocation151_spill] sm:$0xff] }
 0xc7c   : > { %v7705_v6 = vpop.eup %7704  ;;  %11851 = vst [vmem:[#allocation129_spill] sm:$0xff] %v10698_v63 }
 0xc7d   : > { %v2696_v52 = vpop.xlane.xlu0 %2695  ;;  %v10695_v13 = vmul.f32 %v7705_v6, %v11848_v15  ;;  %v7707_v19 = vpop.eup %7706  ;;  %v11853_v6 = vld [vmem:[#allocation149_spill] sm:$0xff] }
 0xc7e   : > { %7716 = vrcp.f32 %v2696_v52  ;;  %4751 = vadd.xlane.f32.xlu1 %v10245_v11  ;;  %4745 = vadd.xlane.f32.xlu0 %v10209_v56  ;;  %v3867_v10 = vmul.f32 %v7707_v19, %v11852_v39  ;;  %v1653_v36 = vpop.xlane.xlu1 %1652  ;;  %v11858_v39 = vld [vmem:[#allocation126_spill] sm:$0xff] }
 0xc7f   : > { %11849 = vst [vmem:[#allocation56_spill] sm:$0xff] %v10695_v13  ;;  %7718 = vrcp.f32 %v10618_v9  ;;  %v11855_v13 = vld [vmem:[#allocation85_spill] sm:$0xff] }
 0xc80   : > { %v7709_v12 = vpop.eup %7708 }
 0xc81   : > { %v3866_v15 = vmul.f32 %v7709_v12, %v11853_v6  ;;  %v3243_v1 = vpop.xlane.xlu0 %3242  ;;  %v7711_v46 = vpop.eup %7710  ;;  %v11856_v12 = vld [vmem:[#allocation124_spill] sm:$0xff] }
 0xc82   : > { %7720 = vrcp.f32 %v3243_v1  ;;  %4763 = vadd.xlane.f32.xlu1 %v10278_v42  ;;  %4741 = vadd.xlane.f32.xlu0 %v10211_v23  ;;  %v1792_v52 = vmul.f32 %v7711_v46, %v11854_v32  ;;  %v11860_v6 = vld [vmem:[#allocation136_spill] sm:$0xff]  ;;  %v11862_v46 = vld [vmem:[#allocation138_spill] sm:$0xff] }
 0xc83   : > { %v3882_v11 = vpack.c.bf16 %v3867_v10, %v3866_v15  ;;  %7722 = vrcp.f32 %v10635_v53  ;;  %v2338_v53 = vpop.permute.xlu1 %2337 }
 0xc84   : > { %v7713_v56 = vpop.eup %7712 }
 0xc85   : > { %v1791_v9 = vmul.f32 %v7713_v56, %v11855_v13  ;;  %v3718_v63 = vpop.xlane.xlu0 %3717  ;;  %3890 = vst.msk [vmem:[#allocation5 + $0x8] sm:$0xff] %vm1412_vm0, %v3882_v11  ;;  %v7715_v19 = vpop.eup %7714 }
 0xc86   : > { %7724 = vrcp.f32 %v3718_v63  ;;  %4759 = vadd.xlane.f32.xlu1 %v10273_v47  ;;  %4753 = vadd.xlane.f32.xlu0 %v10248_v45  ;;  %v10721_v10 = vmul.f32 %v7715_v19, %v11858_v39 }
 0xc87   : > { %v1807_v23 = vpack.c.bf16 %v1792_v52, %v1791_v9  ;;  %7726 = vrcp.f32 %v10649_v33  ;;  %v11865_v52 = vld [vmem:[#allocation148_spill] sm:$0xff] }
 0xc88   : > { %v7717_v42 = vpop.eup %7716  ;;  %11859 = vst [vmem:[#allocation29_spill] sm:$0xff] %v10721_v10 }
 0xc89   : > { %1815 = vst.msk [vmem:[#allocation5] sm:$0xff] %vm1412_vm0, %v1807_v23  ;;  %v1643_v1 = vpop.xlane.xlu0 %1642  ;;  %v10718_v13 = vmul.f32 %v7717_v42, %v11856_v12  ;;  %v7719_v63 = vpop.eup %7718 }
 0xc8a   : > { %2362 = vst.msk [vmem:[#allocation5] sm:$0xff] %vm2361_vm1, %v2338_v53  ;;  %7728 = vrcp.f32 %v1643_v1  ;;  %4771 = vadd.xlane.f32.xlu1 %v10411_v3  ;;  %4749 = vadd.xlane.f32.xlu0 %v10237_v4  ;;  %v10733_v11 = vmul.f32 %v7719_v63, %v11862_v46  ;;  %v11867_v1 = vld [vmem:[#allocation84_spill] sm:$0xff]  ;;  %v11869_v46 = vld [vmem:[#allocation153_spill] sm:$0xff]  ;;  %v11879_v4 = vld [vmem:[#allocation159_spill] sm:$0xff] }
 0xc8b   : > { %11857 = vst [vmem:[#allocation44_spill] sm:$0xff] %v10718_v13  ;;  %7730 = vrcp.f32 %v10667_v35  ;;  %v11864_v35 = vld [vmem:[#allocation150_spill] sm:$0xff] }
 0xc8c   : > { %v7721_v47 = vpop.eup %7720  ;;  %11863 = vst [vmem:[#allocation83_spill] sm:$0xff] %v10733_v11 }
 0xc8d   : > { %v3722_v33 = vpop.xlane.xlu0 %3721  ;;  %v10730_v15 = vmul.f32 %v7721_v47, %v11860_v6  ;;  %v7723_v56 = vpop.eup %7722 }
 0xc8e   : > { %7732 = vrcp.f32 %v3722_v33  ;;  %4767 = vadd.xlane.f32.xlu1 %v10405_v17  ;;  %4761 = vadd.xlane.f32.xlu0 %v10268_v25  ;;  %v3869_v32 = vmul.f32 %v7723_v56, %v11864_v35  ;;  %v11866_v17 = vld [vmem:[#allocation86_spill] sm:$0xff] }
 0xc8f   : > { %11861 = vst [vmem:[#allocation55_spill] sm:$0xff] %v10730_v15  ;;  %7734 = vrcp.f32 %v10682_v61 }
 0xc90   : > { %v7725_v3 = vpop.eup %7724 }
 0xc91   : > { %v3868_v9 = vmul.f32 %v7725_v3, %v11865_v52  ;;  %v1647_v19 = vpop.xlane.xlu0 %1646  ;;  %v7727_v23 = vpop.eup %7726 }
 0xc92   : > { %7736 = vrcp.f32 %v1647_v19  ;;  %4757 = vadd.xlane.f32.xlu0 %v10271_v57  ;;  %v1794_v25 = vmul.f32 %v7727_v23, %v11866_v17  ;;  %v11868_v57 = vld [vmem:[#allocation155_spill] sm:$0xff]  ;;  %v11871_v23 = vld [vmem:[#allocation89_spill] sm:$0xff] }
 0xc93   : > { %v3883_v42 = vpack.c.bf16 %v3869_v32, %v3868_v9  ;;  %7738 = vrcp.f32 %v3728_v24  ;;  %v11870_v9 = vld [vmem:[#allocation91_spill] sm:$0xff] }
 0xc94   : > { %v7729_v53 = vpop.eup %7728 }
 0xc95   : > { %v1793_v12 = vmul.f32 %v7729_v53, %v11867_v1  ;;  %v3726_v39 = vpop.xlane.xlu0 %3725  ;;  %3891 = vst.msk [vmem:[#allocation5 + $0x18] sm:$0xff] %vm1412_vm0, %v3883_v42  ;;  %v7731_v61 = vpop.eup %7730 }
 0xc96   : > { %7740 = vrcp.f32 %v3726_v39  ;;  %4769 = vadd.xlane.f32.xlu0 %v10384_v21  ;;  %v3871_v6 = vmul.f32 %v7731_v61, %v11868_v57 }
 0xc97   : > { %v1808_v63 = vpack.c.bf16 %v1794_v25, %v1793_v12  ;;  %7742 = vrcp.f32 %v1653_v36  ;;  %v11872_v12 = vld [vmem:[#allocation154_spill] sm:$0xff] }
 0xc98   : > { %v7733_v47 = vpop.eup %7732  ;;  %v10747_v33 = vpop.f32.mrb[176].mxu1 }
 0xc99   : > { %v3870_v24 = vmul.f32 %v7733_v47, %v11869_v46  ;;  %v10751_v56 = vpop.f32.mrb[177].mxu1  ;;  %v1651_v3 = vpop.xlane.xlu0 %1650  ;;  %1816 = vst.msk [vmem:[#allocation5 + $0x10] sm:$0xff] %vm1412_vm0, %v1808_v63  ;;  %v11874_v46 = vld [vmem:[#allocation90_spill] sm:$0xff] }
 0xc9a   : > { %v7735_v35 = vpop.eup %7734  ;;  %7744 = vrcp.f32 %v1651_v3  ;;  %v10754_v32 = vpop.f32.mrb[178].mxu1  ;;  %4765 = vadd.xlane.f32.xlu0 %v10392_v40  ;;  %v11873_v40 = vld [vmem:[#allocation152_spill] sm:$0xff] }
 0xc9b   : > { %v10757_v21 = vpop.f32.mrb[179].mxu1  ;;  %v3884_v36 = vpack.c.bf16 %v3871_v6, %v3870_v24  ;;  %v1796_v19 = vmul.f32 %v7735_v35, %v11870_v9  ;;  %v11875_v3 = vld [vmem:[#allocation88_spill] sm:$0xff] }
 0xc9c   : > { %v7737_v52 = vpop.eup %7736 }
 0xc9d   : > { %v1795_v42 = vmul.f32 %v7737_v52, %v11871_v23  ;;  %v4413_v53 = vpop.permute.xlu0 %4412  ;;  %3892 = vst.msk [vmem:[#allocation5 + $0x28] sm:$0xff] %vm1412_vm0, %v3884_v36  ;;  %v7739_v17 = vpop.eup %7738 }
 0xc9e   : > { %4436 = vst.msk [vmem:[#allocation5 + $0x8] sm:$0xff] %vm2361_vm1, %v4413_v53  ;;  %v3873_v39 = vmul.f32 %v7739_v17, %v11872_v12 }
 0xc9f   : > { %v1809_v25 = vpack.c.bf16 %v1796_v19, %v1795_v42 }
 0xca0   : > { %v7741_v1 = vpop.eup %7740 }
 0xca1   : > { %v3872_v61 = vmul.f32 %v7741_v1, %v11873_v40  ;;  %v2885_v63 = vpop.permute.xlu0 %2884  ;;  %1817 = vst.msk [vmem:[#allocation5 + $0x20] sm:$0xff] %vm1412_vm0, %v1809_v25  ;;  %v7743_v47 = vpop.eup %7742 }
 0xca2   : > { %2909 = vst.msk [vmem:[#allocation5] sm:$0xff] %vm2908_vm2, %v2885_v63  ;;  %v1798_v24 = vmul.f32 %v7743_v47, %v11874_v46  ;;  %v11877_v46 = vld [vmem:[#allocation95_spill] sm:$0xff] }
 0xca3   : > { %v3885_v57 = vpack.c.bf16 %v3873_v39, %v3872_v61 }
 0xca4   : > { %v7745_v6 = vpop.eup %7744 }
 0xca5   : > { %v1797_v35 = vmul.f32 %v7745_v6, %v11875_v3  ;;  %v10769_v36 = vpop.f32.mrb[180].mxu1  ;;  %3893 = vst.msk [vmem:[#allocation5 + $0x38] sm:$0xff] %vm1412_vm0, %v3885_v57  ;;  %v11876_v57 = vld [vmem:[#allocation93_spill] sm:$0xff] }
 0xca6   : > { %v10772_v52 = vpop.f32.mrb[181].mxu1 }
 0xca7   : > { %v10774_v9 = vpop.f32.mrb[182].mxu1  ;;  %v1810_v19 = vpack.c.bf16 %v1798_v24, %v1797_v35 }
 0xca8   : > { %v10776_v23 = vpop.f32.mrb[183].mxu1 }
 0xca9   : > { %1818 = vst.msk [vmem:[#allocation5 + $0x30] sm:$0xff] %vm1412_vm0, %v1810_v19 }
 0xcb2   : > { %v10779_v42 = vpop.f32.mrb[184].mxu1 }
 0xcb3   : > { %v10781_v53 = vpop.f32.mrb[185].mxu1 }
 0xcb4   : > { %v10783_v17 = vpop.f32.mrb[186].mxu1 }
 0xcb5   : > { %v10785_v25 = vpop.f32.mrb[187].mxu1 }
 0xcc2   : > { %v3730_v1 = vpop.xlane.xlu1 %3729 }
 0xcc6   : > { %v1655_v12 = vpop.xlane.xlu1 %1654 }
 0xcc7   : > { %7746 = vrcp.f32 %v1655_v12 }
 0xcca   : > { %v1657_v39 = vpop.xlane.xlu1 %1656 }
 0xccb   : > { %7748 = vrcp.f32 %v1657_v39 }
 0xccc   : > { %7750 = vrcp.f32 %v3730_v1  ;;  %v11878_v1 = vld [vmem:[#allocation157_spill] sm:$0xff] }
 0xcce   : > { %v3432_v40 = vpop.permute.xlu1 %3431 }
 0xccf   : > { %3456 = vst.msk [vmem:[#allocation5] sm:$0xff] %vm3455_vm3, %v3432_v40 }
 0xcd1   : > { %v7747_v63 = vpop.eup %7746 }
 0xcd2   : > { %v3732_v61 = vpop.xlane.xlu0 %3731  ;;  %v1799_v6 = vmul.f32 %v7747_v63, %v11876_v57 }
 0xcd3   : > { %7752 = vrcp.f32 %v3732_v61 }
 0xcd5   : > { %v7749_v47 = vpop.eup %7748 }
 0xcd6   : > { %v1800_v24 = vmul.f32 %v7749_v47, %v11877_v46  ;;  %v4415_v3 = vpop.permute.xlu0 %4414  ;;  %v7751_v12 = vpop.eup %7750 }
 0xcd7   : > { %4437 = vst.msk [vmem:[#allocation5 + $0x18] sm:$0xff] %vm2361_vm1, %v4415_v3  ;;  %v3874_v40 = vmul.f32 %v7751_v12, %v11878_v1 }
 0xcd8   : > { %v1811_v35 = vpack.c.bf16 %v1800_v24, %v1799_v6 }
 0xcda   : > { %v2340_v19 = vpop.permute.xlu0 %2339  ;;  %1819 = vst.msk [vmem:[#allocation5 + $0x40] sm:$0xff] %vm1412_vm0, %v1811_v35 }
 0xcdb   : > { %2363 = vst.msk [vmem:[#allocation5 + $0x10] sm:$0xff] %vm2361_vm1, %v2340_v19 }
 0xcdd   : > { %v7753_v39 = vpop.eup %7752 }
 0xcde   : > { %v3875_v61 = vmul.f32 %v7753_v39, %v11879_v4 }
 0xce0   : > { %v3886_v45 = vpack.c.bf16 %v3875_v61, %v3874_v40 }
 0xce2   : > { %3894 = vst.msk [vmem:[#allocation5 + $0x48] sm:$0xff] %vm1412_vm0, %v3886_v45 }
 0xcf9   : > { %v10796_v63 = vpop.f32.mrb[188].mxu1 }
 0xcfa   : > { %v10798_v47 = vpop.f32.mrb[189].mxu1 }
 0xcfb   : > { %v10800_v57 = vpop.f32.mrb[190].mxu1 }
 0xcfc   : > { %v10802_v6 = vpop.f32.mrb[191].mxu1 }
 0xcff   : > { %v4748_v46 = vpop.xlane.xlu1 %4747 }
 0xd00   : > { %7754 = vrcp.f32 %v4748_v46 }
 0xd01   : > { %v10804_v24 = vpop.f32.mrb[192].mxu1 }
 0xd02   : > { %v10806_v3 = vpop.f32.mrb[193].mxu1 }
 0xd03   : > { %v10808_v35 = vpop.f32.mrb[194].mxu1  ;;  %v4744_v19 = vpop.xlane.xlu1 %4743 }
 0xd04   : > { %v10810_v4 = vpop.f32.mrb[195].mxu1 }
 0xd05   : > { %5209 = vmax.xlane.f32.xlu0 %v10810_v4 }
 0xd07   : > { %v4756_v45 = vpop.xlane.xlu1 %4755 }
 0xd09   : > { %v10813_v12 = vpop.f32.mrb[196].mxu1 }
 0xd0a   : > { %v10815_v39 = vpop.f32.mrb[197].mxu1  ;;  %v7755_v30 = vpop.eup %7754 }
 0xd0b   : > { %v10817_v1 = vpop.f32.mrb[198].mxu1  ;;  %v4752_v40 = vpop.xlane.xlu1 %4751 }
 0xd0c   : > { %v4746_v61 = vpop.xlane.xlu0 %4745  ;;  %v10819_v15 = vpop.f32.mrb[199].mxu1 }
 0xd0d   : > { %7756 = vrcp.f32 %v4746_v61  ;;  %5217 = vmax.xlane.f32.xlu0 %v10819_v15 }
 0xd0e   : > { %7758 = vrcp.f32 %v4744_v19 }
 0xd0f   : > { %v4764_v11 = vpop.xlane.xlu1 %4763 }
 0xd10   : > { %7760 = vrcp.f32 %v4764_v11  ;;  %v4742_v13 = vpop.xlane.xlu0 %4741 }
 0xd11   : > { %7762 = vrcp.f32 %v4742_v13  ;;  %v10822_v10 = vpop.f32.mrb[200].mxu1 }
 0xd12   : > { %v10824_v20 = vpop.f32.mrb[201].mxu1  ;;  %5227 = vmax.xlane.f32.xlu0 %v10822_v10  ;;  %7764 = vrcp.f32 %v4756_v45  ;;  %v10836_v45 = vmul.f32 %v7755_v30, %v10754_v32 }
 0xd13   : > { %v10827_v46 = vpop.f32.mrb[202].mxu1  ;;  %v4760_v27 = vpop.xlane.xlu1 %4759 }
 0xd14   : > { %7766 = vrcp.f32 %v4760_v27  ;;  %v4754_v62 = vpop.xlane.xlu0 %4753  ;;  %v10829_v61 = vpop.f32.mrb[203].mxu1 }
 0xd15   : > { %7768 = vrcp.f32 %v4754_v62 }
 0xd16   : > { %5225 = vmax.xlane.f32.xlu0 %v10829_v61  ;;  %7770 = vrcp.f32 %v4752_v40 }
 0xd17   : > { %v7757_v11 = vpop.eup %7756  ;;  %v4772_v13 = vpop.xlane.xlu1 %4771 }
 0xd18   : > { %7772 = vrcp.f32 %v4772_v13  ;;  %v4750_v19 = vpop.xlane.xlu0 %4749  ;;  %v10833_v37 = vmul.f32 %v7757_v11, %v10747_v33  ;;  %v7759_v43 = vpop.eup %7758 }
 0xd19   : > { %7774 = vrcp.f32 %v4750_v19  ;;  %v10838_v27 = vpop.f32.mrb[204].mxu1  ;;  %v4927_v19 = vmul.f32 %v7759_v43, %v10757_v21 }
 0xd1a   : > { %v7761_v54 = vpop.eup %7760  ;;  %v10840_v38 = vpop.f32.mrb[205].mxu1  ;;  %5235 = vmax.xlane.f32.xlu0 %v10838_v27  ;;  %v4943_v62 = vpack.c.bf16 %v10836_v45, %v10833_v37 }
 0xd1b   : > { %v7763_v40 = vpop.eup %7762  ;;  %v10845_v13 = vpop.f32.mrb[206].mxu1  ;;  %v10848_v33 = vmul.f32 %v7761_v54, %v10783_v17 }
 0xd1c   : > { %v4762_v30 = vpop.xlane.xlu0 %4761  ;;  %v10850_v32 = vpop.f32.mrb[207].mxu1  ;;  %v4926_v11 = vmul.f32 %v7763_v40, %v10751_v56 }
 0xd1d   : > { %v7765_v7 = vpop.eup %7764  ;;  %7776 = vrcp.f32 %v4762_v30 }
 0xd1e   : > { %v7767_v58 = vpop.eup %7766  ;;  %5231 = vmax.xlane.f32.xlu0 %v10840_v38  ;;  %v4942_v26 = vpack.c.bf16 %v4927_v19, %v4926_v11  ;;  %v10863_v56 = vmul.f32 %v7765_v7, %v10774_v9 }
 0xd1f   : > { %v7769_v37 = vpop.eup %7768  ;;  %v10856_v45 = vmul.f32 %v7767_v58, %v10785_v25  ;;  %v4768_v58 = vpop.xlane.xlu1 %4767 }
 0xd20   : > { %4958 = vrot.lane.b32.xlu1 %v4942_v26, %s8102_s29  ;;  %v4758_v54 = vpop.xlane.xlu0 %4757  ;;  %v10860_v17 = vmul.f32 %v7769_v37, %v10769_v36  ;;  %v7771_v43 = vpop.eup %7770 }
 0xd21   : > { %7778 = vrcp.f32 %v4758_v54  ;;  %v4931_v36 = vmul.f32 %v7771_v43, %v10776_v23 }
 0xd22   : > { %v7773_v21 = vpop.eup %7772  ;;  %v4945_v40 = vpack.c.bf16 %v10863_v56, %v10860_v17 }
 0xd23   : > { %v7775_v30 = vpop.eup %7774  ;;  %v10868_v11 = vmul.f32 %v7773_v21, %v10800_v57 }
 0xd24   : > { %v4770_v25 = vpop.xlane.xlu0 %4769  ;;  %v4930_v26 = vmul.f32 %v7775_v30, %v10772_v52 }
 0xd25   : > { %7780 = vrcp.f32 %v4770_v25  ;;  %v11880_v25 = vpack.c.bf16 %v10403_v28, %v10400_v5  ;;  %v11882_v5 = vpack.c.bf16 %v10440_v55, %v10437_v14  ;;  %v11883_v28 = vpack.c.bf16 %v10451_v49, %v10448_v2 }
 0xd26   : > { %v4944_v19 = vpack.c.bf16 %v4931_v36, %v4930_v26  ;;  %7782 = vrcp.f32 %v4768_v58  ;;  %v11881_v36 = vld [vmem:[#allocation143_spill] sm:$0xff] }
 0xd27   : > { %v7777_v7 = vpop.eup %7776 }
 0xd28   : > { %v4766_v9 = vpop.xlane.xlu0 %4765  ;;  %v10873_v37 = vmul.f32 %v7777_v7, %v10779_v42 }
 0xd29   : > { %7784 = vrcp.f32 %v4766_v9 }
 0xd2a   : > { %v4947_v54 = vpack.c.bf16 %v10848_v33, %v10873_v37  ;;  %v7340_v33 = vld [vmem:[#allocation14 + $0x84] ss:$8 sps:$4 sm:$0xff]   ;;  %v7338_v37 = vld [vmem:[#allocation14 + $0x80] ss:$8 sps:$4 sm:$0xff]  }
 0xd2b   : > { %v7779_v57 = vpop.eup %7778 }
 0xd2c   : > { %v10878_v21 = vmul.f32 %v7779_v57, %v10781_v53  ;;  %v11886_v57 = vld [vmem:[#allocation142_spill] sm:$0xff] }
 0xd2e   : > { %v4946_v52 = vpack.c.bf16 %v10856_v45, %v10878_v21  ;;  %v7328_v21 = vld [vmem:[#allocation14 + $0x44] ss:$8 sps:$4 sm:$0xff]  }
 0xd2f   : > { %v7781_v23 = vpop.eup %7780 }
 0xd30   : > { %v10883_v43 = vmul.f32 %v7781_v23, %v10796_v63  ;;  %v7783_v30 = vpop.eup %7782  ;;  %v11887_v23 = vld [vmem:[#allocation74_spill] sm:$0xff] }
 0xd31   : > { %v10895_v26 = vmul.f32 %v7783_v30, %v10802_v6  ;;  %v11885_v6 = vld [vmem:[#allocation146_spill] sm:$0xff]  ;;  %v11889_v30 = vpack.c.bf16 %v10494_v29, %v10491_v18  ;;  %v11891_v18 = vpack.c.bf16 %v10426_v44, %v10423_v8 }
 0xd32   : > { %v4949_v42 = vpack.c.bf16 %v10868_v11, %v10883_v43  ;;  %v11948_v11 = vld [vmem:[#allocation129_spill] sm:$0xff]  ;;  %v11949_v43 = vld [vmem:[#allocation56_spill] sm:$0xff] }
 0xd33   : > { %v7785_v58 = vpop.eup %7784 }
 0xd34   : > { %2886 = vrot.lane.b32.xlu0 %v11880_v25, %s8102_s29  ;;  %v10892_v53 = vmul.f32 %v7785_v58, %v10798_v47  ;;  %v11884_v47 = vpack.c.bf16 %v10466_v59, %v10463_v34 }
 0xd36   : > { %v4948_v63 = vpack.c.bf16 %v10895_v26, %v10892_v53  ;;  %v11939_v53 = vld [vmem:[#allocation59_spill] sm:$0xff]  ;;  %v11940_v26 = vld [vmem:[#allocation60_spill] sm:$0xff] }
 0xd44   : > { %5211 = vmax.xlane.f32.xlu1 %v10804_v24 }
 0xd48   : > { %5207 = vmax.xlane.f32.xlu1 %v10806_v3 }
 0xd4c   : > { %5213 = vmax.xlane.f32.xlu1 %v10808_v35 }
 0xd50   : > { %5219 = vmax.xlane.f32.xlu1 %v10813_v12 }
 0xd53   : > { %3735 = vadd.xlane.f32.xlu0 %v11881_v36 }
 0xd54   : > { %5215 = vmax.xlane.f32.xlu1 %v10815_v39 }
 0xd58   : > { %5221 = vmax.xlane.f32.xlu1 %v10817_v1 }
 0xd5c   : > { %5223 = vmax.xlane.f32.xlu1 %v10824_v20 }
 0xd60   : > { %5229 = vmax.xlane.f32.xlu1 %v10827_v46 }
 0xd64   : > { %5237 = vmax.xlane.f32.xlu1 %v10845_v13 }
 0xd68   : > { %5233 = vmax.xlane.f32.xlu1 %v10850_v32 }
 0xd69   : > { %4416 = vrot.lane.b32.xlu0 %v11882_v5, %s8103_s20 }
 0xd6d   : > { %2341 = vrot.lane.b32.xlu0 %v11883_v28, %s8103_s20 }
 0xd71   : > { %2888 = vrot.lane.b32.xlu0 %v11884_v47, %s8102_s29 }
 0xd79   : > { %4960 = vrot.lane.b32.xlu1 %v4943_v62, %s8102_s29  ;;  %v11888_v62 = vld [vmem:[#allocation72_spill] sm:$0xff] }
 0xd90   : > { %3739 = vadd.xlane.f32.xlu0 %v11885_v6 }
 0xd92   : > { %v4959_v7 = vpop.permute.xlu1 %4958  ;;  %v5210_v9 = vpop.xlane.xlu0 %5209 }
 0xd93   : > { %4982 = vst.msk [vmem:[#allocation5 + $0x8] sm:$0xff] %vm2908_vm2, %v4959_v7  ;;  %v5240_v29 = vsub.f32 %v10810_v4, %v5210_v9 }
 0xd95   : > { %v5257_v28 = vmul.f32 1.442695, %v5240_v29 }
 0xd9a   : > { %v5218_v14 = vpop.xlane.xlu0 %5217 }
 0xd9b   : > { %v5244_v55 = vsub.f32 %v10819_v15, %v5218_v14 }
 0xd9d   : > { %3733 = vadd.xlane.f32.xlu1 %v11886_v57 }
 0xd9f   : > { %v5228_v2 = vpop.xlane.xlu0 %5227 }
 0xda0   : > { %v5249_v49 = vsub.f32 %v10822_v10, %v5228_v2  ;;  %v11890_v10 = vpack.c.bf16 %v10506_v50, %v10503_v0 }
 0xda1   : > { %1658 = vadd.xlane.f32.xlu1 %v11887_v23  ;;  %v5265_v23 = vmul.f32 1.442695, %v5244_v55 }
 0xda3   : > { %v5226_v34 = vpop.xlane.xlu0 %5225 }
 0xda4   : > { %v5248_v59 = vsub.f32 %v10829_v61, %v5226_v34 }
 0xda5   : > { %1660 = vadd.xlane.f32.xlu1 %v11888_v62  ;;  %v11893_v62 = vld [vmem:[#allocation75_spill] sm:$0xff] }
 0xda6   : > { %4418 = vrot.lane.b32.xlu0 %v11889_v30, %s8103_s20 }
 0xda7   : > { %v10935_v58 = vpop.xlane.xlu0 %5235 }
 0xda8   : > { %v5253_v15 = vsub.f32 %v10838_v27, %v10935_v58 }
 0xdaa   : > { %2343 = vrot.lane.b32.xlu0 %v11890_v10, %s8103_s20 }
 0xdab   : > { %v10943_v25 = vpop.xlane.xlu0 %5231 }
 0xdac   : > { %v5251_v61 = vsub.f32 %v10840_v38, %v10943_v25  ;;  %v11896_v38 = vpack.c.bf16 %v10478_v31, %v10475_v41 }
 0xdaf   : > { %v2887_v36 = vpop.permute.xlu0 %2886 }
 0xdb0   : > { %2910 = vst.msk [vmem:[#allocation5 + $0x10] sm:$0xff] %vm2908_vm2, %v2887_v36 }
 0xdb6   : > { %3433 = vrot.lane.b32.xlu1 %v11891_v18, %s8101_s27 }
 0xdba   : > { %4962 = vrot.lane.b32.xlu1 %v4944_v19, %s8102_s29  ;;  %v11892_v19 = vld [vmem:[#allocation144_spill] sm:$0xff] }
 0xdd1   : > { %v5212_v5 = vpop.xlane.xlu1 %5211 }
 0xdd2   : > { %v5241_v0 = vsub.f32 %v10804_v24, %v5212_v5  ;;  %v11894_v5 = vld [vmem:[#allocation77_spill] sm:$0xff] }
 0xdd4   : > { %v5259_v50 = vmul.f32 1.442695, %v5241_v0 }
 0xdd5   : > { %v5208_v47 = vpop.xlane.xlu1 %5207 }
 0xdd6   : > { %7786 = vpow2.f32 %v5259_v50  ;;  %v5239_v6 = vsub.f32 %v10806_v3, %v5208_v47 }
 0xdd7   : > { %7788 = vpow2.f32 %v5257_v28  ;;  %v5273_v28 = vmul.f32 1.442695, %v5248_v59  ;;  %v5283_v59 = vmul.f32 1.442695, %v5253_v15 }
 0xdd8   : > { %v5255_v7 = vmul.f32 1.442695, %v5239_v6 }
 0xdd9   : > { %v5214_v14 = vpop.xlane.xlu1 %5213 }
 0xdda   : > { %7790 = vpow2.f32 %v5255_v7  ;;  %v5242_v8 = vsub.f32 %v10808_v35, %v5214_v14  ;;  %v11895_v14 = vld [vmem:[#allocation158_spill] sm:$0xff] }
 0xddc   : > { %v5261_v44 = vmul.f32 1.442695, %v5242_v8 }
 0xddd   : > { %v5220_v57 = vpop.xlane.xlu1 %5219 }
 0xdde   : > { %7792 = vpow2.f32 %v5261_v44  ;;  %v5245_v4 = vsub.f32 %v10813_v12, %v5220_v57  ;;  %3737 = vadd.xlane.f32.xlu1 %v11892_v19  ;;  %v5275_v12 = vmul.f32 1.442695, %v5249_v49 }
 0xde0   : > { %v7787_v24 = vpop.eup %7786  ;;  %v5267_v9 = vmul.f32 1.442695, %v5245_v4  ;;  %v3736_v2 = vpop.xlane.xlu0 %3735 }
 0xde1   : > { %5291 = vadd.xlane.f32.xlu0 %v7787_v24  ;;  %v5216_v34 = vpop.xlane.xlu1 %5215  ;;  %7794 = vrcp.f32 %v3736_v2  ;;  %v10961_v35 = vpop.eup %7788  ;;  %v5279_v2 = vmul.f32 1.442695, %v5251_v61 }
 0xde2   : > { %7796 = vpow2.f32 %v5267_v9  ;;  %v5243_v3 = vsub.f32 %v10815_v39, %v5216_v34  ;;  %1662 = vadd.xlane.f32.xlu1 %v11893_v62 }
 0xde3   : > { %7798 = vpow2.f32 %v5265_v23 }
 0xde4   : > { %v7791_v30 = vpop.eup %7790  ;;  %v5263_v10 = vmul.f32 1.442695, %v5243_v3  ;;  %v4417_v36 = vpop.permute.xlu0 %4416 }
 0xde5   : > { %5287 = vadd.xlane.f32.xlu0 %v7791_v30  ;;  %v5222_v18 = vpop.xlane.xlu1 %5221  ;;  %4438 = vst.msk [vmem:[#allocation5 + $0x28] sm:$0xff] %vm2361_vm1, %v4417_v36  ;;  %v5319_v55 = vpack.c.bf16 %v10961_v35, %v7791_v30 }
 0xde6   : > { %7800 = vpow2.f32 %v5263_v10  ;;  %v5246_v29 = vsub.f32 %v10817_v1, %v5222_v18  ;;  %1664 = vadd.xlane.f32.xlu1 %v11894_v5 }
 0xde7   : > { %6994 = vmatprep.mubr.bf16.mxu0 %v5319_v55  ;;  %7802 = vpow2.f32 %v5275_v12 }
 0xde8   : > { %v10967_v39 = vpop.eup %7792  ;;  %v5269_v0 = vmul.f32 1.442695, %v5246_v29  ;;  %v2342_v50 = vpop.permute.xlu0 %2341 }
 0xde9   : > { %v5224_v47 = vpop.xlane.xlu1 %5223  ;;  %2364 = vst.msk [vmem:[#allocation5 + $0x20] sm:$0xff] %vm2361_vm1, %v2342_v50  ;;  %v5320_v49 = vpack.c.bf16 %v10967_v39, %v7787_v24 }
 0xdea   : > { %7804 = vpow2.f32 %v5269_v0  ;;  %v5247_v6 = vsub.f32 %v10824_v20, %v5224_v47  ;;  %v11897_v0 = vpack.c.bf16 %v10521_v16, %v10518_v22 }
 0xdeb   : > { %v7795_v7 = vpop.eup %7794  ;;  %6995 = vmatmul.mubr.bf16.vlgmr.msra.gmra.mrb[128].mxu0 %v5320_v49  ;;  %7806 = vpow2.f32 %v5273_v28 }
 0xdec   : > { %v7797_v1 = vpop.eup %7796  ;;  %v10973_v8 = vmul.f32 %v7795_v7, %v11895_v14  ;;  %v5271_v44 = vmul.f32 1.442695, %v5247_v6  ;;  %v2889_v57 = vpop.permute.xlu0 %2888  ;;  %v11898_v6 = vld [vmem:[#allocation163_spill] sm:$0xff] }
 0xded   : > { %5299 = vadd.xlane.f32.xlu0 %v7797_v1  ;;  %v5230_v4 = vpop.xlane.xlu1 %5229  ;;  %2911 = vst.msk [vmem:[#allocation5 + $0x20] sm:$0xff] %vm2908_vm2, %v2889_v57  ;;  %v7799_v19 = vpop.eup %7798  ;;  %v11900_v57 = vld [vmem:[#allocation145_spill] sm:$0xff] }
 0xdee   : > { %7808 = vpow2.f32 %v5271_v44  ;;  %v5250_v20 = vsub.f32 %v10827_v46, %v5230_v4 }
 0xdef   : > { %7810 = vpow2.f32 %v5283_v59 }
 0xdf0   : > { %v7801_v24 = vpop.eup %7800  ;;  %v5277_v9 = vmul.f32 1.442695, %v5250_v20 }
 0xdf1   : > { %5295 = vadd.xlane.f32.xlu0 %v7801_v24  ;;  %v5238_v23 = vpop.xlane.xlu1 %5237  ;;  %v5321_v34 = vpack.c.bf16 %v7799_v19, %v7801_v24  ;;  %v7803_v58 = vpop.eup %7802  ;;  %v11901_v24 = vld [vmem:[#allocation92_spill] sm:$0xff] }
 0xdf2   : > { %7812 = vpow2.f32 %v5277_v9  ;;  %v5254_v27 = vsub.f32 %v10845_v13, %v5238_v23 }
 0xdf3   : > { %6998 = vmatprep.mubr.bf16.mxu0 %v5321_v34  ;;  %7814 = vpow2.f32 %v5279_v2  ;;  %v11902_v2 = vld [vmem:[#allocation94_spill] sm:$0xff] }
 0xdf4   : > { %v7805_v15 = vpop.eup %7804  ;;  %v5285_v3 = vmul.f32 1.442695, %v5254_v27  ;;  %v11903_v27 = vld [vmem:[#allocation147_spill] sm:$0xff] }
 0xdf5   : > { %v5234_v46 = vpop.xlane.xlu1 %5233  ;;  %5307 = vadd.xlane.f32.xlu0 %v7803_v58  ;;  %v5322_v62 = vpack.c.bf16 %v7805_v15, %v7797_v1  ;;  %v7807_v10 = vpop.eup %7806 }
 0xdf6   : > { %7816 = vpow2.f32 %v5285_v3  ;;  %v5252_v30 = vsub.f32 %v10850_v32, %v5234_v46  ;;  %v11904_v3 = vld [vmem:[#allocation78_spill] sm:$0xff] }
 0xdf7   : > { %3435 = vrot.lane.b32.xlu1 %v11896_v38, %s8101_s27  ;;  %6999 = vmatmul.mubr.bf16.gmra.mrb[132].mxu0 %v5322_v62  ;;  %v11905_v62 = vld [vmem:[#allocation76_spill] sm:$0xff]  ;;  %v11906_v38 = vld [vmem:[#allocation161_spill] sm:$0xff] }
 0xdf8   : > { %v7809_v25 = vpop.eup %7808  ;;  %v5281_v13 = vmul.f32 1.442695, %v5252_v30 }
 0xdf9   : > { %v4961_v61 = vpop.permute.xlu1 %4960  ;;  %5303 = vadd.xlane.f32.xlu0 %v7809_v25  ;;  %v5323_v36 = vpack.c.bf16 %v7807_v10, %v7809_v25  ;;  %v7811_v12 = vpop.eup %7810 }
 0xdfa   : > { %7818 = vpow2.f32 %v5281_v13  ;;  %4983 = vst.msk [vmem:[#allocation5 + $0x18] sm:$0xff] %vm2908_vm2, %v4961_v61 }
 0xdfb   : > { %7002 = vmatprep.mubr.bf16.mxu0 %v5323_v36 }
 0xdfc   : > { %v7813_v18 = vpop.eup %7812 }
 0xdfd   : > { %5315 = vadd.xlane.f32.xlu0 %v7811_v12  ;;  %v5324_v32 = vpack.c.bf16 %v7813_v18, %v7803_v58  ;;  %v7815_v55 = vpop.eup %7814 }
 0xdff   : > { %7003 = vmatmul.mubr.bf16.gmra.mrb[136].mxu0 %v5324_v32  ;;  %v11908_v32 = vld [vmem:[#allocation41_spill] sm:$0xff] }
 0xe00   : > { %v7817_v29 = vpop.eup %7816 }
 0xe01   : > { %5311 = vadd.xlane.f32.xlu0 %v7815_v55  ;;  %v5326_v41 = vpack.c.bf16 %v7817_v29, %v7811_v12  ;;  %v11907_v12 = vld [vmem:[#allocation36_spill] sm:$0xff] }
 0xe04   : > { %v7819_v31 = vpop.eup %7818 }
 0xe05   : > { %v5325_v5 = vpack.c.bf16 %v7819_v31, %v7815_v55 }
 0xe07   : > { %7006 = vmatprep.mubr.bf16.mxu0 %v5325_v5  ;;  %v11909_v5 = vld [vmem:[#allocation79_spill] sm:$0xff] }
 0xe08   : > { %7007 = vmatmul.mubr.bf16.gmra.mrb[140].mxu0 %v5326_v41 }
 0xe17   : > { %2890 = vrot.lane.b32.xlu0 %v11897_v0, %s8102_s29  ;;  %v11910_v0 = vpack.c.bf16 %v10533_v60, %v11909_v5  ;;  %v11911_v60 = vpack.c.bf16 %v10594_v51, %v10591_v48  ;;  %v7326_v48 = vld [vmem:[#allocation14 + $0x40] ss:$8 sps:$4 sm:$0xff]   ;;  %v7331_v51 = vld [vmem:[#allocation14 + $0x54] ss:$8 sps:$4 sm:$0xff]   ;;  %v7359_v5 = vld [vmem:[#allocation14 + $0xf0] ss:$8 sps:$4 sm:$0xff]  }
 0xe1b   : > { %5293 = vadd.xlane.f32.xlu1 %v10967_v39  ;;  %v11899_v39 = vld [vmem:[#allocation156_spill] sm:$0xff] }
 0xe1d   : > { %v3740_v50 = vpop.xlane.xlu0 %3739 }
 0xe1e   : > { %7820 = vrcp.f32 %v3740_v50  ;;  %v7314_v50 = vld [vmem:[#allocation14] ss:$8 sps:$4 sm:$0xff]  }
 0xe1f   : > { %5289 = vadd.xlane.f32.xlu1 %v10961_v35 }
 0xe21   : > { %v4419_v28 = vpop.permute.xlu0 %4418 }
 0xe22   : > { %4439 = vst.msk [vmem:[#allocation5 + $0x38] sm:$0xff] %vm2361_vm1, %v4419_v28 }
 0xe23   : > { %5301 = vadd.xlane.f32.xlu1 %v7805_v15 }
 0xe25   : > { %v2344_v47 = vpop.permute.xlu0 %2343 }
 0xe26   : > { %2365 = vst.msk [vmem:[#allocation5 + $0x30] sm:$0xff] %vm2361_vm1, %v2344_v47  ;;  %v7319_v47 = vld [vmem:[#allocation14 + $0x14] ss:$8 sps:$4 sm:$0xff]  }
 0xe27   : > { %5297 = vadd.xlane.f32.xlu1 %v7799_v19 }
 0xe28   : > { %v7821_v49 = vpop.eup %7820 }
 0xe29   : > { %v3879_v7 = vmul.f32 %v7821_v49, %v11898_v6  ;;  %v7317_v49 = vld [vmem:[#allocation14 + $0x10] ss:$8 sps:$4 sm:$0xff]  }
 0xe2a   : > { %v3734_v1 = vpop.xlane.xlu1 %3733 }
 0xe2b   : > { %7822 = vrcp.f32 %v3734_v1  ;;  %5309 = vadd.xlane.f32.xlu1 %v7813_v18  ;;  %v7320_v1 = vld [vmem:[#allocation14 + $0x20] ss:$8 sps:$4 sm:$0xff]  }
 0xe2e   : > { %v1659_v22 = vpop.xlane.xlu1 %1658 }
 0xe2f   : > { %5305 = vadd.xlane.f32.xlu1 %v7807_v10  ;;  %7824 = vrcp.f32 %v1659_v22 }
 0xe32   : > { %v1661_v16 = vpop.xlane.xlu1 %1660 }
 0xe33   : > { %7826 = vrcp.f32 %v1661_v16  ;;  %5317 = vadd.xlane.f32.xlu1 %v7817_v29  ;;  %v7325_v16 = vld [vmem:[#allocation14 + $0x34] ss:$8 sps:$4 sm:$0xff]  }
 0xe35   : > { %v7823_v35 = vpop.eup %7822 }
 0xe36   : > { %v3876_v14 = vmul.f32 %v7823_v35, %v11899_v39  ;;  %v3434_v44 = vpop.permute.xlu1 %3433  ;;  %3743 = vadd.xlane.f32.xlu0 %v11900_v57  ;;  %v7323_v35 = vld [vmem:[#allocation14 + $0x30] ss:$8 sps:$4 sm:$0xff]   ;;  %v7334_v39 = vld [vmem:[#allocation14 + $0x64] ss:$8 sps:$4 sm:$0xff]  }
 0xe37   : > { %3457 = vst.msk [vmem:[#allocation5 + $0x10] sm:$0xff] %vm3455_vm3, %v3434_v44  ;;  %5313 = vadd.xlane.f32.xlu1 %v7819_v31  ;;  %v7316_v31 = vld [vmem:[#allocation14 + $0x4] ss:$8 sps:$4 sm:$0xff]   ;;  %v7337_v44 = vld [vmem:[#allocation14 + $0x74] ss:$8 sps:$4 sm:$0xff]  }
 0xe38   : > { %v3887_v59 = vpack.c.bf16 %v10973_v8, %v3876_v14  ;;  %5756 = vmatprep.subr.bf16.mxu0 %v7316_v31  ;;  %v7332_v14 = vld [vmem:[#allocation14 + $0x60] ss:$8 sps:$4 sm:$0xff]   ;;  %v7335_v57 = vld [vmem:[#allocation14 + $0x70] ss:$8 sps:$4 sm:$0xff]  }
 0xe39   : > { %v7825_v20 = vpop.eup %7824  ;;  %5757 = vmatpush1.bf16.msra.mxu0 %v7314_v50 }
 0xe3a   : > { %v4963_v4 = vpop.permute.xlu1 %4962  ;;  %3895 = vst.msk [vmem:[#allocation5 + $0x58] sm:$0xff] %vm1412_vm0, %v3887_v59  ;;  %v1801_v9 = vmul.f32 %v7825_v20, %v11901_v24  ;;  %5758 = vmatprep.subr.bf16.mxu0 %v7319_v47  ;;  %v7341_v59 = vld [vmem:[#allocation14 + $0x90] ss:$8 sps:$4 sm:$0xff]   ;;  %v7346_v20 = vld [vmem:[#allocation14 + $0xa4] ss:$8 sps:$4 sm:$0xff]  }
 0xe3b   : > { %4984 = vst.msk [vmem:[#allocation5 + $0x28] sm:$0xff] %vm2908_vm2, %v4963_v4 }
 0xe3d   : > { %v7827_v19 = vpop.eup %7826  ;;  %5759 = vmatpush1.bf16.msra.mxu0 %v7317_v49 }
 0xe3e   : > { %v1802_v23 = vmul.f32 %v7827_v19, %v11902_v2  ;;  %v7344_v19 = vld [vmem:[#allocation14 + $0xa0] ss:$8 sps:$4 sm:$0xff]   ;;  %v7347_v2 = vld [vmem:[#allocation14 + $0xb0] ss:$8 sps:$4 sm:$0xff]  }
 0xe40   : > { %v1812_v34 = vpack.c.bf16 %v1802_v23, %v1801_v9  ;;  %v7349_v9 = vld [vmem:[#allocation14 + $0xb4] ss:$8 sps:$4 sm:$0xff]  }
 0xe42   : > { %1820 = vst.msk [vmem:[#allocation5 + $0x50] sm:$0xff] %vm1412_vm0, %v1812_v34  ;;  %v7352_v34 = vld [vmem:[#allocation14 + $0xc4] ss:$8 sps:$4 sm:$0xff]  }
 0xe48   : > { %4964 = vrot.lane.b32.xlu1 %v4945_v40, %s8102_s29 }
 0xe6b   : > { %v3738_v8 = vpop.xlane.xlu1 %3737 }
 0xe6c   : > { %7828 = vrcp.f32 %v3738_v8  ;;  %3741 = vadd.xlane.f32.xlu1 %v11903_v27  ;;  %v7350_v8 = vld [vmem:[#allocation14 + $0xc0] ss:$8 sps:$4 sm:$0xff]  }
 0xe6e   : > { %v11013_v15 = vpop.xlane.xlu0 %5291 }
 0xe6f   : > { %v1663_v58 = vpop.xlane.xlu1 %1662 }
 0xe70   : > { %1666 = vadd.xlane.f32.xlu1 %v11904_v3  ;;  %7830 = vrcp.f32 %v1663_v58  ;;  %v7353_v3 = vld [vmem:[#allocation14 + $0xd0] ss:$8 sps:$4 sm:$0xff]  }
 0xe72   : > { %v11017_v10 = vpop.xlane.xlu0 %5287 }
 0xe73   : > { %v1665_v46 = vpop.xlane.xlu1 %1664 }
 0xe74   : > { %7832 = vrcp.f32 %v1665_v46  ;;  %1668 = vadd.xlane.f32.xlu1 %v11905_v62  ;;  %v7355_v46 = vld [vmem:[#allocation14 + $0xd4] ss:$8 sps:$4 sm:$0xff]  }
 0xe75   : > { %7834 = vrcp.f32 %v11013_v15 }
 0xe76   : > { %v7829_v30 = vpop.eup %7828  ;;  %7836 = vrcp.f32 %v11017_v10 }
 0xe77   : > { %v3878_v17 = vmul.f32 %v7829_v30, %v11906_v38  ;;  %v3436_v56 = vpop.permute.xlu1 %3435  ;;  %v7356_v30 = vld [vmem:[#allocation14 + $0xe0] ss:$8 sps:$4 sm:$0xff]   ;;  %v7358_v38 = vld [vmem:[#allocation14 + $0xe4] ss:$8 sps:$4 sm:$0xff]  }
 0xe78   : > { %3458 = vst.msk [vmem:[#allocation5 + $0x20] sm:$0xff] %vm3455_vm3, %v3436_v56 }
 0xe79   : > { %v3888_v40 = vpack.c.bf16 %v3879_v7, %v3878_v17  ;;  %v7322_v7 = vld [vmem:[#allocation14 + $0x24] ss:$8 sps:$4 sm:$0xff]  }
 0xe7a   : > { %v11021_v25 = vpop.xlane.xlu0 %5299  ;;  %v7831_v13 = vpop.eup %7830  ;;  %5760 = vmatprep.subr.bf16.mxu0 %v7322_v7 }
 0xe7b   : > { %3896 = vst.msk [vmem:[#allocation5 + $0x68] sm:$0xff] %vm1412_vm0, %v3888_v40  ;;  %v1803_v18 = vmul.f32 %v7831_v13, %v11907_v12  ;;  %5761 = vmatpush1.bf16.msra.mxu0 %v7320_v1 }
 0xe7c   : > { %5762 = vmatprep.subr.bf16.mxu0 %v7325_v16 }
 0xe7e   : > { %v7833_v61 = vpop.eup %7832  ;;  %v11024_v36 = vpop.xlane.xlu0 %5295 }
 0xe7f   : > { %v1804_v55 = vmul.f32 %v7833_v61, %v11908_v32  ;;  %5763 = vmatpush1.bf16.msra.mxu0 %v7323_v35  ;;  %v7835_v17 = vpop.eup %7834  ;;  %v7361_v32 = vld [vmem:[#allocation14 + $0xf4] ss:$8 sps:$4 sm:$0xff]  }
 0xe80   : > { %5764 = vmatprep.subr.bf16.mxu0 %v7328_v21  ;;  %v7837_v40 = vpop.eup %7836 }
 0xe81   : > { %v1813_v29 = vpack.c.bf16 %v1804_v55, %v1803_v18 }
 0xe82   : > { %v11028_v41 = vpop.xlane.xlu0 %5307 }
 0xe83   : > { %1821 = vst.msk [vmem:[#allocation5 + $0x60] sm:$0xff] %vm1412_vm0, %v1813_v29  ;;  %5765 = vmatpush1.bf16.msra.mxu0 %v7326_v48 }
 0xe84   : > { %5766 = vmatprep.subr.bf16.mxu0 %v7331_v51 }
 0xe85   : > { %3437 = vrot.lane.b32.xlu1 %v11910_v0, %s8101_s27 }
 0xe86   : > { %v11035_v28 = vpop.xlane.xlu0 %5303 }
 0xe89   : > { %4966 = vrot.lane.b32.xlu1 %v4946_v52, %s8102_s29  ;;  %v7329_v52 = vld [vmem:[#allocation14 + $0x50] ss:$8 sps:$4 sm:$0xff]  }
 0xe8a   : > { %v11041_v6 = vpop.xlane.xlu0 %5315  ;;  %5767 = vmatpush1.bf16.msra.mxu0 %v7329_v52  ;;  %v11912_v52 = vld [vmem:[#allocation31_spill] sm:$0xff] }
 0xe8b   : > { %5768 = vmatprep.subr.bf16.mxu0 %v7334_v39 }
 0xe8d   : > { %4422 = vrot.lane.b32.xlu1 %v11911_v60, %s8103_s20 }
 0xe8e   : > { %v11047_v22 = vpop.xlane.xlu0 %5311  ;;  %5769 = vmatpush1.bf16.msra.mxu0 %v7332_v14 }
 0xe8f   : > { %5770 = vmatprep.subr.bf16.mxu0 %v7337_v44 }
 0xe91   : > { %4968 = vrot.lane.b32.xlu1 %v4947_v54, %s8102_s29  ;;  %v7343_v54 = vld [vmem:[#allocation14 + $0x94] ss:$8 sps:$4 sm:$0xff]  }
 0xe92   : > { %v2891_v45 = vpop.permute.xlu0 %2890  ;;  %5771 = vmatpush1.bf16.msra.mxu0 %v7335_v57 }
 0xe93   : > { %2912 = vst.msk [vmem:[#allocation5 + $0x30] sm:$0xff] %vm2908_vm2, %v2891_v45  ;;  %5772 = vmatprep.subr.bf16.mxu0 %v7340_v33  ;;  %v11915_v33 = vld [vmem:[#allocation62_spill] sm:$0xff] }
 0xe96   : > { %5773 = vmatpush1.bf16.msra.mxu0 %v7338_v37  ;;  %v11916_v37 = vld [vmem:[#allocation48_spill] sm:$0xff] }
 0xe97   : > { %5774 = vmatprep.subr.bf16.mxu0 %v7343_v54  ;;  %v11917_v54 = vpack.c.bf16 %v11915_v33, %v11916_v37  ;;  %v11946_v33 = vld [vmem:[#allocation37_spill] sm:$0xff] }
 0xe9a   : > { %5775 = vmatpush1.bf16.msra.mxu0 %v7341_v59 }
 0xe9b   : > { %5776 = vmatprep.subr.bf16.mxu0 %v7346_v20 }
 0xe9e   : > { %5777 = vmatpush1.bf16.msra.mxu0 %v7344_v19 }
 0xe9f   : > { %5778 = vmatprep.subr.bf16.mxu0 %v7349_v9 }
 0xea2   : > { %5779 = vmatpush1.bf16.msra.mxu0 %v7347_v2 }
 0xea3   : > { %5780 = vmatprep.subr.bf16.mxu0 %v7352_v34 }
 0xea6   : > { %5781 = vmatpush1.bf16.msra.mxu0 %v7350_v8 }
 0xea7   : > { %5782 = vmatprep.subr.bf16.mxu0 %v7355_v46 }
 0xea8   : > { %v5294_v4 = vpop.xlane.xlu1 %5293 }
 0xea9   : > { %7838 = vrcp.f32 %v5294_v4 }
 0xeaa   : > { %5783 = vmatpush1.bf16.msra.mxu0 %v7353_v3 }
 0xeab   : > { %5784 = vmatprep.subr.bf16.mxu0 %v7358_v38 }
 0xeac   : > { %v5290_v24 = vpop.xlane.xlu1 %5289 }
 0xead   : > { %7840 = vrcp.f32 %v5290_v24 }
 0xeae   : > { %5785 = vmatpush1.bf16.msra.mxu0 %v7356_v30  ;;  %7842 = vrcp.f32 %v11021_v25 }
 0xeaf   : > { %7844 = vrcp.f32 %v11024_v36  ;;  %5786 = vmatprep.subr.bf16.mxu0 %v7361_v32 }
 0xeb0   : > { %v5302_v23 = vpop.xlane.xlu1 %5301 }
 0xeb1   : > { %7846 = vrcp.f32 %v5302_v23 }
 0xeb2   : > { %5787 = vmatpush1.bf16.msra.mxu0 %v7359_v5  ;;  %v11922_v5 = vld [vmem:[#allocation58_spill] sm:$0xff] }
 0xeb3   : > { %v7839_v61 = vpop.eup %7838 }
 0xeb4   : > { %v5298_v27 = vpop.xlane.xlu1 %5297 }
 0xeb5   : > { %7848 = vrcp.f32 %v5298_v27 }
 0xeb6   : > { %7850 = vrcp.f32 %v11028_v41 }
 0xeb7   : > { %v7841_v55 = vpop.eup %7840  ;;  %7852 = vrcp.f32 %v11035_v28  ;;  %v11913_v28 = vld [vmem:[#allocation35_spill] sm:$0xff] }
 0xeb8   : > { %v5310_v58 = vpop.xlane.xlu1 %5309  ;;  %v7843_v36 = vpop.eup %7842  ;;  %v11914_v39 = vpack.c.bf16 %v11912_v52, %v11913_v28  ;;  %v11942_v28 = vld [vmem:[#allocation50_spill] sm:$0xff] }
 0xeb9   : > { %7854 = vrcp.f32 %v5310_v58  ;;  %v7845_v60 = vpop.eup %7844 }
 0xebb   : > { %v7847_v35 = vpop.eup %7846 }
 0xebc   : > { %v5306_v62 = vpop.xlane.xlu1 %5305 }
 0xebd   : > { %7856 = vrcp.f32 %v5306_v62 }
 0xebe   : > { %v6996_v56 = vpop.f32.mrb[128].mxu0  ;;  %7858 = vrcp.f32 %v11041_v6 }
 0xebf   : > { %v5474_v15 = vmul.f32 %v7835_v17, %v6996_v56  ;;  %v5393_v13 = vpop.f32.mrb[129].mxu0  ;;  %v7849_v48 = vpop.eup %7848  ;;  %7860 = vrcp.f32 %v11047_v22 }
 0xec0   : > { %v5472_v10 = vmul.f32 %v7837_v40, %v5393_v13  ;;  %v6997_v12 = vpop.f32.mrb[130].mxu0  ;;  %v5318_v18 = vpop.xlane.xlu1 %5317  ;;  %v11919_v13 = vld [vmem:[#allocation61_spill] sm:$0xff] }
 0xec1   : > { %v5475_v29 = vmul.f32 %v7839_v61, %v6997_v12  ;;  %v5396_v31 = vpop.f32.mrb[131].mxu0  ;;  %v7851_v59 = vpop.eup %7850  ;;  %7862 = vrcp.f32 %v5318_v18 }
 0xec2   : > { %v5473_v0 = vmul.f32 %v7841_v55, %v5396_v31  ;;  %v7853_v20 = vpop.eup %7852  ;;  %v11921_v31 = vld [vmem:[#allocation42_spill] sm:$0xff] }
 0xec3   : > { %v5489_v50 = vpack.c.bf16 %v5475_v29, %v5474_v15  ;;  %v7855_v9 = vpop.eup %7854  ;;  %v11918_v15 = vld [vmem:[#allocation80_spill] sm:$0xff]  ;;  %v3744_v52 = vpop.xlane.xlu0 %3743 }
 0xec4   : > { %v5488_v47 = vpack.c.bf16 %v5473_v0, %v5472_v10  ;;  %v5314_v49 = vpop.xlane.xlu1 %5313  ;;  %v11920_v61 = vpack.c.bf16 %v11918_v15, %v11919_v13  ;;  %v11923_v0 = vpack.c.bf16 %v11921_v31, %v11922_v5 }
 0xec5   : > { %5506 = vrot.lane.b32.xlu0 %v5489_v50, %s8101_s27  ;;  %7864 = vrcp.f32 %v5314_v49  ;;  %v11924_v50 = vld [vmem:[#allocation23_spill] sm:$0xff] }
 0xec6   : > { %7866 = vrcp.f32 %v3744_v52 }
 0xec7   : > { %v7857_v34 = vpop.eup %7856 }
 0xec8   : > { %v4965_v25 = vpop.permute.xlu1 %4964  ;;  %v7859_v22 = vpop.eup %7858 }
 0xec9   : > { %4985 = vst.msk [vmem:[#allocation5 + $0x38] sm:$0xff] %vm2908_vm2, %v4965_v25  ;;  %5504 = vrot.lane.b32.xlu0 %v5488_v47, %s8101_s27  ;;  %v7861_v62 = vpop.eup %7860  ;;  %v11925_v47 = vld [vmem:[#allocation40_spill] sm:$0xff] }
 0xeca   : > { %v7000_v7 = vpop.f32.mrb[132].mxu0  ;;  %v11926_v49 = vpack.c.bf16 %v11924_v50, %v11925_v47  ;;  %v11927_v25 = vld [vmem:[#allocation20_spill] sm:$0xff]  ;;  %v5538_v47 = vld [vmem:[#allocation5 + $0x10] sm:$0xff] }
 0xecb   : > { %v5478_v1 = vmul.f32 %v7843_v36, %v7000_v7  ;;  %v5409_v16 = vpop.f32.mrb[133].mxu0  ;;  %v7863_v17 = vpop.eup %7862  ;;  %v11928_v36 = vld [vmem:[#allocation45_spill] sm:$0xff] }
 0xecc   : > { %v5476_v45 = vmul.f32 %v7845_v60, %v5409_v16  ;;  %v7001_v21 = vpop.f32.mrb[134].mxu0  ;;  %v11929_v7 = vpack.c.bf16 %v11927_v25, %v11928_v36  ;;  %v11930_v60 = vld [vmem:[#allocation82_spill] sm:$0xff] }
 0xecd   : > { %v5479_v51 = vmul.f32 %v7847_v35, %v7001_v21  ;;  %v5412_v41 = vpop.f32.mrb[135].mxu0  ;;  %4420 = vrot.lane.b32.xlu0 %v11914_v39, %s8103_s20  ;;  %v11933_v35 = vld [vmem:[#allocation98_spill] sm:$0xff] }
 0xece   : > { %v5477_v14 = vmul.f32 %v7849_v48, %v5412_v41  ;;  %v11936_v48 = vld [vmem:[#allocation47_spill] sm:$0xff]  ;;  %v11943_v39 = vld [vmem:[#allocation54_spill] sm:$0xff] }
 0xecf   : > { %v5491_v44 = vpack.c.bf16 %v5479_v51, %v5478_v1  ;;  %v7865_v10 = vpop.eup %7864  ;;  %v11931_v1 = vld [vmem:[#allocation81_spill] sm:$0xff]  ;;  %v11937_v51 = vld [vmem:[#allocation38_spill] sm:$0xff] }
 0xed0   : > { %v5490_v57 = vpack.c.bf16 %v5477_v14, %v5476_v45  ;;  %v11932_v16 = vpack.c.bf16 %v11930_v60, %v11931_v1  ;;  %v11934_v45 = vld [vmem:[#allocation52_spill] sm:$0xff]  ;;  %v11938_v41 = vpack.c.bf16 %v11936_v48, %v11937_v51  ;;  %v11944_v14 = vpack.c.bf16 %v11942_v28, %v11943_v39 }
 0xed1   : > { %2345 = vrot.lane.b32.xlu0 %v11917_v54, %s8103_s20  ;;  %v11935_v21 = vpack.c.bf16 %v11933_v35, %v11934_v45  ;;  %v5540_v1 = vld [vmem:[#allocation5 + $0x20] sm:$0xff] }
 0xed2   : > { %v7004_v4 = vpop.f32.mrb[136].mxu0 }
 0xed3   : > { %v5482_v19 = vmul.f32 %v7851_v59, %v7004_v4  ;;  %v5425_v24 = vpop.f32.mrb[137].mxu0  ;;  %v11951_v4 = vld [vmem:[#allocation29_spill] sm:$0xff] }
 0xed4   : > { %v5480_v2 = vmul.f32 %v7853_v20, %v5425_v24  ;;  %v7005_v23 = vpop.f32.mrb[138].mxu0  ;;  %v11952_v20 = vld [vmem:[#allocation44_spill] sm:$0xff]  ;;  %v7867_v24 = vpop.eup %7866 }
 0xed5   : > { %v5483_v8 = vmul.f32 %v7855_v9, %v7005_v23  ;;  %v5428_v6 = vpop.f32.mrb[139].mxu0  ;;  %5510 = vrot.lane.b32.xlu0 %v5491_v44, %s8101_s27 }
 0xed6   : > { %v5481_v27 = vmul.f32 %v7857_v34, %v5428_v6  ;;  %v11955_v34 = vld [vmem:[#allocation160_spill] sm:$0xff] }
 0xed7   : > { %v5493_v58 = vpack.c.bf16 %v5483_v8, %v5482_v19  ;;  %v11953_v19 = vpack.c.bf16 %v11951_v4, %v11952_v20  ;;  %v5586_v20 = vlaneseq }
 0xed8   : > { %v5492_v3 = vpack.c.bf16 %v5481_v27, %v5480_v2  ;;  %v11954_v2 = vld [vmem:[#allocation162_spill] sm:$0xff]  ;;  %v11956_v27 = vld [vmem:[#allocation83_spill] sm:$0xff] }
 0xed9   : > { %5508 = vrot.lane.b32.xlu0 %v5490_v57, %s8101_s27  ;;  %5514 = vrot.lane.b32.xlu1 %v5493_v58, %s8101_s27  ;;  %v11945_v57 = vld [vmem:[#allocation26_spill] sm:$0xff]  ;;  %v3881_v23 = vmul.f32 %v7867_v24, %v11954_v2  ;;  %v11957_v58 = vld [vmem:[#allocation55_spill] sm:$0xff] }
 0xeda   : > { %v11947_v37 = vpack.c.bf16 %v11945_v57, %v11946_v33 }
 0xedb   : > { %v7008_v46 = vpop.f32.mrb[140].mxu0 }
 0xedc   : > { %v5486_v30 = vmul.f32 %v7859_v22, %v7008_v46  ;;  %v5441_v38 = vpop.f32.mrb[141].mxu0 }
 0xedd   : > { %v5484_v56 = vmul.f32 %v7861_v62, %v5441_v38  ;;  %v7009_v40 = vpop.f32.mrb[142].mxu0  ;;  %2892 = vrot.lane.b32.xlu0 %v11920_v61, %s8102_s29  ;;  %5512 = vrot.lane.b32.xlu1 %v5492_v3, %s8101_s27  ;;  %v11958_v3 = vpack.c.bf16 %v11956_v27, %v11957_v58  ;;  %v11959_v38 = vld [vmem:[#allocation34_spill] sm:$0xff] }
 0xede   : > { %v5487_v12 = vmul.f32 %v7863_v17, %v7009_v40  ;;  %v5444_v18 = vpop.f32.mrb[143].mxu0 }
 0xedf   : > { %v5485_v32 = vmul.f32 %v7865_v10, %v5444_v18 }
 0xee0   : > { %v5495_v55 = vpack.c.bf16 %v5487_v12, %v5486_v30 }
 0xee1   : > { %v5494_v29 = vpack.c.bf16 %v5485_v32, %v5484_v56  ;;  %3439 = vrot.lane.b32.xlu0 %v11923_v0, %s8101_s27  ;;  %4424 = vrot.lane.b32.xlu1 %v11926_v49, %s8103_s20  ;;  %v11960_v56 = vld [vmem:[#allocation39_spill] sm:$0xff] }
 0xee5   : > { %2347 = vrot.lane.b32.xlu0 %v11929_v7, %s8103_s20  ;;  %4970 = vrot.lane.b32.xlu1 %v4948_v63, %s8102_s29  ;;  %v11941_v63 = vpack.c.bf16 %v11939_v53, %v11940_v26 }
 0xee9   : > { %2894 = vrot.lane.b32.xlu0 %v11932_v16, %s8102_s29  ;;  %4426 = vrot.lane.b32.xlu1 %v11935_v21, %s8103_s20 }
 0xeed   : > { %3441 = vrot.lane.b32.xlu0 %v11938_v41, %s8101_s27  ;;  %5516 = vrot.lane.b32.xlu1 %v5494_v29, %s8101_s27  ;;  %v5536_v29 = vld [vmem:[#allocation5] sm:$0xff] }
 0xef1   : > { %2349 = vrot.lane.b32.xlu0 %v11941_v63, %s8103_s20  ;;  %4972 = vrot.lane.b32.xlu1 %v4949_v42, %s8102_s29  ;;  %v11950_v42 = vpack.c.bf16 %v11948_v11, %v11949_v43 }
 0xef5   : > { %2896 = vrot.lane.b32.xlu0 %v11944_v14, %s8102_s29  ;;  %5518 = vrot.lane.b32.xlu1 %v5495_v55, %s8101_s27 }
 0xef9   : > { %v3742_v44 = vpop.xlane.xlu1 %3741  ;;  %3443 = vrot.lane.b32.xlu0 %v11947_v37, %s8101_s27 }
 0xefa   : > { %7868 = vrcp.f32 %v3742_v44 }
 0xefd   : > { %v1667_v54 = vpop.xlane.xlu1 %1666  ;;  %2351 = vrot.lane.b32.xlu0 %v11950_v42, %s8103_s20 }
 0xefe   : > { %7870 = vrcp.f32 %v1667_v54 }
 0xf01   : > { %v1669_v59 = vpop.xlane.xlu1 %1668  ;;  %2898 = vrot.lane.b32.xlu0 %v11953_v19, %s8102_s29  ;;  %v5587_v19 = vshrl.u32 %v5586_v20, 7 }
 0xf02   : > { %7872 = vrcp.f32 %v1669_v59 }
 0xf03   : > { %v5588_v24 = vsub.s32 0, %v5587_v19  ;;  %v5592_v2 = vsub.s32 1, %v5587_v19 }
 0xf04   : > { %v7869_v9 = vpop.eup %7868 }
 0xf05   : > { %v3880_v8 = vmul.f32 %v7869_v9, %v11955_v34  ;;  %v3438_v6 = vpop.permute.xlu1 %3437  ;;  %3445 = vrot.lane.b32.xlu0 %v11958_v3, %s8101_s27  ;;  %v5584_v9 = vld [vmem:[%s11305_s5] sm:$0x3]  ;;  %s8022_s27 = scalar_lea.vmem %s8021_s17, 8192 }
 0xf06   : > { %3459 = vst.msk [vmem:[#allocation5 + $0x30] sm:$0xff] %vm3455_vm3, %v3438_v6  ;;  %v11179_v34 = vrot.slane %v5584_v9, %v5592_v2  ;;  %p8024_p1 = scmp.lt.s32.totalorder %s8022_s27, %s8016_s30 }
 0xf07   : > { %v3889_v22 = vpack.c.bf16 %v3881_v23, %v3880_v8  ;;  %v11177_v23 = vrot.slane %v5584_v9, %v5588_v24 }
 0xf08   : > { %v7871_v62 = vpop.eup %7870  ;;  %p8025_p2 = por %p8024_p1, %p8023_p12 }
 0xf09   : > { %v4967_v46 = vpop.permute.xlu1 %4966  ;;  %3897 = vst.msk [vmem:[#allocation5 + $0x78] sm:$0xff] %vm1412_vm0, %v3889_v22  ;;  %v1805_v17 = vmul.f32 %v7871_v62, %v11959_v38 }
 0xf0a   : > { %p8026_p13 = pnand %p8025_p2, %p8019_p7 }
 0xf0c   : > { %v7873_v30 = vpop.eup %7872 }
 0xf0d   : > { %v1806_v40 = vmul.f32 %v7873_v30, %v11960_v56  ;;  %v4423_v15 = vpop.permute.xlu1 %4422  ;;  %v5542_v51 = vld [vmem:[#allocation5 + $0x30] sm:$0xff] }
 0xf0e   : > { %4441 = vst.msk [vmem:[#allocation5 + $0x58] sm:$0xff] %vm2361_vm1, %v4423_v15 }
 0xf0f   : > { %v1814_v13 = vpack.c.bf16 %v1806_v40, %v1805_v17 }
 0xf11   : > { %v4969_v61 = vpop.permute.xlu1 %4968  ;;  %1822 = vst.msk [vmem:[#allocation5 + $0x70] sm:$0xff] %vm1412_vm0, %v1814_v13 }
 0xf12   : > { %4987 = vst.msk [vmem:[#allocation5 + $0x58] sm:$0xff] %vm2908_vm2, %v4969_v61 }
 0xf37   : > { %v5507_v10 = vpop.permute.xlu0 %5506 }
 0xf38   : > { %5529 = vst.msk [vmem:[#allocation5 + $0x18] sm:$0xff] %vm3455_vm3, %v5507_v10 }
 0xf3b   : > { %v5505_v12 = vpop.permute.xlu0 %5504 }
 0xf3c   : > { %5528 = vst.msk [vmem:[#allocation5 + $0x8] sm:$0xff] %vm3455_vm3, %v5505_v12 }
 0xf3f   : > { %v4421_v18 = vpop.permute.xlu0 %4420  ;;  %v5539_v31 = vld [vmem:[#allocation5 + $0x18] sm:$0xff] }
 0xf40   : > { %4440 = vst.msk [vmem:[#allocation5 + $0x48] sm:$0xff] %vm2361_vm1, %v4421_v18 }
 0xf41   : > { %4986 = vst.msk [vmem:[#allocation5 + $0x48] sm:$0xff] %vm2908_vm2, %v4967_v46 }
 0xf43   : > { %v2346_v32 = vpop.permute.xlu0 %2345  ;;  %v5537_v55 = vld [vmem:[#allocation5 + $0x8] sm:$0xff] }
 0xf44   : > { %2366 = vst.msk [vmem:[#allocation5 + $0x40] sm:$0xff] %vm2361_vm1, %v2346_v32  ;;  %5788 = vmatprep.mubr.bf16.mxu0 %v5537_v55 }
 0xf45   : > { %5789 = vmatmul.mubr.bf16.vlgmr.msra.gmra.mrb[144].mxu0 %v5536_v29 }
 0xf46   : > { %5798 = vmatprep.mubr.bf16.mxu0 %v5539_v31 }
 0xf47   : > { %v5511_v5 = vpop.permute.xlu0 %5510 }
 0xf48   : > { %5531 = vst.msk [vmem:[#allocation5 + $0x38] sm:$0xff] %vm3455_vm3, %v5511_v5 }
 0xf4b   : > { %v5515_v0 = vpop.permute.xlu1 %5514  ;;  %v5509_v50 = vpop.permute.xlu0 %5508 }
 0xf4c   : > { %5533 = vst.msk [vmem:[#allocation5 + $0x58] sm:$0xff] %vm3455_vm3, %v5515_v0  ;;  %5530 = vst.msk [vmem:[#allocation5 + $0x28] sm:$0xff] %vm3455_vm3, %v5509_v50 }
 0xf4d   : > { %5799 = vmatmul.mubr.bf16.gmra.mrb[148].mxu0 %v5538_v47 }
 0xf4f   : > { %v5513_v49 = vpop.permute.xlu1 %5512  ;;  %v2893_v25 = vpop.permute.xlu0 %2892  ;;  %v5543_v16 = vld [vmem:[#allocation5 + $0x38] sm:$0xff] }
 0xf50   : > { %5532 = vst.msk [vmem:[#allocation5 + $0x48] sm:$0xff] %vm3455_vm3, %v5513_v49 }
 0xf51   : > { %2913 = vst.msk [vmem:[#allocation5 + $0x40] sm:$0xff] %vm2908_vm2, %v2893_v25 }
 0xf53   : > { %v4425_v36 = vpop.permute.xlu1 %4424  ;;  %v3440_v7 = vpop.permute.xlu0 %3439  ;;  %v5541_v60 = vld [vmem:[#allocation5 + $0x28] sm:$0xff]  ;;  %v5547_v39 = vld [vmem:[#allocation5 + $0x58] sm:$0xff] }
 0xf54   : > { %4442 = vst.msk [vmem:[#allocation5 + $0x68] sm:$0xff] %vm2361_vm1, %v4425_v36  ;;  %5808 = vmatprep.mubr.bf16.mxu0 %v5541_v60 }
 0xf55   : > { %3460 = vst.msk [vmem:[#allocation5 + $0x40] sm:$0xff] %vm3455_vm3, %v3440_v7  ;;  %5809 = vmatmul.mubr.bf16.gmra.mrb[152].mxu0 %v5540_v1 }
 0xf56   : > { %5818 = vmatprep.mubr.bf16.mxu0 %v5543_v16 }
 0xf57   : > { %v4971_v35 = vpop.permute.xlu1 %4970  ;;  %v2348_v45 = vpop.permute.xlu0 %2347  ;;  %v5545_v41 = vld [vmem:[#allocation5 + $0x48] sm:$0xff] }
 0xf58   : > { %4988 = vst.msk [vmem:[#allocation5 + $0x68] sm:$0xff] %vm2908_vm2, %v4971_v35 }
 0xf59   : > { %2367 = vst.msk [vmem:[#allocation5 + $0x50] sm:$0xff] %vm2361_vm1, %v2348_v45 }
 0xf5b   : > { %v4427_v21 = vpop.permute.xlu1 %4426  ;;  %v2895_v48 = vpop.permute.xlu0 %2894 }
 0xf5c   : > { %4443 = vst.msk [vmem:[#allocation5 + $0x78] sm:$0xff] %vm2361_vm1, %v4427_v21  ;;  %v5544_v28 = vld [vmem:[#allocation5 + $0x40] sm:$0xff] }
 0xf5d   : > { %2914 = vst.msk [vmem:[#allocation5 + $0x50] sm:$0xff] %vm2908_vm2, %v2895_v48  ;;  %5819 = vmatmul.mubr.bf16.gmra.mrb[156].mxu0 %v5542_v51 }
 0xf5e   : > { %5828 = vmatprep.mubr.bf16.mxu0 %v5545_v41 }
 0xf5f   : > { %v5517_v53 = vpop.permute.xlu1 %5516  ;;  %v3442_v26 = vpop.permute.xlu0 %3441 }
 0xf60   : > { %5534 = vst.msk [vmem:[#allocation5 + $0x68] sm:$0xff] %vm3455_vm3, %v5517_v53  ;;  %3461 = vst.msk [vmem:[#allocation5 + $0x50] sm:$0xff] %vm3455_vm3, %v3442_v26 }
 0xf63   : > { %v4973_v63 = vpop.permute.xlu1 %4972  ;;  %v2350_v52 = vpop.permute.xlu0 %2349 }
 0xf64   : > { %4989 = vst.msk [vmem:[#allocation5 + $0x78] sm:$0xff] %vm2908_vm2, %v4973_v63 }
 0xf65   : > { %2368 = vst.msk [vmem:[#allocation5 + $0x60] sm:$0xff] %vm2361_vm1, %v2350_v52  ;;  %5829 = vmatmul.mubr.bf16.gmra.mrb[160].mxu0 %v5544_v28 }
 0xf66   : > { %5838 = vmatprep.mubr.bf16.mxu0 %v5547_v39 }
 0xf67   : > { %v5519_v14 = vpop.permute.xlu1 %5518  ;;  %v2897_v44 = vpop.permute.xlu0 %2896  ;;  %v5546_v33 = vld [vmem:[#allocation5 + $0x50] sm:$0xff]  ;;  %v5549_v37 = vld [vmem:[#allocation5 + $0x68] sm:$0xff] }
 0xf68   : > { %5535 = vst.msk [vmem:[#allocation5 + $0x78] sm:$0xff] %vm3455_vm3, %v5519_v14 }
 0xf69   : > { %2915 = vst.msk [vmem:[#allocation5 + $0x60] sm:$0xff] %vm2908_vm2, %v2897_v44 }
 0xf6b   : > { %v3444_v57 = vpop.permute.xlu0 %3443 }
 0xf6c   : > { %3462 = vst.msk [vmem:[#allocation5 + $0x60] sm:$0xff] %vm3455_vm3, %v3444_v57 }
 0xf6d   : > { %5839 = vmatmul.mubr.bf16.gmra.mrb[164].mxu0 %v5546_v33 }
 0xf6e   : > { %5848 = vmatprep.mubr.bf16.mxu0 %v5549_v37 }
 0xf6f   : > { %v2352_v54 = vpop.permute.xlu0 %2351  ;;  %v5551_v42 = vld [vmem:[#allocation5 + $0x78] sm:$0xff] }
 0xf70   : > { %2369 = vst.msk [vmem:[#allocation5 + $0x70] sm:$0xff] %vm2361_vm1, %v2352_v54 }
 0xf73   : > { %v2899_v11 = vpop.permute.xlu0 %2898  ;;  %v5548_v43 = vld [vmem:[#allocation5 + $0x60] sm:$0xff] }
 0xf74   : > { %2916 = vst.msk [vmem:[#allocation5 + $0x70] sm:$0xff] %vm2908_vm2, %v2899_v11 }
 0xf75   : > { %5849 = vmatmul.mubr.bf16.gmra.mrb[168].mxu0 %v5548_v43 }
 0xf76   : > { %5858 = vmatprep.mubr.bf16.mxu0 %v5551_v42 }
 0xf77   : > { %v3446_v59 = vpop.permute.xlu0 %3445 }
 0xf78   : > { %3463 = vst.msk [vmem:[#allocation5 + $0x70] sm:$0xff] %vm3455_vm3, %v3446_v59 }
 0xf7f   : > { %v5550_v4 = vld [vmem:[#allocation5 + $0x70] sm:$0xff] }
 0xf80   : > { %5859 = vmatmul.mubr.bf16.gmra.mrb[172].mxu0 %v5550_v4 }
0x1018   : > { %v5790_v8 = vpop.f32.mrb[144].mxu0 }
0x1019   : > { %v5791_v6 = vadd.f32 %v5790_v8, %v11177_v23  ;;  %v5792_v27 = vpop.f32.mrb[145].mxu0 }
0x101a   : > { %v5793_v58 = vadd.f32 %v5792_v27, %v11179_v34  ;;  %v5794_v3 = vpop.f32.mrb[146].mxu0 }
0x101b   : > { %5869 = vst [vmem:[%s11185_s10] sm:$0xff] %v5791_v6  ;;  %v5795_v22 = vadd.f32 %v5794_v3, %v11177_v23  ;;  %v5796_v46 = vpop.f32.mrb[147].mxu0 }
0x101c   : > { %5870 = vst [vmem:[%s11185_s10 + $0x8] sm:$0xff] %v5793_v58  ;;  %v5797_v62 = vadd.f32 %v5796_v46, %v11179_v34 }
0x101d   : > { %5871 = vst [vmem:[%s11185_s10 + $0x10] sm:$0xff] %v5795_v22 }
0x101e   : > { %5872 = vst [vmem:[%s11185_s10 + $0x18] sm:$0xff] %v5797_v62 }
0x1020   : > { %v5800_v30 = vpop.f32.mrb[148].mxu0 }
0x1021   : > { %v5801_v38 = vadd.f32 %v5800_v30, %v11177_v23  ;;  %v5802_v17 = vpop.f32.mrb[149].mxu0 }
0x1022   : > { %v5803_v56 = vadd.f32 %v5802_v17, %v11179_v34  ;;  %v5804_v40 = vpop.f32.mrb[150].mxu0 }
0x1023   : > { %5873 = vst [vmem:[%s11185_s10 + $0x20] sm:$0xff] %v5801_v38  ;;  %v5805_v15 = vadd.f32 %v5804_v40, %v11177_v23  ;;  %v5806_v13 = vpop.f32.mrb[151].mxu0 }
0x1024   : > { %5874 = vst [vmem:[%s11185_s10 + $0x28] sm:$0xff] %v5803_v56  ;;  %v5807_v61 = vadd.f32 %v5806_v13, %v11179_v34 }
0x1025   : > { %5875 = vst [vmem:[%s11185_s10 + $0x30] sm:$0xff] %v5805_v15 }
0x1026   : > { %5876 = vst [vmem:[%s11185_s10 + $0x38] sm:$0xff] %v5807_v61 }
0x1028   : > { %v5810_v10 = vpop.f32.mrb[152].mxu0 }
0x1029   : > { %v5811_v12 = vadd.f32 %v5810_v10, %v11177_v23  ;;  %v5812_v18 = vpop.f32.mrb[153].mxu0 }
0x102a   : > { %v5813_v32 = vadd.f32 %v5812_v18, %v11179_v34  ;;  %v5814_v55 = vpop.f32.mrb[154].mxu0 }
0x102b   : > { %5877 = vst [vmem:[%s11185_s10 + $0x40] sm:$0xff] %v5811_v12  ;;  %v5815_v29 = vadd.f32 %v5814_v55, %v11177_v23  ;;  %v5816_v31 = vpop.f32.mrb[155].mxu0 }
0x102c   : > { %5878 = vst [vmem:[%s11185_s10 + $0x48] sm:$0xff] %v5813_v32  ;;  %v5817_v5 = vadd.f32 %v5816_v31, %v11179_v34 }
0x102d   : > { %5879 = vst [vmem:[%s11185_s10 + $0x50] sm:$0xff] %v5815_v29 }
0x102e   : > { %5880 = vst [vmem:[%s11185_s10 + $0x58] sm:$0xff] %v5817_v5 }
0x1030   : > { %v5820_v0 = vpop.f32.mrb[156].mxu0 }
0x1031   : > { %v5821_v50 = vadd.f32 %v5820_v0, %v11177_v23  ;;  %v5822_v47 = vpop.f32.mrb[157].mxu0 }
0x1032   : > { %v5823_v49 = vadd.f32 %v5822_v47, %v11179_v34  ;;  %v5824_v25 = vpop.f32.mrb[158].mxu0 }
0x1033   : > { %5881 = vst [vmem:[%s11185_s10 + $0x60] sm:$0xff] %v5821_v50  ;;  %v5825_v36 = vadd.f32 %v5824_v25, %v11177_v23  ;;  %v5826_v7 = vpop.f32.mrb[159].mxu0 }
0x1034   : > { %5882 = vst [vmem:[%s11185_s10 + $0x68] sm:$0xff] %v5823_v49  ;;  %v5827_v60 = vadd.f32 %v5826_v7, %v11179_v34 }
0x1035   : > { %5883 = vst [vmem:[%s11185_s10 + $0x70] sm:$0xff] %v5825_v36 }
0x1036   : > { %5884 = vst [vmem:[%s11185_s10 + $0x78] sm:$0xff] %v5827_v60 }
0x1038   : > { %v5830_v1 = vpop.f32.mrb[160].mxu0 }
0x1039   : > { %v5831_v16 = vadd.f32 %v5830_v1, %v11177_v23  ;;  %v5832_v35 = vpop.f32.mrb[161].mxu0 }
0x103a   : > { %v5833_v45 = vadd.f32 %v5832_v35, %v11179_v34  ;;  %v5834_v21 = vpop.f32.mrb[162].mxu0 }
0x103b   : > { %5885 = vst [vmem:[%s11185_s10 + $0x80] sm:$0xff] %v5831_v16  ;;  %v5835_v48 = vadd.f32 %v5834_v21, %v11177_v23  ;;  %v5836_v51 = vpop.f32.mrb[163].mxu0 }
0x103c   : > { %5886 = vst [vmem:[%s11185_s10 + $0x88] sm:$0xff] %v5833_v45  ;;  %v5837_v41 = vadd.f32 %v5836_v51, %v11179_v34 }
0x103d   : > { %5887 = vst [vmem:[%s11185_s10 + $0x90] sm:$0xff] %v5835_v48 }
0x103e   : > { %5888 = vst [vmem:[%s11185_s10 + $0x98] sm:$0xff] %v5837_v41 }
0x1040   : > { %v5840_v53 = vpop.f32.mrb[164].mxu0 }
0x1041   : > { %v5841_v26 = vadd.f32 %v5840_v53, %v11177_v23  ;;  %v5842_v63 = vpop.f32.mrb[165].mxu0 }
0x1042   : > { %v5843_v52 = vadd.f32 %v5842_v63, %v11179_v34  ;;  %v5844_v28 = vpop.f32.mrb[166].mxu0 }
0x1043   : > { %5889 = vst [vmem:[%s11185_s10 + $0xa0] sm:$0xff] %v5841_v26  ;;  %v5845_v39 = vadd.f32 %v5844_v28, %v11177_v23  ;;  %v5846_v14 = vpop.f32.mrb[167].mxu0 }
0x1044   : > { %5890 = vst [vmem:[%s11185_s10 + $0xa8] sm:$0xff] %v5843_v52  ;;  %v5847_v44 = vadd.f32 %v5846_v14, %v11179_v34 }
0x1045   : > { %5891 = vst [vmem:[%s11185_s10 + $0xb0] sm:$0xff] %v5845_v39 }
0x1046   : > { %5892 = vst [vmem:[%s11185_s10 + $0xb8] sm:$0xff] %v5847_v44 }
0x1048   : > { %v5850_v57 = vpop.f32.mrb[168].mxu0 }
0x1049   : > { %v5851_v33 = vadd.f32 %v5850_v57, %v11177_v23  ;;  %v5852_v37 = vpop.f32.mrb[169].mxu0 }
0x104a   : > { %v5853_v54 = vadd.f32 %v5852_v37, %v11179_v34  ;;  %v5854_v11 = vpop.f32.mrb[170].mxu0 }
0x104b   : > { %5893 = vst [vmem:[%s11185_s10 + $0xc0] sm:$0xff] %v5851_v33  ;;  %v5855_v43 = vadd.f32 %v5854_v11, %v11177_v23  ;;  %v5856_v42 = vpop.f32.mrb[171].mxu0 }
0x104c   : > { %5894 = vst [vmem:[%s11185_s10 + $0xc8] sm:$0xff] %v5853_v54  ;;  %v5857_v59 = vadd.f32 %v5856_v42, %v11179_v34 }
0x104d   : > { %5895 = vst [vmem:[%s11185_s10 + $0xd0] sm:$0xff] %v5855_v43 }
0x104e   : > { %5896 = vst [vmem:[%s11185_s10 + $0xd8] sm:$0xff] %v5857_v59 }
0x1053   : > { %v5860_v4 = vpop.f32.mrb[172].mxu0 }
0x1054   : > { %v5861_v20 = vadd.f32 %v5860_v4, %v11177_v23  ;;  %v5862_v19 = vpop.f32.mrb[173].mxu0 }
0x1055   : > { %v5863_v24 = vadd.f32 %v5862_v19, %v11179_v34  ;;  %v5864_v9 = vpop.f32.mrb[174].mxu0 }
0x1056   : > { %5897 = vst [vmem:[%s11185_s10 + $0xe0] sm:$0xff] %v5861_v20  ;;  %v5865_v2 = vadd.f32 %v5864_v9, %v11177_v23  ;;  %v5866_v8 = vpop.f32.mrb[175].mxu0 }
0x1057   : > { %5898 = vst [vmem:[%s11185_s10 + $0xe8] sm:$0xff] %v5863_v24  ;;  %v5867_v6 = vadd.f32 %v5866_v8, %v11179_v34 }
0x1058   : > { %5899 = vst [vmem:[%s11185_s10 + $0xf0] sm:$0xff] %v5865_v2 }
0x1059   : > { %5900 = vst [vmem:[%s11185_s10 + $0xf8] sm:$0xff] %v5867_v6 }
0x105a   : > { %8029 = shalt.err (!%p8026_p13)
}
0x105b   : > { %s8030_s29 = scalar_lea.hbm %s11250_s13, 4096  ;;  %s8034_s12 = scalar_lea.hbm %s11306_s6, 8192 }
0x105c   : > { %p8031_p9 = scmp.ne.s32.totalorder %s11250_s13, %s8030_s29  ;;  %p8035_p4 = scmp.lt.u32.totalorder %s11250_s13, %s11306_s6 }
0x105d   : > { %p8036_p8 = scmp.lt.u32.totalorder %s8034_s12, %s8030_s29  ;;  %p8038_p3 = scmp.lt.u32.totalorder %s8030_s29, %s11250_s13 }
0x105e   : > { %p8032_p0 = pnand %p8031_p9, %p8313_p10 }
0x105f   : > { %p8037_p6 = por %p8036_p8, %p8035_p4 }
0x1060   : > { %p8033_p11 = pneg %p8032_p0 }
0x1061   : > { %p8039_p5 = por %p8038_p3, %p8037_p6 }
0x1063   : > { %p8040_p7 = pnand %p8039_p5, %p8033_p11 }
0x1065   : > { %8043 = shalt.err (!%p8040_p7)
}
0x1066   : > { %s8105_s8 = smov 256   ;;  %s8106_s11 = smov 16  }
0x1067   : > { %7092 = dma.vmem_to_hbm [thread:$0]  (%p8313_p10), %s11252_s26, 4096, %s11250_s13, %s5902_s25, %s8105_s8, %s8105_s8, %s8106_s11  }
0x1068 PF: > { %s5930_s30 = sand.u32 1, %s8078_s21   ;;  %p11961_p12 = scmp.ne.s32.totalorder %s11449_s28, 0 }
0x1069   : > { %p11962_p1 = scmp.ge.s32.totalorder %s8090_s24, 2  ;;  %s5931_s9 = scalar_lea.sflag [#allocation8], %s5930_s30 }
0x106b   : > { %p7112_p2 = pnand %p11962_p1, %p11961_p12 }
0x106d   : > { %8073 = dma.done.wait (!%p7112_p2), %s5931_s9, 4096  }
0x106e   : > { %8075 = vsyncadd (!%p7112_p2), %s5931_s9, 4294963200  ;;  %p21_p13 = scmp.ge.s32.totalorder %s8303_s18, 4   ;;  %s11963_s21 = smov %s8082_s22 }
0x106f   : > { %s11964_s22 = smov %s8086_s23  ;;  %s11965_s23 = smov %s8319_s16 }
0x1070   : > { %s11966_s24 = smov %s8303_s18  ;;  %23 = sbr.rel (!%p21_p13) target bundleno = 7 (0x7), region = 105 }
0x1077   :  { %5936 = vsyncpa [#allocation7], 1 }
0x1078   :  { %5938 = vsyncpa [#allocation7 + $0x1], 1 }
0x1079   :  { %5939 = vsyncpa [#allocation10], 1 }
0x107a   :  { %5940 = vsyncpa [#allocation13], 1 }
0x107b   :  { %5941 = vsyncpa [#allocation8], 1 }
0x107c   :  { %5943 = vsyncpa [#allocation8 + $0x1], 1 }

</bundles_post_ra>
